<compile_context>
chip_gen: v5e
topology: v5e:2x2
jax: 0.10.0
libtpu: 0.0.40
codegen_flags: <defaults>
</compile_context>

<pallas_src>
import functools
import math

import jax
import jax.numpy as jnp
from jax import lax
from jax.experimental import pallas as pl
from jax.experimental.pallas import tpu as pltpu

MATMUL_DTYPE = jnp.bfloat16   # MXU-native input dtype; set to jnp.float32 for full-precision parity.
POS_DIM_PAD = 8               # pad the rank-3 pos contraction to a full sublane tile


def encoder_layer_kernel(src_ref, qpos_ref, wqkv_ref, wpeqkv_ref, bqkv_ref,
                         wo_ref, bo_ref, out_ref, *, num_heads):
    """One grid step handles `block_b` batch elements, entirely in native (L, Bb, C) order.

    src_ref   : (L, Bb, C)  f32   native PyTorch sequence-first layout slice
    qpos_ref  : (L, Bb, 8)  f32   transposed + zero-padded positional coordinates
    wqkv_ref  : (C, 3C)     bf16  fused [Wq | Wk | Wv]
    wpeqkv_ref: (8, 3C)     bf16  W_pe @ W_qkv (pos-embed folded into the QKV projection)
    bqkv_ref  : (1, 3C)     f32   b_pe @ W_qkv + b_qkv
    wo_ref    : (C, C)      bf16  out projection
    bo_ref    : (1, C)      f32
    out_ref   : (L, Bb, C)  f32
    """
    L, Bb, C = src_ref.shape
    H = num_heads
    dh = C // H
    R = L * Bb
    mm = MATMUL_DTYPE
    f32 = jnp.float32

    # ---- rows in native (l, b) order: layout-free reshape (Bb is a multiple of 8) ----
    src = src_ref[...]                                   # (L, Bb, C) f32, kept for the residual
    x_rows = src.reshape(R, C)                           # (R, C)
    pos_rows = qpos_ref[...].reshape(R, qpos_ref.shape[-1])   # (R, 8)

    # ---- fused QKV projection with the pos-embed folded in (two MXU matmuls, bf16 in / f32 acc) ----
    qkv = (jnp.dot(x_rows.astype(mm), wqkv_ref[...], preferred_element_type=f32)
           + jnp.dot(pos_rows.astype(mm), wpeqkv_ref[...], preferred_element_type=f32)
           + bqkv_ref[...])                              # (R, 3C) f32
    qkv_mm = qkv.astype(mm)

    # ---- block-diagonal attention bias: rows are l-major, so batch(r) = r % Bb ----
    ri = lax.broadcasted_iota(jnp.int32, (R, R), 0)
    ci = lax.broadcasted_iota(jnp.int32, (R, R), 1)
    attn_bias = jnp.where((ri % Bb) == (ci % Bb), 0.0, -1e30).astype(f32)   # (R, R)

    # ---- multi-head attention; every batch element shares one big MXU matmul per head ----
    scale = f32(1.0 / math.sqrt(dh))
    wo = wo_ref[...]                                     # (C, C) bf16, loaded once
    src2 = jnp.zeros((R, C), f32)
    for h in range(H):                                   # static unroll; each iter is MXU-sized
        q_h = qkv_mm[:, h * dh:(h + 1) * dh]             # (R, dh)
        k_h = qkv_mm[:, C + h * dh:C + (h + 1) * dh]
        v_h = qkv_mm[:, 2 * C + h * dh:2 * C + (h + 1) * dh]
        s = jnp.einsum('rd,md->rm', q_h, k_h, preferred_element_type=f32)   # (R, R)
        s = s * scale + attn_bias
        s = s - jnp.max(s, axis=-1, keepdims=True)
        p = jnp.exp(s)                                   # masked entries underflow to exactly 0
        p = p * pl.reciprocal(jnp.sum(p, axis=-1, keepdims=True), approx=True)
        o_h = jnp.dot(p.astype(mm), v_h, preferred_element_type=f32)        # (R, dh)
        # fold the output projection per head -> no lane-dim concat of dh-wide head outputs
        src2 = src2 + jnp.dot(o_h.astype(mm), wo[h * dh:(h + 1) * dh, :],
                              preferred_element_type=f32)                   # (R, C)
    src2 = src2 + bo_ref[...]

    # ---- residual (with the ORIGINAL src, no pos-embed) ----
    res = (x_rows + src2).reshape(L, Bb, C)              # layout-free reshape back

    # ---- InstanceNorm1d (affine=False, eps=1e-5) over the sequence dim (= leading axis) + ReLU ----
    mean = jnp.mean(res, axis=0, keepdims=True)          # leading-axis reduce: pure VPU adds
    var = jnp.mean(jnp.square(res - mean), axis=0, keepdims=True)
    out_ref[...] = jnp.maximum((res - mean) * lax.rsqrt(var + 1e-5), 0.0)   # direct (L, Bb, C) store


def transformer_encoder_layer(src_lbc, query_pos, params, *, num_heads, block_b=None):
    """src_lbc: (L, B, C) f32 (PyTorch layout); query_pos: (B, 3, L) f32."""
    L, B, C = src_lbc.shape
    P = query_pos.shape[1]
    assert C % num_heads == 0, "d_model must be divisible by num_heads"
    assert P <= POS_DIM_PAD

    if block_b is None:
        block_b = B                                      # single step: best for 1-TC v5e / v6e
        try:
            kind = jax.devices()[0].device_kind.lower()
        except Exception:
            kind = ""
        # 2-TensorCore parts: one "parallel" step per core.
        if any(t in kind for t in ("v7", "v4", "v5p")) and B % 2 == 0 and (B // 2) % 8 == 0:
            block_b = B // 2
    assert block_b == B or (B % block_b == 0 and block_b % 8 == 0)
    grid = (B // block_b,)

    mm = MATMUL_DTYPE
    f32 = jnp.float32

    # Fold the 1x1-conv positional embedding into the fused QKV projection (tiny, once per call):
    #   (src + qpos^T Wpe + bpe) Wqkv + bqkv = src Wqkv + qpos^T (Wpe Wqkv) + (bpe Wqkv + bqkv)
    w_qkv = params['w_qkv'].astype(mm)                                        # (C, 3C)
    w_peqkv = jnp.pad(params['w_pe'].astype(f32) @ params['w_qkv'].astype(f32),
                      ((0, POS_DIM_PAD - P), (0, 0))).astype(mm)              # (8, 3C)
    b_qkv = (params['b_pe'].astype(f32) @ params['w_qkv'].astype(f32)
             + params['b_qkv'].astype(f32))                                   # (1, 3C)
    w_o = params['w_o'].astype(mm)                                            # (C, C)
    b_o = params['b_o'].astype(f32)                                           # (1, C)
    # (B, 3, L) -> (L, B, 8): 3*B*L floats (few KB) — negligible, keeps the kernel relayout-free.
    qpos_lbp = jnp.pad(jnp.transpose(query_pos, (2, 0, 1)).astype(f32),
                       ((0, 0), (0, 0), (0, POS_DIM_PAD - P)))                # (L, B, 8)

    kernel = functools.partial(encoder_layer_kernel, num_heads=num_heads)

    def const_spec(shape):
        # Weights: constant index_map -> fetched once, revisited every grid step.
        return pl.BlockSpec(shape, lambda g: (0,) * len(shape))

    in_specs = [
        pl.BlockSpec((L, block_b, C), lambda g: (0, g, 0)),           # src, native (L, B, C)
        pl.BlockSpec((L, block_b, POS_DIM_PAD), lambda g: (0, g, 0)), # padded qpos^T
        const_spec((C, 3 * C)),          # W_qkv (bf16)
        const_spec((POS_DIM_PAD, 3 * C)),# W_pe @ W_qkv (bf16)
        const_spec((1, 3 * C)),          # folded QKV bias (f32)
        const_spec((C, C)),              # W_o (bf16)
        const_spec((1, C)),              # b_o (f32)
    ]
    out_spec = pl.BlockSpec((L, block_b, C), lambda g: (0, g, 0))     # lane-dense C=128 f32 store

    return pl.pallas_call(
        kernel,
        out_shape=jax.ShapeDtypeStruct((L, B, C), jnp.float32),
        grid=grid,
        in_specs=in_specs,
        out_specs=out_spec,
        compiler_params=pltpu.CompilerParams(
            dimension_semantics=("parallel",),
            vmem_limit_bytes=32 * 1024 * 1024,
        ),
    )(src_lbc, qpos_lbp, w_qkv, w_peqkv, b_qkv, w_o, b_o)


def reference_jax(src_lbc, query_pos, params, *, num_heads):
    """Pure-JAX f32 reference mirroring the PyTorch forward()."""
    L, B, C = src_lbc.shape
    H, dh = num_heads, C // num_heads

    # self_posembed: Conv1d(3->C, k=1) on (B,3,L) -> (B,C,L); .permute(2,0,1) -> (L,B,C)
    pe = jnp.einsum('bdl,dc->lbc', query_pos, params['w_pe']) + params['b_pe'][0]
    x = src_lbc + pe                                                  # query = key = value

    qkv = jnp.einsum('lbc,ck->lbk', x, params['w_qkv']) + params['b_qkv'][0]
    q, k, v = qkv[..., :C], qkv[..., C:2 * C], qkv[..., 2 * C:]

    def heads(t):                                                     # (L,B,C) -> (B,H,L,dh)
        return t.reshape(L, B, H, dh).transpose(1, 2, 0, 3)

    s = jnp.einsum('bhld,bhmd->bhlm', heads(q), heads(k)) / jnp.sqrt(jnp.float32(dh))
    p = jax.nn.softmax(s, axis=-1)
    o = jnp.einsum('bhlm,bhmd->bhld', p, heads(v)).transpose(2, 0, 1, 3).reshape(L, B, C)
    src2 = o @ params['w_o'] + params['b_o'][0]

    res = src_lbc + src2                                              # residual with ORIGINAL src
    mean = res.mean(axis=0, keepdims=True)                            # InstanceNorm1d over seq dim
    var = ((res - mean) ** 2).mean(axis=0, keepdims=True)
    return jnp.maximum((res - mean) * lax.rsqrt(var + 1e-5), 0.0)     # F.relu


def init_params(key, d_model, pos_dim=3):
    ks = jax.random.split(key, 6)
    s = 0.1
    return {
        # fused [Wq | Wk | Wv] projection
        'w_qkv': s * jax.random.normal(ks[0], (d_model, 3 * d_model), jnp.float32),
        'b_qkv': 0.01 * jax.random.normal(ks[1], (1, 3 * d_model), jnp.float32),
        'w_o': s * jax.random.normal(ks[2], (d_model, d_model), jnp.float32),
        'b_o': 0.01 * jax.random.normal(ks[3], (1, d_model), jnp.float32),
        # 1x1 Conv1d(pos_dim -> d_model), weight stored transposed as (pos_dim, d_model)
        'w_pe': s * jax.random.normal(ks[4], (pos_dim, d_model), jnp.float32),
        'b_pe': 0.01 * jax.random.normal(ks[5], (1, d_model), jnp.float32),
    }


if __name__ == "__main__":
    # Small but TPU-friendly demo shapes: d_model = 128 (one lane tile), 16 seq, 16 batch.
    L, B, C = 16, 16, 128
    num_heads = 4

    key = jax.random.PRNGKey(0)
    k_src, k_pos, k_par = jax.random.split(key, 3)
    src = jax.random.normal(k_src, (L, B, C), jnp.float32)            # PyTorch (L, B, C) layout
    query_pos = jax.random.normal(k_pos, (B, 3, L), jnp.float32)      # coordinates for posembed
    params = init_params(k_par, C)

    out = transformer_encoder_layer(src, query_pos, params, num_heads=num_heads)
    out = jax.block_until_ready(out)

    ref = reference_jax(src, query_pos, params, num_heads=num_heads)
    assert out.shape == (L, B, C)

    max_err = float(jnp.max(jnp.abs(out - ref)))
    mean_err = float(jnp.mean(jnp.abs(out - ref)))
    # Error budget vs the f32 reference: bf16 MXU inputs through three chained projections,
    # the folded pos-embed path and the approx softmax reciprocal give ~1e-2-level deviations;
    # a structural bug would be O(1).
    assert max_err < 1e-1 and mean_err < 1.5e-2, \
        f"mismatch vs reference: max abs err {max_err}, mean abs err {mean_err}"

    print("KERNEL_OK")
</pallas_src>

<mosaic_0001>
module attributes {stable_mosaic.version = 11 : i64} {
  func.func @encoder_layer_kernel(%arg0: i32, %arg1: memref<16x16x128xf32, #tpu.memory_space<vmem>>, %arg2: memref<16x16x8xf32, #tpu.memory_space<vmem>>, %arg3: memref<128x384xbf16, #tpu.memory_space<vmem>>, %arg4: memref<8x384xbf16, #tpu.memory_space<vmem>>, %arg5: memref<1x384xf32, #tpu.memory_space<vmem>>, %arg6: memref<128x128xbf16, #tpu.memory_space<vmem>>, %arg7: memref<1x128xf32, #tpu.memory_space<vmem>>, %arg8: memref<16x16x128xf32, #tpu.memory_space<vmem>>) attributes {dimension_semantics = [#tpu.dimension_semantics<parallel>], iteration_bounds = array<i64: 1>, scalar_prefetch = 0 : i64, scratch_operands = 0 : i64, tpu.core_type = #tpu.core_type<tc>, window_params = [{transform_indices = @transform_0, window_bounds = array<i64: 16, 16, 128>}, {transform_indices = @transform_1, window_bounds = array<i64: 16, 16, 8>}, {pipeline_mode = #tpu.pipeline_mode<synchronous>, transform_indices = @transform_2, window_bounds = array<i64: 128, 384>}, {pipeline_mode = #tpu.pipeline_mode<synchronous>, transform_indices = @transform_3, window_bounds = array<i64: 8, 384>}, {pipeline_mode = #tpu.pipeline_mode<synchronous>, transform_indices = @transform_4, window_bounds = array<i64: 1, 384>}, {pipeline_mode = #tpu.pipeline_mode<synchronous>, transform_indices = @transform_5, window_bounds = array<i64: 128, 128>}, {pipeline_mode = #tpu.pipeline_mode<synchronous>, transform_indices = @transform_6, window_bounds = array<i64: 1, 128>}, {transform_indices = @transform_7, window_bounds = array<i64: 16, 16, 128>}]} {
    %c0 = arith.constant 0 : index
    %c0_0 = arith.constant 0 : index
    %c0_1 = arith.constant 0 : index
    %0 = vector.load %arg1[%c0, %c0_0, %c0_1] : memref<16x16x128xf32, #tpu.memory_space<vmem>>, vector<16x16x128xf32>
    %1 = vector.shape_cast %0 : vector<16x16x128xf32> to vector<256x128xf32>
    %c0_2 = arith.constant 0 : index
    %c0_3 = arith.constant 0 : index
    %c0_4 = arith.constant 0 : index
    %2 = vector.load %arg2[%c0_2, %c0_3, %c0_4] : memref<16x16x8xf32, #tpu.memory_space<vmem>>, vector<16x16x8xf32>
    %3 = vector.shape_cast %2 : vector<16x16x8xf32> to vector<256x8xf32>
    %4 = arith.truncf %1 : vector<256x128xf32> to vector<256x128xbf16>
    %c0_5 = arith.constant 0 : index
    %c0_6 = arith.constant 0 : index
    %5 = vector.load %arg3[%c0_5, %c0_6] : memref<128x384xbf16, #tpu.memory_space<vmem>>, vector<128x384xbf16>
    %cst = arith.constant dense<0.000000e+00> : vector<256x384xf32>
    %6 = tpu.matmul %4, %5, %cst {dimension_numbers = #tpu.dot_dimension_numbers<[1], [0], [0], [1], [0, 0, 1, 1], [], []>} : vector<256x128xbf16>, vector<128x384xbf16>, vector<256x384xf32> -> vector<256x384xf32>
    %7 = arith.truncf %3 : vector<256x8xf32> to vector<256x8xbf16>
    %c0_7 = arith.constant 0 : index
    %c0_8 = arith.constant 0 : index
    %8 = vector.load %arg4[%c0_7, %c0_8] : memref<8x384xbf16, #tpu.memory_space<vmem>>, vector<8x384xbf16>
    %cst_9 = arith.constant dense<0.000000e+00> : vector<256x384xf32>
    %9 = tpu.matmul %7, %8, %cst_9 {dimension_numbers = #tpu.dot_dimension_numbers<[1], [0], [0], [1], [0, 0, 1, 1], [], []>} : vector<256x8xbf16>, vector<8x384xbf16>, vector<256x384xf32> -> vector<256x384xf32>
    %10 = arith.addf %6, %9 : vector<256x384xf32>
    %c0_10 = arith.constant 0 : index
    %c0_11 = arith.constant 0 : index
    %11 = vector.load %arg5[%c0_10, %c0_11] : memref<1x384xf32, #tpu.memory_space<vmem>>, vector<1x384xf32>
    %12 = vector.broadcast %11 : vector<1x384xf32> to vector<256x384xf32>
    %13 = arith.addf %10, %12 : vector<256x384xf32>
    %14 = arith.truncf %13 : vector<256x384xf32> to vector<256x384xbf16>
    %15 = tpu.iota {dimensions = array<i32: 0>} : vector<256x256xi32>
    %16 = tpu.iota {dimensions = array<i32: 1>} : vector<256x256xi32>
    %c16_i32 = arith.constant 16 : i32
    %c0_i32 = arith.constant 0 : i32
    %17 = arith.cmpi eq, %c16_i32, %c0_i32 : i32
    %c1_i32 = arith.constant 1 : i32
    %18 = arith.select %17, %c1_i32, %c16_i32 : i32
    %19 = vector.broadcast %18 : i32 to vector<256x256xi32>
    %20 = arith.remsi %15, %19 : vector<256x256xi32>
    %c0_i32_12 = arith.constant 0 : i32
    %21 = vector.broadcast %c0_i32_12 : i32 to vector<256x256xi32>
    %22 = arith.cmpi ne, %20, %21 : vector<256x256xi32>
    %c0_i32_13 = arith.constant 0 : i32
    %23 = vector.broadcast %c0_i32_13 : i32 to vector<256x256xi32>
    %24 = arith.cmpi slt, %20, %23 : vector<256x256xi32>
    %c0_i32_14 = arith.constant 0 : i32
    %25 = arith.cmpi slt, %18, %c0_i32_14 : i32
    %26 = vector.broadcast %25 : i1 to vector<256x256xi1>
    %27 = vector.broadcast %26 : vector<256x256xi1> to vector<256x256xi1>
    %28 = arith.xori %24, %27 : vector<256x256xi1>
    %29 = arith.andi %28, %22 : vector<256x256xi1>
    %30 = vector.broadcast %18 : i32 to vector<256x256xi32>
    %31 = arith.addi %20, %30 : vector<256x256xi32>
    %32 = arith.select %29, %31, %20 : vector<256x256xi1>, vector<256x256xi32>
    %c16_i32_15 = arith.constant 16 : i32
    %c0_i32_16 = arith.constant 0 : i32
    %33 = arith.cmpi eq, %c16_i32_15, %c0_i32_16 : i32
    %c1_i32_17 = arith.constant 1 : i32
    %34 = arith.select %33, %c1_i32_17, %c16_i32_15 : i32
    %35 = vector.broadcast %34 : i32 to vector<256x256xi32>
    %36 = arith.remsi %16, %35 : vector<256x256xi32>
    %c0_i32_18 = arith.constant 0 : i32
    %37 = vector.broadcast %c0_i32_18 : i32 to vector<256x256xi32>
    %38 = arith.cmpi ne, %36, %37 : vector<256x256xi32>
    %c0_i32_19 = arith.constant 0 : i32
    %39 = vector.broadcast %c0_i32_19 : i32 to vector<256x256xi32>
    %40 = arith.cmpi slt, %36, %39 : vector<256x256xi32>
    %c0_i32_20 = arith.constant 0 : i32
    %41 = arith.cmpi slt, %34, %c0_i32_20 : i32
    %42 = vector.broadcast %41 : i1 to vector<256x256xi1>
    %43 = vector.broadcast %42 : vector<256x256xi1> to vector<256x256xi1>
    %44 = arith.xori %40, %43 : vector<256x256xi1>
    %45 = arith.andi %44, %38 : vector<256x256xi1>
    %46 = vector.broadcast %34 : i32 to vector<256x256xi32>
    %47 = arith.addi %36, %46 : vector<256x256xi32>
    %48 = arith.select %45, %47, %36 : vector<256x256xi1>, vector<256x256xi32>
    %49 = arith.cmpi eq, %32, %48 : vector<256x256xi32>
    %cst_21 = arith.constant 0.000000e+00 : f32
    %cst_22 = arith.constant -1.000000e+30 : f32
    %50 = vector.broadcast %cst_21 : f32 to vector<256x256xf32>
    %51 = vector.broadcast %cst_22 : f32 to vector<256x256xf32>
    %52 = arith.select %49, %50, %51 : vector<256x256xi1>, vector<256x256xf32>
    %c0_23 = arith.constant 0 : index
    %c0_24 = arith.constant 0 : index
    %53 = vector.load %arg6[%c0_23, %c0_24] : memref<128x128xbf16, #tpu.memory_space<vmem>>, vector<128x128xbf16>
    %cst_25 = arith.constant 0.000000e+00 : f32
    %54 = vector.broadcast %cst_25 : f32 to vector<256x128xf32>
    %55 = vector.extract_strided_slice %14 {offsets = [0, 0], sizes = [256, 32], strides = [1, 1]} : vector<256x384xbf16> to vector<256x32xbf16>
    %56 = vector.extract_strided_slice %14 {offsets = [0, 128], sizes = [256, 32], strides = [1, 1]} : vector<256x384xbf16> to vector<256x32xbf16>
    %57 = vector.extract_strided_slice %14 {offsets = [0, 256], sizes = [256, 32], strides = [1, 1]} : vector<256x384xbf16> to vector<256x32xbf16>
    "tpu.trace_start"() <{level = 10 : i32, message = "rd,md->rm"}> : () -> ()
    %cst_26 = arith.constant dense<0.000000e+00> : vector<256x256xf32>
    %58 = tpu.matmul %55, %56, %cst_26 {dimension_numbers = #tpu.dot_dimension_numbers<[1], [1], [0], [0], [0, 0, 1, 0], [], []>} : vector<256x32xbf16>, vector<256x32xbf16>, vector<256x256xf32> -> vector<256x256xf32>
    "tpu.trace_stop"() : () -> ()
    %cst_27 = arith.constant 0.176776692 : f32
    %59 = vector.broadcast %cst_27 : f32 to vector<256x256xf32>
    %60 = arith.mulf %58, %59 : vector<256x256xf32>
    %61 = arith.addf %60, %52 : vector<256x256xf32>
    %cst_28 = arith.constant dense<0xFF800000> : vector<256xf32>
    %62 = vector.multi_reduction <maximumf>, %61, %cst_28 [1] : vector<256x256xf32> to vector<256xf32>
    %63 = vector.shape_cast %62 : vector<256xf32> to vector<256x1xf32>
    %64 = vector.broadcast %63 : vector<256x1xf32> to vector<256x256xf32>
    %65 = arith.subf %61, %64 : vector<256x256xf32>
    %66 = math.exp %65 : vector<256x256xf32>
    %cst_29 = arith.constant dense<0.000000e+00> : vector<256xf32>
    %67 = vector.multi_reduction <add>, %66, %cst_29 [1] : vector<256x256xf32> to vector<256xf32>
    %68 = vector.shape_cast %67 : vector<256xf32> to vector<256x1xf32>
    %69 = tpu.reciprocal %68 {approx = true} : vector<256x1xf32> -> vector<256x1xf32>
    %70 = vector.broadcast %69 : vector<256x1xf32> to vector<256x256xf32>
    %71 = arith.mulf %66, %70 : vector<256x256xf32>
    %72 = arith.truncf %71 : vector<256x256xf32> to vector<256x256xbf16>
    %cst_30 = arith.constant dense<0.000000e+00> : vector<256x32xf32>
    %73 = tpu.matmul %72, %57, %cst_30 {dimension_numbers = #tpu.dot_dimension_numbers<[1], [0], [0], [1], [0, 0, 1, 1], [], []>} : vector<256x256xbf16>, vector<256x32xbf16>, vector<256x32xf32> -> vector<256x32xf32>
    %74 = arith.truncf %73 : vector<256x32xf32> to vector<256x32xbf16>
    %75 = vector.extract_strided_slice %53 {offsets = [0, 0], sizes = [32, 128], strides = [1, 1]} : vector<128x128xbf16> to vector<32x128xbf16>
    %cst_31 = arith.constant dense<0.000000e+00> : vector<256x128xf32>
    %76 = tpu.matmul %74, %75, %cst_31 {dimension_numbers = #tpu.dot_dimension_numbers<[1], [0], [0], [1], [0, 0, 1, 1], [], []>} : vector<256x32xbf16>, vector<32x128xbf16>, vector<256x128xf32> -> vector<256x128xf32>
    %77 = arith.addf %54, %76 : vector<256x128xf32>
    %78 = vector.extract_strided_slice %14 {offsets = [0, 32], sizes = [256, 32], strides = [1, 1]} : vector<256x384xbf16> to vector<256x32xbf16>
    %79 = vector.extract_strided_slice %14 {offsets = [0, 160], sizes = [256, 32], strides = [1, 1]} : vector<256x384xbf16> to vector<256x32xbf16>
    %80 = vector.extract_strided_slice %14 {offsets = [0, 288], sizes = [256, 32], strides = [1, 1]} : vector<256x384xbf16> to vector<256x32xbf16>
    "tpu.trace_start"() <{level = 10 : i32, message = "rd,md->rm"}> : () -> ()
    %cst_32 = arith.constant dense<0.000000e+00> : vector<256x256xf32>
    %81 = tpu.matmul %78, %79, %cst_32 {dimension_numbers = #tpu.dot_dimension_numbers<[1], [1], [0], [0], [0, 0, 1, 0], [], []>} : vector<256x32xbf16>, vector<256x32xbf16>, vector<256x256xf32> -> vector<256x256xf32>
    "tpu.trace_stop"() : () -> ()
    %cst_33 = arith.constant 0.176776692 : f32
    %82 = vector.broadcast %cst_33 : f32 to vector<256x256xf32>
    %83 = arith.mulf %81, %82 : vector<256x256xf32>
    %84 = arith.addf %83, %52 : vector<256x256xf32>
    %cst_34 = arith.constant dense<0xFF800000> : vector<256xf32>
    %85 = vector.multi_reduction <maximumf>, %84, %cst_34 [1] : vector<256x256xf32> to vector<256xf32>
    %86 = vector.shape_cast %85 : vector<256xf32> to vector<256x1xf32>
    %87 = vector.broadcast %86 : vector<256x1xf32> to vector<256x256xf32>
    %88 = arith.subf %84, %87 : vector<256x256xf32>
    %89 = math.exp %88 : vector<256x256xf32>
    %cst_35 = arith.constant dense<0.000000e+00> : vector<256xf32>
    %90 = vector.multi_reduction <add>, %89, %cst_35 [1] : vector<256x256xf32> to vector<256xf32>
    %91 = vector.shape_cast %90 : vector<256xf32> to vector<256x1xf32>
    %92 = tpu.reciprocal %91 {approx = true} : vector<256x1xf32> -> vector<256x1xf32>
    %93 = vector.broadcast %92 : vector<256x1xf32> to vector<256x256xf32>
    %94 = arith.mulf %89, %93 : vector<256x256xf32>
    %95 = arith.truncf %94 : vector<256x256xf32> to vector<256x256xbf16>
    %cst_36 = arith.constant dense<0.000000e+00> : vector<256x32xf32>
    %96 = tpu.matmul %95, %80, %cst_36 {dimension_numbers = #tpu.dot_dimension_numbers<[1], [0], [0], [1], [0, 0, 1, 1], [], []>} : vector<256x256xbf16>, vector<256x32xbf16>, vector<256x32xf32> -> vector<256x32xf32>
    %97 = arith.truncf %96 : vector<256x32xf32> to vector<256x32xbf16>
    %98 = vector.extract_strided_slice %53 {offsets = [32, 0], sizes = [32, 128], strides = [1, 1]} : vector<128x128xbf16> to vector<32x128xbf16>
    %cst_37 = arith.constant dense<0.000000e+00> : vector<256x128xf32>
    %99 = tpu.matmul %97, %98, %cst_37 {dimension_numbers = #tpu.dot_dimension_numbers<[1], [0], [0], [1], [0, 0, 1, 1], [], []>} : vector<256x32xbf16>, vector<32x128xbf16>, vector<256x128xf32> -> vector<256x128xf32>
    %100 = arith.addf %77, %99 : vector<256x128xf32>
    %101 = vector.extract_strided_slice %14 {offsets = [0, 64], sizes = [256, 32], strides = [1, 1]} : vector<256x384xbf16> to vector<256x32xbf16>
    %102 = vector.extract_strided_slice %14 {offsets = [0, 192], sizes = [256, 32], strides = [1, 1]} : vector<256x384xbf16> to vector<256x32xbf16>
    %103 = vector.extract_strided_slice %14 {offsets = [0, 320], sizes = [256, 32], strides = [1, 1]} : vector<256x384xbf16> to vector<256x32xbf16>
    "tpu.trace_start"() <{level = 10 : i32, message = "rd,md->rm"}> : () -> ()
    %cst_38 = arith.constant dense<0.000000e+00> : vector<256x256xf32>
    %104 = tpu.matmul %101, %102, %cst_38 {dimension_numbers = #tpu.dot_dimension_numbers<[1], [1], [0], [0], [0, 0, 1, 0], [], []>} : vector<256x32xbf16>, vector<256x32xbf16>, vector<256x256xf32> -> vector<256x256xf32>
    "tpu.trace_stop"() : () -> ()
    %cst_39 = arith.constant 0.176776692 : f32
    %105 = vector.broadcast %cst_39 : f32 to vector<256x256xf32>
    %106 = arith.mulf %104, %105 : vector<256x256xf32>
    %107 = arith.addf %106, %52 : vector<256x256xf32>
    %cst_40 = arith.constant dense<0xFF800000> : vector<256xf32>
    %108 = vector.multi_reduction <maximumf>, %107, %cst_40 [1] : vector<256x256xf32> to vector<256xf32>
    %109 = vector.shape_cast %108 : vector<256xf32> to vector<256x1xf32>
    %110 = vector.broadcast %109 : vector<256x1xf32> to vector<256x256xf32>
    %111 = arith.subf %107, %110 : vector<256x256xf32>
    %112 = math.exp %111 : vector<256x256xf32>
    %cst_41 = arith.constant dense<0.000000e+00> : vector<256xf32>
    %113 = vector.multi_reduction <add>, %112, %cst_41 [1] : vector<256x256xf32> to vector<256xf32>
    %114 = vector.shape_cast %113 : vector<256xf32> to vector<256x1xf32>
    %115 = tpu.reciprocal %114 {approx = true} : vector<256x1xf32> -> vector<256x1xf32>
    %116 = vector.broadcast %115 : vector<256x1xf32> to vector<256x256xf32>
    %117 = arith.mulf %112, %116 : vector<256x256xf32>
    %118 = arith.truncf %117 : vector<256x256xf32> to vector<256x256xbf16>
    %cst_42 = arith.constant dense<0.000000e+00> : vector<256x32xf32>
    %119 = tpu.matmul %118, %103, %cst_42 {dimension_numbers = #tpu.dot_dimension_numbers<[1], [0], [0], [1], [0, 0, 1, 1], [], []>} : vector<256x256xbf16>, vector<256x32xbf16>, vector<256x32xf32> -> vector<256x32xf32>
    %120 = arith.truncf %119 : vector<256x32xf32> to vector<256x32xbf16>
    %121 = vector.extract_strided_slice %53 {offsets = [64, 0], sizes = [32, 128], strides = [1, 1]} : vector<128x128xbf16> to vector<32x128xbf16>
    %cst_43 = arith.constant dense<0.000000e+00> : vector<256x128xf32>
    %122 = tpu.matmul %120, %121, %cst_43 {dimension_numbers = #tpu.dot_dimension_numbers<[1], [0], [0], [1], [0, 0, 1, 1], [], []>} : vector<256x32xbf16>, vector<32x128xbf16>, vector<256x128xf32> -> vector<256x128xf32>
    %123 = arith.addf %100, %122 : vector<256x128xf32>
    %124 = vector.extract_strided_slice %14 {offsets = [0, 96], sizes = [256, 32], strides = [1, 1]} : vector<256x384xbf16> to vector<256x32xbf16>
    %125 = vector.extract_strided_slice %14 {offsets = [0, 224], sizes = [256, 32], strides = [1, 1]} : vector<256x384xbf16> to vector<256x32xbf16>
    %126 = vector.extract_strided_slice %14 {offsets = [0, 352], sizes = [256, 32], strides = [1, 1]} : vector<256x384xbf16> to vector<256x32xbf16>
    "tpu.trace_start"() <{level = 10 : i32, message = "rd,md->rm"}> : () -> ()
    %cst_44 = arith.constant dense<0.000000e+00> : vector<256x256xf32>
    %127 = tpu.matmul %124, %125, %cst_44 {dimension_numbers = #tpu.dot_dimension_numbers<[1], [1], [0], [0], [0, 0, 1, 0], [], []>} : vector<256x32xbf16>, vector<256x32xbf16>, vector<256x256xf32> -> vector<256x256xf32>
    "tpu.trace_stop"() : () -> ()
    %cst_45 = arith.constant 0.176776692 : f32
    %128 = vector.broadcast %cst_45 : f32 to vector<256x256xf32>
    %129 = arith.mulf %127, %128 : vector<256x256xf32>
    %130 = arith.addf %129, %52 : vector<256x256xf32>
    %cst_46 = arith.constant dense<0xFF800000> : vector<256xf32>
    %131 = vector.multi_reduction <maximumf>, %130, %cst_46 [1] : vector<256x256xf32> to vector<256xf32>
    %132 = vector.shape_cast %131 : vector<256xf32> to vector<256x1xf32>
    %133 = vector.broadcast %132 : vector<256x1xf32> to vector<256x256xf32>
    %134 = arith.subf %130, %133 : vector<256x256xf32>
    %135 = math.exp %134 : vector<256x256xf32>
    %cst_47 = arith.constant dense<0.000000e+00> : vector<256xf32>
    %136 = vector.multi_reduction <add>, %135, %cst_47 [1] : vector<256x256xf32> to vector<256xf32>
    %137 = vector.shape_cast %136 : vector<256xf32> to vector<256x1xf32>
    %138 = tpu.reciprocal %137 {approx = true} : vector<256x1xf32> -> vector<256x1xf32>
    %139 = vector.broadcast %138 : vector<256x1xf32> to vector<256x256xf32>
    %140 = arith.mulf %135, %139 : vector<256x256xf32>
    %141 = arith.truncf %140 : vector<256x256xf32> to vector<256x256xbf16>
    %cst_48 = arith.constant dense<0.000000e+00> : vector<256x32xf32>
    %142 = tpu.matmul %141, %126, %cst_48 {dimension_numbers = #tpu.dot_dimension_numbers<[1], [0], [0], [1], [0, 0, 1, 1], [], []>} : vector<256x256xbf16>, vector<256x32xbf16>, vector<256x32xf32> -> vector<256x32xf32>
    %143 = arith.truncf %142 : vector<256x32xf32> to vector<256x32xbf16>
    %144 = vector.extract_strided_slice %53 {offsets = [96, 0], sizes = [32, 128], strides = [1, 1]} : vector<128x128xbf16> to vector<32x128xbf16>
    %cst_49 = arith.constant dense<0.000000e+00> : vector<256x128xf32>
    %145 = tpu.matmul %143, %144, %cst_49 {dimension_numbers = #tpu.dot_dimension_numbers<[1], [0], [0], [1], [0, 0, 1, 1], [], []>} : vector<256x32xbf16>, vector<32x128xbf16>, vector<256x128xf32> -> vector<256x128xf32>
    %146 = arith.addf %123, %145 : vector<256x128xf32>
    %c0_50 = arith.constant 0 : index
    %c0_51 = arith.constant 0 : index
    %147 = vector.load %arg7[%c0_50, %c0_51] : memref<1x128xf32, #tpu.memory_space<vmem>>, vector<1x128xf32>
    %148 = vector.broadcast %147 : vector<1x128xf32> to vector<256x128xf32>
    %149 = arith.addf %146, %148 : vector<256x128xf32>
    %150 = arith.addf %1, %149 : vector<256x128xf32>
    %151 = vector.shape_cast %150 : vector<256x128xf32> to vector<16x16x128xf32>
    %cst_52 = arith.constant dense<0.000000e+00> : vector<16x128xf32>
    %152 = vector.multi_reduction <add>, %151, %cst_52 [0] : vector<16x16x128xf32> to vector<16x128xf32>
    %153 = vector.shape_cast %152 : vector<16x128xf32> to vector<1x16x128xf32>
    %cst_53 = arith.constant 1.600000e+01 : f32
    %154 = vector.broadcast %cst_53 : f32 to vector<1x16x128xf32>
    %155 = arith.divf %153, %154 : vector<1x16x128xf32>
    %156 = vector.broadcast %155 : vector<1x16x128xf32> to vector<16x16x128xf32>
    %157 = arith.subf %151, %156 : vector<16x16x128xf32>
    %158 = arith.mulf %157, %157 : vector<16x16x128xf32>
    %cst_54 = arith.constant dense<0.000000e+00> : vector<16x128xf32>
    %159 = vector.multi_reduction <add>, %158, %cst_54 [0] : vector<16x16x128xf32> to vector<16x128xf32>
    %160 = vector.shape_cast %159 : vector<16x128xf32> to vector<1x16x128xf32>
    %cst_55 = arith.constant 1.600000e+01 : f32
    %161 = vector.broadcast %cst_55 : f32 to vector<1x16x128xf32>
    %162 = arith.divf %160, %161 : vector<1x16x128xf32>
    %163 = vector.broadcast %155 : vector<1x16x128xf32> to vector<16x16x128xf32>
    %164 = arith.subf %151, %163 : vector<16x16x128xf32>
    %cst_56 = arith.constant 9.99999974E-6 : f32
    %165 = vector.broadcast %cst_56 : f32 to vector<1x16x128xf32>
    %166 = arith.addf %162, %165 : vector<1x16x128xf32>
    %167 = math.rsqrt %166 : vector<1x16x128xf32>
    %168 = vector.broadcast %167 : vector<1x16x128xf32> to vector<16x16x128xf32>
    %169 = arith.mulf %164, %168 : vector<16x16x128xf32>
    %cst_57 = arith.constant 0.000000e+00 : f32
    %170 = vector.broadcast %cst_57 : f32 to vector<16x16x128xf32>
    %171 = arith.maximumf %169, %170 : vector<16x16x128xf32>
    %c0_58 = arith.constant 0 : index
    %c0_59 = arith.constant 0 : index
    %c0_60 = arith.constant 0 : index
    %172 = vector.load %arg8[%c0_58, %c0_59, %c0_60] : memref<16x16x128xf32, #tpu.memory_space<vmem>>, vector<16x16x128xf32>
    tpu.vector_store %arg8[%c0_58, %c0_59, %c0_60], %171 {strides = array<i32>} : memref<16x16x128xf32, #tpu.memory_space<vmem>>, vector<16x16x128xf32>,
    return
  }
  func.func @transform_0(%arg0: i32) -> (i32, i32, i32) {
    %c0_i32 = arith.constant 0 : i32
    %c0_i32_0 = arith.constant 0 : i32
    %c0_i32_1 = arith.constant 0 : i32
    return %c0_i32, %arg0, %c0_i32_0 : i32, i32, i32
  }
  func.func @transform_1(%arg0: i32) -> (i32, i32, i32) {
    %c0_i32 = arith.constant 0 : i32
    %c0_i32_0 = arith.constant 0 : i32
    %c0_i32_1 = arith.constant 0 : i32
    return %c0_i32, %arg0, %c0_i32_0 : i32, i32, i32
  }
  func.func @transform_2(%arg0: i32) -> (i32, i32) {
    %c0_i32 = arith.constant 0 : i32
    %c0_i32_0 = arith.constant 0 : i32
    %c0_i32_1 = arith.constant 0 : i32
    return %c0_i32, %c0_i32_0 : i32, i32
  }
  func.func @transform_3(%arg0: i32) -> (i32, i32) {
    %c0_i32 = arith.constant 0 : i32
    %c0_i32_0 = arith.constant 0 : i32
    %c0_i32_1 = arith.constant 0 : i32
    return %c0_i32, %c0_i32_0 : i32, i32
  }
  func.func @transform_4(%arg0: i32) -> (i32, i32) {
    %c0_i32 = arith.constant 0 : i32
    %c0_i32_0 = arith.constant 0 : i32
    %c0_i32_1 = arith.constant 0 : i32
    return %c0_i32, %c0_i32_0 : i32, i32
  }
  func.func @transform_5(%arg0: i32) -> (i32, i32) {
    %c0_i32 = arith.constant 0 : i32
    %c0_i32_0 = arith.constant 0 : i32
    %c0_i32_1 = arith.constant 0 : i32
    return %c0_i32, %c0_i32_0 : i32, i32
  }
  func.func @transform_6(%arg0: i32) -> (i32, i32) {
    %c0_i32 = arith.constant 0 : i32
    %c0_i32_0 = arith.constant 0 : i32
    %c0_i32_1 = arith.constant 0 : i32
    return %c0_i32, %c0_i32_0 : i32, i32
  }
  func.func @transform_7(%arg0: i32) -> (i32, i32, i32) {
    %c0_i32 = arith.constant 0 : i32
    %c0_i32_0 = arith.constant 0 : i32
    %c0_i32_1 = arith.constant 0 : i32
    return %c0_i32, %arg0, %c0_i32_0 : i32, i32, i32
  }
}

</mosaic_0001>

<bundles_post_ra>
// kernel: tpu_custom_call.1
= control target key start
LH: loop header
LB: loop body
LE: loop exit
PB: predicated region body
PF: predicated region fallthrough
CT: control target
= control target key end

     0   :  { %12 = vsyncpa [#allocation3], 0  ;;  %s14430_s0 = inlined_call_operand.vmem [shape: f32[16,16,128], index: 0, kind: input, shape index: {}]   ;;  %s14431_s1 = inlined_call_operand.vmem [shape: f32[16,16,8], index: 1, kind: input, shape index: {}]   ;;  %s14432_s2 = inlined_call_operand.hbm [shape: bf16[128,384], index: 2, kind: input, shape index: {}]   ;;  %s14433_s3 = inlined_call_operand.vmem [shape: bf16[8,384], index: 3, kind: input, shape index: {}]   ;;  %s14434_s4 = inlined_call_operand.vmem [shape: f32[1,384], index: 4, kind: input, shape index: {}]   ;;  %s14435_s5 = inlined_call_operand.vmem [shape: bf16[128,128], index: 5, kind: input, shape index: {}]   ;;  %s14436_s6 = inlined_call_operand.vmem [shape: f32[1,128], index: 6, kind: input, shape index: {}]   ;;  %s14437_s7 = inlined_call_operand.hbm [shape: f32[16,16,128], index: 7, kind: output, shape index: {}]  }
   0x1   :  { %13 = vsyncpa [#allocation4], 0  ;;  %s22_s26 = sshll.u32 %s14432_s2, 4  ;;  %s8924_s27 = smov [#allocation2]   ;;  %s23_s26 = int_to_ptr.hbm [resolvable:$true] %s22_s26 }
   0x2   :  { %s24_s28 = sshll.u32 %s8924_s27, 4  ;;  %s8925_s29 = smov 192   ;;  %s25_s28 = int_to_ptr.vmem [resolvable:$true] %s24_s28 }
   0x3   :  { %s8926_s30 = smov 12  }
   0x4   :  { %30 = dma.hbm_to_vmem [thread:$0]  %s23_s26, 3072, %s25_s28, [#allocation3], %s8925_s29, %s8925_s29, %s8926_s30  }
   0x5   :  { %8920 = dma.done.wait [#allocation3], 3072  }
   0x6   :  { %8921 = vsyncadd [#allocation3], 4294964224  ;;  %v172_v0 = vld [vmem:[%s14433_s3] sm:$0xff]  ;;  %vm231_vm0 = vcmask 1043456   ;;  %v77_v4 = vld [vmem:[%s14431_s1 + $0x8] sm:$0xff]  ;;  %vm182_vm1 = vcmask 64512  }
   0x7   :  { %v176_v1 = vunpack.c.l.b16 %v172_v0  ;;  %v177_v2 = vunpack.c.h.b16 %v172_v0  ;;  %v76_v3 = vld [vmem:[%s14431_s1] sm:$0xff]  ;;  %v93_v6 = vld [vmem:[%s14431_s1 + $0x88] sm:$0xff]  ;;  %v78_v13 = vld [vmem:[%s14431_s1 + $0x10] sm:$0xff]  ;;  %s8927_s16 = smov 96   ;;  %vm1787_vm2 = vcmask 261120   ;;  %s8930_s22 = smov 32  }
   0x8   :  { %v92_v5 = vld [vmem:[%s14431_s1 + $0x80] sm:$0xff]  ;;  %v8995_v11 = vpack.c.bf16 %v77_v4, %v76_v3  ;;  %v79_v14 = vld [vmem:[%s14431_s1 + $0x18] sm:$0xff]  ;;  %v94_v15 = vld [vmem:[%s14431_s1 + $0x90] sm:$0xff]  ;;  %s8933_s15 = smov 128  }
   0x9   :  { %v179_v7 = vpack.c.b16 %v176_v1, %v176_v1  ;;  %v180_v8 = vpack.c.b16 %v177_v2, %v177_v2  ;;  %v8997_v12 = vpack.c.bf16 %v93_v6, %v92_v5  ;;  %v95_v16 = vld [vmem:[%s14431_s1 + $0x98] sm:$0xff]  ;;  %v9019_v17 = vpack.c.bf16 %v79_v14, %v78_v13  ;;  %v80_v19 = vld [vmem:[%s14431_s1 + $0x20] sm:$0xff]  ;;  %v81_v20 = vld [vmem:[%s14431_s1 + $0x28] sm:$0xff] }
   0xa   :  { %v9021_v18 = vpack.c.bf16 %v95_v16, %v94_v15  ;;  %v96_v21 = vld [vmem:[%s14431_s1 + $0xa0] sm:$0xff]  ;;  %v97_v22 = vld [vmem:[%s14431_s1 + $0xa8] sm:$0xff]  ;;  %v9043_v23 = vpack.c.bf16 %v81_v20, %v80_v19  ;;  %v82_v25 = vld [vmem:[%s14431_s1 + $0x30] sm:$0xff] }
   0xb   :  { %v233_v9 = vsel %vm231_vm0, %v179_v7, 0  ;;  %v236_v10 = vsel %vm231_vm0, %v180_v8, 0  ;;  %v9045_v24 = vpack.c.bf16 %v97_v22, %v96_v21  ;;  %v83_v26 = vld [vmem:[%s14431_s1 + $0x38] sm:$0xff]  ;;  %v98_v27 = vld [vmem:[%s14431_s1 + $0xb0] sm:$0xff]  ;;  %v84_v31 = vld [vmem:[%s14431_s1 + $0x40] sm:$0xff] }
   0xc   :  { %248 = vmatpush.bf16.msra.mxu0 %v233_v9  ;;  %8052 = vmatpush.bf16.msra.mxu2 %v233_v9  ;;  %v99_v28 = vld [vmem:[%s14431_s1 + $0xb8] sm:$0xff]  ;;  %v9067_v29 = vpack.c.bf16 %v83_v26, %v82_v25  ;;  %v85_v32 = vld [vmem:[%s14431_s1 + $0x48] sm:$0xff]  ;;  %v100_v33 = vld [vmem:[%s14431_s1 + $0xc0] sm:$0xff] }
   0xd   :  { %8053 = vmatpush.bf16.msra.mxu3 %v236_v10  ;;  %337 = vmatpush.bf16.msra.mxu1 %v236_v10  ;;  %v9069_v30 = vpack.c.bf16 %v99_v28, %v98_v27  ;;  %v101_v34 = vld [vmem:[%s14431_s1 + $0xc8] sm:$0xff]  ;;  %v9091_v35 = vpack.c.bf16 %v85_v32, %v84_v31  ;;  %v8042_v38 = vld [vmem:[#allocation2 + $0xb0] sm:$0xf0]  ;;  %v7788_v41 = vld [vmem:[#allocation2 + $0xb4] sm:$0xf0] }
   0xe   :  { %v9093_v36 = vpack.c.bf16 %v101_v34, %v100_v33  ;;  %v7786_v37 = vld [vmem:[#allocation2 + $0xa8] sm:$0xf]  ;;  %v8041_v39 = vld [vmem:[#allocation2 + $0xac] sm:$0xf]  ;;  %v7774_v43 = vld [vmem:[#allocation2 + $0x90] sm:$0xf] }
   0xf   :  { %7652 = vmatmul.msk.bf16.vlgmr.msra.gmra.mxu0 %vm182_vm1, %v8995_v11  ;;  %7660 = vmatmul.msk.bf16.vlgmr.msra.gmra.mxu2 %vm182_vm1, %v8997_v12  ;;  %v7787_v40 = vor.u32 %v8042_v38, %v7786_v37  ;;  %v7791_v42 = vor.u32 %v8041_v39, %v7788_v41  ;;  %v8039_v44 = vld [vmem:[#allocation2 + $0x98] sm:$0xf0]  ;;  %v8038_v45 = vld [vmem:[#allocation2 + $0x94] sm:$0xf]  ;;  %v7776_v47 = vld [vmem:[#allocation2 + $0x9c] sm:$0xf0] }
  0x10   :  { %7676 = vmatmul.msk.bf16.vlgmr.msra.gmra.mxu3 %vm182_vm1, %v8997_v12  ;;  %7668 = vmatmul.msk.bf16.vlgmr.msra.gmra.mxu1 %vm182_vm1, %v8995_v11  ;;  %v7775_v46 = vor.u32 %v8039_v44, %v7774_v43  ;;  %v7794_v48 = vld [vmem:[#allocation2 + $0xb0] sm:$0xf]  ;;  %v8043_v49 = vld [vmem:[#allocation2 + $0xb8] sm:$0xf0]  ;;  %v7779_v50 = vor.u32 %v8038_v45, %v7776_v47  ;;  %v7762_v52 = vld [vmem:[#allocation2 + $0x78] sm:$0xf] }
  0x11   :  { %636 = vmatpush.bf16.msrb.mxu3 %v7787_v40  ;;  %725 = vmatpush.bf16.msrb.mxu0 %v7791_v42  ;;  %v7795_v51 = vor.u32 %v8043_v49, %v7794_v48  ;;  %v8036_v53 = vld [vmem:[#allocation2 + $0x80] sm:$0xf0]  ;;  %v8035_v54 = vld [vmem:[#allocation2 + $0x7c] sm:$0xf]  ;;  %v7764_v55 = vld [vmem:[#allocation2 + $0x84] sm:$0xf0] }
  0x12   :  { %v7782_v56 = vld [vmem:[#allocation2 + $0x98] sm:$0xf]  ;;  %v8040_v57 = vld [vmem:[#allocation2 + $0xa0] sm:$0xf0]  ;;  %v7763_v59 = vor.u32 %v8036_v53, %v7762_v52  ;;  %v7770_v60 = vld [vmem:[#allocation2 + $0x80] sm:$0xf]  ;;  %v7767_v62 = vor.u32 %v8035_v54, %v7764_v55 }
  0x13   :  { %814 = vmatpush.bf16.msrb.mxu1 %v7795_v51  ;;  %v7783_v58 = vor.u32 %v8040_v57, %v7782_v56  ;;  %v8037_v61 = vld [vmem:[#allocation2 + $0x88] sm:$0xf0]  ;;  %v7750_v63 = vld [vmem:[#allocation2 + $0x60] sm:$0xf]  ;;  %v86_v1 = vld [vmem:[%s14431_s1 + $0x50] sm:$0xff] }
  0x14   :  { %v8033_v0 = vld [vmem:[#allocation2 + $0x68] sm:$0xf0]  ;;  %v8032_v2 = vld [vmem:[#allocation2 + $0x64] sm:$0xf]  ;;  %v7752_v3 = vld [vmem:[#allocation2 + $0x6c] sm:$0xf0]  ;;  %v7771_v7 = vor.u32 %v8037_v61, %v7770_v60 }
  0x15   :  { %637 = vmatpush.bf16.msrb.mxu3 %v7775_v46  ;;  %726 = vmatpush.bf16.msrb.mxu0 %v7779_v50  ;;  %v87_v4 = vld [vmem:[%s14431_s1 + $0x58] sm:$0xff]  ;;  %v102_v5 = vld [vmem:[%s14431_s1 + $0xd0] sm:$0xff]  ;;  %v7751_v8 = vor.u32 %v8033_v0, %v7750_v63  ;;  %v7755_v9 = vor.u32 %v8032_v2, %v7752_v3  ;;  %v7738_v14 = vld [vmem:[#allocation2 + $0x48] sm:$0xf] }
  0x16   :  { %v103_v6 = vld [vmem:[%s14431_s1 + $0xd8] sm:$0xff]  ;;  %v9115_v10 = vpack.c.bf16 %v87_v4, %v86_v1  ;;  %v8030_v15 = vld [vmem:[#allocation2 + $0x50] sm:$0xf0]  ;;  %v8029_v16 = vld [vmem:[#allocation2 + $0x4c] sm:$0xf] }
  0x17   :  { %815 = vmatpush.bf16.msrb.mxu1 %v7783_v58  ;;  %v9117_v13 = vpack.c.bf16 %v103_v6, %v102_v5  ;;  %v7739_v19 = vor.u32 %v8030_v15, %v7738_v14  ;;  %v7740_v20 = vld [vmem:[#allocation2 + $0x54] sm:$0xf0]  ;;  %v7758_v22 = vld [vmem:[#allocation2 + $0x68] sm:$0xf]  ;;  %v8034_v25 = vld [vmem:[#allocation2 + $0x70] sm:$0xf0] }
  0x18   :  { %v7743_v21 = vor.u32 %v8029_v16, %v7740_v20  ;;  %v7726_v26 = vld [vmem:[#allocation2 + $0x30] sm:$0xf]  ;;  %v7759_v27 = vor.u32 %v8034_v25, %v7758_v22  ;;  %v8027_v28 = vld [vmem:[#allocation2 + $0x38] sm:$0xf0]  ;;  %v8026_v31 = vld [vmem:[#allocation2 + $0x34] sm:$0xf] }
  0x19   :  { %638 = vmatpush.bf16.msrb.mxu3 %v7763_v59  ;;  %727 = vmatpush.bf16.msrb.mxu0 %v7767_v62  ;;  %v7728_v32 = vld [vmem:[#allocation2 + $0x3c] sm:$0xf0]  ;;  %v7727_v33 = vor.u32 %v8027_v28, %v7726_v26  ;;  %v7746_v37 = vld [vmem:[#allocation2 + $0x50] sm:$0xf]  ;;  %v8031_v38 = vld [vmem:[#allocation2 + $0x58] sm:$0xf0] }
  0x1a   :  { %v7731_v34 = vor.u32 %v8026_v31, %v7728_v32  ;;  %v7714_v39 = vld [vmem:[#allocation2 + $0x18] sm:$0xf]  ;;  %v7747_v40 = vor.u32 %v8031_v38, %v7746_v37  ;;  %v8024_v41 = vld [vmem:[#allocation2 + $0x20] sm:$0xf0]  ;;  %v8023_v42 = vld [vmem:[#allocation2 + $0x1c] sm:$0xf] }
  0x1b   :  { %816 = vmatpush.bf16.msrb.mxu1 %v7771_v7  ;;  %v7716_v43 = vld [vmem:[#allocation2 + $0x24] sm:$0xf0]  ;;  %v7734_v44 = vld [vmem:[#allocation2 + $0x38] sm:$0xf]  ;;  %v8028_v45 = vld [vmem:[#allocation2 + $0x40] sm:$0xf0]  ;;  %v7715_v46 = vor.u32 %v8024_v41, %v7714_v39 }
  0x1c   :  { %v7719_v47 = vor.u32 %v8023_v42, %v7716_v43  ;;  %v88_v48 = vld [vmem:[%s14431_s1 + $0x60] sm:$0xff]  ;;  %v7735_v49 = vor.u32 %v8028_v45, %v7734_v44  ;;  %v173_v50 = vld [vmem:[%s14433_s3 + $0x8] sm:$0xf]  ;;  %v8021_v57 = vld [vmem:[#allocation2 + $0x8] sm:$0xf0] }
  0x1d   :  { %639 = vmatpush.bf16.msrb.mxu3 %v7751_v8  ;;  %728 = vmatpush.bf16.msrb.mxu0 %v7755_v9  ;;  %v89_v51 = vld [vmem:[%s14431_s1 + $0x68] sm:$0xff]  ;;  %v104_v52 = vld [vmem:[%s14431_s1 + $0xe0] sm:$0xff]  ;;  %v178_v54 = vunpack.c.l.b16 %v173_v50  ;;  %v7704_v62 = vld [vmem:[#allocation2 + $0xc] sm:$0xf0] }
  0x1e   :  { %v105_v53 = vld [vmem:[%s14431_s1 + $0xe8] sm:$0xff]  ;;  %v7702_v56 = vld [vmem:[#allocation2] sm:$0xf]  ;;  %v8020_v58 = vld [vmem:[#allocation2 + $0x4] sm:$0xf]  ;;  %v9142_v59 = vpack.c.bf16 %v89_v51, %v88_v48 }
  0x1f   :  { %7653 = vmatmul.msk.bf16.gmra.mxu0 %vm182_vm1, %v9019_v17  ;;  %7661 = vmatmul.msk.bf16.gmra.mxu2 %vm182_vm1, %v9021_v18  ;;  %v181_v55 = vpack.c.b16 %v178_v54, %v178_v54  ;;  %v9144_v60 = vpack.c.bf16 %v105_v53, %v104_v52  ;;  %v7703_v61 = vor.u32 %v8021_v57, %v7702_v56  ;;  %v7722_v1 = vld [vmem:[#allocation2 + $0x20] sm:$0xf]  ;;  %v8025_v2 = vld [vmem:[#allocation2 + $0x28] sm:$0xf0]  ;;  %v7710_v4 = vld [vmem:[#allocation2 + $0x8] sm:$0xf] }
  0x20   :  { %7677 = vmatmul.msk.bf16.gmra.mxu3 %vm182_vm1, %v9021_v18  ;;  %7669 = vmatmul.msk.bf16.gmra.mxu1 %vm182_vm1, %v9019_v17  ;;  %v7707_v0 = vor.u32 %v8020_v58, %v7704_v62  ;;  %v7723_v3 = vor.u32 %v8025_v2, %v7722_v1  ;;  %v8022_v5 = vld [vmem:[#allocation2 + $0x10] sm:$0xf0]  ;;  %v91_v8 = vld [vmem:[%s14431_s1 + $0x78] sm:$0xff]  ;;  %v45_v20 = vld [vmem:[%s14430_s0 + $0x8] sm:$0xff] }
  0x21   :  { %640 = vmatpush.bf16.msrb.mxu3 %v7739_v19  ;;  %729 = vmatpush.bf16.msrb.mxu0 %v7743_v21  ;;  %v239_v63 = vsel %vm231_vm0, %v181_v55, 0  ;;  %v7711_v6 = vor.u32 %v8022_v5, %v7710_v4  ;;  %v90_v7 = vld [vmem:[%s14431_s1 + $0x70] sm:$0xff]  ;;  %v107_v14 = vld [vmem:[%s14431_s1 + $0xf8] sm:$0xff]  ;;  %v44_v19 = vld [vmem:[%s14430_s0] sm:$0xff] }
  0x22   :  { %817 = vmatpush.bf16.msrb.mxu1 %v7759_v27  ;;  %426 = vmatpush.bf16.msrb.mxu2 %v239_v63  ;;  %v106_v9 = vld [vmem:[%s14431_s1 + $0xf0] sm:$0xff]  ;;  %v9167_v15 = vpack.c.bf16 %v91_v8, %v90_v7  ;;  %v108_v21 = vpack.c.bf16 %v45_v20, %v44_v19  ;;  %v48_v44 = vld [vmem:[%s14430_s0 + $0x20] sm:$0xff]  ;;  %v49_v45 = vld [vmem:[%s14430_s0 + $0x28] sm:$0xff] }
  0x23   :  { %v9169_v16 = vpack.c.bf16 %v107_v14, %v106_v9  ;;  %v46_v32 = vld [vmem:[%s14430_s0 + $0x10] sm:$0xff]  ;;  %v51_v55 = vld [vmem:[%s14430_s0 + $0x38] sm:$0xff]  ;;  %v52_v2 = vld [vmem:[%s14430_s0 + $0x40] sm:$0xff] }
  0x24   :  { %v50_v54 = vld [vmem:[%s14430_s0 + $0x30] sm:$0xff] }
  0x25   :  { %641 = vmatpush.bf16.msrb.mxu3 %v7727_v33  ;;  %730 = vmatpush.bf16.msrb.mxu0 %v7731_v34  ;;  %v47_v33 = vld [vmem:[%s14430_s0 + $0x18] sm:$0xff]  ;;  %v111_v57 = vpack.c.bf16 %v51_v55, %v50_v54  ;;  %v54_v20 = vld [vmem:[%s14430_s0 + $0x50] sm:$0xff] }
  0x26   :  { %818 = vmatpush.bf16.msrb.mxu1 %v7747_v40  ;;  %v109_v37 = vpack.c.bf16 %v47_v33, %v46_v32 }
  0x29   :  { %642 = vmatpush.bf16.msrb.mxu3 %v7715_v46  ;;  %731 = vmatpush.bf16.msrb.mxu0 %v7719_v47  ;;  %v110_v47 = vpack.c.bf16 %v49_v45, %v48_v44 }
  0x2a   :  { %819 = vmatpush.bf16.msrb.mxu1 %v7735_v49 }
  0x2d   :  { %643 = vmatpush.bf16.msrb.mxu3 %v7703_v61  ;;  %732 = vmatpush.bf16.msrb.mxu0 %v7707_v0 }
  0x2e   :  { %820 = vmatpush.bf16.msrb.mxu1 %v7723_v3  ;;  %v53_v3 = vld [vmem:[%s14430_s0 + $0x48] sm:$0xff] }
  0x2f   :  { %7654 = vmatmul.msk.bf16.gmra.mxu0 %vm182_vm1, %v9043_v23  ;;  %7662 = vmatmul.msk.bf16.gmra.mxu2 %vm182_vm1, %v9045_v24  ;;  %v112_v5 = vpack.c.bf16 %v53_v3, %v52_v2  ;;  %v57_v2 = vld [vmem:[%s14430_s0 + $0x68] sm:$0xff] }
  0x30   :  { %7678 = vmatmul.msk.bf16.gmra.mxu3 %vm182_vm1, %v9045_v24  ;;  %7670 = vmatmul.msk.bf16.gmra.mxu1 %vm182_vm1, %v9043_v23 }
  0x32   :  { %821 = vmatpush.bf16.msrb.mxu1 %v7711_v6 }
  0x3f   :  { %7655 = vmatmul.msk.bf16.gmra.mxu0 %vm182_vm1, %v9067_v29  ;;  %7663 = vmatmul.msk.bf16.gmra.mxu2 %vm182_vm1, %v9069_v30 }
  0x40   :  { %7679 = vmatmul.msk.bf16.gmra.mxu3 %vm182_vm1, %v9069_v30  ;;  %7671 = vmatmul.msk.bf16.gmra.mxu1 %vm182_vm1, %v9067_v29 }
  0x4f   :  { %7656 = vmatmul.msk.bf16.gmra.mxu0 %vm182_vm1, %v9091_v35  ;;  %7664 = vmatmul.msk.bf16.gmra.mxu2 %vm182_vm1, %v9093_v36 }
  0x50   :  { %7680 = vmatmul.msk.bf16.gmra.mxu3 %vm182_vm1, %v9093_v36  ;;  %7672 = vmatmul.msk.bf16.gmra.mxu1 %vm182_vm1, %v9091_v35 }
  0x5f   :  { %7657 = vmatmul.msk.bf16.gmra.mxu0 %vm182_vm1, %v9115_v10  ;;  %7665 = vmatmul.msk.bf16.gmra.mxu2 %vm182_vm1, %v9117_v13 }
  0x60   :  { %7681 = vmatmul.msk.bf16.gmra.mxu3 %vm182_vm1, %v9117_v13  ;;  %7673 = vmatmul.msk.bf16.gmra.mxu1 %vm182_vm1, %v9115_v10 }
  0x6f   :  { %7658 = vmatmul.msk.bf16.gmra.mxu0 %vm182_vm1, %v9142_v59  ;;  %7666 = vmatmul.msk.bf16.gmra.mxu2 %vm182_vm1, %v9144_v60 }
  0x70   :  { %7682 = vmatmul.msk.bf16.gmra.mxu3 %vm182_vm1, %v9144_v60  ;;  %7674 = vmatmul.msk.bf16.gmra.mxu1 %vm182_vm1, %v9142_v59 }
  0x7f   :  { %7659 = vmatmul.msk.bf16.gmra.mxu0 %vm182_vm1, %v9167_v15  ;;  %7667 = vmatmul.msk.bf16.gmra.mxu2 %vm182_vm1, %v9169_v16 }
  0x80   :  { %7683 = vmatmul.msk.bf16.gmra.mxu3 %vm182_vm1, %v9169_v16  ;;  %7675 = vmatmul.msk.bf16.gmra.mxu1 %vm182_vm1, %v9167_v15 }
  0x8c   :  { %v9185_v22 = vpop.f32.mrf.mxu0 }
  0x8d   :  { %v9187_v25 = vpop.f32.mrf.mxu1 }
  0x8f   :  { %7684 = vmatmul.msk.bf16.vlgmr.msrb.gmra.mxu2 %vm182_vm1, %v8995_v11  ;;  %733 = vmatmul.bf16.vlgmr.msrb.gmra.mxu0 %v108_v21 }
  0x90   :  { %644 = vmatmul.bf16.vlgmr.msrb.gmra.mxu3 %v108_v21  ;;  %822 = vmatmul.bf16.vlgmr.msrb.gmra.mxu1 %v108_v21  ;;  %v55_v21 = vld [vmem:[%s14430_s0 + $0x58] sm:$0xff] }
  0x91   :  { %v113_v33 = vpack.c.bf16 %v55_v21, %v54_v20 }
  0x92   :  { %v9191_v26 = vpop.f32.mrf.mxu2 }
  0x93   :  { %v9193_v27 = vpop.f32.mrf.mxu3 }
  0x94   :  { %v9195_v28 = vpop.f32.mrf.mxu0 }
  0x95   :  { %v9197_v31 = vpop.f32.mrf.mxu1 }
  0x9a   :  { %v9205_v11 = vpop.f32.mrf.mxu2 }
  0x9b   :  { %14800 = vst [vmem:[#allocation8_spill] sm:$0xff] %v9205_v11  ;;  %v9207_v34 = vpop.f32.mrf.mxu3 }
  0x9c   :  { %14801 = vst [vmem:[#allocation9_spill] sm:$0xff] %v9207_v34  ;;  %v9209_v38 = vpop.f32.mrf.mxu0 }
  0x9d   :  { %v9211_v39 = vpop.f32.mrf.mxu1 }
  0x9f   :  { %7685 = vmatmul.msk.bf16.gmra.mxu2 %vm182_vm1, %v9019_v17  ;;  %738 = vmatmul.bf16.gmra.mxu0 %v109_v37 }
  0xa0   :  { %649 = vmatmul.bf16.gmra.mxu3 %v109_v37  ;;  %827 = vmatmul.bf16.gmra.mxu1 %v109_v37 }
  0xa2   :  { %v9215_v40 = vpop.f32.mrf.mxu2 }
  0xa3   :  { %14802 = vst [vmem:[#allocation10_spill] sm:$0xff] %v9215_v40  ;;  %v9217_v41 = vpop.f32.mrf.mxu3 }
  0xa4   :  { %14803 = vst [vmem:[#allocation11_spill] sm:$0xff] %v9217_v41  ;;  %v9219_v42 = vpop.f32.mrf.mxu0 }
  0xa5   :  { %v9221_v43 = vpop.f32.mrf.mxu1 }
  0xaa   :  { %v9229_v17 = vpop.f32.mrf.mxu2 }
  0xab   :  { %14804 = vst [vmem:[#allocation12_spill] sm:$0xff] %v9229_v17  ;;  %v9231_v46 = vpop.f32.mrf.mxu3 }
  0xac   :  { %14805 = vst [vmem:[#allocation13_spill] sm:$0xff] %v9231_v46  ;;  %v9233_v48 = vpop.f32.mrf.mxu0 }
  0xad   :  { %v9235_v49 = vpop.f32.mrf.mxu1 }
  0xaf   :  { %7686 = vmatmul.msk.bf16.gmra.mxu2 %vm182_vm1, %v9043_v23  ;;  %743 = vmatmul.bf16.gmra.mxu0 %v110_v47 }
  0xb0   :  { %654 = vmatmul.bf16.gmra.mxu3 %v110_v47  ;;  %832 = vmatmul.bf16.gmra.mxu1 %v110_v47 }
  0xb2   :  { %v9239_v50 = vpop.f32.mrf.mxu2 }
  0xb3   :  { %14806 = vst [vmem:[#allocation14_spill] sm:$0xff] %v9239_v50  ;;  %v9241_v51 = vpop.f32.mrf.mxu3 }
  0xb4   :  { %14807 = vst [vmem:[#allocation15_spill] sm:$0xff] %v9241_v51  ;;  %v9243_v52 = vpop.f32.mrf.mxu0 }
  0xb5   :  { %v9245_v53 = vpop.f32.mrf.mxu1 }
  0xba   :  { %v9253_v23 = vpop.f32.mrf.mxu2 }
  0xbb   :  { %14808 = vst [vmem:[#allocation16_spill] sm:$0xff] %v9253_v23  ;;  %v9255_v56 = vpop.f32.mrf.mxu3 }
  0xbc   :  { %14809 = vst [vmem:[#allocation17_spill] sm:$0xff] %v9255_v56  ;;  %v9257_v58 = vpop.f32.mrf.mxu0  ;;  %v62_v56 = vld [vmem:[%s14430_s0 + $0x90] sm:$0xff] }
  0xbd   :  { %v9259_v61 = vpop.f32.mrf.mxu1 }
  0xbf   :  { %7687 = vmatmul.msk.bf16.gmra.mxu2 %vm182_vm1, %v9067_v29  ;;  %748 = vmatmul.bf16.gmra.mxu0 %v111_v57 }
  0xc0   :  { %659 = vmatmul.bf16.gmra.mxu3 %v111_v57  ;;  %837 = vmatmul.bf16.gmra.mxu1 %v111_v57  ;;  %v56_v57 = vld [vmem:[%s14430_s0 + $0x60] sm:$0xff] }
  0xc2   :  { %v9263_v62 = vpop.f32.mrf.mxu2 }
  0xc3   :  { %14810 = vst [vmem:[#allocation18_spill] sm:$0xff] %v9263_v62  ;;  %v9265_v63 = vpop.f32.mrf.mxu3 }
  0xc4   :  { %14811 = vst [vmem:[#allocation19_spill] sm:$0xff] %v9265_v63  ;;  %v9267_v0 = vpop.f32.mrf.mxu0 }
  0xc5   :  { %v9269_v1 = vpop.f32.mrf.mxu1 }
  0xca   :  { %v9277_v29 = vpop.f32.mrf.mxu2 }
  0xcb   :  { %14812 = vst [vmem:[#allocation20_spill] sm:$0xff] %v9277_v29  ;;  %v9279_v4 = vpop.f32.mrf.mxu3  ;;  %v903_v29 = vld [vmem:[%s14434_s4] sm:$0x7]  ;;  %s8929_s4 = smov 64  }
  0xcc   :  { %14813 = vst [vmem:[#allocation21_spill] sm:$0xff] %v9279_v4  ;;  %v9281_v6 = vpop.f32.mrf.mxu0  ;;  %v9388_v23 = vperm.slane %v903_v29, 0 }
  0xcd   :  { %v9283_v7 = vpop.f32.mrf.mxu1 }
  0xcf   :  { %7688 = vmatmul.msk.bf16.gmra.mxu2 %vm182_vm1, %v9091_v35  ;;  %753 = vmatmul.bf16.gmra.mxu0 %v112_v5 }
  0xd0   :  { %664 = vmatmul.bf16.gmra.mxu3 %v112_v5  ;;  %842 = vmatmul.bf16.gmra.mxu1 %v112_v5  ;;  %v114_v5 = vpack.c.bf16 %v57_v2, %v56_v57  ;;  %v58_v57 = vld [vmem:[%s14430_s0 + $0x70] sm:$0xff]  ;;  %v59_v2 = vld [vmem:[%s14430_s0 + $0x78] sm:$0xff] }
  0xd2   :  { %v9287_v8 = vpop.f32.mrf.mxu2 }
  0xd3   :  { %14814 = vst [vmem:[#allocation22_spill] sm:$0xff] %v9287_v8  ;;  %v9289_v9 = vpop.f32.mrf.mxu3 }
  0xd4   :  { %14815 = vst [vmem:[#allocation23_spill] sm:$0xff] %v9289_v9  ;;  %v9291_v14 = vpop.f32.mrf.mxu0 }
  0xd5   :  { %v9293_v19 = vpop.f32.mrf.mxu1 }
  0xda   :  { %v9301_v35 = vpop.f32.mrf.mxu2 }
  0xdb   :  { %14816 = vst [vmem:[#allocation24_spill] sm:$0xff] %v9301_v35  ;;  %v9303_v32 = vpop.f32.mrf.mxu3 }
  0xdc   :  { %14817 = vst [vmem:[#allocation25_spill] sm:$0xff] %v9303_v32  ;;  %v9305_v37 = vpop.f32.mrf.mxu0 }
  0xdd   :  { %v9307_v44 = vpop.f32.mrf.mxu1 }
  0xdf   :  { %7689 = vmatmul.msk.bf16.gmra.mxu2 %vm182_vm1, %v9115_v10  ;;  %758 = vmatmul.bf16.gmra.mxu0 %v113_v33 }
  0xe0   :  { %669 = vmatmul.bf16.gmra.mxu3 %v113_v33  ;;  %847 = vmatmul.bf16.gmra.mxu1 %v113_v33 }
  0xe2   :  { %v9311_v45 = vpop.f32.mrf.mxu2 }
  0xe3   :  { %14818 = vst [vmem:[#allocation26_spill] sm:$0xff] %v9311_v45  ;;  %v9313_v47 = vpop.f32.mrf.mxu3 }
  0xe4   :  { %14819 = vst [vmem:[#allocation27_spill] sm:$0xff] %v9313_v47  ;;  %v9315_v54 = vpop.f32.mrf.mxu0 }
  0xe5   :  { %v9317_v55 = vpop.f32.mrf.mxu1 }
  0xea   :  { %v9325_v10 = vpop.f32.mrf.mxu2 }
  0xeb   :  { %14820 = vst [vmem:[#allocation28_spill] sm:$0xff] %v9325_v10  ;;  %v9327_v3 = vpop.f32.mrf.mxu3 }
  0xec   :  { %14821 = vst [vmem:[#allocation29_spill] sm:$0xff] %v9327_v3  ;;  %v9329_v20 = vpop.f32.mrf.mxu0 }
  0xed   :  { %v9331_v21 = vpop.f32.mrf.mxu1 }
  0xef   :  { %7690 = vmatmul.msk.bf16.gmra.mxu2 %vm182_vm1, %v9142_v59  ;;  %763 = vmatmul.bf16.gmra.mxu0 %v114_v5 }
  0xf0   :  { %674 = vmatmul.bf16.gmra.mxu3 %v114_v5  ;;  %852 = vmatmul.bf16.gmra.mxu1 %v114_v5  ;;  %v115_v5 = vpack.c.bf16 %v59_v2, %v58_v57  ;;  %v60_v57 = vld [vmem:[%s14430_s0 + $0x80] sm:$0xff]  ;;  %v61_v2 = vld [vmem:[%s14430_s0 + $0x88] sm:$0xff] }
  0xf2   :  { %v9335_v33 = vpop.f32.mrf.mxu2 }
  0xf3   :  { %14822 = vst [vmem:[#allocation30_spill] sm:$0xff] %v9335_v33  ;;  %v9337_v47 = vpop.f32.mrf.mxu3 }
  0xf4   :  { %14823 = vst [vmem:[#allocation31_spill] sm:$0xff] %v9337_v47  ;;  %v9339_v45 = vpop.f32.mrf.mxu0 }
  0xf5   :  { %v9341_v10 = vpop.f32.mrf.mxu1 }
  0xfa   :  { %v9349_v59 = vpop.f32.mrf.mxu2 }
  0xfb   :  { %14824 = vst [vmem:[#allocation32_spill] sm:$0xff] %v9349_v59  ;;  %v9351_v3 = vpop.f32.mrf.mxu3 }
  0xfc   :  { %14825 = vst [vmem:[#allocation33_spill] sm:$0xff] %v9351_v3  ;;  %v9353_v33 = vpop.f32.mrf.mxu0 }
  0xfd   :  { %v9355_v47 = vpop.f32.mrf.mxu1 }
  0xff   :  { %7691 = vmatmul.msk.bf16.gmra.mxu2 %vm182_vm1, %v9167_v15  ;;  %768 = vmatmul.bf16.gmra.mxu0 %v115_v5 }
 0x100   :  { %679 = vmatmul.bf16.gmra.mxu3 %v115_v5  ;;  %857 = vmatmul.bf16.gmra.mxu1 %v115_v5  ;;  %v116_v5 = vpack.c.bf16 %v61_v2, %v60_v57  ;;  %v9385_v2 = vperm.slane %v903_v29, 1 }
 0x102   :  { %v9359_v35 = vpop.f32.mrf.mxu2 }
 0x103   :  { %14826 = vst [vmem:[#allocation34_spill] sm:$0xff] %v9359_v35  ;;  %v9361_v32 = vpop.f32.mrf.mxu3 }
 0x104   :  { %14827 = vst [vmem:[#allocation35_spill] sm:$0xff] %v9361_v32  ;;  %v9363_v9 = vpop.f32.mrf.mxu0 }
 0x105   :  { %v9365_v59 = vpop.f32.mrf.mxu1 }
 0x10a   :  { %v9373_v15 = vpop.f32.mrf.mxu2 }
 0x10b   :  { %14828 = vst [vmem:[#allocation36_spill] sm:$0xff] %v9373_v15  ;;  %v9375_v3 = vpop.f32.mrf.mxu3  ;;  %v9382_v15 = vperm.slane %v903_v29, 2 }
 0x10c   :  { %14829 = vst [vmem:[#allocation37_spill] sm:$0xff] %v9375_v3  ;;  %v734_v35 = vpop.f32.mrf.mxu0 }
 0x10d   :  { %v823_v8 = vpop.f32.mrf.mxu1  ;;  %v735_v57 = vadd.f32 %v734_v35, %v9187_v25 }
 0x10f   :  { %7692 = vmatmul.msk.bf16.gmra.mxu2 %vm182_vm1, %v8997_v12  ;;  %773 = vmatmul.bf16.gmra.mxu0 %v116_v5 }
 0x110   :  { %684 = vmatmul.bf16.gmra.mxu3 %v116_v5  ;;  %862 = vmatmul.bf16.gmra.mxu1 %v116_v5 }
 0x112   :  { %v428_v32 = vpop.f32.mrf.mxu2 }
 0x113   :  { %v645_v4 = vpop.f32.mrf.mxu3  ;;  %v824_v63 = vadd.f32 %v823_v8, %v428_v32  ;;  %v63_v8 = vld [vmem:[%s14430_s0 + $0x98] sm:$0xff]  ;;  %v912_v32 = vadd.f32 %v9385_v2, %v735_v57 }
 0x114   :  { %v736_v62 = vpop.f32.mrf.mxu0  ;;  %v646_v12 = vadd.f32 %v645_v4, %v9185_v22  ;;  %v117_v50 = vpack.c.bf16 %v63_v8, %v62_v56 }
 0x115   :  { %v825_v3 = vpop.f32.mrf.mxu1  ;;  %v913_v5 = vadd.f32 %v9382_v15, %v824_v63  ;;  %v737_v35 = vadd.f32 %v736_v62, %v9197_v31 }
 0x116   :  { %v911_v25 = vadd.f32 %v9388_v23, %v646_v12 }
 0x117   :  { %v1008_v22 = vpack.c.bf16 %v913_v5, %v913_v5  ;;  %v915_v11 = vadd.f32 %v9385_v2, %v737_v35 }
 0x118   :  { %v1007_v40 = vpack.c.bf16 %v912_v32, %v911_v25 }
 0x119   :  { %v2734_v34 = vunpack.c.l.b16 %v1008_v22 }
 0x11a   :  { %v430_v51 = vpop.f32.mrf.mxu2  ;;  %v1739_v56 = vunpack.c.h.b16 %v1007_v40 }
 0x11b   :  { %v647_v29 = vpop.f32.mrf.mxu3  ;;  %v826_v4 = vadd.f32 %v825_v3, %v430_v51 }
 0x11c   :  { %v648_v63 = vadd.f32 %v647_v29, %v9195_v28  ;;  %v739_v17 = vpop.f32.mrf.mxu0  ;;  %v1691_v28 = vunpack.c.l.b16 %v1007_v40  ;;  %v64_v40 = vld [vmem:[%s14430_s0 + $0xa0] sm:$0xff] }
 0x11d   :  { %v916_v46 = vadd.f32 %v9382_v15, %v826_v4  ;;  %v828_v41 = vpop.f32.mrf.mxu1 }
 0x11e   :  { %v914_v57 = vadd.f32 %v9388_v23, %v648_v63 }
 0x11f   :  { %v1010_v12 = vpack.c.bf16 %v916_v46, %v916_v46  ;;  %7693 = vmatmul.msk.bf16.gmra.mxu2 %vm182_vm1, %v9021_v18  ;;  %778 = vmatmul.bf16.gmra.mxu0 %v117_v50 }
 0x120   :  { %v1009_v31 = vpack.c.bf16 %v915_v11, %v914_v57  ;;  %689 = vmatmul.bf16.gmra.mxu3 %v117_v50  ;;  %867 = vmatmul.bf16.gmra.mxu1 %v117_v50  ;;  %v740_v11 = vadd.f32 %v739_v17, %v9211_v39 }
 0x121   :  { %v2735_v51 = vunpack.c.l.b16 %v1010_v12 }
 0x122   :  { %v1692_v62 = vunpack.c.l.b16 %v1009_v31  ;;  %v1740_v3 = vunpack.c.h.b16 %v1009_v31  ;;  %v433_v5 = vpop.f32.mrf.mxu2  ;;  %v918_v39 = vadd.f32 %v9385_v2, %v740_v11 }
 0x123   :  { %v9406_v8 = vpack.c.b16 %v2735_v51, %v2734_v34  ;;  %v650_v32 = vpop.f32.mrf.mxu3  ;;  %v829_v25 = vadd.f32 %v828_v41, %v433_v5  ;;  %v65_v41 = vld [vmem:[%s14430_s0 + $0xa8] sm:$0xff] }
 0x124   :  { %v9408_v35 = vpack.c.b16 %v1692_v62, %v1691_v28  ;;  %v741_v46 = vpop.f32.mrf.mxu0  ;;  %v9410_v22 = vpack.c.b16 %v1740_v3, %v1739_v56  ;;  %v651_v50 = vadd.f32 %v650_v32, %v9209_v38  ;;  %v118_v12 = vpack.c.bf16 %v65_v41, %v64_v40 }
 0x125   :  { %14830 = vst [vmem:[#allocation38_spill] sm:$0xff] %v9406_v8  ;;  %v830_v18 = vpop.f32.mrf.mxu1  ;;  %v919_v34 = vadd.f32 %v9382_v15, %v829_v25  ;;  %v742_v17 = vadd.f32 %v741_v46, %v9221_v43 }
 0x126   :  { %14831 = vst [vmem:[#allocation39_spill] sm:$0xff] %v9408_v35  ;;  %3024 = vrot.lane.b32.xlu0 %v9410_v22, %s8927_s16  ;;  %2992 = vrot.lane.b32.xlu2 %v9408_v35, %s8927_s16  ;;  %v917_v38 = vadd.f32 %v9388_v23, %v651_v50 }
 0x127   :  { %14832 = vst [vmem:[#allocation40_spill] sm:$0xff] %v9410_v22  ;;  %v1012_v4 = vpack.c.bf16 %v919_v34, %v919_v34  ;;  %v921_v3 = vadd.f32 %v9385_v2, %v742_v17 }
 0x128   :  { %v1011_v62 = vpack.c.bf16 %v918_v39, %v917_v38 }
 0x129   :  { %v2736_v32 = vunpack.c.l.b16 %v1012_v4 }
 0x12a   :  { %v435_v29 = vpop.f32.mrf.mxu2 }
 0x12b   :  { %v652_v63 = vpop.f32.mrf.mxu3  ;;  %v831_v57 = vadd.f32 %v830_v18, %v435_v29 }
 0x12c   :  { %v653_v31 = vadd.f32 %v652_v63, %v9219_v42  ;;  %v744_v51 = vpop.f32.mrf.mxu0  ;;  %v1741_v42 = vunpack.c.h.b16 %v1011_v62  ;;  %v66_v63 = vld [vmem:[%s14430_s0 + $0xb0] sm:$0xff] }
 0x12d   :  { %v922_v28 = vadd.f32 %v9382_v15, %v831_v57  ;;  %v833_v56 = vpop.f32.mrf.mxu1  ;;  %v67_v57 = vld [vmem:[%s14430_s0 + $0xb8] sm:$0xff] }
 0x12e   :  { %v920_v5 = vadd.f32 %v9388_v23, %v653_v31 }
 0x12f   :  { %v1014_v25 = vpack.c.bf16 %v922_v28, %v922_v28  ;;  %7694 = vmatmul.msk.bf16.gmra.mxu2 %vm182_vm1, %v9045_v24  ;;  %783 = vmatmul.bf16.gmra.mxu0 %v118_v12  ;;  %v745_v24 = vadd.f32 %v744_v51, %v9235_v49 }
 0x130   :  { %v1013_v43 = vpack.c.bf16 %v921_v3, %v920_v5  ;;  %694 = vmatmul.bf16.gmra.mxu3 %v118_v12  ;;  %872 = vmatmul.bf16.gmra.mxu1 %v118_v12  ;;  %v1693_v12 = vunpack.c.l.b16 %v1011_v62  ;;  %v119_v5 = vpack.c.bf16 %v67_v57, %v66_v63 }
 0x131   :  { %v2737_v46 = vunpack.c.l.b16 %v1014_v25  ;;  %v924_v31 = vadd.f32 %v9385_v2, %v745_v24 }
 0x132   :  { %v1742_v18 = vunpack.c.h.b16 %v1013_v43  ;;  %v438_v11 = vpop.f32.mrf.mxu2  ;;  %v1694_v4 = vunpack.c.l.b16 %v1013_v43 }
 0x133   :  { %v9434_v50 = vpack.c.b16 %v2737_v46, %v2736_v32  ;;  %v655_v34 = vpop.f32.mrf.mxu3  ;;  %v834_v40 = vadd.f32 %v833_v56, %v438_v11 }
 0x134   :  { %v746_v41 = vpop.f32.mrf.mxu0  ;;  %v9436_v39 = vpack.c.b16 %v1742_v18, %v1741_v42  ;;  %v656_v17 = vadd.f32 %v655_v34, %v9233_v48  ;;  %v9454_v32 = vpack.c.b16 %v1694_v4, %v1693_v12 }
 0x135   :  { %14833 = vst [vmem:[#allocation41_spill] sm:$0xff] %v9434_v50  ;;  %v835_v38 = vpop.f32.mrf.mxu1  ;;  %3972 = vrot.lane.b32.xlu0 %v9434_v50, %s8927_s16  ;;  %v925_v29 = vadd.f32 %v9382_v15, %v834_v40  ;;  %v747_v48 = vadd.f32 %v746_v41, %v9245_v53 }
 0x136   :  { %14834 = vst [vmem:[#allocation42_spill] sm:$0xff] %v9436_v39  ;;  %3026 = vrot.lane.b32.xlu1 %v9436_v39, %s8927_s16  ;;  %v923_v49 = vadd.f32 %v9388_v23, %v656_v17 }
 0x137   :  { %v1016_v28 = vpack.c.bf16 %v925_v29, %v925_v29  ;;  %14835 = vst [vmem:[#allocation43_spill] sm:$0xff] %v9454_v32  ;;  %v927_v18 = vadd.f32 %v9385_v2, %v747_v48  ;;  %v69_v48 = vld [vmem:[%s14430_s0 + $0xc8] sm:$0xff] }
 0x138   :  { %v1015_v62 = vpack.c.bf16 %v924_v31, %v923_v49  ;;  %v68_v49 = vld [vmem:[%s14430_s0 + $0xc0] sm:$0xff] }
 0x139   :  { %v2738_v53 = vunpack.c.l.b16 %v1016_v28 }
 0x13a   :  { %v440_v51 = vpop.f32.mrf.mxu2  ;;  %v1743_v41 = vunpack.c.h.b16 %v1015_v62  ;;  %v1695_v28 = vunpack.c.l.b16 %v1015_v62 }
 0x13b   :  { %v657_v56 = vpop.f32.mrf.mxu3  ;;  %v836_v3 = vadd.f32 %v835_v38, %v440_v51 }
 0x13c   :  { %v658_v25 = vadd.f32 %v657_v56, %v9243_v52  ;;  %v749_v43 = vpop.f32.mrf.mxu0 }
 0x13d   :  { %v928_v46 = vadd.f32 %v9382_v15, %v836_v3  ;;  %v838_v42 = vpop.f32.mrf.mxu1  ;;  %v750_v57 = vadd.f32 %v749_v43, %v9259_v61  ;;  %v120_v43 = vpack.c.bf16 %v69_v48, %v68_v49 }
 0x13e   :  { %v926_v11 = vadd.f32 %v9388_v23, %v658_v25  ;;  %2994 = vrot.lane.b32.xlu1 %v9454_v32, %s8927_s16 }
 0x13f   :  { %v1018_v34 = vpack.c.bf16 %v928_v46, %v928_v46  ;;  %7695 = vmatmul.msk.bf16.gmra.mxu2 %vm182_vm1, %v9069_v30  ;;  %788 = vmatmul.bf16.gmra.mxu0 %v119_v5  ;;  %v930_v61 = vadd.f32 %v9385_v2, %v750_v57 }
 0x140   :  { %v1017_v40 = vpack.c.bf16 %v927_v18, %v926_v11  ;;  %699 = vmatmul.bf16.gmra.mxu3 %v119_v5  ;;  %877 = vmatmul.bf16.gmra.mxu1 %v119_v5 }
 0x141   :  { %v2739_v52 = vunpack.c.l.b16 %v1018_v34 }
 0x142   :  { %v1744_v38 = vunpack.c.h.b16 %v1017_v40  ;;  %v443_v24 = vpop.f32.mrf.mxu2  ;;  %v1696_v30 = vunpack.c.l.b16 %v1017_v40 }
 0x143   :  { %v9464_v17 = vpack.c.b16 %v2739_v52, %v2738_v53  ;;  %v660_v29 = vpop.f32.mrf.mxu3  ;;  %v839_v51 = vadd.f32 %v838_v42, %v443_v24 }
 0x144   :  { %v751_v4 = vpop.f32.mrf.mxu0  ;;  %v9466_v63 = vpack.c.b16 %v1744_v38, %v1743_v41  ;;  %v661_v12 = vadd.f32 %v660_v29, %v9257_v58  ;;  %v9483_v46 = vpack.c.b16 %v1696_v30, %v1695_v28  ;;  %v70_v28 = vld [vmem:[%s14430_s0 + $0xd0] sm:$0xff] }
 0x145   :  { %14836 = vst [vmem:[#allocation44_spill] sm:$0xff] %v9464_v17  ;;  %v840_v31 = vpop.f32.mrf.mxu1  ;;  %3974 = vrot.lane.b32.xlu0 %v9464_v17, %s8927_s16  ;;  %v752_v56 = vadd.f32 %v751_v4, %v9269_v1  ;;  %v931_v34 = vadd.f32 %v9382_v15, %v839_v51 }
 0x146   :  { %14837 = vst [vmem:[#allocation45_spill] sm:$0xff] %v9466_v63  ;;  %3028 = vrot.lane.b32.xlu1 %v9466_v63, %s8927_s16  ;;  %v929_v58 = vadd.f32 %v9388_v23, %v661_v12 }
 0x147   :  { %14838 = vst [vmem:[#allocation46_spill] sm:$0xff] %v9483_v46  ;;  %v933_v52 = vadd.f32 %v9385_v2, %v752_v56  ;;  %v1020_v41 = vpack.c.bf16 %v931_v34, %v931_v34  ;;  %v71_v56 = vld [vmem:[%s14430_s0 + $0xd8] sm:$0xff] }
 0x148   :  { %v1019_v53 = vpack.c.bf16 %v930_v61, %v929_v58 }
 0x149   :  { %v2740_v58 = vunpack.c.l.b16 %v1020_v41 }
 0x14a   :  { %v445_v3 = vpop.f32.mrf.mxu2  ;;  %v1745_v38 = vunpack.c.h.b16 %v1019_v53 }
 0x14b   :  { %v662_v5 = vpop.f32.mrf.mxu3  ;;  %v841_v25 = vadd.f32 %v840_v31, %v445_v3 }
 0x14c   :  { %v663_v18 = vadd.f32 %v662_v5, %v9267_v0  ;;  %v754_v11 = vpop.f32.mrf.mxu0  ;;  %v1697_v0 = vunpack.c.l.b16 %v1019_v53  ;;  %v121_v53 = vpack.c.bf16 %v71_v56, %v70_v28 }
 0x14d   :  { %v843_v40 = vpop.f32.mrf.mxu1  ;;  %v934_v62 = vadd.f32 %v9382_v15, %v841_v25  ;;  %v755_v48 = vadd.f32 %v754_v11, %v9283_v7 }
 0x14e   :  { %v932_v42 = vadd.f32 %v9388_v23, %v663_v18  ;;  %2996 = vrot.lane.b32.xlu1 %v9483_v46, %s8927_s16 }
 0x14f   :  { %7696 = vmatmul.msk.bf16.gmra.mxu2 %vm182_vm1, %v9093_v36  ;;  %793 = vmatmul.bf16.gmra.mxu0 %v120_v43  ;;  %v1022_v4 = vpack.c.bf16 %v934_v62, %v934_v62  ;;  %v936_v7 = vadd.f32 %v9385_v2, %v755_v48 }
 0x150   :  { %v1021_v1 = vpack.c.bf16 %v933_v52, %v932_v42  ;;  %704 = vmatmul.bf16.gmra.mxu3 %v120_v43  ;;  %882 = vmatmul.bf16.gmra.mxu1 %v120_v43 }
 0x151   :  { %v2741_v51 = vunpack.c.l.b16 %v1022_v4 }
 0x152   :  { %v1698_v24 = vunpack.c.l.b16 %v1021_v1  ;;  %v1746_v29 = vunpack.c.h.b16 %v1021_v1  ;;  %v448_v57 = vpop.f32.mrf.mxu2 }
 0x153   :  { %v665_v12 = vpop.f32.mrf.mxu3  ;;  %v844_v3 = vadd.f32 %v843_v40, %v448_v57  ;;  %v9512_v5 = vpack.c.b16 %v2741_v51, %v2740_v58 }
 0x154   :  { %v9494_v31 = vpack.c.b16 %v1698_v24, %v1697_v0  ;;  %v756_v30 = vpop.f32.mrf.mxu0  ;;  %v9496_v49 = vpack.c.b16 %v1746_v29, %v1745_v38  ;;  %v666_v36 = vadd.f32 %v665_v12, %v9281_v6 }
 0x155   :  { %v845_v61 = vpop.f32.mrf.mxu1  ;;  %14841 = vst [vmem:[#allocation49_spill] sm:$0xff] %v9512_v5  ;;  %v757_v25 = vadd.f32 %v756_v30, %v9293_v19  ;;  %v937_v62 = vadd.f32 %v9382_v15, %v844_v3  ;;  %v72_v3 = vld [vmem:[%s14430_s0 + $0xe0] sm:$0xff] }
 0x156   :  { %14839 = vst [vmem:[#allocation47_spill] sm:$0xff] %v9494_v31  ;;  %3030 = vrot.lane.b32.xlu1 %v9496_v49, %s8927_s16  ;;  %2998 = vrot.lane.b32.xlu2 %v9494_v31, %s8927_s16  ;;  %v935_v6 = vadd.f32 %v9388_v23, %v666_v36 }
 0x157   :  { %14840 = vst [vmem:[#allocation48_spill] sm:$0xff] %v9496_v49  ;;  %v939_v0 = vadd.f32 %v9385_v2, %v757_v25  ;;  %v1024_v38 = vpack.c.bf16 %v937_v62, %v937_v62  ;;  %v73_v25 = vld [vmem:[%s14430_s0 + $0xe8] sm:$0xff] }
 0x158   :  { %v1023_v42 = vpack.c.bf16 %v936_v7, %v935_v6 }
 0x15a   :  { %v450_v43 = vpop.f32.mrf.mxu2  ;;  %v1747_v24 = vunpack.c.h.b16 %v1023_v42 }
 0x15b   :  { %v667_v18 = vpop.f32.mrf.mxu3  ;;  %v846_v11 = vadd.f32 %v845_v61, %v450_v43 }
 0x15c   :  { %v668_v34 = vadd.f32 %v667_v18, %v9291_v14  ;;  %v759_v52 = vpop.f32.mrf.mxu0  ;;  %v1699_v14 = vunpack.c.l.b16 %v1023_v42  ;;  %v122_v42 = vpack.c.bf16 %v73_v25, %v72_v3  ;;  %v74_v25 = vld [vmem:[%s14430_s0 + $0xf0] sm:$0xff] }
 0x15d   :  { %v848_v1 = vpop.f32.mrf.mxu1  ;;  %v940_v40 = vadd.f32 %v9382_v15, %v846_v11  ;;  %v760_v56 = vadd.f32 %v759_v52, %v9307_v44 }
 0x15e   :  { %v938_v41 = vadd.f32 %v9388_v23, %v668_v34  ;;  %3976 = vrot.lane.b32.xlu2 %v9512_v5, %s8927_s16 }
 0x15f   :  { %7697 = vmatmul.msk.bf16.gmra.mxu2 %vm182_vm1, %v9117_v13  ;;  %798 = vmatmul.bf16.gmra.mxu0 %v121_v53  ;;  %v1026_v57 = vpack.c.bf16 %v940_v40, %v940_v40  ;;  %v2742_v13 = vunpack.c.l.b16 %v1024_v38 }
 0x160   :  { %v1025_v19 = vpack.c.bf16 %v939_v0, %v938_v41  ;;  %709 = vmatmul.bf16.gmra.mxu3 %v121_v53  ;;  %887 = vmatmul.bf16.gmra.mxu1 %v121_v53 }
 0x161   :  { %v2743_v28 = vunpack.c.l.b16 %v1026_v57 }
 0x162   :  { %v1700_v29 = vunpack.c.l.b16 %v1025_v19  ;;  %v1748_v4 = vunpack.c.h.b16 %v1025_v19  ;;  %v453_v12 = vpop.f32.mrf.mxu2 }
 0x163   :  { %v670_v30 = vpop.f32.mrf.mxu3  ;;  %v849_v48 = vadd.f32 %v848_v1, %v453_v12  ;;  %v9541_v43 = vpack.c.b16 %v2743_v28, %v2742_v13 }
 0x164   :  { %v9524_v36 = vpack.c.b16 %v1700_v29, %v1699_v14  ;;  %v761_v61 = vpop.f32.mrf.mxu0  ;;  %v9526_v58 = vpack.c.b16 %v1748_v4, %v1747_v24  ;;  %v671_v7 = vadd.f32 %v670_v30, %v9305_v37  ;;  %v942_v37 = vadd.f32 %v9385_v2, %v760_v56 }
 0x165   :  { %v850_v51 = vpop.f32.mrf.mxu1  ;;  %v943_v6 = vadd.f32 %v9382_v15, %v849_v48  ;;  %14844 = vst [vmem:[#allocation52_spill] sm:$0xff] %v9541_v43  ;;  %v762_v18 = vadd.f32 %v761_v61, %v9317_v55 }
 0x166   :  { %14842 = vst [vmem:[#allocation50_spill] sm:$0xff] %v9524_v36  ;;  %3000 = vrot.lane.b32.xlu0 %v9524_v36, %s8927_s16  ;;  %3032 = vrot.lane.b32.xlu2 %v9526_v58, %s8927_s16  ;;  %v941_v44 = vadd.f32 %v9388_v23, %v671_v7 }
 0x167   :  { %14843 = vst [vmem:[#allocation51_spill] sm:$0xff] %v9526_v58  ;;  %v1028_v53 = vpack.c.bf16 %v943_v6, %v943_v6  ;;  %v945_v19 = vadd.f32 %v9385_v2, %v762_v18 }
 0x168   :  { %v1027_v40 = vpack.c.bf16 %v942_v37, %v941_v44 }
 0x169   :  { %v2744_v55 = vunpack.c.l.b16 %v1028_v53 }
 0x16a   :  { %v455_v11 = vpop.f32.mrf.mxu2  ;;  %v1701_v29 = vunpack.c.l.b16 %v1027_v40  ;;  %v1749_v4 = vunpack.c.h.b16 %v1027_v40 }
 0x16b   :  { %v672_v34 = vpop.f32.mrf.mxu3  ;;  %v851_v52 = vadd.f32 %v850_v51, %v455_v11 }
 0x16c   :  { %v673_v62 = vadd.f32 %v672_v34, %v9315_v54  ;;  %v764_v1 = vpop.f32.mrf.mxu0 }
 0x16d   :  { %v946_v0 = vadd.f32 %v9382_v15, %v851_v52  ;;  %v853_v41 = vpop.f32.mrf.mxu1  ;;  %v765_v7 = vadd.f32 %v764_v1, %v9331_v21  ;;  %v75_v21 = vld [vmem:[%s14430_s0 + $0xf8] sm:$0xff] }
 0x16e   :  { %v944_v14 = vadd.f32 %v9388_v23, %v673_v62  ;;  %3978 = vrot.lane.b32.xlu0 %v9541_v43, %s8927_s16  ;;  %v123_v52 = vpack.c.bf16 %v75_v21, %v74_v25 }
 0x16f   :  { %v1030_v38 = vpack.c.bf16 %v946_v0, %v946_v0  ;;  %7698 = vmatmul.msk.bf16.gmra.mxu2 %vm182_vm1, %v9144_v60  ;;  %803 = vmatmul.bf16.gmra.mxu0 %v122_v42 }
 0x170   :  { %v1029_v24 = vpack.c.bf16 %v945_v19, %v944_v14  ;;  %714 = vmatmul.bf16.gmra.mxu3 %v122_v42  ;;  %892 = vmatmul.bf16.gmra.mxu1 %v122_v42 }
 0x171   :  { %v2745_v54 = vunpack.c.l.b16 %v1030_v38 }
 0x172   :  { %v1702_v57 = vunpack.c.l.b16 %v1029_v24  ;;  %v1750_v12 = vunpack.c.h.b16 %v1029_v24  ;;  %v458_v30 = vpop.f32.mrf.mxu2 }
 0x173   :  { %v9554_v48 = vpack.c.b16 %v2745_v54, %v2744_v55  ;;  %v675_v61 = vpop.f32.mrf.mxu3  ;;  %v854_v51 = vadd.f32 %v853_v41, %v458_v30 }
 0x174   :  { %v9556_v13 = vpack.c.b16 %v1702_v57, %v1701_v29  ;;  %v766_v28 = vpop.f32.mrf.mxu0  ;;  %v9558_v56 = vpack.c.b16 %v1750_v12, %v1749_v4  ;;  %v676_v6 = vadd.f32 %v675_v61, %v9329_v20  ;;  %v948_v20 = vadd.f32 %v9385_v2, %v765_v7 }
 0x175   :  { %14845 = vst [vmem:[#allocation53_spill] sm:$0xff] %v9554_v48  ;;  %v855_v60 = vpop.f32.mrf.mxu1  ;;  %v949_v3 = vadd.f32 %v9382_v15, %v854_v51  ;;  %v767_v44 = vadd.f32 %v766_v28, %v9341_v10 }
 0x176   :  { %14846 = vst [vmem:[#allocation54_spill] sm:$0xff] %v9556_v13  ;;  %3002 = vrot.lane.b32.xlu1 %v9556_v13, %s8927_s16  ;;  %3034 = vrot.lane.b32.xlu2 %v9558_v56, %s8927_s16  ;;  %v947_v37 = vadd.f32 %v9388_v23, %v676_v6 }
 0x177   :  { %14847 = vst [vmem:[#allocation55_spill] sm:$0xff] %v9558_v56  ;;  %3980 = vrot.lane.b32.xlu0 %v9554_v48, %s8927_s16  ;;  %v1032_v11 = vpack.c.bf16 %v949_v3, %v949_v3  ;;  %v951_v40 = vadd.f32 %v9385_v2, %v767_v44 }
 0x178   :  { %v1031_v41 = vpack.c.bf16 %v948_v20, %v947_v37 }
 0x179   :  { %v2746_v14 = vunpack.c.l.b16 %v1032_v11 }
 0x17a   :  { %v460_v18 = vpop.f32.mrf.mxu2  ;;  %v1703_v7 = vunpack.c.l.b16 %v1031_v41 }
 0x17b   :  { %v677_v53 = vpop.f32.mrf.mxu3  ;;  %v856_v34 = vadd.f32 %v855_v60, %v460_v18 }
 0x17c   :  { %v678_v42 = vadd.f32 %v677_v53, %v9339_v45  ;;  %v769_v62 = vpop.f32.mrf.mxu0  ;;  %v1751_v45 = vunpack.c.h.b16 %v1031_v41 }
 0x17d   :  { %v952_v1 = vadd.f32 %v9382_v15, %v856_v34  ;;  %v858_v0 = vpop.f32.mrf.mxu1 }
 0x17e   :  { %v950_v19 = vadd.f32 %v9388_v23, %v678_v42 }
 0x17f   :  { %v1034_v55 = vpack.c.bf16 %v952_v1, %v952_v1  ;;  %808 = vmatmul.bf16.gmra.mxu0 %v123_v52  ;;  %7699 = vmatmul.msk.bf16.gmra.mxu2 %vm182_vm1, %v9169_v16  ;;  %v770_v16 = vadd.f32 %v769_v62, %v9355_v47 }
 0x180   :  { %v1033_v10 = vpack.c.bf16 %v951_v40, %v950_v19  ;;  %719 = vmatmul.bf16.gmra.mxu3 %v123_v52  ;;  %897 = vmatmul.bf16.gmra.mxu1 %v123_v52 }
 0x181   :  { %v2747_v38 = vunpack.c.l.b16 %v1034_v55  ;;  %v954_v6 = vadd.f32 %v9385_v2, %v770_v16 }
 0x182   :  { %v1752_v24 = vunpack.c.h.b16 %v1033_v10  ;;  %v463_v54 = vpop.f32.mrf.mxu2  ;;  %v1704_v60 = vunpack.c.l.b16 %v1033_v10 }
 0x183   :  { %v9584_v29 = vpack.c.b16 %v2747_v38, %v2746_v14  ;;  %v680_v4 = vpop.f32.mrf.mxu3  ;;  %v859_v57 = vadd.f32 %v858_v0, %v463_v54 }
 0x184   :  { %v771_v12 = vpop.f32.mrf.mxu0  ;;  %v9586_v30 = vpack.c.b16 %v1752_v24, %v1751_v45  ;;  %v681_v51 = vadd.f32 %v680_v4, %v9353_v33  ;;  %v9598_v47 = vpack.c.b16 %v1704_v60, %v1703_v7 }
 0x185   :  { %14848 = vst [vmem:[#allocation56_spill] sm:$0xff] %v9584_v29  ;;  %v860_v61 = vpop.f32.mrf.mxu1  ;;  %3982 = vrot.lane.b32.xlu0 %v9584_v29, %s8927_s16  ;;  %v955_v28 = vadd.f32 %v9382_v15, %v859_v57  ;;  %v772_v25 = vadd.f32 %v771_v12, %v9365_v59 }
 0x186   :  { %14849 = vst [vmem:[#allocation57_spill] sm:$0xff] %v9586_v30  ;;  %3036 = vrot.lane.b32.xlu2 %v9586_v30, %s8927_s16  ;;  %v953_v3 = vadd.f32 %v9388_v23, %v681_v51 }
 0x187   :  { %v1036_v20 = vpack.c.bf16 %v955_v28, %v955_v28  ;;  %14850 = vst [vmem:[#allocation58_spill] sm:$0xff] %v9598_v47  ;;  %v957_v52 = vadd.f32 %v9385_v2, %v772_v25 }
 0x188   :  { %v1035_v34 = vpack.c.bf16 %v954_v6, %v953_v3  ;;  %v14855_v6 = vld [vmem:[#allocation8_spill] sm:$0xff] }
 0x189   :  { %v2748_v59 = vunpack.c.l.b16 %v1036_v20 }
 0x18a   :  { %v465_v21 = vpop.f32.mrf.mxu2  ;;  %v1705_v41 = vunpack.c.l.b16 %v1035_v34  ;;  %v1753_v40 = vunpack.c.h.b16 %v1035_v34 }
 0x18b   :  { %v682_v37 = vpop.f32.mrf.mxu3  ;;  %v861_v44 = vadd.f32 %v860_v61, %v465_v21 }
 0x18c   :  { %v683_v33 = vadd.f32 %v682_v37, %v9363_v9  ;;  %v774_v18 = vpop.f32.mrf.mxu0 }
 0x18d   :  { %v958_v11 = vadd.f32 %v9382_v15, %v861_v44  ;;  %v863_v53 = vpop.f32.mrf.mxu1  ;;  %v775_v61 = vadd.f32 %v774_v18, %v9193_v27  ;;  %v1855_v44 = vsel %vm1787_vm2, %v9586_v30, 0 }
 0x18e   :  { %v956_v42 = vadd.f32 %v9388_v23, %v683_v33  ;;  %3004 = vrot.lane.b32.xlu2 %v9598_v47, %s8927_s16 }
 0x18f   :  { %v1038_v62 = vpack.c.bf16 %v958_v11, %v958_v11  ;;  %v960_v7 = vadd.f32 %v9385_v2, %v775_v61 }
 0x190   :  { %v1037_v1 = vpack.c.bf16 %v957_v52, %v956_v42 }
 0x191   :  { %v2749_v0 = vunpack.c.l.b16 %v1038_v62 }
 0x192   :  { %v1706_v19 = vunpack.c.l.b16 %v1037_v1  ;;  %v1754_v9 = vunpack.c.h.b16 %v1037_v1  ;;  %v468_v14 = vpop.f32.mrf.mxu2  ;;  %v14857_v1 = vld [vmem:[#allocation10_spill] sm:$0xff] }
 0x193   :  { %v9606_v55 = vpack.c.b16 %v2749_v0, %v2748_v59  ;;  %v685_v10 = vpop.f32.mrf.mxu3  ;;  %v9608_v38 = vadd.f32 %v863_v53, %v468_v14 }
 0x194   :  { %v9610_v45 = vpack.c.b16 %v1706_v19, %v1705_v41  ;;  %v776_v24 = vpop.f32.mrf.mxu0  ;;  %v9612_v54 = vpack.c.b16 %v1754_v9, %v1753_v40  ;;  %v686_v57 = vadd.f32 %v685_v10, %v9191_v26  ;;  %v14854_v26 = vld [vmem:[#allocation9_spill] sm:$0xff]  ;;  %v1852_v41 = vsel %vm1787_vm2, %v9558_v56, 0  ;;  %v14858_v19 = vld [vmem:[#allocation11_spill] sm:$0xff] }
 0x195   :  { %14851 = vst [vmem:[#allocation59_spill] sm:$0xff] %v9606_v55  ;;  %v9614_v4 = vpop.f32.mrf.mxu1  ;;  %2798 = vmatpush.bf16.msra.mxu0 %v9606_v55  ;;  %v777_v51 = vadd.f32 %v776_v24, %v14854_v26  ;;  %v14859_v24 = vld [vmem:[#allocation13_spill] sm:$0xff] }
 0x196   :  { %14852 = vst [vmem:[#allocation60_spill] sm:$0xff] %v9610_v45  ;;  %3038 = vrot.lane.b32.xlu1 %v9612_v54, %s8927_s16  ;;  %3006 = vrot.lane.b32.xlu0 %v9610_v45, %s8927_s16  ;;  %v1858_v12 = vsel %vm1787_vm2, %v9612_v54, 0  ;;  %v959_v16 = vadd.f32 %v9388_v23, %v686_v57 }
 0x197   :  { %14853 = vst [vmem:[#allocation61_spill] sm:$0xff] %v9612_v54  ;;  %1884 = vmatpush.bf16.xpose.msra.mxu2 %v1858_v12  ;;  %3984 = vrot.lane.b32.xlu2 %v9606_v55, %s8927_s16  ;;  %v963_v27 = vadd.f32 %v9385_v2, %v777_v51  ;;  %v14861_v51 = vld [vmem:[#allocation12_spill] sm:$0xff] }
 0x198   :  { %v1039_v20 = vpack.c.bf16 %v960_v7, %v959_v16 }
 0x199   :  { %2799 = vmatpush.bf16.msra.mxu0 %v9584_v29 }
 0x19a   :  { %v9630_v28 = vpop.f32.mrf.mxu2  ;;  %v1755_v18 = vunpack.c.h.b16 %v1039_v20  ;;  %v1707_v14 = vunpack.c.l.b16 %v1039_v20  ;;  %v1849_v20 = vsel %vm1787_vm2, %v9526_v58, 0 }
 0x19b   :  { %v687_v60 = vpop.f32.mrf.mxu3 }
 0x19c   :  { %v688_v3 = vadd.f32 %v687_v60, %v14855_v6  ;;  %v779_v25 = vpop.f32.mrf.mxu0 }
 0x19d   :  { %v868_v21 = vpop.f32.mrf.mxu1  ;;  %2800 = vmatpush.bf16.msra.mxu0 %v9554_v48  ;;  %v780_v9 = vadd.f32 %v779_v25, %v14858_v19  ;;  %v14865_v19 = vld [vmem:[#allocation14_spill] sm:$0xff] }
 0x19e   :  { %v962_v37 = vadd.f32 %v9388_v23, %v688_v3 }
 0x19f   :  { %1885 = vmatpush.bf16.xpose.msra.mxu2 %v1855_v44  ;;  %v966_v26 = vadd.f32 %v9385_v2, %v780_v9 }
 0x1a0   :  { %v1041_v33 = vpack.c.bf16 %v963_v27, %v962_v37 }
 0x1a1   :  { %2801 = vmatpush.bf16.msra.mxu0 %v9541_v43 }
 0x1a2   :  { %v1756_v11 = vunpack.c.h.b16 %v1041_v33  ;;  %v473_v53 = vpop.f32.mrf.mxu2  ;;  %v1708_v40 = vunpack.c.l.b16 %v1041_v33 }
 0x1a3   :  { %v690_v34 = vpop.f32.mrf.mxu3  ;;  %v9640_v52 = vadd.f32 %v868_v21, %v473_v53 }
 0x1a4   :  { %v781_v42 = vpop.f32.mrf.mxu0  ;;  %v9642_v59 = vpack.c.b16 %v1756_v11, %v1755_v18  ;;  %v691_v0 = vadd.f32 %v690_v34, %v14857_v1  ;;  %v9658_v16 = vpack.c.b16 %v1708_v40, %v1707_v14  ;;  %v1846_v14 = vsel %vm1787_vm2, %v9496_v49, 0 }
 0x1a5   :  { %v9644_v62 = vpop.f32.mrf.mxu1  ;;  %2802 = vmatpush.bf16.msra.mxu0 %v9512_v5  ;;  %v782_v57 = vadd.f32 %v781_v42, %v14859_v24  ;;  %v9670_v42 = vpop.permute.xlu2 %2992  ;;  %v14866_v24 = vld [vmem:[#allocation15_spill] sm:$0xff] }
 0x1a6   :  { %14856 = vst [vmem:[#allocation9_spill] sm:$0xff] %v9642_v59  ;;  %3040 = vrot.lane.b32.xlu1 %v9642_v59, %s8927_s16  ;;  %v965_v10 = vadd.f32 %v9388_v23, %v691_v0 }
 0x1a7   :  { %1886 = vmatpush.bf16.xpose.msra.mxu2 %v1852_v41  ;;  %14860 = vst [vmem:[#allocation8_spill] sm:$0xff] %v9658_v16  ;;  %v969_v25 = vadd.f32 %v9385_v2, %v782_v57 }
 0x1a8   :  { %v1043_v3 = vpack.c.bf16 %v966_v26, %v965_v10  ;;  %14862 = vst [vmem:[#allocation10_spill] sm:$0xff] %v9670_v42  ;;  %v14867_v26 = vld [vmem:[#allocation17_spill] sm:$0xff] }
 0x1a9   :  { %2803 = vmatpush.bf16.msra.mxu0 %v9464_v17 }
 0x1aa   :  { %v9656_v12 = vpop.f32.mrf.mxu2  ;;  %v1709_v37 = vunpack.c.l.b16 %v1043_v3  ;;  %v1757_v44 = vunpack.c.h.b16 %v1043_v3 }
 0x1ab   :  { %v692_v61 = vpop.f32.mrf.mxu3 }
 0x1ac   :  { %v693_v60 = vadd.f32 %v692_v61, %v14861_v51  ;;  %v784_v7 = vpop.f32.mrf.mxu0 }
 0x1ad   :  { %v873_v6 = vpop.f32.mrf.mxu1  ;;  %2804 = vmatpush.bf16.msra.mxu0 %v9434_v50  ;;  %v785_v57 = vadd.f32 %v784_v7, %v14866_v24 }
 0x1ae   :  { %v968_v21 = vadd.f32 %v9388_v23, %v693_v60  ;;  %3008 = vrot.lane.b32.xlu1 %v9658_v16, %s8927_s16 }
 0x1af   :  { %1887 = vmatpush.bf16.xpose.msra.mxu2 %v1849_v20 }
 0x1b0   :  { %v1045_v27 = vpack.c.bf16 %v969_v25, %v968_v21  ;;  %v972_v21 = vadd.f32 %v9385_v2, %v785_v57  ;;  %v9688_v20 = vpop.permute.xlu2 %2998 }
 0x1b1   :  { %2805 = vmatpush.bf16.msra.mxu0 %v9406_v8  ;;  %14868 = vst [vmem:[#allocation12_spill] sm:$0xff] %v9688_v20 }
 0x1b2   :  { %v1710_v33 = vunpack.c.l.b16 %v1045_v27  ;;  %v1758_v18 = vunpack.c.h.b16 %v1045_v27  ;;  %v478_v11 = vpop.f32.mrf.mxu2  ;;  %v14869_v27 = vld [vmem:[#allocation16_spill] sm:$0xff] }
 0x1b3   :  { %v695_v53 = vpop.f32.mrf.mxu3  ;;  %v874_v34 = vadd.f32 %v873_v6, %v478_v11 }
 0x1b4   :  { %v9672_v1 = vpack.c.b16 %v1710_v33, %v1709_v37  ;;  %v786_v0 = vpop.f32.mrf.mxu0  ;;  %v9674_v41 = vpack.c.b16 %v1758_v18, %v1757_v44  ;;  %v696_v9 = vadd.f32 %v695_v53, %v14865_v19 }
 0x1b5   :  { %v875_v40 = vpop.f32.mrf.mxu1  ;;  %v973_v10 = vadd.f32 %v9382_v15, %v874_v34  ;;  %v787_v51 = vadd.f32 %v786_v0, %v14867_v26  ;;  %v1843_v34 = vsel %vm1787_vm2, %v9466_v63, 0  ;;  %v9696_v0 = vpop.permute.xlu0 %3024 }
 0x1b6   :  { %14863 = vst [vmem:[#allocation11_spill] sm:$0xff] %v9672_v1  ;;  %3010 = vrot.lane.b32.xlu0 %v9672_v1, %s8927_s16  ;;  %3042 = vrot.lane.b32.xlu2 %v9674_v41, %s8927_s16  ;;  %v971_v61 = vadd.f32 %v9388_v23, %v696_v9 }
 0x1b7   :  { %14864 = vst [vmem:[#allocation13_spill] sm:$0xff] %v9674_v41  ;;  %1888 = vmatpush.bf16.xpose.msra.mxu2 %v1846_v14  ;;  %v1048_v6 = vpack.c.bf16 %v973_v10, %v973_v10  ;;  %v975_v7 = vadd.f32 %v9385_v2, %v787_v51 }
 0x1b8   :  { %v1047_v11 = vpack.c.bf16 %v972_v21, %v971_v61 }
 0x1ba   :  { %v480_v60 = vpop.f32.mrf.mxu2  ;;  %v1711_v10 = vunpack.c.l.b16 %v1047_v11  ;;  %v1759_v24 = vunpack.c.h.b16 %v1047_v11  ;;  %v1840_v11 = vsel %vm1787_vm2, %v9436_v39, 0 }
 0x1bb   :  { %v697_v3 = vpop.f32.mrf.mxu3  ;;  %v876_v25 = vadd.f32 %v875_v40, %v480_v60  ;;  %v2754_v40 = vunpack.c.l.b16 %v1048_v6 }
 0x1bc   :  { %v698_v37 = vadd.f32 %v697_v3, %v14869_v27  ;;  %v789_v44 = vpop.f32.mrf.mxu0  ;;  %v14873_v27 = vld [vmem:[#allocation18_spill] sm:$0xff] }
 0x1bd   :  { %v976_v33 = vadd.f32 %v9382_v15, %v876_v25  ;;  %v878_v18 = vpop.f32.mrf.mxu1 }
 0x1be   :  { %v974_v53 = vadd.f32 %v9388_v23, %v698_v37 }
 0x1bf   :  { %v1050_v19 = vpack.c.bf16 %v976_v33, %v976_v33  ;;  %1889 = vmatpush.bf16.xpose.msra.mxu2 %v1843_v34  ;;  %v9707_v33 = vpop.permute.xlu2 %3976  ;;  %v9716_v34 = vpop.permute.xlu0 %3972 }
 0x1c0   :  { %v1049_v9 = vpack.c.bf16 %v975_v7, %v974_v53  ;;  %v14874_v7 = vld [vmem:[#allocation19_spill] sm:$0xff] }
 0x1c1   :  { %v2755_v14 = vunpack.c.l.b16 %v1050_v19  ;;  %v790_v53 = vadd.f32 %v789_v44, %v14874_v7 }
 0x1c2   :  { %v1712_v57 = vunpack.c.l.b16 %v1049_v9  ;;  %v1760_v26 = vunpack.c.h.b16 %v1049_v9  ;;  %v483_v60 = vpop.f32.mrf.mxu2  ;;  %v14875_v9 = vld [vmem:[#allocation21_spill] sm:$0xff] }
 0x1c3   :  { %v9698_v61 = vpack.c.b16 %v2755_v14, %v2754_v40  ;;  %v700_v51 = vpop.f32.mrf.mxu3  ;;  %v879_v19 = vadd.f32 %v878_v18, %v483_v60  ;;  %v1837_v60 = vsel %vm1787_vm2, %v9410_v22, 0 }
 0x1c4   :  { %v9700_v3 = vpack.c.b16 %v1712_v57, %v1711_v10  ;;  %v791_v25 = vpop.f32.mrf.mxu0  ;;  %v9702_v21 = vpack.c.b16 %v1760_v26, %v1759_v24  ;;  %v701_v37 = vadd.f32 %v700_v51, %v14873_v27  ;;  %v978_v24 = vadd.f32 %v9385_v2, %v790_v53  ;;  %v14876_v51 = vld [vmem:[#allocation20_spill] sm:$0xff] }
 0x1c5   :  { %14870 = vst [vmem:[#allocation14_spill] sm:$0xff] %v9698_v61  ;;  %v880_v6 = vpop.f32.mrf.mxu1  ;;  %3990 = vrot.lane.b32.xlu1 %v9698_v61, %s8927_s16  ;;  %v792_v14 = vadd.f32 %v791_v25, %v14875_v9  ;;  %v979_v29 = vadd.f32 %v9382_v15, %v879_v19  ;;  %v9728_v25 = vpop.permute.xlu1 %3026 }
 0x1c6   :  { %14871 = vst [vmem:[#allocation15_spill] sm:$0xff] %v9700_v3  ;;  %3044 = vrot.lane.b32.xlu0 %v9702_v21, %s8927_s16  ;;  %3012 = vrot.lane.b32.xlu2 %v9700_v3, %s8927_s16  ;;  %v977_v40 = vadd.f32 %v9388_v23, %v701_v37 }
 0x1c7   :  { %14872 = vst [vmem:[#allocation17_spill] sm:$0xff] %v9702_v21  ;;  %1890 = vmatpush.bf16.xpose.msra.mxu2 %v1840_v11  ;;  %v981_v11 = vadd.f32 %v9385_v2, %v792_v14  ;;  %v9730_v37 = vpop.permute.xlu2 %3032  ;;  %v9732_v9 = vpop.permute.xlu0 %3974 }
 0x1c8   :  { %v1051_v5 = vpack.c.bf16 %v978_v24, %v977_v40  ;;  %v1052_v40 = vpack.c.bf16 %v979_v29, %v979_v29 }
 0x1ca   :  { %v485_v10 = vpop.f32.mrf.mxu2  ;;  %v1713_v53 = vunpack.c.l.b16 %v1051_v5  ;;  %v1761_v19 = vunpack.c.h.b16 %v1051_v5  ;;  %v2756_v55 = vunpack.c.l.b16 %v1052_v40  ;;  %v14880_v5 = vld [vmem:[#allocation23_spill] sm:$0xff] }
 0x1cb   :  { %v702_v57 = vpop.f32.mrf.mxu3  ;;  %v881_v26 = vadd.f32 %v880_v6, %v485_v10 }
 0x1cc   :  { %v703_v27 = vadd.f32 %v702_v57, %v14876_v51  ;;  %v794_v50 = vpop.f32.mrf.mxu0 }
 0x1cd   :  { %v883_v44 = vpop.f32.mrf.mxu1  ;;  %v982_v18 = vadd.f32 %v9382_v15, %v881_v26  ;;  %v795_v29 = vadd.f32 %v794_v50, %v14880_v5  ;;  %v14885_v5 = vld [vmem:[#allocation24_spill] sm:$0xff] }
 0x1ce   :  { %v980_v7 = vadd.f32 %v9388_v23, %v703_v27 }
 0x1cf   :  { %1891 = vmatpush.bf16.xpose.msra.mxu2 %v1837_v60  ;;  %v1054_v24 = vpack.c.bf16 %v982_v18, %v982_v18  ;;  %v14879_v60 = vld [vmem:[#allocation22_spill] sm:$0xff] }
 0x1d0   :  { %v1053_v6 = vpack.c.bf16 %v981_v11, %v980_v7  ;;  %v9746_v7 = vpop.permute.xlu2 %3034 }
 0x1d1   :  { %v2757_v11 = vunpack.c.l.b16 %v1054_v24  ;;  %v984_v24 = vadd.f32 %v9385_v2, %v795_v29 }
 0x1d2   :  { %v1714_v10 = vunpack.c.l.b16 %v1053_v6  ;;  %v1762_v14 = vunpack.c.h.b16 %v1053_v6  ;;  %v488_v57 = vpop.f32.mrf.mxu2 }
 0x1d3   :  { %v705_v51 = vpop.f32.mrf.mxu3  ;;  %v884_v6 = vadd.f32 %v883_v44, %v488_v57  ;;  %v9751_v40 = vpack.c.b16 %v2757_v11, %v2756_v55 }
 0x1d4   :  { %v9734_v26 = vpack.c.b16 %v1714_v10, %v1713_v53  ;;  %v796_v27 = vpop.f32.mrf.mxu0  ;;  %v9736_v17 = vpack.c.b16 %v1762_v14, %v1761_v19  ;;  %v706_v48 = vadd.f32 %v705_v51, %v14879_v60  ;;  %v9749_v53 = vpop.permute.xlu1 %2994  ;;  %v14883_v19 = vld [vmem:[#allocation25_spill] sm:$0xff] }
 0x1d5   :  { %v885_v43 = vpop.f32.mrf.mxu1  ;;  %14881 = vst [vmem:[#allocation19_spill] sm:$0xff] %v9749_v53  ;;  %v797_v10 = vadd.f32 %v796_v27, %v14883_v19 }
 0x1d6   :  { %14877 = vst [vmem:[#allocation16_spill] sm:$0xff] %v9734_v26  ;;  %3014 = vrot.lane.b32.xlu1 %v9734_v26, %s8927_s16  ;;  %3046 = vrot.lane.b32.xlu2 %v9736_v17, %s8927_s16  ;;  %v983_v18 = vadd.f32 %v9388_v23, %v706_v48  ;;  %v985_v48 = vadd.f32 %v9382_v15, %v884_v6 }
 0x1d7   :  { %14878 = vst [vmem:[#allocation18_spill] sm:$0xff] %v9736_v17  ;;  %7796 = vmatmul.msk.bf16.vlgmr.msra.gmra.mxu2 %vm1787_vm2, %v9408_v35  ;;  %v987_v57 = vadd.f32 %v9385_v2, %v797_v10 }
 0x1d8   :  { %14882 = vst [vmem:[#allocation21_spill] sm:$0xff] %v9751_v40  ;;  %v9755_v51 = vpop.permute.xlu0 %3000  ;;  %v1055_v63 = vpack.c.bf16 %v984_v24, %v983_v18  ;;  %v1056_v19 = vpack.c.bf16 %v985_v48, %v985_v48  ;;  %v14888_v48 = vld [vmem:[#allocation26_spill] sm:$0xff] }
 0x1d9   :  { %14884 = vst [vmem:[#allocation20_spill] sm:$0xff] %v9755_v51 }
 0x1da   :  { %v490_v14 = vpop.f32.mrf.mxu2 }
 0x1db   :  { %v707_v50 = vpop.f32.mrf.mxu3  ;;  %v886_v60 = vadd.f32 %v885_v43, %v490_v14  ;;  %v1715_v43 = vunpack.c.l.b16 %v1055_v63  ;;  %v1763_v14 = vunpack.c.h.b16 %v1055_v63 }
 0x1dc   :  { %v708_v22 = vadd.f32 %v707_v50, %v14885_v5  ;;  %v799_v39 = vpop.f32.mrf.mxu0 }
 0x1dd   :  { %v888_v44 = vpop.f32.mrf.mxu1  ;;  %v988_v27 = vadd.f32 %v9382_v15, %v886_v60 }
 0x1de   :  { %v986_v55 = vadd.f32 %v9388_v23, %v708_v22  ;;  %3992 = vrot.lane.b32.xlu2 %v9751_v40, %s8927_s16  ;;  %v9768_v22 = vpop.permute.xlu1 %3028 }
 0x1df   :  { %v1058_v24 = vpack.c.bf16 %v988_v27, %v988_v27  ;;  %v14889_v27 = vld [vmem:[#allocation27_spill] sm:$0xff] }
 0x1e0   :  { %v1057_v11 = vpack.c.bf16 %v987_v57, %v986_v55  ;;  %v9764_v29 = vpop.permute.xlu2 %3036  ;;  %v9766_v10 = vpop.permute.xlu0 %3978  ;;  %v2758_v55 = vunpack.c.l.b16 %v1056_v19 }
 0x1e1   :  { %v2759_v30 = vunpack.c.l.b16 %v1058_v24 }
 0x1e2   :  { %v1716_v50 = vunpack.c.l.b16 %v1057_v11  ;;  %v1764_v18 = vunpack.c.h.b16 %v1057_v11  ;;  %v493_v6 = vpop.f32.mrf.mxu2  ;;  %v800_v11 = vadd.f32 %v799_v39, %v14889_v27 }
 0x1e3   :  { %v710_v5 = vpop.f32.mrf.mxu3  ;;  %v889_v49 = vadd.f32 %v888_v44, %v493_v6 }
 0x1e4   :  { %v9770_v60 = vpack.c.b16 %v1716_v50, %v1715_v43  ;;  %v801_v56 = vpop.f32.mrf.mxu0  ;;  %v9772_v58 = vpack.c.b16 %v1764_v18, %v1763_v14  ;;  %v711_v63 = vadd.f32 %v710_v5, %v14888_v48  ;;  %v9785_v14 = vpack.c.b16 %v2759_v30, %v2758_v55  ;;  %v14892_v50 = vld [vmem:[#allocation29_spill] sm:$0xff] }
 0x1e5   :  { %v890_v57 = vpop.f32.mrf.mxu1  ;;  %v991_v44 = vadd.f32 %v9382_v15, %v889_v49  ;;  %v802_v18 = vadd.f32 %v801_v56, %v14892_v50  ;;  %v990_v54 = vadd.f32 %v9385_v2, %v800_v11  ;;  %v14893_v49 = vld [vmem:[#allocation28_spill] sm:$0xff] }
 0x1e6   :  { %14886 = vst [vmem:[#allocation22_spill] sm:$0xff] %v9770_v60  ;;  %3016 = vrot.lane.b32.xlu0 %v9770_v60, %s8927_s16  ;;  %3048 = vrot.lane.b32.xlu2 %v9772_v58, %s8927_s16  ;;  %v989_v19 = vadd.f32 %v9388_v23, %v711_v63 }
 0x1e7   :  { %14887 = vst [vmem:[#allocation23_spill] sm:$0xff] %v9772_v58  ;;  %7797 = vmatmul.msk.bf16.gmra.mxu2 %vm1787_vm2, %v9454_v32  ;;  %v1060_v6 = vpack.c.bf16 %v991_v44, %v991_v44  ;;  %v993_v55 = vadd.f32 %v9385_v2, %v802_v18 }
 0x1e8   :  { %v9783_v43 = vpop.permute.xlu2 %3004  ;;  %14891 = vst [vmem:[#allocation24_spill] sm:$0xff] %v9785_v14  ;;  %v1059_v30 = vpack.c.bf16 %v990_v54, %v989_v19 }
 0x1e9   :  { %14890 = vst [vmem:[#allocation25_spill] sm:$0xff] %v9783_v43  ;;  %v3981_v27 = vpop.permute.xlu0 %3980  ;;  %v9792_v43 = vpop.permute.xlu1 %2996 }
 0x1ea   :  { %v495_v24 = vpop.f32.mrf.mxu2  ;;  %14894 = vst [vmem:[#allocation26_spill] sm:$0xff] %v9792_v43 }
 0x1eb   :  { %v712_v5 = vpop.f32.mrf.mxu3  ;;  %v891_v48 = vadd.f32 %v890_v57, %v495_v24  ;;  %v2760_v57 = vunpack.c.l.b16 %v1060_v6  ;;  %v1717_v24 = vunpack.c.l.b16 %v1059_v30 }
 0x1ec   :  { %v713_v8 = vadd.f32 %v712_v5, %v14893_v49  ;;  %v804_v51 = vpop.f32.mrf.mxu0  ;;  %v1765_v5 = vunpack.c.h.b16 %v1059_v30 }
 0x1ed   :  { %v994_v20 = vadd.f32 %v9382_v15, %v891_v48  ;;  %v893_v39 = vpop.f32.mrf.mxu1 }
 0x1ee   :  { %v992_v56 = vadd.f32 %v9388_v23, %v713_v8  ;;  %3994 = vrot.lane.b32.xlu2 %v9785_v14, %s8927_s16 }
 0x1ef   :  { %v1062_v63 = vpack.c.bf16 %v994_v20, %v994_v20  ;;  %v14898_v20 = vld [vmem:[#allocation30_spill] sm:$0xff] }
 0x1f0   :  { %v1061_v44 = vpack.c.bf16 %v993_v55, %v992_v56  ;;  %v14899_v56 = vld [vmem:[#allocation31_spill] sm:$0xff] }
 0x1f1   :  { %v2761_v11 = vunpack.c.l.b16 %v1062_v63  ;;  %v3985_v50 = vpop.permute.xlu2 %3984 }
 0x1f2   :  { %v1718_v48 = vunpack.c.l.b16 %v1061_v44  ;;  %v1766_v49 = vunpack.c.h.b16 %v1061_v44  ;;  %v498_v53 = vpop.f32.mrf.mxu2  ;;  %4018 = vmatpush.bf16.msrb.mxu0 %v3985_v50  ;;  %v14900_v44 = vld [vmem:[#allocation33_spill] sm:$0xff] }
 0x1f3   :  { %v9798_v43 = vpack.c.b16 %v2761_v11, %v2760_v57  ;;  %v715_v54 = vpop.f32.mrf.mxu3  ;;  %v894_v19 = vadd.f32 %v893_v39, %v498_v53  ;;  %v9814_v39 = vpop.permute.xlu1 %3030  ;;  %v805_v57 = vadd.f32 %v804_v51, %v14899_v56 }
 0x1f4   :  { %v9800_v18 = vpack.c.b16 %v1718_v48, %v1717_v24  ;;  %v806_v8 = vpop.f32.mrf.mxu0  ;;  %v9802_v42 = vpack.c.b16 %v1766_v49, %v1765_v5  ;;  %v716_v6 = vadd.f32 %v715_v54, %v14898_v20  ;;  %v14901_v54 = vld [vmem:[#allocation32_spill] sm:$0xff] }
 0x1f5   :  { %14895 = vst [vmem:[#allocation27_spill] sm:$0xff] %v9798_v43  ;;  %3996 = vrot.lane.b32.xlu1 %v9798_v43, %s8927_s16  ;;  %v895_v30 = vpop.f32.mrf.mxu1  ;;  %v997_v55 = vadd.f32 %v9382_v15, %v894_v19  ;;  %v807_v11 = vadd.f32 %v806_v8, %v14900_v44  ;;  %v996_v49 = vadd.f32 %v9385_v2, %v805_v57 }
 0x1f6   :  { %14896 = vst [vmem:[#allocation29_spill] sm:$0xff] %v9800_v18  ;;  %3050 = vrot.lane.b32.xlu0 %v9802_v42, %s8927_s16  ;;  %3018 = vrot.lane.b32.xlu2 %v9800_v18, %s8927_s16  ;;  %v995_v63 = vadd.f32 %v9388_v23, %v716_v6 }
 0x1f7   :  { %14897 = vst [vmem:[#allocation28_spill] sm:$0xff] %v9802_v42  ;;  %7798 = vmatmul.msk.bf16.gmra.mxu2 %vm1787_vm2, %v9483_v46  ;;  %v3983_v53 = vpop.permute.xlu0 %3982  ;;  %v1064_v24 = vpack.c.bf16 %v997_v55, %v997_v55  ;;  %v999_v51 = vadd.f32 %v9385_v2, %v807_v11  ;;  %v14904_v11 = vld [vmem:[#allocation34_spill] sm:$0xff] }
 0x1f8   :  { %4019 = vmatpush.bf16.msrb.mxu0 %v3983_v53  ;;  %v1063_v60 = vpack.c.bf16 %v996_v49, %v995_v63 }
 0x1f9   :  { %v2762_v56 = vunpack.c.l.b16 %v1064_v24 }
 0x1fa   :  { %v500_v50 = vpop.f32.mrf.mxu2  ;;  %v1767_v57 = vunpack.c.h.b16 %v1063_v60 }
 0x1fb   :  { %v717_v5 = vpop.f32.mrf.mxu3  ;;  %v896_v48 = vadd.f32 %v895_v30, %v500_v50  ;;  %v9824_v44 = vpop.permute.xlu1 %3002 }
 0x1fc   :  { %v718_v19 = vadd.f32 %v717_v5, %v14901_v54  ;;  %4020 = vmatpush.bf16.msrb.mxu0 %v3981_v27  ;;  %v809_v18 = vpop.f32.mrf.mxu0 }
 0x1fd   :  { %v1000_v20 = vadd.f32 %v9382_v15, %v896_v48  ;;  %v898_v6 = vpop.f32.mrf.mxu1 }
 0x1fe   :  { %v998_v53 = vadd.f32 %v9388_v23, %v718_v19 }
 0x1ff   :  { %v1066_v8 = vpack.c.bf16 %v1000_v20, %v1000_v20  ;;  %v14905_v20 = vld [vmem:[#allocation35_spill] sm:$0xff] }
 0x200   :  { %v1065_v55 = vpack.c.bf16 %v999_v51, %v998_v53  ;;  %4021 = vmatpush.bf16.msrb.mxu0 %v9766_v10  ;;  %v810_v51 = vadd.f32 %v809_v18, %v14905_v20 }
 0x201   :  { %v2763_v30 = vunpack.c.l.b16 %v1066_v8 }
 0x202   :  { %v1768_v50 = vunpack.c.h.b16 %v1065_v55  ;;  %v503_v27 = vpop.f32.mrf.mxu2  ;;  %v1720_v10 = vunpack.c.l.b16 %v1065_v55  ;;  %v1002_v18 = vadd.f32 %v9385_v2, %v810_v51  ;;  %v3123_v51 = vsel %vm1787_vm2, %v9764_v29, 0 }
 0x203   :  { %v9827_v5 = vpack.c.b16 %v2763_v30, %v2762_v56  ;;  %v720_v48 = vpop.f32.mrf.mxu3  ;;  %v899_v63 = vadd.f32 %v898_v6, %v503_v27  ;;  %v14906_v30 = vld [vmem:[#allocation37_spill] sm:$0xff]  ;;  %v3120_v29 = vsel %vm1787_vm2, %v9746_v7, 0 }
 0x204   :  { %v9829_v49 = vpack.c.b16 %v1768_v50, %v1767_v57  ;;  %4022 = vmatpush.bf16.msrb.mxu0 %v9707_v33  ;;  %v721_v24 = vadd.f32 %v720_v48, %v14904_v11  ;;  %v811_v54 = vpop.f32.mrf.mxu0  ;;  %v1719_v33 = vunpack.c.l.b16 %v1063_v60  ;;  %v14908_v11 = vld [vmem:[#allocation36_spill] sm:$0xff] }
 0x205   :  { %14902 = vst [vmem:[#allocation30_spill] sm:$0xff] %v9827_v5  ;;  %3998 = vrot.lane.b32.xlu1 %v9827_v5, %s8927_s16  ;;  %v1003_v19 = vadd.f32 %v9382_v15, %v899_v63  ;;  %v900_v6 = vpop.f32.mrf.mxu1  ;;  %v812_v57 = vadd.f32 %v811_v54, %v14906_v30 }
 0x206   :  { %14903 = vst [vmem:[#allocation31_spill] sm:$0xff] %v9829_v49  ;;  %3052 = vrot.lane.b32.xlu2 %v9829_v49, %s8927_s16  ;;  %v1001_v8 = vadd.f32 %v9388_v23, %v721_v24  ;;  %v9845_v50 = vpack.c.b16 %v1720_v10, %v1719_v33 }
 0x207   :  { %7799 = vmatmul.msk.bf16.gmra.mxu2 %vm1787_vm2, %v9494_v31  ;;  %v1068_v48 = vpack.c.bf16 %v1003_v19, %v1003_v19  ;;  %v1005_v24 = vadd.f32 %v9385_v2, %v812_v57  ;;  %v871_v2 = vadd.f32 %v9644_v62, %v9656_v12  ;;  %v866_v57 = vadd.f32 %v9614_v4, %v9630_v28 }
 0x208   :  { %v3039_v53 = vpop.permute.xlu1 %3038  ;;  %4023 = vmatpush.bf16.msrb.mxu0 %v9732_v9  ;;  %14907 = vst [vmem:[#allocation33_spill] sm:$0xff] %v9845_v50  ;;  %v1067_v60 = vpack.c.bf16 %v1002_v18, %v1001_v8  ;;  %v1879_v18 = vsel %vm1787_vm2, %v9829_v49, 0  ;;  %v961_v62 = vadd.f32 %v9382_v15, %v9608_v38 }
 0x209   :  { %v3126_v56 = vsel %vm1787_vm2, %v3039_v53, 0  ;;  %v2764_v54 = vunpack.c.l.b16 %v1068_v48  ;;  %v967_v48 = vadd.f32 %v9382_v15, %v9640_v52  ;;  %v964_v12 = vadd.f32 %v9382_v15, %v866_v57 }
 0x20a   :  { %3152 = vmatpush.bf16.xpose.msrb.mxu2 %v3126_v56  ;;  %v505_v55 = vpop.f32.mrf.mxu2  ;;  %v1721_v33 = vunpack.c.l.b16 %v1067_v60  ;;  %v1769_v56 = vunpack.c.h.b16 %v1067_v60  ;;  %v3117_v52 = vsel %vm1787_vm2, %v9730_v37, 0  ;;  %v1040_v7 = vpack.c.bf16 %v961_v62, %v961_v62 }
 0x20b   :  { %v722_v27 = vpop.f32.mrf.mxu3  ;;  %v901_v63 = vadd.f32 %v900_v6, %v505_v55  ;;  %v1044_v4 = vpack.c.bf16 %v967_v48, %v967_v48  ;;  %v1876_v60 = vsel %vm1787_vm2, %v9802_v42, 0  ;;  %v3114_v37 = vsel %vm1787_vm2, %v9814_v39, 0 }
 0x20c   :  { %v723_v20 = vadd.f32 %v722_v27, %v14908_v11  ;;  %4024 = vmatpush.bf16.msrb.mxu0 %v9716_v34  ;;  %v1042_v11 = vpack.c.bf16 %v964_v12, %v964_v12  ;;  %v1870_v39 = vsel %vm1787_vm2, %v9736_v17, 0 }
 0x20d   :  { %3020 = vrot.lane.b32.xlu1 %v9845_v50, %s8927_s16  ;;  %v1006_v9 = vadd.f32 %v9382_v15, %v901_v63  ;;  %v970_v63 = vadd.f32 %v9382_v15, %v871_v2  ;;  %v2750_v15 = vunpack.c.l.b16 %v1040_v7 }
 0x20e   :  { %v1004_v10 = vadd.f32 %v9388_v23, %v723_v20  ;;  %v2752_v20 = vunpack.c.l.b16 %v1044_v4  ;;  %v2751_v38 = vunpack.c.l.b16 %v1042_v11  ;;  %v9953_v4 = vpop.permute.xlu0 %3006 }
 0x20f   :  { %v1070_v53 = vpack.c.bf16 %v1006_v9, %v1006_v9  ;;  %v1046_v28 = vpack.c.bf16 %v970_v63, %v970_v63  ;;  %14914 = vst [vmem:[#allocation62_spill] sm:$0xff] %v9953_v4 }
 0x210   :  { %v1069_v19 = vpack.c.bf16 %v1005_v24, %v1004_v10  ;;  %v9903_v10 = vpack.c.b16 %v2751_v38, %v2750_v15 }
 0x211   :  { %v2765_v6 = vunpack.c.l.b16 %v1070_v53  ;;  %v2753_v9 = vunpack.c.l.b16 %v1046_v28  ;;  %v3111_v53 = vsel %vm1787_vm2, %v9768_v22, 0  ;;  %v3105_v22 = vsel %vm1787_vm2, %v9696_v0, 0 }
 0x212   :  { %v1722_v34 = vunpack.c.l.b16 %v1069_v19  ;;  %v1770_v30 = vunpack.c.h.b16 %v1069_v19  ;;  %3153 = vmatpush.bf16.xpose.msrb.mxu2 %v3123_v51  ;;  %14913 = vst [vmem:[#allocation36_spill] sm:$0xff] %v9903_v10  ;;  %v3108_v19 = vsel %vm1787_vm2, %v9728_v25, 0  ;;  %v1867_v51 = vsel %vm1787_vm2, %v9702_v21, 0 }
 0x213   :  { %v9857_v55 = vpack.c.b16 %v2765_v6, %v2764_v54  ;;  %v9898_v24 = vpack.c.b16 %v2753_v9, %v2752_v20  ;;  %v1873_v54 = vsel %vm1787_vm2, %v9772_v58, 0  ;;  %v1864_v6 = vsel %vm1787_vm2, %v9674_v41, 0 }
 0x214   :  { %v9859_v27 = vpack.c.b16 %v1722_v34, %v1721_v33  ;;  %v9861_v8 = vpack.c.b16 %v1770_v30, %v1769_v56  ;;  %v9927_v56 = vpop.permute.xlu2 %3042  ;;  %v1861_v25 = vsel %vm1787_vm2, %v9642_v59, 0 }
 0x215   :  { %14909 = vst [vmem:[#allocation32_spill] sm:$0xff] %v9857_v55  ;;  %2887 = vmatpush.bf16.msra.mxu1 %v9857_v55 }
 0x216   :  { %14910 = vst [vmem:[#allocation34_spill] sm:$0xff] %v9859_v27  ;;  %3054 = vrot.lane.b32.xlu1 %v9861_v8, %s8927_s16  ;;  %3022 = vrot.lane.b32.xlu0 %v9859_v27, %s8927_s16  ;;  %v1882_v23 = vsel %vm1787_vm2, %v9861_v8, 0 }
 0x217   :  { %14911 = vst [vmem:[#allocation35_spill] sm:$0xff] %v9861_v8  ;;  %7800 = vmatmul.msk.bf16.gmra.mxu2 %vm1787_vm2, %v9524_v36  ;;  %1973 = vmatpush.bf16.xpose.msra.mxu3 %v1882_v23 }
 0x218   :  { %14912 = vst [vmem:[#allocation37_spill] sm:$0xff] %v9898_v24  ;;  %v9925_v33 = vpop.permute.xlu1 %3040 }
 0x219   :  { %2888 = vmatpush.bf16.msra.mxu1 %v9827_v5 }
 0x21a   :  { %3154 = vmatpush.bf16.xpose.msrb.mxu2 %v3120_v29 }
 0x21d   :  { %2889 = vmatpush.bf16.msra.mxu1 %v9798_v43 }
 0x21e   :  { %4000 = vrot.lane.b32.xlu1 %v9857_v55, %s8927_s16 }
 0x21f   :  { %1974 = vmatpush.bf16.xpose.msra.mxu3 %v1879_v18 }
 0x220   :  { %v9931_v34 = vpop.permute.xlu1 %3008  ;;  %v9933_v30 = vpop.permute.xlu2 %3012 }
 0x221   :  { %2890 = vmatpush.bf16.msra.mxu1 %v9785_v14 }
 0x222   :  { %3155 = vmatpush.bf16.xpose.msrb.mxu2 %v3117_v52 }
 0x225   :  { %2891 = vmatpush.bf16.msra.mxu1 %v9751_v40 }
 0x227   :  { %7801 = vmatmul.msk.bf16.gmra.mxu2 %vm1787_vm2, %v9556_v13  ;;  %1975 = vmatpush.bf16.xpose.msra.mxu3 %v1876_v60 }
 0x228   :  { %v9961_v11 = vpop.permute.xlu0 %3010 }
 0x229   :  { %2892 = vmatpush.bf16.msra.mxu1 %v9698_v61 }
 0x22a   :  { %3156 = vmatpush.bf16.xpose.msrb.mxu2 %v3114_v37 }
 0x22d   :  { %2893 = vmatpush.bf16.msra.mxu1 %v9898_v24 }
 0x22f   :  { %1976 = vmatpush.bf16.xpose.msra.mxu3 %v1873_v54 }
 0x230   :  { %v3047_v2 = vpop.permute.xlu2 %3046 }
 0x231   :  { %2894 = vmatpush.bf16.msra.mxu1 %v9903_v10 }
 0x232   :  { %3157 = vmatpush.bf16.xpose.msrb.mxu2 %v3111_v53 }
 0x237   :  { %7802 = vmatmul.msk.bf16.gmra.mxu2 %vm1787_vm2, %v9598_v47  ;;  %1977 = vmatpush.bf16.xpose.msra.mxu3 %v1870_v39  ;;  %v3991_v23 = vpop.permute.xlu1 %3990 }
 0x238   :  { %v3993_v48 = vpop.permute.xlu2 %3992  ;;  %v3045_v60 = vpop.permute.xlu0 %3044 }
 0x23a   :  { %3158 = vmatpush.bf16.xpose.msrb.mxu2 %v3108_v19 }
 0x23f   :  { %1978 = vmatpush.bf16.xpose.msra.mxu3 %v1867_v51 }
 0x240   :  { %v3049_v62 = vpop.permute.xlu2 %3048 }
 0x242   :  { %3159 = vmatpush.bf16.xpose.msrb.mxu2 %v3105_v22 }
 0x247   :  { %7803 = vmatmul.msk.bf16.gmra.mxu2 %vm1787_vm2, %v9610_v45  ;;  %1979 = vmatpush.bf16.xpose.msra.mxu3 %v1864_v6 }
 0x248   :  { %v9943_v57 = vpop.permute.xlu1 %3014  ;;  %v3995_v7 = vpop.permute.xlu2 %3994 }
 0x24f   :  { %1980 = vmatpush.bf16.xpose.msra.mxu3 %v1861_v25  ;;  %v14918_v25 = vld [vmem:[#allocation22_spill] sm:$0xff] }
 0x250   :  { %v9967_v15 = vpop.permute.xlu2 %3018 }
 0x251   :  { %14916 = vst [vmem:[#allocation64_spill] sm:$0xff] %v9967_v15 }
 0x256   :  { %7812 = vmatmul.msk.bf16.vlgmr.msra.gmra.mxu3 %vm1787_vm2, %v9408_v35 }
 0x257   :  { %7804 = vmatmul.msk.bf16.gmra.mxu2 %vm1787_vm2, %v9658_v16 }
 0x258   :  { %v9976_v53 = vpop.permute.xlu0 %3016 }
 0x259   :  { %14917 = vst [vmem:[#allocation65_spill] sm:$0xff] %v9976_v53 }
 0x25a   :  { %v9939_v0 = vpop.f32.mrf.mxu2 }
 0x25b   :  { %v2062_v14 = vmul.f32 0.17677669, %v9939_v0 }
 0x260   :  { %v3053_v39 = vpop.permute.xlu2 %3052 }
 0x261   :  { %v3147_v19 = vsel %vm1787_vm2, %v3053_v39, 0  ;;  %v3141_v39 = vsel %vm1787_vm2, %v3049_v62, 0 }
 0x262   :  { %v9941_v29 = vpop.f32.mrf.mxu2 }
 0x266   :  { %7813 = vmatmul.msk.bf16.gmra.mxu3 %vm1787_vm2, %v9454_v32 }
 0x267   :  { %7805 = vmatmul.msk.bf16.gmra.mxu2 %vm1787_vm2, %v9672_v1  ;;  %v3997_v18 = vpop.permute.xlu1 %3996 }
 0x268   :  { %v3051_v6 = vpop.permute.xlu0 %3050 }
 0x26a   :  { %v9949_v63 = vpop.f32.mrf.mxu2 }
 0x272   :  { %v9951_v12 = vpop.f32.mrf.mxu2 }
 0x276   :  { %7814 = vmatmul.msk.bf16.gmra.mxu3 %vm1787_vm2, %v9483_v46 }
 0x277   :  { %7806 = vmatmul.msk.bf16.gmra.mxu2 %vm1787_vm2, %v9700_v3  ;;  %v3999_v28 = vpop.permute.xlu1 %3998 }
 0x27a   :  { %v9959_v52 = vpop.f32.mrf.mxu2 }
 0x27f   :  { %v9963_v20 = vpop.permute.xlu1 %3020 }
 0x280   :  { %14915 = vst [vmem:[#allocation63_spill] sm:$0xff] %v9963_v20 }
 0x282   :  { %v9965_v9 = vpop.f32.mrf.mxu2 }
 0x286   :  { %7815 = vmatmul.msk.bf16.gmra.mxu3 %vm1787_vm2, %v9494_v31 }
 0x287   :  { %7807 = vmatmul.msk.bf16.gmra.mxu2 %vm1787_vm2, %v9734_v26 }
 0x288   :  { %v3055_v38 = vpop.permute.xlu1 %3054 }
 0x289   :  { %v3150_v37 = vsel %vm1787_vm2, %v3055_v38, 0  ;;  %v3144_v38 = vsel %vm1787_vm2, %v3051_v6, 0 }
 0x28a   :  { %v9974_v54 = vpop.f32.mrf.mxu2  ;;  %3241 = vmatpush.bf16.xpose.msrb.mxu3 %v3150_v37 }
 0x290   :  { %v4001_v22 = vpop.permute.xlu1 %4000 }
 0x291   :  { %4107 = vmatpush.bf16.msrb.mxu1 %v4001_v22  ;;  %v14919_v22 = vld [vmem:[#allocation29_spill] sm:$0xff] }
 0x292   :  { %v9979_v51 = vpop.f32.mrf.mxu2  ;;  %3242 = vmatpush.bf16.xpose.msrb.mxu3 %v3147_v19 }
 0x295   :  { %4108 = vmatpush.bf16.msrb.mxu1 %v3999_v28  ;;  %v3138_v28 = vsel %vm1787_vm2, %v3047_v2, 0  ;;  %v3129_v2 = vsel %vm1787_vm2, %v9925_v33, 0 }
 0x296   :  { %7816 = vmatmul.msk.bf16.gmra.mxu3 %vm1787_vm2, %v9524_v36 }
 0x297   :  { %7808 = vmatmul.msk.bf16.gmra.mxu2 %vm1787_vm2, %v14918_v25 }
 0x299   :  { %4109 = vmatpush.bf16.msrb.mxu1 %v3997_v18  ;;  %v3135_v18 = vsel %vm1787_vm2, %v3045_v60, 0  ;;  %v1071_v60 = vlaneseq }
 0x29a   :  { %v9986_v37 = vpop.f32.mrf.mxu2  ;;  %3243 = vmatpush.bf16.xpose.msrb.mxu3 %v3144_v38 }
 0x29b   :  { %v1105_v38 = vand.u32 127, %v1071_v60 }
 0x29d   :  { %4110 = vmatpush.bf16.msrb.mxu1 %v3995_v7 }
 0x2a1   :  { %4111 = vmatpush.bf16.msrb.mxu1 %v3993_v48  ;;  %v3132_v48 = vsel %vm1787_vm2, %v9927_v56, 0  ;;  %v10019_v56 = vshrl.u32 %v1071_v60, 7  ;;  %v14920_v60 = vld [vmem:[#allocation10_spill] sm:$0xff] }
 0x2a2   :  { %v9989_v19 = vpop.f32.mrf.mxu2  ;;  %3244 = vmatpush.bf16.xpose.msrb.mxu3 %v3141_v39 }
 0x2a5   :  { %4112 = vmatpush.bf16.msrb.mxu1 %v3991_v23 }
 0x2a6   :  { %7817 = vmatmul.msk.bf16.gmra.mxu3 %vm1787_vm2, %v9556_v13 }
 0x2a7   :  { %7809 = vmatmul.msk.bf16.gmra.mxu2 %vm1787_vm2, %v14919_v22 }
 0x2aa   :  { %v9996_v6 = vpop.f32.mrf.mxu2  ;;  %3245 = vmatpush.bf16.xpose.msrb.mxu3 %v3138_v28  ;;  %v1106_v28 = vadd.s32 128, %v1105_v38 }
 0x2ac   :  { %v10024_v33 = vand.u32 15, %v1106_v28 }
 0x2b2   :  { %v9999_v7 = vpop.f32.mrf.mxu2  ;;  %3246 = vmatpush.bf16.xpose.msrb.mxu3 %v3135_v18  ;;  %v1111_v18 = vand.u32 15, %v10019_v56 }
 0x2b4   :  { %vm1516_vm4 = vcmp.eq.s32.totalorder %v1111_v18, %v10024_v33 }
 0x2b6   :  { %7818 = vmatmul.msk.bf16.gmra.mxu3 %vm1787_vm2, %v9598_v47 }
 0x2b7   :  { %7810 = vmatmul.msk.bf16.gmra.mxu2 %vm1787_vm2, %v9845_v50 }
 0x2ba   :  { %v10007_v23 = vpop.f32.mrf.mxu2  ;;  %3247 = vmatpush.bf16.xpose.msrb.mxu3 %v3132_v48  ;;  %v10022_v48 = vand.u32 15, %v1105_v38  ;;  %v14496_v38 = vmov -1e+30  }
 0x2bb   :  { %v10040_v43 = vsel %vm1516_vm4, 0.0, %v14496_v38 }
 0x2bc   :  { %vm1515_vm3 = vcmp.eq.s32.totalorder %v1111_v18, %v10022_v48  ;;  %14922 = vst [vmem:[#allocation66_spill] sm:$0xff] %v10040_v43 }
 0x2bd   :  { %v10037_v28 = vsel %vm1515_vm3, 0.0, %v14496_v38  ;;  %v2064_v38 = vmul.f32 0.17677669, %v9941_v29  ;;  %v1075_v29 = vadd.s32 24, %v10019_v56 }
 0x2be   :  { %14921 = vst [vmem:[#allocation10_spill] sm:$0xff] %v10037_v28  ;;  %v10043_v18 = vadd.f32 %v2062_v14, %v10037_v28  ;;  %v14923_v14 = vmov -1e+30  }
 0x2bf   :  { %v1132_v32 = vand.u32 15, %v1075_v29 }
 0x2c1   :  { %vm1521_vm9 = vcmp.eq.s32.totalorder %v1132_v32, %v10022_v48  ;;  %vm1522_vm10 = vcmp.eq.s32.totalorder %v1132_v32, %v10024_v33 }
 0x2c2   :  { %3248 = vmatpush.bf16.xpose.msrb.mxu3 %v3129_v2  ;;  %v10011_v62 = vpop.f32.mrf.mxu2  ;;  %v1073_v2 = vadd.s32 8, %v10019_v56  ;;  %v10099_v17 = vsel %vm1521_vm9, 0.0, %v14923_v14 }
 0x2c3   :  { %14929 = vst [vmem:[#allocation70_spill] sm:$0xff] %v10099_v17 }
 0x2c4   :  { %v1118_v5 = vand.u32 15, %v1073_v2 }
 0x2c6   :  { %7819 = vmatmul.msk.bf16.gmra.mxu3 %vm1787_vm2, %v9610_v45  ;;  %v1074_v45 = vadd.s32 16, %v10019_v56  ;;  %vm1517_vm5 = vcmp.eq.s32.totalorder %v1118_v5, %v10022_v48  ;;  %vm1518_vm6 = vcmp.eq.s32.totalorder %v1118_v5, %v10024_v33 }
 0x2c7   :  { %7811 = vmatmul.msk.bf16.gmra.mxu2 %vm1787_vm2, %v9859_v27  ;;  %v10057_v13 = vsel %vm1517_vm5, 0.0, %v14923_v14 }
 0x2c8   :  { %14924 = vst [vmem:[#allocation67_spill] sm:$0xff] %v10057_v13  ;;  %v1125_v47 = vand.u32 15, %v1074_v45  ;;  %v10063_v31 = vadd.f32 %v2064_v38, %v10057_v13  ;;  %v14926_v45 = vld [vmem:[#allocation19_spill] sm:$0xff]  ;;  %v2066_v38 = vmul.f32 0.17677669, %v9949_v63  ;;  %v1076_v63 = vadd.s32 32, %v10019_v56 }
 0x2ca   :  { %v10017_v39 = vpop.f32.mrf.mxu2  ;;  %vm1519_vm7 = vcmp.eq.s32.totalorder %v1125_v47, %v10022_v48  ;;  %vm1520_vm8 = vcmp.eq.s32.totalorder %v1125_v47, %v10024_v33 }
 0x2d2   :  { %v10031_v40 = vpop.f32.mrf.mxu2 }
 0x2d6   :  { %7820 = vmatmul.msk.bf16.gmra.mxu3 %vm1787_vm2, %v9658_v16 }
 0x2d7   :  { %7828 = vmatmul.msk.bf16.vlgmr.msrb.gmra.mxu2 %vm1787_vm2, %v14920_v60 }
 0x2d9   :  { %v1982_v61 = vpop.f32.mrf.mxu3 }
 0x2da   :  { %v2063_v55 = vmul.f32 0.17677669, %v1982_v61  ;;  %v10054_v61 = vpop.f32.mrf.mxu2 }
 0x2dc   :  { %v10046_v16 = vadd.f32 %v2063_v55, %v10040_v43  ;;  %v10060_v55 = vsel %vm1518_vm6, 0.0, %v14923_v14 }
 0x2dd   :  { %14925 = vst [vmem:[#allocation68_spill] sm:$0xff] %v10060_v55 }
 0x2de   :  { %v2190_v0 = vmax.f32 %v10043_v18, %v10046_v16 }
 0x2e0   :  { %2191 = vmax.xlane.f32.xlu0 %v2190_v0  ;;  %v10082_v0 = vsel %vm1520_vm8, 0.0, %v14923_v14 }
 0x2e1   :  { %v1984_v2 = vpop.f32.mrf.mxu3  ;;  %14928 = vst [vmem:[#allocation69_spill] sm:$0xff] %v10082_v0 }
 0x2e2   :  { %v2065_v35 = vmul.f32 0.17677669, %v1984_v2  ;;  %v10084_v46 = vpop.f32.mrf.mxu2 }
 0x2e4   :  { %v10066_v36 = vadd.f32 %v2065_v35, %v10060_v55  ;;  %v10079_v35 = vsel %vm1519_vm7, 0.0, %v14923_v14 }
 0x2e5   :  { %14927 = vst [vmem:[#allocation19_spill] sm:$0xff] %v10079_v35  ;;  %v10087_v47 = vadd.f32 %v2066_v38, %v10079_v35  ;;  %v10102_v38 = vsel %vm1522_vm10, 0.0, %v14923_v14 }
 0x2e6   :  { %7821 = vmatmul.msk.bf16.gmra.mxu3 %vm1787_vm2, %v9672_v1  ;;  %v2193_v5 = vmax.f32 %v10063_v31, %v10066_v36  ;;  %14930 = vst [vmem:[#allocation71_spill] sm:$0xff] %v10102_v38 }
 0x2e7   :  { %7829 = vmatmul.msk.bf16.gmra.mxu2 %vm1787_vm2, %v14926_v45 }
 0x2e8   :  { %2194 = vmax.xlane.f32.xlu0 %v2193_v5 }
 0x2e9   :  { %v1987_v2 = vpop.f32.mrf.mxu3 }
 0x2ea   :  { %v2067_v1 = vmul.f32 0.17677669, %v1987_v2  ;;  %v2068_v2 = vmul.f32 0.17677669, %v9951_v12  ;;  %v10110_v42 = vpop.f32.mrf.mxu2  ;;  %v1077_v12 = vadd.s32 40, %v10019_v56 }
 0x2ec   :  { %v10090_v59 = vadd.f32 %v2067_v1, %v10082_v0  ;;  %v1139_v1 = vand.u32 15, %v1076_v63  ;;  %v10105_v21 = vadd.f32 %v2068_v2, %v10099_v17  ;;  %v14931_v63 = vld [vmem:[#allocation26_spill] sm:$0xff]  ;;  %v1146_v49 = vand.u32 15, %v1077_v12 }
 0x2ed   :  { %v2074_v0 = vmul.f32 0.17677669, %v9974_v54 }
 0x2ee   :  { %v2196_v5 = vmax.f32 %v10087_v47, %v10090_v59  ;;  %vm1523_vm11 = vcmp.eq.s32.totalorder %v1139_v1, %v10022_v48  ;;  %vm1524_vm12 = vcmp.eq.s32.totalorder %v1139_v1, %v10024_v33  ;;  %vm1525_vm13 = vcmp.eq.s32.totalorder %v1146_v49, %v10022_v48 }
 0x2ef   :  { %v10126_v2 = vsel %vm1524_vm12, 0.0, %v14923_v14  ;;  %vm1526_vm14 = vcmp.eq.s32.totalorder %v1146_v49, %v10024_v33  ;;  %v10142_v12 = vsel %vm1525_vm13, 0.0, %v14923_v14  ;;  %v1079_v49 = vadd.s32 56, %v10019_v56 }
 0x2f0   :  { %2197 = vmax.xlane.f32.xlu0 %v2196_v5  ;;  %v10123_v5 = vsel %vm1523_vm11, 0.0, %v14923_v14  ;;  %14933 = vst [vmem:[#allocation72_spill] sm:$0xff] %v10126_v2 }
 0x2f1   :  { %v1989_v29 = vpop.f32.mrf.mxu3  ;;  %14932 = vst [vmem:[#allocation26_spill] sm:$0xff] %v10123_v5 }
 0x2f2   :  { %v2069_v41 = vmul.f32 0.17677669, %v1989_v29  ;;  %14934 = vst [vmem:[#allocation73_spill] sm:$0xff] %v10142_v12 }
 0x2f4   :  { %v10108_v58 = vadd.f32 %v2069_v41, %v10102_v38  ;;  %v2070_v41 = vmul.f32 0.17677669, %v9959_v52  ;;  %v10138_v52 = vpop.f32.mrf.mxu2 }
 0x2f6   :  { %7822 = vmatmul.msk.bf16.gmra.mxu3 %vm1787_vm2, %v9700_v3  ;;  %v2199_v32 = vmax.f32 %v10105_v21, %v10108_v58  ;;  %v10129_v8 = vadd.f32 %v2070_v41, %v10123_v5  ;;  %v10145_v41 = vsel %vm1526_vm14, 0.0, %v14923_v14 }
 0x2f7   :  { %7830 = vmatmul.msk.bf16.gmra.mxu2 %vm1787_vm2, %v14931_v63  ;;  %14935 = vst [vmem:[#allocation74_spill] sm:$0xff] %v10145_v41 }
 0x2f8   :  { %2200 = vmax.xlane.f32.xlu1 %v2199_v32  ;;  %v2072_v32 = vmul.f32 0.17677669, %v9965_v9  ;;  %v14936_v9 = vld [vmem:[#allocation12_spill] sm:$0xff] }
 0x2f9   :  { %v1992_v29 = vpop.f32.mrf.mxu3 }
 0x2fa   :  { %v2071_v3 = vmul.f32 0.17677669, %v1992_v29  ;;  %v10148_v55 = vadd.f32 %v2072_v32, %v10142_v12  ;;  %v1160_v32 = vand.u32 15, %v1079_v49 }
 0x2fc   :  { %v10132_v1 = vadd.f32 %v2071_v3, %v10126_v2  ;;  %v10160_v43 = vpop.f32.mrf.mxu2  ;;  %vm1529_vm15 = vcmp.eq.s32.totalorder %v1160_v32, %v10022_v48  ;;  %vm1530_vm0 = vcmp.eq.s32.totalorder %v1160_v32, %v10024_v33 }
 0x2fd   :  { %v10168_v12 = vsel %vm1529_vm15, 0.0, %v14923_v14 }
 0x2fe   :  { %v2202_v13 = vmax.f32 %v10129_v8, %v10132_v1  ;;  %14937 = vst [vmem:[#allocation12_spill] sm:$0xff] %v10168_v12 }
 0x300   :  { %2203 = vmax.xlane.f32.xlu2 %v2202_v13 }
 0x301   :  { %v1994_v29 = vpop.f32.mrf.mxu3 }
 0x302   :  { %v2073_v3 = vmul.f32 0.17677669, %v1994_v29 }
 0x304   :  { %v10151_v28 = vadd.f32 %v2073_v3, %v10145_v41  ;;  %v2076_v3 = vmul.f32 0.17677669, %v9979_v51  ;;  %v10171_v41 = vsel %vm1530_vm0, 0.0, %v14923_v14  ;;  %v10173_v5 = vpop.f32.mrf.mxu2 }
 0x305   :  { %14938 = vst [vmem:[#allocation75_spill] sm:$0xff] %v10171_v41 }
 0x306   :  { %7823 = vmatmul.msk.bf16.gmra.mxu3 %vm1787_vm2, %v9734_v26  ;;  %v2205_v13 = vmax.f32 %v10148_v55, %v10151_v28  ;;  %v10176_v49 = vadd.f32 %v2076_v3, %v10168_v12 }
 0x307   :  { %7831 = vmatmul.msk.bf16.gmra.mxu2 %vm1787_vm2, %v14936_v9 }
 0x308   :  { %2206 = vmax.xlane.f32.xlu0 %v2205_v13  ;;  %14939 = vst [vmem:[#allocation76_spill] sm:$0xff] %v10176_v49 }
 0x309   :  { %v1997_v29 = vpop.f32.mrf.mxu3 }
 0x30a   :  { %v2075_v17 = vmul.f32 0.17677669, %v1997_v29 }
 0x311   :  { %v1999_v26 = vpop.f32.mrf.mxu3  ;;  %3988 = vrot.lane.b32.xlu1 %v9898_v24, %s8927_s16  ;;  %v14941_v24 = vld [vmem:[#allocation20_spill] sm:$0xff] }
 0x312   :  { %v2077_v13 = vmul.f32 0.17677669, %v1999_v26  ;;  %v10189_v26 = vpop.f32.mrf.mxu2 }
 0x314   :  { %v10179_v32 = vadd.f32 %v2077_v13, %v10171_v41  ;;  %v1082_v41 = vadd.s32 80, %v10019_v56 }
 0x316   :  { %14940 = vst [vmem:[#allocation77_spill] sm:$0xff] %v10179_v32  ;;  %7824 = vmatmul.msk.bf16.gmra.mxu3 %vm1787_vm2, %v14918_v25  ;;  %v2211_v51 = vmax.f32 %v10176_v49, %v10179_v32  ;;  %v1078_v25 = vadd.s32 48, %v10019_v56  ;;  %v1181_v32 = vand.u32 15, %v1082_v41 }
 0x317   :  { %7832 = vmatmul.msk.bf16.gmra.mxu2 %vm1787_vm2, %v14941_v24 }
 0x318   :  { %2212 = vmax.xlane.f32.xlu2 %v2211_v51  ;;  %v1153_v51 = vand.u32 15, %v1078_v25  ;;  %vm1536_vm4 = vcmp.eq.s32.totalorder %v1181_v32, %v10024_v33  ;;  %vm1535_vm5 = vcmp.eq.s32.totalorder %v1181_v32, %v10022_v48  ;;  %v1083_v32 = vadd.s32 88, %v10019_v56 }
 0x319   :  { %v2002_v2 = vpop.f32.mrf.mxu3  ;;  %v10231_v41 = vsel %vm1536_vm4, 0.0, %v14923_v14 }
 0x31a   :  { %v10195_v13 = vpop.f32.mrf.mxu2  ;;  %vm1528_vm1 = vcmp.eq.s32.totalorder %v1153_v51, %v10024_v33  ;;  %vm1527_vm3 = vcmp.eq.s32.totalorder %v1153_v51, %v10022_v48  ;;  %v14948_v51 = vld [vmem:[#allocation25_spill] sm:$0xff]  ;;  %14949 = vst [vmem:[#allocation82_spill] sm:$0xff] %v10231_v41 }
 0x31b   :  { %14942 = vst [vmem:[#allocation20_spill] sm:$0xff] %v10195_v13  ;;  %v10208_v35 = vsel %vm1528_vm1, 0.0, %v14923_v14  ;;  %v10212_v25 = vsel %vm1527_vm3, 0.0, %v14923_v14  ;;  %v1080_v13 = vadd.s32 64, %v10019_v56 }
 0x31c   :  { %3986 = vrot.lane.b32.xlu0 %v9903_v10, %s8927_s16  ;;  %v14943_v10 = vld [vmem:[#allocation38_spill] sm:$0xff]  ;;  %14944 = vst [vmem:[#allocation78_spill] sm:$0xff] %v10208_v35  ;;  %v10221_v29 = vadd.f32 %v2074_v0, %v10212_v25  ;;  %v2082_v0 = vmul.f32 0.17677669, %v9996_v6 }
 0x31d   :  { %14945 = vst [vmem:[#allocation79_spill] sm:$0xff] %v10212_v25  ;;  %v1167_v54 = vand.u32 15, %v1080_v13  ;;  %v10238_v13 = vsel %vm1535_vm5, 0.0, %v14923_v14 }
 0x31e   :  { %14947 = vst [vmem:[#allocation81_spill] sm:$0xff] %v10221_v29 }
 0x31f   :  { %vm1532_vm6 = vcmp.eq.s32.totalorder %v1167_v54, %v10024_v33  ;;  %vm1531_vm7 = vcmp.eq.s32.totalorder %v1167_v54, %v10022_v48  ;;  %14950 = vst [vmem:[#allocation83_spill] sm:$0xff] %v10238_v13 }
 0x320   :  { %v10242_v25 = vsel %vm1532_vm6, 0.0, %v14923_v14  ;;  %v10249_v6 = vsel %vm1531_vm7, 0.0, %v14923_v14 }
 0x321   :  { %v10191_v3 = vpop.f32.mrf.mxu3  ;;  %14951 = vst [vmem:[#allocation84_spill] sm:$0xff] %v10242_v25 }
 0x322   :  { %14953 = vst [vmem:[#allocation86_spill] sm:$0xff] %v10249_v6 }
 0x326   :  { %7825 = vmatmul.msk.bf16.gmra.mxu3 %vm1787_vm2, %v14919_v22  ;;  %v10205_v22 = vpop.f32.mrf.mxu2 }
 0x327   :  { %7833 = vmatmul.msk.bf16.gmra.mxu2 %vm1787_vm2, %v9824_v44 }
 0x329   :  { %v2007_v12 = vpop.f32.mrf.mxu3 }
 0x32a   :  { %v2083_v49 = vmul.f32 0.17677669, %v2007_v12  ;;  %v2079_v12 = vmul.f32 0.17677669, %v2002_v2  ;;  %v1188_v2 = vand.u32 15, %v1083_v32 }
 0x32c   :  { %v10255_v54 = vadd.f32 %v2079_v12, %v10242_v25  ;;  %vm1538_vm8 = vcmp.eq.s32.totalorder %v1188_v2, %v10024_v33  ;;  %vm1537_vm9 = vcmp.eq.s32.totalorder %v1188_v2, %v10022_v48 }
 0x32d   :  { %v10272_v32 = vsel %vm1538_vm8, 0.0, %v14923_v14 }
 0x32e   :  { %14955 = vst [vmem:[#allocation88_spill] sm:$0xff] %v10255_v54 }
 0x32f   :  { %14957 = vst [vmem:[#allocation90_spill] sm:$0xff] %v10272_v32 }
 0x330   :  { %3970 = vrot.lane.b32.xlu2 %v14943_v10, %s8927_s16  ;;  %v10216_v10 = vadd.f32 %v2075_v17, %v10208_v35  ;;  %v10245_v35 = vadd.f32 %v2083_v49, %v10231_v41  ;;  %s8934_s16 = smov 8  }
 0x331   :  { %v2009_v38 = vpop.f32.mrf.mxu3 }
 0x332   :  { %14946 = vst [vmem:[#allocation80_spill] sm:$0xff] %v10216_v10  ;;  %v2208_v17 = vmax.f32 %v10221_v29, %v10216_v10  ;;  %v2085_v41 = vmul.f32 0.17677669, %v2009_v38  ;;  %v1087_v38 = vadd.s32 120, %v10019_v56 }
 0x333   :  { %14952 = vst [vmem:[#allocation85_spill] sm:$0xff] %v10245_v35 }
 0x336   :  { %7826 = vmatmul.msk.bf16.gmra.mxu3 %vm1787_vm2, %v9845_v50  ;;  %v10234_v50 = vpop.f32.mrf.mxu2 }
 0x337   :  { %7834 = vmatmul.msk.bf16.gmra.mxu2 %vm1787_vm2, %v14948_v51  ;;  %v2078_v51 = vmul.f32 0.17677669, %v9986_v37  ;;  %v1084_v37 = vadd.s32 96, %v10019_v56 }
 0x339   :  { %v2012_v20 = vpop.f32.mrf.mxu3  ;;  %v10262_v49 = vadd.f32 %v2078_v51, %v10249_v6  ;;  %v2084_v51 = vmul.f32 0.17677669, %v9999_v7  ;;  %v1195_v2 = vand.u32 15, %v1084_v37  ;;  %v10285_v6 = vadd.f32 %v2085_v41, %v10272_v32 }
 0x33b   :  { %2209 = vmax.xlane.f32.xlu1 %v2208_v17  ;;  %v10252_v17 = vadd.f32 %v2082_v0, %v10238_v13  ;;  %14956 = vst [vmem:[#allocation89_spill] sm:$0xff] %v10262_v49  ;;  %v2214_v0 = vmax.f32 %v10262_v49, %v10255_v54  ;;  %v1081_v13 = vadd.s32 72, %v10019_v56  ;;  %vm1540_vm10 = vcmp.eq.s32.totalorder %v1195_v2, %v10024_v33 }
 0x33c   :  { %14959 = vst [vmem:[#allocation92_spill] sm:$0xff] %v10285_v6  ;;  %vm1539_vm11 = vcmp.eq.s32.totalorder %v1195_v2, %v10022_v48  ;;  %v10298_v41 = vsel %vm1540_vm10, 0.0, %v14923_v14 }
 0x33d   :  { %14954 = vst [vmem:[#allocation87_spill] sm:$0xff] %v10252_v17  ;;  %v2220_v29 = vmax.f32 %v10252_v17, %v10245_v35  ;;  %v1174_v35 = vand.u32 15, %v1081_v13  ;;  %v1086_v17 = vadd.s32 112, %v10019_v56 }
 0x33e   :  { %v10269_v12 = vpop.f32.mrf.mxu2  ;;  %14962 = vst [vmem:[#allocation95_spill] sm:$0xff] %v10298_v41 }
 0x33f   :  { %vm10301_vm12 = vcmp.eq.s32.totalorder %v1174_v35, %v10022_v48  ;;  %vm1534_vm13 = vcmp.eq.s32.totalorder %v1174_v35, %v10024_v33  ;;  %v1209_v2 = vand.u32 15, %v1086_v17 }
 0x341   :  { %v10257_v10 = vpop.f32.mrf.mxu3  ;;  %vm1544_vm0 = vcmp.eq.s32.totalorder %v1209_v2, %v10024_v33  ;;  %vm1543_vm1 = vcmp.eq.s32.totalorder %v1209_v2, %v10022_v48 }
 0x343   :  { %2221 = vmax.xlane.f32.xlu1 %v2220_v29  ;;  %v10282_v29 = vsel %vm1537_vm9, 0.0, %v14923_v14 }
 0x344   :  { %14958 = vst [vmem:[#allocation91_spill] sm:$0xff] %v10282_v29  ;;  %v10289_v7 = vadd.f32 %v2084_v51, %v10282_v29  ;;  %v2086_v51 = vmul.f32 0.17677669, %v10007_v23  ;;  %v2081_v29 = vmul.f32 0.17677669, %v10191_v3  ;;  %v10321_v23 = vsel %vm1534_vm13, 0.0, %v14923_v14 }
 0x345   :  { %14967 = vst [vmem:[#allocation98_spill] sm:$0xff] %v10321_v23  ;;  %v10333_v3 = vsel %vm10301_vm12, 0.0, %v14923_v14 }
 0x346   :  { %7827 = vmatmul.msk.bf16.gmra.mxu3 %vm1787_vm2, %v9859_v27  ;;  %2215 = vmax.xlane.f32.xlu0 %v2214_v0  ;;  %14960 = vst [vmem:[#allocation93_spill] sm:$0xff] %v10289_v7  ;;  %v1216_v0 = vand.u32 15, %v1087_v38  ;;  %v10291_v27 = vpop.permute.xlu0 %3022  ;;  %v2223_v37 = vmax.f32 %v10289_v7, %v10285_v6  ;;  %v10311_v38 = vsel %vm1539_vm11, 0.0, %v14923_v14  ;;  %v10314_v32 = vpop.f32.mrf.mxu2  ;;  %v10342_v54 = vadd.f32 %v2081_v29, %v10321_v23 }
 0x347   :  { %7835 = vmatmul.msk.bf16.gmra.mxu2 %vm1787_vm2, %v9953_v4  ;;  %14961 = vst [vmem:[#allocation94_spill] sm:$0xff] %v10291_v27  ;;  %v2087_v4 = vmul.f32 0.17677669, %v2012_v20  ;;  %v1085_v20 = vadd.s32 104, %v10019_v56  ;;  %v2092_v27 = vmul.f32 0.17677669, %v10031_v40  ;;  %v10336_v40 = vadd.f32 %v2086_v51, %v10311_v38 }
 0x348   :  { %vm1545_vm14 = vcmp.eq.s32.totalorder %v1216_v0, %v10022_v48  ;;  %vm1546_vm15 = vcmp.eq.s32.totalorder %v1216_v0, %v10024_v33  ;;  %14965 = vst [vmem:[#allocation96_spill] sm:$0xff] %v10311_v38  ;;  %v2080_v0 = vmul.f32 0.17677669, %v9989_v19  ;;  %v1088_v19 = vadd.s32 128, %v10019_v56 }
 0x349   :  { %v2017_v25 = vpop.f32.mrf.mxu3  ;;  %14966 = vst [vmem:[#allocation97_spill] sm:$0xff] %v10314_v32  ;;  %v10318_v35 = vadd.f32 %v2087_v4, %v10298_v41  ;;  %v10325_v6 = vsel %vm1545_vm14, 0.0, %v14923_v14  ;;  %v10328_v17 = vsel %vm1546_vm15, 0.0, %v14923_v14  ;;  %v1202_v41 = vand.u32 15, %v1085_v20 }
 0x34a   :  { %14968 = vst [vmem:[#allocation99_spill] sm:$0xff] %v10325_v6  ;;  %v2091_v49 = vmul.f32 0.17677669, %v2017_v25  ;;  %v10347_v32 = vadd.f32 %v2092_v27, %v10325_v6  ;;  %v10353_v20 = vsel %vm1544_vm0, 0.0, %v14923_v14  ;;  %v10356_v2 = vadd.f32 %v2080_v0, %v10333_v3 }
 0x34b   :  { %14969 = vst [vmem:[#allocation100_spill] sm:$0xff] %v10328_v17  ;;  %v2226_v13 = vmax.f32 %v10336_v40, %v10318_v35  ;;  %vm1542_vm3 = vcmp.eq.s32.totalorder %v1202_v41, %v10024_v33  ;;  %v10360_v29 = vsel %vm1543_vm1, 0.0, %v14923_v14  ;;  %v2090_v25 = vmul.f32 0.17677669, %v10017_v39 }
 0x34c   :  { %14970 = vst [vmem:[#allocation101_spill] sm:$0xff] %v10333_v3  ;;  %vm10368_vm4 = vcmp.eq.s32.totalorder %v1202_v41, %v10022_v48  ;;  %v1223_v0 = vand.u32 15, %v1088_v19  ;;  %v2217_v39 = vmax.f32 %v10356_v2, %v10342_v54  ;;  %v10382_v41 = vsel %vm1542_vm3, 0.0, %v14923_v14 }
 0x34d   :  { %14971 = vst [vmem:[#allocation102_spill] sm:$0xff] %v10353_v20 }
 0x34e   :  { %2224 = vmax.xlane.f32.xlu0 %v2223_v37  ;;  %14972 = vst [vmem:[#allocation103_spill] sm:$0xff] %v10360_v29  ;;  %v10385_v19 = vpop.f32.mrf.mxu2  ;;  %vm1548_vm5 = vcmp.eq.s32.totalorder %v1223_v0, %v10024_v33  ;;  %vm10398_vm6 = vcmp.eq.s32.totalorder %v1223_v0, %v10022_v48  ;;  %v1090_v0 = vadd.s32 144, %v10019_v56 }
 0x34f   :  { %14975 = vst [vmem:[#allocation104_spill] sm:$0xff] %v10382_v41  ;;  %v10412_v3 = vsel %vm1548_vm5, 0.0, %v14923_v14 }
 0x350   :  { %14980 = vst [vmem:[#allocation107_spill] sm:$0xff] %v10412_v3 }
 0x351   :  { %v2019_v37 = vpop.f32.mrf.mxu3 }
 0x352   :  { %v2093_v4 = vmul.f32 0.17677669, %v2019_v37 }
 0x353   :  { %v2192_v7 = vpop.xlane.xlu0 %2191 }
 0x354   :  { %v10350_v51 = vadd.f32 %v2093_v4, %v10328_v17  ;;  %v2089_v4 = vmul.f32 0.17677669, %v10257_v10  ;;  %v2286_v6 = vsub.f32 %v10043_v18, %v2192_v7  ;;  %v10388_v18 = vadd.f32 %v2090_v25, %v10360_v29 }
 0x355   :  { %v2287_v17 = vsub.f32 %v10046_v16, %v2192_v7  ;;  %v2094_v29 = vmul.f32 0.17677669, %v10054_v61 }
 0x356   :  { %7844 = vmatmul.msk.bf16.vlgmr.msrb.gmra.mxu3 %vm1787_vm2, %v14920_v60  ;;  %2227 = vmax.xlane.f32.xlu0 %v2226_v13  ;;  %v2235_v27 = vmax.f32 %v10347_v32, %v10350_v51  ;;  %v10379_v60 = vadd.f32 %v2091_v49, %v10353_v20  ;;  %v2088_v13 = vmul.f32 0.17677669, %v10011_v62  ;;  %v10395_v49 = vsel %vm10368_vm4, 0.0, %v14923_v14 }
 0x357   :  { %7836 = vmatmul.msk.bf16.gmra.mxu2 %vm1787_vm2, %v9931_v34  ;;  %14976 = vst [vmem:[#allocation105_spill] sm:$0xff] %v10395_v49  ;;  %v2350_v62 = vmul.f32 1.442695, %v2286_v6 }
 0x358   :  { %2236 = vmax.xlane.f32.xlu1 %v2235_v27  ;;  %v2232_v37 = vmax.f32 %v10388_v18, %v10379_v60  ;;  %v10415_v6 = vadd.f32 %v2088_v13, %v10395_v49 }
 0x359   :  { %v2022_v10 = vpop.f32.mrf.mxu3  ;;  %2218 = vmax.xlane.f32.xlu2 %v2217_v39  ;;  %v10403_v39 = vadd.f32 %v2089_v4, %v10382_v41  ;;  %v2352_v4 = vmul.f32 1.442695, %v2287_v17  ;;  %8066 = vpow2.f32 %v2350_v62  ;;  %v1089_v62 = vadd.s32 136, %v10019_v56 }
 0x35a   :  { %v2095_v25 = vmul.f32 0.17677669, %v2022_v10  ;;  %14981 = vst [vmem:[#allocation108_spill] sm:$0xff] %v10415_v6 }
 0x35b   :  { %v2195_v20 = vpop.xlane.xlu0 %2194  ;;  %14979 = vst [vmem:[#allocation106_spill] sm:$0xff] %v10403_v39 }
 0x35c   :  { %v2288_v16 = vsub.f32 %v10063_v31, %v2195_v20  ;;  %v2289_v7 = vsub.f32 %v10066_v36, %v2195_v20  ;;  %v10420_v31 = vsel %vm10398_vm6, 0.0, %v14923_v14  ;;  %v2229_v36 = vmax.f32 %v10415_v6, %v10403_v39 }
 0x35d   :  { %14982 = vst [vmem:[#allocation109_spill] sm:$0xff] %v10420_v31  ;;  %v10425_v61 = vadd.f32 %v2095_v25, %v10412_v3  ;;  %v1237_v20 = vand.u32 15, %v1090_v0  ;;  %v10428_v17 = vadd.f32 %v2094_v29, %v10420_v31  ;;  %v2098_v0 = vmul.f32 0.17677669, %v10110_v42 }
 0x35e   :  { %v2354_v41 = vmul.f32 1.442695, %v2288_v16  ;;  %v2356_v10 = vmul.f32 1.442695, %v2289_v7  ;;  %2233 = vmax.xlane.f32.xlu0 %v2232_v37  ;;  %v10430_v16 = vpop.f32.mrf.mxu2 }
 0x35f   :  { %14983 = vst [vmem:[#allocation110_spill] sm:$0xff] %v10425_v61  ;;  %v2238_v7 = vmax.f32 %v10428_v17, %v10425_v61  ;;  %v10435_v37 = vpop.eup %8066  ;;  %vm1551_vm7 = vcmp.eq.s32.totalorder %v1237_v20, %v10022_v48  ;;  %vm1552_vm8 = vcmp.eq.s32.totalorder %v1237_v20, %v10024_v33 }
 0x360   :  { %8068 = vpow2.f32 %v2354_v41  ;;  %14984 = vst [vmem:[#allocation111_spill] sm:$0xff] %v10428_v17  ;;  %v10458_v20 = vsel %vm1552_vm8, 0.0, %v14923_v14 }
 0x361   :  { %8070 = vpow2.f32 %v2356_v10  ;;  %v2024_v13 = vpop.f32.mrf.mxu3  ;;  %2230 = vmax.xlane.f32.xlu2 %v2229_v36  ;;  %v1230_v10 = vand.u32 15, %v1089_v62  ;;  %14986 = vst [vmem:[#allocation113_spill] sm:$0xff] %v10458_v20 }
 0x362   :  { %8072 = vpow2.f32 %v2352_v4  ;;  %v2097_v49 = vmul.f32 0.17677669, %v2024_v13 }
 0x363   :  { %v2198_v27 = vpop.xlane.xlu0 %2197  ;;  %vm1550_vm9 = vcmp.eq.s32.totalorder %v1230_v10, %v10024_v33  ;;  %vm1549_vm10 = vcmp.eq.s32.totalorder %v1230_v10, %v10022_v48 }
 0x364   :  { %v2290_v25 = vsub.f32 %v10087_v47, %v2198_v27  ;;  %v2291_v4 = vsub.f32 %v10090_v59, %v2198_v27  ;;  %v10453_v47 = vsel %vm1551_vm7, 0.0, %v14923_v14 }
 0x365   :  { %14985 = vst [vmem:[#allocation112_spill] sm:$0xff] %v10453_v47  ;;  %v10462_v59 = vadd.f32 %v2098_v0, %v10453_v47  ;;  %v10476_v0 = vsel %vm1550_vm9, 0.0, %v14923_v14 }
 0x366   :  { %v10438_v41 = vpop.eup %8068  ;;  %7845 = vmatmul.msk.bf16.gmra.mxu3 %vm1787_vm2, %v14926_v45  ;;  %2239 = vmax.xlane.f32.xlu0 %v2238_v7  ;;  %v2358_v31 = vmul.f32 1.442695, %v2290_v25  ;;  %v2360_v27 = vmul.f32 1.442695, %v2291_v4  ;;  %v10473_v38 = vpop.f32.mrf.mxu2  ;;  %14989 = vst [vmem:[#allocation116_spill] sm:$0xff] %v10476_v0 }
 0x367   :  { %v10444_v29 = vpop.eup %8070  ;;  %7837 = vmatmul.msk.bf16.gmra.mxu2 %vm1787_vm2, %v9961_v11  ;;  %14987 = vst [vmem:[#allocation114_spill] sm:$0xff] %v10462_v59  ;;  %v2096_v4 = vmul.f32 0.17677669, %v10084_v46 }
 0x368   :  { %v10450_v36 = vpop.eup %8072  ;;  %v2481_v45 = vadd.f32 %v10444_v29, %v10438_v41  ;;  %8074 = vpow2.f32 %v2358_v31 }
 0x369   :  { %v2027_v7 = vpop.f32.mrf.mxu3  ;;  %v2478_v3 = vadd.f32 %v10450_v36, %v10435_v37  ;;  %8076 = vpow2.f32 %v2360_v27 }
 0x36a   :  { %v2099_v42 = vmul.f32 0.17677669, %v2027_v7  ;;  %2482 = vadd.xlane.f32.xlu1 %v2481_v45  ;;  %v1092_v7 = vadd.s32 160, %v10019_v56 }
 0x36b   :  { %v2201_v62 = vpop.xlane.xlu1 %2200 }
 0x36c   :  { %v10468_v23 = vadd.f32 %v2099_v42, %v10458_v20  ;;  %v2292_v25 = vsub.f32 %v10105_v21, %v2201_v62  ;;  %v2293_v45 = vsub.f32 %v10108_v58, %v2201_v62  ;;  %v10482_v21 = vsel %vm1549_vm10, 0.0, %v14923_v14 }
 0x36d   :  { %14990 = vst [vmem:[#allocation117_spill] sm:$0xff] %v10482_v21  ;;  %v1091_v58 = vadd.s32 152, %v10019_v56  ;;  %v10486_v42 = vadd.f32 %v2097_v49, %v10476_v0  ;;  %v1251_v62 = vand.u32 15, %v1092_v7  ;;  %v10489_v46 = vadd.f32 %v2096_v4, %v10482_v21 }
 0x36e   :  { %14988 = vst [vmem:[#allocation115_spill] sm:$0xff] %v10468_v23  ;;  %v2362_v47 = vmul.f32 1.442695, %v2292_v25  ;;  %2479 = vadd.xlane.f32.xlu0 %v2478_v3  ;;  %v2244_v13 = vmax.f32 %v10462_v59, %v10468_v23  ;;  %v2364_v10 = vmul.f32 1.442695, %v2293_v45  ;;  %v10491_v27 = vpop.eup %8074  ;;  %v1093_v49 = vadd.s32 168, %v10019_v56  ;;  %v10505_v4 = vpop.f32.mrf.mxu2 }
 0x36f   :  { %v1244_v31 = vand.u32 15, %v1091_v58  ;;  %v2241_v25 = vmax.f32 %v10489_v46, %v10486_v42  ;;  %v10495_v45 = vpop.eup %8076  ;;  %vm1555_vm11 = vcmp.eq.s32.totalorder %v1251_v62, %v10022_v48  ;;  %vm1556_vm13 = vcmp.eq.s32.totalorder %v1251_v62, %v10024_v33 }
 0x370   :  { %8078 = vpow2.f32 %v2362_v47  ;;  %v2102_v7 = vmul.f32 0.17677669, %v10160_v43 }
 0x371   :  { %v2029_v20 = vpop.f32.mrf.mxu3  ;;  %8080 = vpow2.f32 %v2364_v10  ;;  %vm1554_vm12 = vcmp.eq.s32.totalorder %v1244_v31, %v10024_v33  ;;  %vm1553_vm14 = vcmp.eq.s32.totalorder %v1244_v31, %v10022_v48  ;;  %v1258_v31 = vand.u32 15, %v1093_v49 }
 0x372   :  { %2245 = vmax.xlane.f32.xlu1 %v2244_v13  ;;  %v2101_v13 = vmul.f32 0.17677669, %v2029_v20  ;;  %v10519_v43 = vsel %vm1554_vm12, 0.0, %v14923_v14  ;;  %v10525_v20 = vsel %vm1556_vm13, 0.0, %v14923_v14  ;;  %v10528_v0 = vsel %vm1553_vm14, 0.0, %v14923_v14 }
 0x373   :  { %v2204_v3 = vpop.xlane.xlu2 %2203  ;;  %14992 = vst [vmem:[#allocation119_spill] sm:$0xff] %v10519_v43  ;;  %vm1557_vm15 = vcmp.eq.s32.totalorder %v1258_v31, %v10022_v48  ;;  %vm1558_vm0 = vcmp.eq.s32.totalorder %v1258_v31, %v10024_v33 }
 0x374   :  { %v2294_v47 = vsub.f32 %v10129_v8, %v2204_v3  ;;  %v2295_v10 = vsub.f32 %v10132_v1, %v2204_v3  ;;  %v10514_v8 = vsel %vm1555_vm11, 0.0, %v14923_v14  ;;  %v2100_v1 = vmul.f32 0.17677669, %v10138_v52  ;;  %14993 = vst [vmem:[#allocation120_spill] sm:$0xff] %v10525_v20 }
 0x375   :  { %14991 = vst [vmem:[#allocation118_spill] sm:$0xff] %v10514_v8  ;;  %v10531_v23 = vadd.f32 %v2102_v7, %v10514_v8  ;;  %v10534_v17 = vadd.f32 %v2101_v13, %v10519_v43 }
 0x376   :  { %7846 = vmatmul.msk.bf16.gmra.mxu3 %vm1787_vm2, %v14931_v63  ;;  %2242 = vmax.xlane.f32.xlu0 %v2241_v25  ;;  %v10511_v58 = vpop.eup %8078  ;;  %v2484_v63 = vadd.f32 %v10495_v45, %v10491_v27  ;;  %v2366_v25 = vmul.f32 1.442695, %v2294_v47  ;;  %14994 = vst [vmem:[#allocation121_spill] sm:$0xff] %v10528_v0  ;;  %v2368_v59 = vmul.f32 1.442695, %v2295_v10  ;;  %v10545_v7 = vadd.f32 %v2100_v1, %v10528_v0  ;;  %v10554_v10 = vpop.f32.mrf.mxu2 }
 0x377   :  { %7838 = vmatmul.msk.bf16.gmra.mxu2 %vm1787_vm2, %v9933_v30  ;;  %v10521_v62 = vpop.eup %8080  ;;  %14995 = vst [vmem:[#allocation122_spill] sm:$0xff] %v10554_v10 }
 0x378   :  { %v2487_v47 = vadd.f32 %v10521_v62, %v10511_v58  ;;  %8082 = vpow2.f32 %v2366_v25 }
 0x379   :  { %v2032_v3 = vpop.f32.mrf.mxu3  ;;  %8084 = vpow2.f32 %v2368_v59 }
 0x37a   :  { %v2103_v21 = vmul.f32 0.17677669, %v2032_v3  ;;  %2485 = vadd.xlane.f32.xlu1 %v2484_v63  ;;  %v1094_v63 = vadd.s32 176, %v10019_v56  ;;  %v10557_v3 = vsel %vm1557_vm15, 0.0, %v14923_v14 }
 0x37b   :  { %v2207_v61 = vpop.xlane.xlu0 %2206  ;;  %14996 = vst [vmem:[#allocation123_spill] sm:$0xff] %v10557_v3 }
 0x37c   :  { %v10537_v52 = vadd.f32 %v2103_v21, %v10525_v20  ;;  %v2296_v39 = vsub.f32 %v10148_v55, %v2207_v61  ;;  %v2297_v49 = vsub.f32 %v10151_v28, %v2207_v61  ;;  %v2104_v28 = vmul.f32 0.17677669, %v10173_v5 }
 0x37d   :  { %v2247_v61 = vmax.f32 %v10545_v7, %v10534_v17  ;;  %v1265_v31 = vand.u32 15, %v1094_v63 }
 0x37e   :  { %v2370_v13 = vmul.f32 1.442695, %v2296_v39  ;;  %v2372_v21 = vmul.f32 1.442695, %v2297_v49  ;;  %2488 = vadd.xlane.f32.xlu0 %v2487_v47  ;;  %v2250_v55 = vmax.f32 %v10531_v23, %v10537_v52  ;;  %v10560_v39 = vsel %vm1558_vm0, 0.0, %v14923_v14  ;;  %v10562_v5 = vpop.eup %8082  ;;  %v10595_v8 = vpop.f32.mrf.mxu2 }
 0x37f   :  { %14997 = vst [vmem:[#allocation124_spill] sm:$0xff] %v10560_v39  ;;  %v10565_v49 = vadd.f32 %v2104_v28, %v10557_v3  ;;  %vm1559_vm1 = vcmp.eq.s32.totalorder %v1265_v31, %v10022_v48  ;;  %vm1560_vm3 = vcmp.eq.s32.totalorder %v1265_v31, %v10024_v33  ;;  %v2106_v28 = vmul.f32 0.17677669, %v10189_v26 }
 0x380   :  { %8086 = vpow2.f32 %v2370_v13  ;;  %2251 = vmax.xlane.f32.xlu2 %v2250_v55  ;;  %v10570_v13 = vpop.eup %8084  ;;  %15003 = vst [vmem:[#allocation130_spill] sm:$0xff] %v10595_v8  ;;  %v1096_v3 = vadd.s32 192, %v10019_v56 }
 0x381   :  { %8088 = vpow2.f32 %v2372_v21  ;;  %v2034_v1 = vpop.f32.mrf.mxu3  ;;  %14998 = vst [vmem:[#allocation125_spill] sm:$0xff] %v10565_v49 }
 0x382   :  { %v2105_v25 = vmul.f32 0.17677669, %v2034_v1  ;;  %2248 = vmax.xlane.f32.xlu1 %v2247_v61  ;;  %v2490_v1 = vadd.f32 %v10570_v13, %v10562_v5 }
 0x383   :  { %v3989_v59 = vpop.permute.xlu1 %3988 }
 0x384   :  { %4113 = vmatpush.bf16.msrb.mxu1 %v3989_v59  ;;  %v10568_v47 = vadd.f32 %v2105_v25, %v10560_v39  ;;  %v10593_v25 = vsel %vm1560_vm3, 0.0, %v14923_v14 }
 0x385   :  { %15002 = vst [vmem:[#allocation129_spill] sm:$0xff] %v10593_v25 }
 0x386   :  { %14999 = vst [vmem:[#allocation126_spill] sm:$0xff] %v10568_v47  ;;  %v10572_v21 = vpop.eup %8086  ;;  %7847 = vmatmul.msk.bf16.gmra.mxu3 %vm1787_vm2, %v14936_v9  ;;  %v2253_v63 = vmax.f32 %v10565_v49, %v10568_v47  ;;  %v10590_v9 = vsel %vm1559_vm1, 0.0, %v14923_v14  ;;  %v10610_v0 = vpop.f32.mrf.mxu2 }
 0x387   :  { %v10580_v55 = vpop.eup %8088  ;;  %7839 = vmatmul.msk.bf16.gmra.mxu2 %vm1787_vm2, %v9943_v57  ;;  %15001 = vst [vmem:[#allocation128_spill] sm:$0xff] %v10590_v9 }
 0x388   :  { %15000 = vst [vmem:[#allocation127_spill] sm:$0xff] %v10580_v55  ;;  %2254 = vmax.xlane.f32.xlu2 %v2253_v63  ;;  %v2493_v61 = vadd.f32 %v10580_v55, %v10572_v21  ;;  %v10600_v63 = vadd.f32 %v2106_v28, %v10590_v9  ;;  %v1097_v28 = vadd.s32 200, %v10019_v56 }
 0x389   :  { %v2037_v31 = vpop.f32.mrf.mxu3 }
 0x38a   :  { %v2107_v59 = vmul.f32 0.17677669, %v2037_v31  ;;  %2494 = vadd.xlane.f32.xlu0 %v2493_v61  ;;  %2491 = vadd.xlane.f32.xlu1 %v2490_v1  ;;  %v1279_v61 = vand.u32 15, %v1096_v3  ;;  %v1286_v9 = vand.u32 15, %v1097_v28 }
 0x38b   :  { %v10597_v26 = vpop.xlane.xlu2 %2212 }
 0x38c   :  { %v10603_v20 = vadd.f32 %v2107_v59, %v10593_v25  ;;  %vm1563_vm4 = vcmp.eq.s32.totalorder %v1279_v61, %v10022_v48  ;;  %vm1564_vm5 = vcmp.eq.s32.totalorder %v1279_v61, %v10024_v33  ;;  %v1098_v25 = vadd.s32 208, %v10019_v56 }
 0x38d   :  { %v10624_v3 = vsel %vm1564_vm5, 0.0, %v14923_v14  ;;  %vm1565_vm6 = vcmp.eq.s32.totalorder %v1286_v9, %v10022_v48  ;;  %vm1566_vm7 = vcmp.eq.s32.totalorder %v1286_v9, %v10024_v33  ;;  %v1099_v9 = vadd.s32 216, %v10019_v56 }
 0x38e   :  { %v3987_v39 = vpop.permute.xlu0 %3986  ;;  %v2256_v43 = vmax.f32 %v10600_v63, %v10603_v20  ;;  %15005 = vst [vmem:[#allocation132_spill] sm:$0xff] %v10624_v3  ;;  %v10637_v8 = vpop.f32.mrf.mxu2 }
 0x38f   :  { %4114 = vmatpush.bf16.msrb.mxu1 %v3987_v39  ;;  %v2110_v39 = vmul.f32 0.17677669, %v10205_v22 }
 0x391   :  { %v10608_v31 = vpop.f32.mrf.mxu3 }
 0x392   :  { %2257 = vmax.xlane.f32.xlu0 %v2256_v43  ;;  %v10621_v43 = vsel %vm1563_vm4, 0.0, %v14923_v14 }
 0x393   :  { %v3971_v1 = vpop.permute.xlu2 %3970  ;;  %15004 = vst [vmem:[#allocation131_spill] sm:$0xff] %v10621_v43 }
 0x394   :  { %4025 = vmatpush.bf16.msrb.mxu0 %v3971_v1 }
 0x396   :  { %7848 = vmatmul.msk.bf16.gmra.mxu3 %vm1787_vm2, %v14941_v24  ;;  %v10627_v24 = vadd.f32 %v2110_v39, %v10621_v43  ;;  %v10641_v39 = vsel %vm1565_vm6, 0.0, %v14923_v14  ;;  %v1293_v43 = vand.u32 15, %v1098_v25  ;;  %v2114_v25 = vmul.f32 0.17677669, %v10269_v12 }
 0x397   :  { %7840 = vmatmul.msk.bf16.gmra.mxu2 %vm1787_vm2, %v9976_v53  ;;  %15008 = vst [vmem:[#allocation135_spill] sm:$0xff] %v10641_v39 }
 0x398   :  { %15006 = vst [vmem:[#allocation133_spill] sm:$0xff] %v10627_v24  ;;  %vm1567_vm8 = vcmp.eq.s32.totalorder %v1293_v43, %v10022_v48  ;;  %vm1568_vm9 = vcmp.eq.s32.totalorder %v1293_v43, %v10024_v33 }
 0x399   :  { %v2042_v59 = vpop.f32.mrf.mxu3 }
 0x39a   :  { %v2111_v1 = vmul.f32 0.17677669, %v2042_v59  ;;  %v2112_v59 = vmul.f32 0.17677669, %v10234_v50 }
 0x39c   :  { %v10630_v61 = vadd.f32 %v2111_v1, %v10624_v3  ;;  %v10644_v1 = vsel %vm1566_vm7, 0.0, %v14923_v14  ;;  %v10647_v10 = vadd.f32 %v2112_v59, %v10641_v39  ;;  %v1300_v39 = vand.u32 15, %v1099_v9 }
 0x39d   :  { %15009 = vst [vmem:[#allocation136_spill] sm:$0xff] %v10644_v1 }
 0x39e   :  { %15007 = vst [vmem:[#allocation134_spill] sm:$0xff] %v10630_v61  ;;  %v2262_v22 = vmax.f32 %v10627_v24, %v10630_v61  ;;  %vm1569_vm10 = vcmp.eq.s32.totalorder %v1300_v39, %v10022_v48  ;;  %vm1570_vm11 = vcmp.eq.s32.totalorder %v1300_v39, %v10024_v33  ;;  %v1095_v39 = vadd.s32 184, %v10019_v56 }
 0x39f   :  { %15010 = vst [vmem:[#allocation137_spill] sm:$0xff] %v10647_v10 }
 0x3a0   :  { %2263 = vmax.xlane.f32.xlu1 %v2262_v22  ;;  %v10665_v22 = vpop.f32.mrf.mxu2 }
 0x3a1   :  { %v2044_v28 = vpop.f32.mrf.mxu3 }
 0x3a2   :  { %v2113_v3 = vmul.f32 0.17677669, %v2044_v28 }
 0x3a4   :  { %v10650_v53 = vadd.f32 %v2113_v3, %v10644_v1  ;;  %v10663_v3 = vsel %vm1567_vm8, 0.0, %v14923_v14 }
 0x3a5   :  { %15012 = vst [vmem:[#allocation139_spill] sm:$0xff] %v10663_v3  ;;  %v10671_v43 = vadd.f32 %v2114_v25, %v10663_v3 }
 0x3a6   :  { %15011 = vst [vmem:[#allocation138_spill] sm:$0xff] %v10650_v53  ;;  %7849 = vmatmul.msk.bf16.gmra.mxu3 %vm1787_vm2, %v9824_v44  ;;  %v2265_v50 = vmax.f32 %v10647_v10, %v10650_v53  ;;  %v10668_v44 = vsel %vm1568_vm9, 0.0, %v14923_v14  ;;  %v15017_v10 = vld [vmem:[#allocation80_spill] sm:$0xff] }
 0x3a7   :  { %7841 = vmatmul.msk.bf16.gmra.mxu2 %vm1787_vm2, %v9967_v15  ;;  %15013 = vst [vmem:[#allocation140_spill] sm:$0xff] %v10668_v44 }
 0x3a8   :  { %2266 = vmax.xlane.f32.xlu1 %v2265_v50  ;;  %15014 = vst [vmem:[#allocation141_spill] sm:$0xff] %v10671_v43  ;;  %v15016_v50 = vld [vmem:[#allocation81_spill] sm:$0xff] }
 0x3a9   :  { %v2047_v59 = vpop.f32.mrf.mxu3 }
 0x3aa   :  { %v2115_v28 = vmul.f32 0.17677669, %v2047_v59  ;;  %v15018_v59 = vld [vmem:[#allocation97_spill] sm:$0xff] }
 0x3ab   :  { %v2116_v9 = vmul.f32 0.17677669, %v15018_v59 }
 0x3ac   :  { %v10674_v1 = vadd.f32 %v2115_v28, %v10668_v44  ;;  %v10684_v28 = vsel %vm1569_vm10, 0.0, %v14923_v14  ;;  %v10687_v44 = vsel %vm1570_vm11, 0.0, %v14923_v14 }
 0x3ad   :  { %15019 = vst [vmem:[#allocation81_spill] sm:$0xff] %v10684_v28 }
 0x3ae   :  { %15015 = vst [vmem:[#allocation142_spill] sm:$0xff] %v10674_v1  ;;  %v2210_v15 = vpop.xlane.xlu1 %2209  ;;  %v2268_v12 = vmax.f32 %v10671_v43, %v10674_v1  ;;  %v10689_v43 = vpop.f32.mrf.mxu2 }
 0x3af   :  { %v2298_v53 = vsub.f32 %v15016_v50, %v2210_v15  ;;  %v2299_v61 = vsub.f32 %v15017_v10, %v2210_v15  ;;  %15020 = vst [vmem:[#allocation80_spill] sm:$0xff] %v10687_v44  ;;  %v10693_v15 = vadd.f32 %v2116_v9, %v10684_v28  ;;  %v15024_v10 = vld [vmem:[#allocation25_spill] sm:$0xff]  ;;  %v2109_v28 = vmul.f32 0.17677669, %v10608_v31 }
 0x3b0   :  { %2269 = vmax.xlane.f32.xlu2 %v2268_v12  ;;  %15021 = vst [vmem:[#allocation97_spill] sm:$0xff] %v10689_v43  ;;  %v15025_v12 = vld [vmem:[#allocation63_spill] sm:$0xff]  ;;  %v15035_v31 = vld [vmem:[#allocation89_spill] sm:$0xff] }
 0x3b1   :  { %v2374_v25 = vmul.f32 1.442695, %v2298_v53  ;;  %v2376_v3 = vmul.f32 1.442695, %v2299_v61  ;;  %v2049_v24 = vpop.f32.mrf.mxu3  ;;  %15022 = vst [vmem:[#allocation143_spill] sm:$0xff] %v10693_v15 }
 0x3b2   :  { %v2117_v1 = vmul.f32 0.17677669, %v2049_v24  ;;  %v1272_v24 = vand.u32 15, %v1095_v39 }
 0x3b3   :  { %8090 = vpow2.f32 %v2374_v25 }
 0x3b4   :  { %8092 = vpow2.f32 %v2376_v3  ;;  %v10696_v53 = vadd.f32 %v2117_v1, %v10687_v44  ;;  %v15027_v3 = vld [vmem:[#allocation76_spill] sm:$0xff]  ;;  %vm1562_vm12 = vcmp.eq.s32.totalorder %v1272_v24, %v10024_v33  ;;  %vm1561_vm13 = vcmp.eq.s32.totalorder %v1272_v24, %v10022_v48 }
 0x3b5   :  { %v2300_v59 = vsub.f32 %v15027_v3, %v10597_v26  ;;  %v15031_v3 = vld [vmem:[#allocation20_spill] sm:$0xff]  ;;  %v10724_v43 = vsel %vm1561_vm13, 0.0, %v14923_v14 }
 0x3b6   :  { %15023 = vst [vmem:[#allocation144_spill] sm:$0xff] %v10696_v53  ;;  %7850 = vmatmul.msk.bf16.gmra.mxu3 %vm1787_vm2, %v15024_v10  ;;  %v2271_v61 = vmax.f32 %v10693_v15, %v10696_v53  ;;  %v15029_v10 = vld [vmem:[#allocation77_spill] sm:$0xff]  ;;  %v10721_v53 = vpop.f32.mrf.mxu2 }
 0x3b7   :  { %7842 = vmatmul.msk.bf16.gmra.mxu2 %vm1787_vm2, %v15025_v12  ;;  %v2301_v44 = vsub.f32 %v15029_v10, %v10597_v26  ;;  %v2108_v12 = vmul.f32 0.17677669, %v15031_v3  ;;  %15032 = vst [vmem:[#allocation20_spill] sm:$0xff] %v10721_v53  ;;  %v2378_v15 = vmul.f32 1.442695, %v2300_v59  ;;  %v15036_v3 = vld [vmem:[#allocation88_spill] sm:$0xff] }
 0x3b8   :  { %2272 = vmax.xlane.f32.xlu2 %v2271_v61  ;;  %v10718_v61 = vsel %vm1562_vm12, 0.0, %v14923_v14  ;;  %15033 = vst [vmem:[#allocation145_spill] sm:$0xff] %v10724_v43  ;;  %v15038_v53 = vld [vmem:[#allocation92_spill] sm:$0xff] }
 0x3b9   :  { %v10704_v50 = vpop.eup %8090  ;;  %v2052_v9 = vpop.f32.mrf.mxu3  ;;  %15030 = vst [vmem:[#allocation77_spill] sm:$0xff] %v10718_v61  ;;  %v2380_v6 = vmul.f32 1.442695, %v2301_v44  ;;  %v10727_v26 = vadd.f32 %v2109_v28, %v10718_v61  ;;  %8094 = vpow2.f32 %v2378_v15  ;;  %v1100_v15 = vadd.s32 224, %v10019_v56 }
 0x3ba   :  { %15026 = vst [vmem:[#allocation25_spill] sm:$0xff] %v10704_v50  ;;  %v2216_v25 = vpop.xlane.xlu0 %2215  ;;  %v10709_v1 = vpop.eup %8092 }
 0x3bb   :  { %15028 = vst [vmem:[#allocation76_spill] sm:$0xff] %v10709_v1  ;;  %v2496_v39 = vadd.f32 %v10709_v1, %v10704_v50  ;;  %v2302_v10 = vsub.f32 %v15035_v31, %v2216_v25  ;;  %v10733_v50 = vadd.f32 %v2108_v12, %v10724_v43  ;;  %8096 = vpow2.f32 %v2380_v6  ;;  %v15039_v12 = vld [vmem:[#allocation62_spill] sm:$0xff] }
 0x3bc   :  { %15034 = vst [vmem:[#allocation146_spill] sm:$0xff] %v10727_v26  ;;  %v2303_v59 = vsub.f32 %v15036_v3, %v2216_v25  ;;  %v10747_v3 = vpop.xlane.xlu1 %2221 }
 0x3bd   :  { %2497 = vadd.xlane.f32.xlu0 %v2496_v39  ;;  %v15037_v39 = vld [vmem:[#allocation93_spill] sm:$0xff]  ;;  %v2259_v28 = vmax.f32 %v10733_v50, %v10727_v26  ;;  %v2382_v49 = vmul.f32 1.442695, %v2302_v10 }
 0x3be   :  { %v2384_v55 = vmul.f32 1.442695, %v2303_v59  ;;  %v10745_v25 = vpop.f32.mrf.mxu2 }
 0x3bf   :  { %v10743_v6 = vpop.eup %8094  ;;  %15041 = vst [vmem:[#allocation88_spill] sm:$0xff] %v10745_v25 }
 0x3c0   :  { %15040 = vst [vmem:[#allocation89_spill] sm:$0xff] %v10743_v6 }
 0x3c1   :  { %v10730_v24 = vpop.f32.mrf.mxu3 }
 0x3c2   :  { %v2225_v1 = vpop.xlane.xlu0 %2224 }
 0x3c3   :  { %v2308_v44 = vsub.f32 %v15037_v39, %v2225_v1  ;;  %v2309_v47 = vsub.f32 %v15038_v53, %v2225_v1  ;;  %v15042_v53 = vld [vmem:[#allocation94_spill] sm:$0xff]  ;;  %v10751_v1 = vpop.eup %8096 }
 0x3c4   :  { %15043 = vst [vmem:[#allocation93_spill] sm:$0xff] %v10751_v1 }
 0x3c5   :  { %v2394_v61 = vmul.f32 1.442695, %v2308_v44  ;;  %v2396_v31 = vmul.f32 1.442695, %v2309_v47  ;;  %2260 = vmax.xlane.f32.xlu0 %v2259_v28  ;;  %v1307_v47 = vand.u32 15, %v1100_v15  ;;  %v2499_v44 = vadd.f32 %v10751_v1, %v10743_v6 }
 0x3c6   :  { %7851 = vmatmul.msk.bf16.gmra.mxu3 %vm1787_vm2, %v15039_v12  ;;  %v2118_v6 = vmul.f32 0.17677669, %v10385_v19 }
 0x3c7   :  { %8098 = vpow2.f32 %v2394_v61  ;;  %7843 = vmatmul.msk.bf16.gmra.mxu2 %vm1787_vm2, %v15042_v53  ;;  %vm1572_vm14 = vcmp.eq.s32.totalorder %v1307_v47, %v10024_v33  ;;  %vm10761_vm15 = vcmp.eq.s32.totalorder %v1307_v47, %v10022_v48 }
 0x3c8   :  { %8100 = vpow2.f32 %v2396_v31  ;;  %v10772_v47 = vsel %vm1572_vm14, 0.0, %v14923_v14 }
 0x3c9   :  { %8102 = vpow2.f32 %v2382_v49  ;;  %v2057_v10 = vpop.f32.mrf.mxu3  ;;  %15046 = vst [vmem:[#allocation92_spill] sm:$0xff] %v10772_v47 }
 0x3ca   :  { %v2228_v59 = vpop.xlane.xlu0 %2227  ;;  %8104 = vpow2.f32 %v2384_v55  ;;  %v1101_v55 = vadd.s32 232, %v10019_v56 }
 0x3cb   :  { %v2310_v61 = vsub.f32 %v10336_v40, %v2228_v59  ;;  %v2311_v39 = vsub.f32 %v10318_v35, %v2228_v59  ;;  %v1102_v35 = vadd.s32 240, %v10019_v56  ;;  %v2119_v59 = vmul.f32 0.17677669, %v2052_v9  ;;  %v2237_v53 = vpop.xlane.xlu1 %2236 }
 0x3cc   :  { %v2219_v12 = vpop.xlane.xlu2 %2218  ;;  %v1314_v19 = vand.u32 15, %v1101_v55 }
 0x3cd   :  { %v10758_v28 = vpop.eup %8098  ;;  %v2398_v49 = vmul.f32 1.442695, %v2310_v61  ;;  %v2400_v15 = vmul.f32 1.442695, %v2311_v39  ;;  %v2304_v43 = vsub.f32 %v10356_v2, %v2219_v12  ;;  %v2305_v1 = vsub.f32 %v10342_v54, %v2219_v12  ;;  %2500 = vadd.xlane.f32.xlu0 %v2499_v44 }
 0x3ce   :  { %v10766_v40 = vpop.eup %8100  ;;  %v10784_v54 = vsel %vm10761_vm15, 0.0, %v14923_v14  ;;  %v1321_v2 = vand.u32 15, %v1102_v35  ;;  %v10787_v44 = vadd.f32 %v2119_v59, %v10772_v47  ;;  %vm1574_vm1 = vcmp.eq.s32.totalorder %v1314_v19, %v10024_v33 }
 0x3cf   :  { %8106 = vpow2.f32 %v2398_v49  ;;  %v2511_v61 = vadd.f32 %v10766_v40, %v10758_v28  ;;  %v10776_v39 = vpop.eup %8102  ;;  %v2386_v25 = vmul.f32 1.442695, %v2304_v43  ;;  %v2388_v9 = vmul.f32 1.442695, %v2305_v1  ;;  %15047 = vst [vmem:[#allocation62_spill] sm:$0xff] %v10784_v54 }
 0x3d0   :  { %8108 = vpow2.f32 %v2400_v15  ;;  %v10779_v26 = vpop.eup %8104  ;;  %v2316_v15 = vsub.f32 %v10347_v32, %v2237_v53  ;;  %v10793_v43 = vadd.f32 %v2118_v6, %v10784_v54  ;;  %v2317_v1 = vsub.f32 %v10350_v51, %v2237_v53 }
 0x3d1   :  { %2512 = vadd.xlane.f32.xlu2 %v2511_v61  ;;  %v10789_v49 = vpop.f32.mrf.mxu3  ;;  %8110 = vpow2.f32 %v2386_v25  ;;  %v2502_v31 = vadd.f32 %v10779_v26, %v10776_v39  ;;  %vm1576_vm0 = vcmp.eq.s32.totalorder %v1321_v2, %v10024_v33  ;;  %vm10806_vm3 = vcmp.eq.s32.totalorder %v1321_v2, %v10022_v48 }
 0x3d2   :  { %v2234_v12 = vpop.xlane.xlu0 %2233  ;;  %8112 = vpow2.f32 %v2388_v9  ;;  %v2274_v6 = vmax.f32 %v10793_v43, %v10787_v44  ;;  %vm10814_vm4 = vcmp.eq.s32.totalorder %v1314_v19, %v10022_v48  ;;  %v2123_v53 = vmul.f32 0.17677669, %v2057_v10 }
 0x3d3   :  { %v2314_v59 = vsub.f32 %v10388_v18, %v2234_v12  ;;  %v2315_v51 = vsub.f32 %v10379_v60, %v2234_v12  ;;  %v2121_v18 = vmul.f32 0.17677669, %v10730_v24  ;;  %v2410_v61 = vmul.f32 1.442695, %v2316_v15 }
 0x3d4   :  { %v10824_v60 = vsel %vm1576_vm0, 0.0, %v14923_v14  ;;  %v2412_v2 = vmul.f32 1.442695, %v2317_v1  ;;  %v10827_v12 = vsel %vm1574_vm1, 0.0, %v14923_v14  ;;  %v2122_v24 = vmul.f32 0.17677669, %v10473_v38 }
 0x3d5   :  { %v10798_v35 = vpop.eup %8106  ;;  %2503 = vadd.xlane.f32.xlu0 %v2502_v31  ;;  %15052 = vst [vmem:[#allocation147_spill] sm:$0xff] %v10824_v60  ;;  %v2120_v31 = vmul.f32 0.17677669, %v10430_v16  ;;  %v2406_v10 = vmul.f32 1.442695, %v2314_v59  ;;  %v10838_v15 = vsel %vm10806_vm3, 0.0, %v14923_v14  ;;  %v10850_v38 = vadd.f32 %v2123_v53, %v10824_v60 }
 0x3d6   :  { %v10803_v55 = vpop.eup %8108  ;;  %7852 = vmatmul.msk.bf16.gmra.mxu3 %vm1787_vm2, %v9931_v34  ;;  %15053 = vst [vmem:[#allocation148_spill] sm:$0xff] %v10827_v12  ;;  %v2408_v1 = vmul.f32 1.442695, %v2315_v51  ;;  %v10847_v16 = vsel %vm10814_vm4, 0.0, %v14923_v14  ;;  %8114 = vpow2.f32 %v2410_v61  ;;  %v10853_v59 = vadd.f32 %v2121_v18, %v10827_v12 }
 0x3d7   :  { %v2514_v9 = vadd.f32 %v10803_v55, %v10798_v35  ;;  %v10829_v19 = vpop.eup %8110  ;;  %15054 = vst [vmem:[#allocation149_spill] sm:$0xff] %v10838_v15  ;;  %8116 = vpow2.f32 %v2412_v2  ;;  %v10858_v51 = vadd.f32 %v2122_v24, %v10838_v15  ;;  %v1103_v53 = vadd.s32 248, %v10019_v56 }
 0x3d8   :  { %v10833_v34 = vpop.eup %8112  ;;  %15055 = vst [vmem:[#allocation150_spill] sm:$0xff] %v10847_v16  ;;  %8118 = vpow2.f32 %v2406_v10  ;;  %v2124_v15 = vmul.f32 0.17677669, %v10505_v4 }
 0x3d9   :  { %2515 = vadd.xlane.f32.xlu1 %v2514_v9  ;;  %2275 = vmax.xlane.f32.xlu2 %v2274_v6  ;;  %v10840_v47 = vpop.f32.mrf.mxu3  ;;  %v2505_v32 = vadd.f32 %v10833_v34, %v10829_v19  ;;  %v10861_v6 = vadd.f32 %v2120_v31, %v10847_v16  ;;  %8120 = vpow2.f32 %v2408_v1  ;;  %v2280_v61 = vmax.f32 %v10858_v51, %v10850_v38 }
 0x3da   :  { %v10842_v54 = vpop.xlane.xlu0 %2239  ;;  %v1328_v10 = vand.u32 15, %v1103_v53 }
 0x3db   :  { %v2277_v18 = vmax.f32 %v10861_v6, %v10853_v59 }
 0x3dc   :  { %v10868_v9 = vpop.eup %8114  ;;  %vm1578_vm5 = vcmp.eq.s32.totalorder %v1328_v10, %v10024_v33  ;;  %vm1577_vm6 = vcmp.eq.s32.totalorder %v1328_v10, %v10022_v48 }
 0x3dd   :  { %v2483_v25 = vpop.xlane.xlu1 %2482  ;;  %2506 = vadd.xlane.f32.xlu0 %v2505_v32  ;;  %v10870_v2 = vpop.eup %8116  ;;  %v10894_v48 = vsel %vm1577_vm6, 0.0, %v14923_v14 }
 0x3de   :  { %8122 = vrcp.f32 %v2483_v25  ;;  %15056 = vst [vmem:[#allocation151_spill] sm:$0xff] %v10870_v2  ;;  %v10874_v1 = vpop.eup %8118  ;;  %v2523_v53 = vadd.f32 %v10870_v2, %v10868_v9 }
 0x3df   :  { %15057 = vst [vmem:[#allocation152_spill] sm:$0xff] %v10874_v1  ;;  %v10876_v56 = vpop.eup %8120 }
 0x3e0   :  { %15058 = vst [vmem:[#allocation153_spill] sm:$0xff] %v10876_v56 }
 0x3e1   :  { %2278 = vmax.xlane.f32.xlu2 %v2277_v18  ;;  %2281 = vmax.xlane.f32.xlu1 %v2280_v61  ;;  %v10872_v31 = vpop.f32.mrf.mxu3  ;;  %v2125_v18 = vmul.f32 0.17677669, %v10789_v49  ;;  %v2520_v61 = vadd.f32 %v10876_v56, %v10874_v1  ;;  %15060 = vst [vmem:[#allocation155_spill] sm:$0xff] %v10894_v48 }
 0x3e2   :  { %v2480_v24 = vpop.xlane.xlu0 %2479 }
 0x3e3   :  { %8124 = vrcp.f32 %v2480_v24  ;;  %v10890_v24 = vsel %vm1578_vm5, 0.0, %v14923_v14 }
 0x3e4   :  { %v8123_v25 = vpop.eup %8122  ;;  %15059 = vst [vmem:[#allocation154_spill] sm:$0xff] %v10890_v24  ;;  %v10903_v4 = vadd.f32 %v2125_v18, %v10890_v24 }
 0x3e5   :  { %v10879_v32 = vpop.xlane.xlu1 %2245  ;;  %v2608_v49 = vmul.f32 %v8123_v25, %v10438_v41  ;;  %v10906_v41 = vadd.f32 %v2124_v15, %v10894_v48 }
 0x3e6   :  { %7853 = vmatmul.msk.bf16.gmra.mxu3 %vm1787_vm2, %v9961_v11  ;;  %v2609_v11 = vmul.f32 %v8123_v25, %v10444_v29 }
 0x3e9   :  { %v8125_v33 = vpop.eup %8124  ;;  %2524 = vadd.xlane.f32.xlu2 %v2523_v53  ;;  %2521 = vadd.xlane.f32.xlu1 %v2520_v61  ;;  %v3255_v16 = vpop.f32.mrf.mxu3 }
 0x3ea   :  { %v2606_v10 = vmul.f32 %v8125_v33, %v10435_v37  ;;  %v2607_v60 = vmul.f32 %v8125_v33, %v10450_v36  ;;  %v2243_v12 = vpop.xlane.xlu0 %2242  ;;  %v2283_v37 = vmax.f32 %v10906_v41, %v10903_v4  ;;  %v15061_v36 = vld [vmem:[#allocation61_spill] sm:$0xff]  ;;  %v3335_v18 = vmul.f32 0.17677669, %v3255_v16 }
 0x3eb   :  { %v2320_v56 = vsub.f32 %v10489_v46, %v2243_v12  ;;  %v2321_v1 = vsub.f32 %v10486_v42, %v2243_v12  ;;  %v15063_v16 = vld [vmem:[#allocation69_spill] sm:$0xff] }
 0x3ec   :  { %v2670_v53 = vpack.c.bf16 %v2608_v49, %v2606_v10  ;;  %v2671_v14 = vpack.c.bf16 %v2609_v11, %v2607_v60  ;;  %v10912_v60 = vpop.xlane.xlu2 %2230  ;;  %v3334_v11 = vmul.f32 0.17677669, %v10610_v0 }
 0x3ed   :  { %v2418_v61 = vmul.f32 1.442695, %v2320_v56  ;;  %v2420_v2 = vmul.f32 1.442695, %v2321_v1  ;;  %v2486_v29 = vpop.xlane.xlu1 %2485 }
 0x3ee   :  { %2806 = vmatmul.bf16.vlgmr.msra.gmra.mxu0 %v2670_v53  ;;  %2895 = vmatmul.bf16.vlgmr.msra.gmra.mxu1 %v2671_v14 }
 0x3ef   :  { %8126 = vpow2.f32 %v2418_v61 }
 0x3f0   :  { %8128 = vpow2.f32 %v2420_v2 }
 0x3f1   :  { %8130 = vrcp.f32 %v2486_v29  ;;  %2284 = vmax.xlane.f32.xlu1 %v2283_v37  ;;  %4556 = vrot.lane.b32.xlu0 %v15061_v36, %s8929_s4  ;;  %v3257_v42 = vpop.f32.mrf.mxu3  ;;  %v10930_v37 = vadd.f32 %v3335_v18, %v15063_v16  ;;  %v15098_v36 = vld [vmem:[#allocation79_spill] sm:$0xff] }
 0x3f2   :  { %v2489_v46 = vpop.xlane.xlu0 %2488 }
 0x3f3   :  { %8132 = vrcp.f32 %v2489_v46 }
 0x3f5   :  { %v10914_v12 = vpop.eup %8126  ;;  %v2249_v1 = vpop.xlane.xlu1 %2248 }
 0x3f6   :  { %v10916_v15 = vpop.eup %8128  ;;  %v2324_v25 = vsub.f32 %v10545_v7, %v2249_v1  ;;  %v2325_v2 = vsub.f32 %v10534_v17, %v2249_v1  ;;  %7854 = vmatmul.msk.bf16.gmra.mxu3 %vm1787_vm2, %v9933_v30  ;;  %v2252_v30 = vpop.xlane.xlu2 %2251  ;;  %v15064_v1 = vld [vmem:[#allocation19_spill] sm:$0xff] }
 0x3f7   :  { %15062 = vst [vmem:[#allocation156_spill] sm:$0xff] %v10916_v15  ;;  %v8131_v56 = vpop.eup %8130  ;;  %v2529_v33 = vadd.f32 %v10916_v15, %v10914_v12 }
 0x3f8   :  { %v2426_v10 = vmul.f32 1.442695, %v2324_v25  ;;  %v2428_v53 = vmul.f32 1.442695, %v2325_v2  ;;  %v2610_v61 = vmul.f32 %v8131_v56, %v10491_v27  ;;  %v2611_v17 = vmul.f32 %v8131_v56, %v10495_v45 }
 0x3f9   :  { %v8133_v49 = vpop.eup %8132  ;;  %2530 = vadd.xlane.f32.xlu2 %v2529_v33  ;;  %v3260_v14 = vpop.f32.mrf.mxu3  ;;  %v10933_v25 = vadd.f32 %v3334_v11, %v15064_v1  ;;  %v3337_v2 = vmul.f32 0.17677669, %v3257_v42  ;;  %v2326_v27 = vsub.f32 %v10531_v23, %v2252_v30  ;;  %v2327_v45 = vsub.f32 %v10537_v52, %v2252_v30  ;;  %v15067_v11 = vld [vmem:[#allocation71_spill] sm:$0xff] }
 0x3fa   :  { %v2612_v7 = vmul.f32 %v8133_v49, %v10511_v58  ;;  %v2613_v29 = vmul.f32 %v8133_v49, %v10521_v62  ;;  %8134 = vpow2.f32 %v2426_v10  ;;  %v3336_v62 = vmul.f32 0.17677669, %v10637_v8  ;;  %v15068_v8 = vld [vmem:[#allocation70_spill] sm:$0xff]  ;;  %v15069_v30 = vld [vmem:[#allocation87_spill] sm:$0xff] }
 0x3fb   :  { %8136 = vpow2.f32 %v2428_v53  ;;  %v3464_v56 = vmax.f32 %v10933_v25, %v10930_v37  ;;  %v2430_v42 = vmul.f32 1.442695, %v2326_v27  ;;  %v10945_v10 = vadd.f32 %v3337_v2, %v15067_v11  ;;  %v15070_v27 = vld [vmem:[#allocation85_spill] sm:$0xff]  ;;  %v15074_v11 = vld [vmem:[#allocation26_spill] sm:$0xff] }
 0x3fc   :  { %v2672_v46 = vpack.c.bf16 %v2612_v7, %v2610_v61  ;;  %v2673_v0 = vpack.c.bf16 %v2613_v29, %v2611_v17  ;;  %v2432_v53 = vmul.f32 1.442695, %v2327_v45  ;;  %v3339_v61 = vmul.f32 0.17677669, %v3260_v14  ;;  %v15071_v45 = vld [vmem:[#allocation72_spill] sm:$0xff] }
 0x3fd   :  { %v2495_v33 = vpop.xlane.xlu0 %2494  ;;  %v2492_v58 = vpop.xlane.xlu1 %2491  ;;  %v10950_v7 = vadd.f32 %v3336_v62, %v15068_v8  ;;  %v3338_v29 = vmul.f32 0.17677669, %v10665_v22  ;;  %v2307_v2 = vsub.f32 %v15070_v27, %v10747_v3 }
 0x3fe   :  { %2811 = vmatmul.bf16.gmra.mxu0 %v2672_v46  ;;  %2900 = vmatmul.bf16.gmra.mxu1 %v2673_v0  ;;  %8138 = vrcp.f32 %v2495_v33  ;;  %v2306_v46 = vsub.f32 %v15069_v30, %v10747_v3  ;;  %v2255_v33 = vpop.xlane.xlu2 %2254  ;;  %v10960_v62 = vadd.f32 %v3339_v61, %v15071_v45  ;;  %v15073_v30 = vld [vmem:[#allocation127_spill] sm:$0xff]  ;;  %v15075_v45 = vld [vmem:[#allocation125_spill] sm:$0xff] }
 0x3ff   :  { %8140 = vrcp.f32 %v2492_v58  ;;  %v3467_v58 = vmax.f32 %v10950_v7, %v10945_v10  ;;  %v2328_v8 = vsub.f32 %v15075_v45, %v2255_v33  ;;  %v10982_v45 = vpop.f32.mrf.mxu2 }
 0x400   :  { %v10940_v18 = vpop.eup %8134  ;;  %8142 = vpow2.f32 %v2430_v42  ;;  %15072 = vst [vmem:[#allocation87_spill] sm:$0xff] %v10960_v62  ;;  %v2390_v61 = vmul.f32 1.442695, %v2306_v46  ;;  %v15079_v46 = vld [vmem:[#allocation97_spill] sm:$0xff] }
 0x401   :  { %15065 = vst [vmem:[#allocation157_spill] sm:$0xff] %v10940_v18  ;;  %v10942_v49 = vpop.eup %8136  ;;  %3465 = vmax.xlane.f32.xlu2 %v3464_v56  ;;  %v3262_v23 = vpop.f32.mrf.mxu3  ;;  %8144 = vpow2.f32 %v2432_v53  ;;  %v10971_v53 = vadd.f32 %v3338_v29, %v15074_v11 }
 0x402   :  { %15066 = vst [vmem:[#allocation158_spill] sm:$0xff] %v10942_v49  ;;  %v2535_v52 = vadd.f32 %v10942_v49, %v10940_v18  ;;  %8146 = vpow2.f32 %v2390_v61 }
 0x404   :  { %v8139_v17 = vpop.eup %8138  ;;  %2536 = vadd.xlane.f32.xlu1 %v2535_v52 }
 0x405   :  { %v8141_v0 = vpop.eup %8140  ;;  %v2258_v14 = vpop.xlane.xlu0 %2257  ;;  %v2616_v3 = vmul.f32 %v8139_v17, %v10572_v21  ;;  %v2617_v27 = vmul.f32 %v8139_v17, %v15073_v30  ;;  %v3340_v30 = vmul.f32 0.17677669, %v15079_v46 }
 0x406   :  { %v2330_v22 = vsub.f32 %v10600_v63, %v2258_v14  ;;  %v2331_v56 = vsub.f32 %v10603_v20, %v2258_v14  ;;  %7855 = vmatmul.msk.bf16.gmra.mxu3 %vm1787_vm2, %v9943_v57  ;;  %v2614_v52 = vmul.f32 %v8141_v0, %v10562_v5  ;;  %v2615_v42 = vmul.f32 %v8141_v0, %v10570_v13  ;;  %v15076_v63 = vld [vmem:[#allocation126_spill] sm:$0xff]  ;;  %v10977_v21 = vpop.eup %8142 }
 0x407   :  { %v2329_v16 = vsub.f32 %v15076_v63, %v2255_v33  ;;  %v3341_v57 = vmul.f32 0.17677669, %v3262_v23  ;;  %v3470_v5 = vmax.f32 %v10971_v53, %v10960_v62  ;;  %15077 = vst [vmem:[#allocation85_spill] sm:$0xff] %v10977_v21  ;;  %v2392_v13 = vmul.f32 1.442695, %v2307_v2  ;;  %v10979_v29 = vpop.eup %8144  ;;  %v15080_v23 = vld [vmem:[#allocation108_spill] sm:$0xff] }
 0x408   :  { %v2438_v20 = vmul.f32 1.442695, %v2330_v22  ;;  %v2440_v1 = vmul.f32 1.442695, %v2331_v56  ;;  %v2674_v17 = vpack.c.bf16 %v2616_v3, %v2614_v52  ;;  %v2675_v0 = vpack.c.bf16 %v2617_v27, %v2615_v42  ;;  %15078 = vst [vmem:[#allocation127_spill] sm:$0xff] %v10979_v29  ;;  %v15081_v2 = vld [vmem:[#allocation74_spill] sm:$0xff]  ;;  %v10998_v61 = vpop.eup %8146 }
 0x409   :  { %3468 = vmax.xlane.f32.xlu2 %v3467_v58  ;;  %v3265_v14 = vpop.f32.mrf.mxu3  ;;  %v2434_v33 = vmul.f32 1.442695, %v2328_v8  ;;  %v2436_v58 = vmul.f32 1.442695, %v2329_v16  ;;  %v2312_v22 = vsub.f32 %v15080_v23, %v10912_v60  ;;  %v10987_v56 = vadd.f32 %v3341_v57, %v15081_v2  ;;  %v15082_v52 = vld [vmem:[#allocation106_spill] sm:$0xff]  ;;  %v15083_v8 = vld [vmem:[#allocation73_spill] sm:$0xff] }
 0x40a   :  { %8148 = vpow2.f32 %v2438_v20  ;;  %v2313_v3 = vsub.f32 %v15082_v52, %v10912_v60  ;;  %v2538_v42 = vadd.f32 %v10979_v29, %v10977_v21  ;;  %v10994_v16 = vadd.f32 %v3340_v30, %v15083_v8  ;;  %v15089_v52 = vld [vmem:[#allocation65_spill] sm:$0xff]  ;;  %v15094_v2 = vld [vmem:[#allocation78_spill] sm:$0xff]  ;;  %v15117_v62 = vld [vmem:[#allocation68_spill] sm:$0xff] }
 0x40b   :  { %8150 = vpow2.f32 %v2440_v1  ;;  %v2402_v1 = vmul.f32 1.442695, %v2312_v22 }
 0x40c   :  { %3471 = vmax.xlane.f32.xlu1 %v3470_v5  ;;  %8152 = vpow2.f32 %v2392_v13  ;;  %v3473_v63 = vmax.f32 %v10994_v16, %v10987_v56  ;;  %v2404_v60 = vmul.f32 1.442695, %v2313_v3  ;;  %v15086_v13 = vld [vmem:[#allocation133_spill] sm:$0xff] }
 0x40d   :  { %8154 = vpow2.f32 %v2434_v33 }
 0x40e   :  { %2816 = vmatmul.bf16.gmra.mxu0 %v2674_v17  ;;  %2905 = vmatmul.bf16.gmra.mxu1 %v2675_v0  ;;  %8156 = vpow2.f32 %v2436_v58  ;;  %v15087_v0 = vld [vmem:[#allocation134_spill] sm:$0xff]  ;;  %v11012_v58 = vpop.f32.mrf.mxu2 }
 0x40f   :  { %8158 = vpow2.f32 %v2402_v1 }
 0x410   :  { %v11002_v20 = vpop.eup %8148  ;;  %8160 = vpow2.f32 %v2404_v60 }
 0x411   :  { %2539 = vadd.xlane.f32.xlu2 %v2538_v42  ;;  %v10996_v27 = vpop.f32.mrf.mxu3  ;;  %15084 = vst [vmem:[#allocation125_spill] sm:$0xff] %v11002_v20  ;;  %v11004_v5 = vpop.eup %8150 }
 0x412   :  { %15085 = vst [vmem:[#allocation126_spill] sm:$0xff] %v11004_v5  ;;  %v11008_v30 = vpop.eup %8152  ;;  %v2544_v42 = vadd.f32 %v11004_v5, %v11002_v20  ;;  %v15101_v20 = vld [vmem:[#allocation138_spill] sm:$0xff] }
 0x413   :  { %v2264_v57 = vpop.xlane.xlu1 %2263  ;;  %v11010_v33 = vpop.eup %8154 }
 0x414   :  { %3474 = vmax.xlane.f32.xlu1 %v3473_v63  ;;  %v2334_v17 = vsub.f32 %v15086_v13, %v2264_v57  ;;  %v2335_v46 = vsub.f32 %v15087_v0, %v2264_v57  ;;  %15088 = vst [vmem:[#allocation97_spill] sm:$0xff] %v11010_v33  ;;  %v11016_v3 = vpop.eup %8156  ;;  %v2508_v57 = vadd.f32 %v11008_v30, %v10998_v61  ;;  %v3343_v13 = vmul.f32 0.17677669, %v3265_v14  ;;  %v15091_v0 = vld [vmem:[#allocation20_spill] sm:$0xff] }
 0x415   :  { %15090 = vst [vmem:[#allocation108_spill] sm:$0xff] %v11016_v3  ;;  %v2541_v1 = vadd.f32 %v11016_v3, %v11010_v33 }
 0x416   :  { %v2446_v23 = vmul.f32 1.442695, %v2334_v17  ;;  %v2448_v22 = vmul.f32 1.442695, %v2335_v46  ;;  %7856 = vmatmul.msk.bf16.gmra.mxu3 %vm1787_vm2, %v15089_v52  ;;  %v11024_v17 = vpop.eup %8158  ;;  %v3342_v46 = vmul.f32 0.17677669, %v15091_v0  ;;  %v11034_v8 = vadd.f32 %v3343_v13, %v15094_v2 }
 0x417   :  { %v11027_v60 = vpop.eup %8160  ;;  %v15100_v0 = vld [vmem:[#allocation137_spill] sm:$0xff] }
 0x418   :  { %8162 = vpow2.f32 %v2446_v23  ;;  %15095 = vst [vmem:[#allocation133_spill] sm:$0xff] %v11034_v8  ;;  %v11041_v48 = vadd.f32 %v3342_v46, %v15098_v36  ;;  %v2517_v29 = vadd.f32 %v11027_v60, %v11024_v17  ;;  %v15102_v36 = vld [vmem:[#allocation122_spill] sm:$0xff] }
 0x419   :  { %8164 = vpow2.f32 %v2448_v22  ;;  %2545 = vadd.xlane.f32.xlu2 %v2544_v42  ;;  %v3270_v63 = vpop.f32.mrf.mxu3  ;;  %v15093_v22 = vld [vmem:[#allocation111_spill] sm:$0xff] }
 0x41a   :  { %v2318_v42 = vsub.f32 %v15093_v22, %v10842_v54  ;;  %15099 = vst [vmem:[#allocation65_spill] sm:$0xff] %v11041_v48  ;;  %v3331_v22 = vmul.f32 0.17677669, %v10840_v47  ;;  %v3476_v46 = vmax.f32 %v11041_v48, %v11034_v8  ;;  %v3346_v47 = vmul.f32 0.17677669, %v10982_v45  ;;  %v15116_v8 = vld [vmem:[#allocation130_spill] sm:$0xff] }
 0x41b   :  { %2509 = vadd.xlane.f32.xlu0 %v2508_v57  ;;  %v2267_v52 = vpop.xlane.xlu1 %2266  ;;  %v15097_v57 = vld [vmem:[#allocation110_spill] sm:$0xff]  ;;  %v3332_v48 = vmul.f32 0.17677669, %v15116_v8 }
 0x41c   :  { %2542 = vadd.xlane.f32.xlu1 %v2541_v1  ;;  %v2319_v11 = vsub.f32 %v15097_v57, %v10842_v54  ;;  %v11043_v1 = vpop.f32.mrf.mxu2  ;;  %v2336_v24 = vsub.f32 %v15100_v0, %v2267_v52  ;;  %v2337_v13 = vsub.f32 %v15101_v20, %v2267_v52  ;;  %v2414_v54 = vmul.f32 1.442695, %v2318_v42  ;;  %v15103_v52 = vld [vmem:[#allocation66_spill] sm:$0xff]  ;;  %v15106_v42 = vld [vmem:[#allocation64_spill] sm:$0xff] }
 0x41d   :  { %v3347_v57 = vmul.f32 0.17677669, %v3270_v63  ;;  %v3330_v0 = vmul.f32 0.17677669, %v15102_v36  ;;  %v15104_v63 = vld [vmem:[#allocation84_spill] sm:$0xff]  ;;  %v15107_v36 = vld [vmem:[#allocation10_spill] sm:$0xff] }
 0x41e   :  { %v11029_v23 = vpop.eup %8162  ;;  %v2416_v3 = vmul.f32 1.442695, %v2319_v11  ;;  %v2450_v20 = vmul.f32 1.442695, %v2336_v24  ;;  %v2452_v33 = vmul.f32 1.442695, %v2337_v13  ;;  %8166 = vpow2.f32 %v2414_v54 }
 0x41f   :  { %15092 = vst [vmem:[#allocation106_spill] sm:$0xff] %v11029_v23  ;;  %v11036_v14 = vpop.eup %8164  ;;  %v11069_v11 = vadd.f32 %v3330_v0, %v15107_v36  ;;  %v15115_v36 = vld [vmem:[#allocation144_spill] sm:$0xff] }
 0x420   :  { %15096 = vst [vmem:[#allocation134_spill] sm:$0xff] %v11036_v14  ;;  %v2550_v5 = vadd.f32 %v11036_v14, %v11029_v23  ;;  %v11061_v23 = vadd.f32 %v3331_v22, %v15103_v52  ;;  %8168 = vpow2.f32 %v2416_v3 }
 0x421   :  { %v11050_v2 = vpop.f32.mrf.mxu3  ;;  %8170 = vpow2.f32 %v2450_v20  ;;  %v15113_v20 = vld [vmem:[#allocation115_spill] sm:$0xff] }
 0x422   :  { %2551 = vadd.xlane.f32.xlu2 %v2550_v5  ;;  %v11064_v5 = vadd.f32 %v3347_v57, %v15104_v63  ;;  %8172 = vpow2.f32 %v2452_v33  ;;  %v3458_v45 = vmax.f32 %v11069_v11, %v11061_v23  ;;  %v15111_v33 = vld [vmem:[#allocation114_spill] sm:$0xff]  ;;  %v15114_v63 = vld [vmem:[#allocation143_spill] sm:$0xff] }
 0x423   :  { %2518 = vadd.xlane.f32.xlu0 %v2517_v29  ;;  %v11057_v14 = vpop.xlane.xlu2 %2269  ;;  %v15108_v29 = vld [vmem:[#allocation86_spill] sm:$0xff]  ;;  %v2322_v0 = vsub.f32 %v15111_v33, %v10879_v32 }
 0x424   :  { %3477 = vmax.xlane.f32.xlu1 %v3476_v46  ;;  %15105 = vst [vmem:[#allocation20_spill] sm:$0xff] %v11064_v5  ;;  %v11072_v21 = vadd.f32 %v3346_v47, %v15108_v29  ;;  %v3188_v22 = vpop.f32.mrf.mxu2  ;;  %v11080_v54 = vpop.eup %8166 }
 0x426   :  { %7857 = vmatmul.msk.bf16.gmra.mxu3 %vm1787_vm2, %v15106_v42  ;;  %15109 = vst [vmem:[#allocation111_spill] sm:$0xff] %v11072_v21  ;;  %v3482_v13 = vmax.f32 %v11072_v21, %v11064_v5  ;;  %v11082_v57 = vpop.eup %8168  ;;  %v2323_v42 = vsub.f32 %v15113_v20, %v10879_v32  ;;  %v2422_v5 = vmul.f32 1.442695, %v2322_v0  ;;  %v3352_v32 = vmul.f32 0.17677669, %v3188_v22 }
 0x427   :  { %v11084_v46 = vpop.eup %8170  ;;  %v2526_v18 = vadd.f32 %v11082_v57, %v11080_v54 }
 0x428   :  { %15110 = vst [vmem:[#allocation110_spill] sm:$0xff] %v11084_v46  ;;  %v11088_v47 = vpop.eup %8172  ;;  %v2424_v15 = vmul.f32 1.442695, %v2323_v42  ;;  %8174 = vpow2.f32 %v2422_v5 }
 0x429   :  { %v11074_v24 = vpop.f32.mrf.mxu3  ;;  %15112 = vst [vmem:[#allocation137_spill] sm:$0xff] %v11088_v47  ;;  %v2553_v33 = vadd.f32 %v11088_v47, %v11084_v46  ;;  %v15121_v47 = vld [vmem:[#allocation67_spill] sm:$0xff] }
 0x42a   :  { %8176 = vpow2.f32 %v2424_v15  ;;  %v11109_v8 = vadd.f32 %v3332_v48, %v15121_v47  ;;  %v15125_v48 = vld [vmem:[#allocation96_spill] sm:$0xff] }
 0x42b   :  { %3459 = vmax.xlane.f32.xlu0 %v3458_v45  ;;  %v2273_v3 = vpop.xlane.xlu2 %2272  ;;  %v3333_v45 = vmul.f32 0.17677669, %v10872_v31 }
 0x42c   :  { %3483 = vmax.xlane.f32.xlu1 %v3482_v13  ;;  %v2340_v29 = vsub.f32 %v15114_v63, %v2273_v3  ;;  %v2341_v13 = vsub.f32 %v15115_v36, %v2273_v3  ;;  %v3191_v63 = vpop.f32.mrf.mxu2  ;;  %v15118_v3 = vld [vmem:[#allocation63_spill] sm:$0xff] }
 0x42d   :  { %v11101_v36 = vadd.f32 %v3333_v45, %v15117_v62  ;;  %v15133_v62 = vld [vmem:[#allocation88_spill] sm:$0xff] }
 0x42e   :  { %v2458_v20 = vmul.f32 1.442695, %v2340_v29  ;;  %v2460_v31 = vmul.f32 1.442695, %v2341_v13  ;;  %v15122_v29 = vld [vmem:[#allocation91_spill] sm:$0xff]  ;;  %v11118_v15 = vpop.eup %8174 }
 0x42f   :  { %v11112_v42 = vadd.f32 %v3352_v32, %v15122_v29  ;;  %v3461_v5 = vmax.f32 %v11109_v8, %v11101_v36  ;;  %15124 = vst [vmem:[#allocation64_spill] sm:$0xff] %v11118_v15  ;;  %v3344_v47 = vmul.f32 0.17677669, %v15133_v62 }
 0x430   :  { %v2498_v52 = vpop.xlane.xlu0 %2497  ;;  %8178 = vpow2.f32 %v2458_v20  ;;  %v11126_v32 = vpop.eup %8176 }
 0x431   :  { %v3277_v49 = vpop.f32.mrf.mxu3  ;;  %15123 = vst [vmem:[#allocation122_spill] sm:$0xff] %v11112_v42  ;;  %8180 = vpow2.f32 %v2460_v31 }
 0x432   :  { %v3353_v21 = vmul.f32 0.17677669, %v3277_v49  ;;  %v15119_v49 = vld [vmem:[#allocation90_spill] sm:$0xff]  ;;  %15129 = vst [vmem:[#allocation143_spill] sm:$0xff] %v11126_v32  ;;  %8182 = vrcp.f32 %v2498_v52 }
 0x433   :  { %2527 = vadd.xlane.f32.xlu0 %v2526_v18  ;;  %v3354_v18 = vmul.f32 0.17677669, %v3191_v63  ;;  %v15127_v63 = vld [vmem:[#allocation95_spill] sm:$0xff] }
 0x434   :  { %2554 = vadd.xlane.f32.xlu1 %v2553_v33  ;;  %v11106_v0 = vadd.f32 %v3353_v21, %v15119_v49 }
 0x435   :  { %v11121_v33 = vadd.f32 %v3354_v18, %v15125_v48  ;;  %v15132_v18 = vld [vmem:[#allocation146_spill] sm:$0xff] }
 0x436   :  { %7858 = vmatmul.msk.bf16.gmra.mxu3 %vm1787_vm2, %v15118_v3  ;;  %15120 = vst [vmem:[#allocation138_spill] sm:$0xff] %v11106_v0  ;;  %v3491_v21 = vmax.f32 %v11112_v42, %v11106_v0  ;;  %v11128_v31 = vpop.eup %8178  ;;  %v11130_v3 = vpop.f32.mrf.mxu2 }
 0x437   :  { %15126 = vst [vmem:[#allocation114_spill] sm:$0xff] %v11121_v33 }
 0x438   :  { %v2261_v22 = vpop.xlane.xlu0 %2260  ;;  %15130 = vst [vmem:[#allocation144_spill] sm:$0xff] %v11128_v31 }
 0x439   :  { %v3280_v45 = vpop.f32.mrf.mxu3  ;;  %v2332_v49 = vsub.f32 %v10733_v50, %v2261_v22  ;;  %v2333_v48 = vsub.f32 %v15132_v18, %v2261_v22 }
 0x43a   :  { %v3355_v13 = vmul.f32 0.17677669, %v3280_v45 }
 0x43b   :  { %3462 = vmax.xlane.f32.xlu0 %v3461_v5  ;;  %v11134_v5 = vpop.eup %8180  ;;  %v2442_v46 = vmul.f32 1.442695, %v2332_v49  ;;  %v2444_v22 = vmul.f32 1.442695, %v2333_v48 }
 0x43c   :  { %v11124_v20 = vadd.f32 %v3355_v13, %v15127_v63  ;;  %3492 = vmax.xlane.f32.xlu1 %v3491_v21  ;;  %15131 = vst [vmem:[#allocation130_spill] sm:$0xff] %v11134_v5  ;;  %v3345_v13 = vmul.f32 0.17677669, %v10996_v27  ;;  %v2532_v63 = vadd.f32 %v11126_v32, %v11118_v15  ;;  %v2559_v52 = vadd.f32 %v11134_v5, %v11128_v31  ;;  %v8183_v50 = vpop.eup %8182  ;;  %v15137_v5 = vld [vmem:[#allocation25_spill] sm:$0xff] }
 0x43d   :  { %v2618_v62 = vmul.f32 %v8183_v50, %v15137_v5  ;;  %v15138_v31 = vld [vmem:[#allocation89_spill] sm:$0xff] }
 0x43e   :  { %15128 = vst [vmem:[#allocation115_spill] sm:$0xff] %v11124_v20  ;;  %v3494_v45 = vmax.f32 %v11121_v33, %v11124_v20  ;;  %v15136_v33 = vld [vmem:[#allocation12_spill] sm:$0xff]  ;;  %v11157_v49 = vpop.f32.mrf.mxu2 }
 0x43f   :  { %v11154_v0 = vadd.f32 %v3344_v47, %v15136_v33 }
 0x440   :  { %v2501_v29 = vpop.xlane.xlu0 %2500  ;;  %3495 = vmax.xlane.f32.xlu2 %v3494_v45  ;;  %v15134_v45 = vld [vmem:[#allocation75_spill] sm:$0xff] }
 0x441   :  { %8184 = vrcp.f32 %v2501_v29  ;;  %v11139_v21 = vpop.f32.mrf.mxu3  ;;  %v11149_v27 = vadd.f32 %v3345_v13, %v15134_v45  ;;  %v15135_v29 = vld [vmem:[#allocation94_spill] sm:$0xff]  ;;  %v15140_v13 = vld [vmem:[#allocation93_spill] sm:$0xff] }
 0x442   :  { %8186 = vpow2.f32 %v2442_v46 }
 0x443   :  { %2533 = vadd.xlane.f32.xlu0 %v2532_v63  ;;  %8188 = vpow2.f32 %v2444_v22  ;;  %v3479_v46 = vmax.f32 %v11154_v0, %v11149_v27 }
 0x444   :  { %v11146_v20 = vpop.xlane.xlu2 %2512  ;;  %2560 = vadd.xlane.f32.xlu1 %v2559_v52  ;;  %v15139_v52 = vld [vmem:[#allocation76_spill] sm:$0xff] }
 0x445   :  { %v2619_v42 = vmul.f32 %v8183_v50, %v15139_v52  ;;  %v8045_v50 = vld [vmem:[%s14435_s5 + $0x8] sm:$0xff] }
 0x446   :  { %7859 = vmatmul.msk.bf16.gmra.mxu3 %vm1787_vm2, %v15135_v29  ;;  %v11181_v52 = vpop.f32.mrf.mxu2 }
 0x447   :  { %v8185_v18 = vpop.eup %8184  ;;  %4427 = vmatpush.bf16.msra.mxu3 %v8045_v50  ;;  %v15146_v50 = vld [vmem:[#allocation101_spill] sm:$0xff] }
 0x448   :  { %v2504_v63 = vpop.xlane.xlu0 %2503  ;;  %v2620_v48 = vmul.f32 %v8185_v18, %v15138_v31  ;;  %v2621_v45 = vmul.f32 %v8185_v18, %v15140_v13  ;;  %v11170_v31 = vpop.eup %8186 }
 0x449   :  { %v11162_v32 = vpop.f32.mrf.mxu3  ;;  %15141 = vst [vmem:[#allocation63_spill] sm:$0xff] %v11170_v31  ;;  %v11175_v18 = vpop.eup %8188  ;;  %8190 = vrcp.f32 %v2504_v63 }
 0x44a   :  { %v2676_v29 = vpack.c.bf16 %v2620_v48, %v2618_v62  ;;  %v2677_v47 = vpack.c.bf16 %v2621_v45, %v2619_v42  ;;  %15142 = vst [vmem:[#allocation146_spill] sm:$0xff] %v11175_v18  ;;  %v3349_v45 = vmul.f32 0.17677669, %v11050_v2  ;;  %v3348_v48 = vmul.f32 0.17677669, %v11012_v58  ;;  %v15143_v2 = vld [vmem:[#allocation98_spill] sm:$0xff] }
 0x44b   :  { %3480 = vmax.xlane.f32.xlu0 %v3479_v46 }
 0x44c   :  { %v11166_v33 = vpop.xlane.xlu1 %2515  ;;  %v2276_v5 = vpop.xlane.xlu2 %2275  ;;  %2821 = vmatmul.bf16.gmra.mxu0 %v2676_v29  ;;  %2910 = vmatmul.bf16.gmra.mxu1 %v2677_v47  ;;  %v11188_v29 = vadd.f32 %v3349_v45, %v15143_v2  ;;  %v11193_v58 = vadd.f32 %v3348_v48, %v15146_v50  ;;  %v15149_v45 = vld [vmem:[#allocation142_spill] sm:$0xff]  ;;  %v3351_v2 = vmul.f32 0.17677669, %v11074_v24 }
 0x44d   :  { %v2342_v22 = vsub.f32 %v10793_v43, %v2276_v5  ;;  %v2343_v15 = vsub.f32 %v10787_v44, %v2276_v5  ;;  %v2547_v44 = vadd.f32 %v11175_v18, %v11170_v31  ;;  %v3350_v31 = vmul.f32 0.17677669, %v11043_v1 }
 0x44e   :  { %15144 = vst [vmem:[#allocation88_spill] sm:$0xff] %v11188_v29 }
 0x44f   :  { %v2462_v62 = vmul.f32 1.442695, %v2342_v22  ;;  %v2464_v42 = vmul.f32 1.442695, %v2343_v15  ;;  %v8191_v47 = vpop.eup %8190 }
 0x450   :  { %v2507_v43 = vpop.xlane.xlu0 %2506  ;;  %v2622_v50 = vmul.f32 %v8191_v47, %v10776_v39  ;;  %v15150_v39 = vld [vmem:[#allocation82_spill] sm:$0xff] }
 0x451   :  { %8192 = vpow2.f32 %v2462_v62  ;;  %v11183_v13 = vpop.f32.mrf.mxu3 }
 0x452   :  { %8194 = vpow2.f32 %v2464_v42  ;;  %v15148_v42 = vld [vmem:[#allocation141_spill] sm:$0xff] }
 0x453   :  { %8196 = vrcp.f32 %v2507_v43  ;;  %2548 = vadd.xlane.f32.xlu0 %v2547_v44  ;;  %v2338_v43 = vsub.f32 %v15148_v42, %v11057_v14  ;;  %v2623_v42 = vmul.f32 %v8191_v47, %v10779_v26  ;;  %v15151_v26 = vld [vmem:[#allocation35_spill] sm:$0xff] }
 0x454   :  { %v2282_v46 = vpop.xlane.xlu1 %2281 }
 0x455   :  { %v2346_v15 = vsub.f32 %v10858_v51, %v2282_v46  ;;  %v2347_v63 = vsub.f32 %v10850_v38, %v2282_v46  ;;  %v8044_v38 = vld [vmem:[%s14435_s5] sm:$0xff]  ;;  %v2339_v46 = vsub.f32 %v15149_v45, %v11057_v14  ;;  %v2454_v14 = vmul.f32 1.442695, %v2338_v43  ;;  %v2279_v43 = vpop.xlane.xlu2 %2278 }
 0x456   :  { %4428 = vmatpush.bf16.msra.mxu3 %v8044_v38 }
 0x457   :  { %v11190_v5 = vpop.eup %8192  ;;  %v2470_v22 = vmul.f32 1.442695, %v2346_v15  ;;  %v2472_v44 = vmul.f32 1.442695, %v2347_v63  ;;  %v3485_v15 = vmax.f32 %v11193_v58, %v11188_v29  ;;  %v11217_v29 = vadd.f32 %v3351_v2, %v15150_v39  ;;  %v15158_v39 = vld [vmem:[#allocation105_spill] sm:$0xff] }
 0x458   :  { %15145 = vst [vmem:[#allocation94_spill] sm:$0xff] %v11190_v5  ;;  %v11195_v62 = vpop.eup %8194 }
 0x459   :  { %15147 = vst [vmem:[#allocation25_spill] sm:$0xff] %v11195_v62  ;;  %v8197_v51 = vpop.eup %8196  ;;  %v2562_v48 = vadd.f32 %v11195_v62, %v11190_v5  ;;  %8198 = vpow2.f32 %v2470_v22  ;;  %v2456_v62 = vmul.f32 1.442695, %v2339_v46  ;;  %v11214_v5 = vpop.f32.mrf.mxu2  ;;  %v2344_v46 = vsub.f32 %v10861_v6, %v2279_v43 }
 0x45a   :  { %v2624_v63 = vmul.f32 %v8197_v51, %v10829_v19  ;;  %v2625_v18 = vmul.f32 %v8197_v51, %v10833_v34  ;;  %8200 = vpow2.f32 %v2472_v44  ;;  %v11219_v19 = vpop.f32.mrf.mxu3  ;;  %v15152_v34 = vld [vmem:[#allocation83_spill] sm:$0xff] }
 0x45b   :  { %2563 = vadd.xlane.f32.xlu2 %v2562_v48  ;;  %3486 = vmax.xlane.f32.xlu0 %v3485_v15  ;;  %v11224_v1 = vadd.f32 %v3350_v31, %v15152_v34  ;;  %8202 = vpow2.f32 %v2454_v14  ;;  %v2345_v15 = vsub.f32 %v10853_v59, %v2279_v43 }
 0x45c   :  { %v2678_v24 = vpack.c.bf16 %v2624_v63, %v2622_v50  ;;  %v2679_v45 = vpack.c.bf16 %v2625_v18, %v2623_v42  ;;  %8204 = vpow2.f32 %v2456_v62  ;;  %v11237_v38 = vpop.xlane.xlu1 %2521  ;;  %v3357_v63 = vmul.f32 0.17677669, %v11139_v21 }
 0x45d   :  { %4572 = vrot.lane.b32.xlu1 %v15151_v26, %s8929_s4  ;;  %v3488_v2 = vmax.f32 %v11224_v1, %v11217_v29  ;;  %v3359_v26 = vmul.f32 0.17677669, %v11162_v32  ;;  %v3361_v32 = vmul.f32 0.17677669, %v11183_v13  ;;  %v15168_v13 = vld [vmem:[#allocation99_spill] sm:$0xff] }
 0x45e   :  { %2826 = vmatmul.bf16.gmra.mxu0 %v2678_v24  ;;  %2915 = vmatmul.bf16.gmra.mxu1 %v2679_v45  ;;  %v3356_v45 = vmul.f32 0.17677669, %v11130_v3 }
 0x45f   :  { %v11226_v47 = vpop.eup %8198 }
 0x460   :  { %15153 = vst [vmem:[#allocation89_spill] sm:$0xff] %v11226_v47  ;;  %v11228_v18 = vpop.eup %8200  ;;  %v11255_v34 = vadd.f32 %v3356_v45, %v15158_v39 }
 0x461   :  { %15154 = vst [vmem:[#allocation76_spill] sm:$0xff] %v11228_v18  ;;  %v2568_v22 = vadd.f32 %v11228_v18, %v11226_v47  ;;  %v11235_v31 = vpop.eup %8202  ;;  %v11241_v51 = vpop.f32.mrf.mxu2  ;;  %v15164_v18 = vld [vmem:[#allocation103_spill] sm:$0xff] }
 0x462   :  { %15155 = vst [vmem:[#allocation93_spill] sm:$0xff] %v11235_v31  ;;  %v11239_v62 = vpop.eup %8204  ;;  %v11244_v48 = vpop.f32.mrf.mxu3 }
 0x463   :  { %v4557_v50 = vpop.permute.xlu0 %4556  ;;  %3489 = vmax.xlane.f32.xlu0 %v3488_v2  ;;  %2569 = vadd.xlane.f32.xlu2 %v2568_v22  ;;  %15156 = vst [vmem:[#allocation141_spill] sm:$0xff] %v11239_v62  ;;  %v2556_v42 = vadd.f32 %v11239_v62, %v11235_v31  ;;  %v2466_v2 = vmul.f32 1.442695, %v2344_v46  ;;  %v2468_v22 = vmul.f32 1.442695, %v2345_v15 }
 0x464   :  { %v4644_v44 = vsel %vm1787_vm2, %v4557_v50, 0  ;;  %v15157_v50 = vld [vmem:[#allocation104_spill] sm:$0xff]  ;;  %v2285_v6 = vpop.xlane.xlu1 %2284  ;;  %v3363_v31 = vmul.f32 0.17677669, %v11219_v19  ;;  %v15174_v19 = vld [vmem:[#allocation109_spill] sm:$0xff] }
 0x465   :  { %4670 = vmatpush.bf16.xpose.msra.mxu0 %v4644_v44  ;;  %v11252_v44 = vadd.f32 %v3357_v63, %v15157_v50  ;;  %8206 = vpow2.f32 %v2466_v2  ;;  %v2348_v45 = vsub.f32 %v10906_v41, %v2285_v6  ;;  %v2349_v39 = vsub.f32 %v10903_v4, %v2285_v6  ;;  %v15162_v4 = vld [vmem:[#allocation102_spill] sm:$0xff] }
 0x466   :  { %8208 = vpow2.f32 %v2468_v22  ;;  %v11283_v6 = vadd.f32 %v3359_v26, %v15162_v4 }
 0x467   :  { %v3497_v43 = vmax.f32 %v11255_v34, %v11252_v44  ;;  %v2476_v41 = vmul.f32 1.442695, %v2349_v39 }
 0x468   :  { %15163 = vst [vmem:[#allocation160_spill] sm:$0xff] %v11283_v6 }
 0x469   :  { %v11257_v59 = vpop.f32.mrf.mxu2 }
 0x46a   :  { %v11259_v21 = vpop.f32.mrf.mxu3 }
 0x46b   :  { %v2807_v14 = vpop.f32.mrf.mxu0  ;;  %v2896_v24 = vpop.f32.mrf.mxu1  ;;  %2557 = vadd.xlane.f32.xlu0 %v2556_v42 }
 0x46c   :  { %v2897_v42 = vadd.f32 %v2896_v24, %v2807_v14  ;;  %v11263_v63 = vpop.eup %8206 }
 0x46d   :  { %15159 = vst [vmem:[#allocation142_spill] sm:$0xff] %v11263_v63  ;;  %v11265_v50 = vpop.eup %8208 }
 0x46e   :  { %15160 = vst [vmem:[#allocation159_spill] sm:$0xff] %v11265_v50  ;;  %v2565_v14 = vadd.f32 %v11265_v50, %v11263_v63 }
 0x473   :  { %v2809_v3 = vpop.f32.mrf.mxu0  ;;  %v2898_v46 = vpop.f32.mrf.mxu1  ;;  %3498 = vmax.xlane.f32.xlu0 %v3497_v43 }
 0x474   :  { %v2899_v15 = vadd.f32 %v2898_v46, %v2809_v3  ;;  %v3358_v3 = vmul.f32 0.17677669, %v11157_v49  ;;  %v11276_v46 = vpop.f32.mrf.mxu2  ;;  %v3360_v49 = vmul.f32 0.17677669, %v11181_v52 }
 0x476   :  { %v2976_v2 = vpack.c.bf16 %v2899_v15, %v2897_v42  ;;  %v2474_v42 = vmul.f32 1.442695, %v2348_v45  ;;  %v11278_v15 = vpop.f32.mrf.mxu3  ;;  %v11287_v47 = vadd.f32 %v3358_v3, %v15164_v18  ;;  %v11298_v3 = vadd.f32 %v3360_v49, %v15168_v13 }
 0x477   :  { %v11268_v22 = vpop.xlane.xlu1 %2536 }
 0x478   :  { %7892 = vmatmul.msk.bf16.vlgmr.msra.gmra.mxu3 %vm1787_vm2, %v2976_v2  ;;  %v15161_v2 = vld [vmem:[#allocation31_spill] sm:$0xff]  ;;  %15165 = vst [vmem:[#allocation161_spill] sm:$0xff] %v11287_v47  ;;  %8210 = vpow2.f32 %v2474_v42  ;;  %v3500_v39 = vmax.f32 %v11287_v47, %v11283_v6 }
 0x479   :  { %8212 = vpow2.f32 %v2476_v41  ;;  %15169 = vst [vmem:[#allocation163_spill] sm:$0xff] %v11298_v3  ;;  %v11304_v41 = vpop.xlane.xlu2 %2524 }
 0x47a   :  { %8214 = vrcp.f32 %v11146_v20 }
 0x47b   :  { %v2812_v24 = vpop.f32.mrf.mxu0  ;;  %v2901_v43 = vpop.f32.mrf.mxu1  ;;  %2566 = vadd.xlane.f32.xlu0 %v2565_v14  ;;  %4570 = vrot.lane.b32.xlu2 %v15161_v2, %s8929_s4  ;;  %v15166_v2 = vld [vmem:[#allocation100_spill] sm:$0xff] }
 0x47c   :  { %v11295_v63 = vadd.f32 %v3361_v32, %v15166_v2  ;;  %v2902_v26 = vadd.f32 %v2901_v43, %v2812_v24  ;;  %v11302_v52 = vpop.f32.mrf.mxu2  ;;  %v3362_v24 = vmul.f32 0.17677669, %v11214_v5  ;;  %v15172_v32 = vld [vmem:[#allocation107_spill] sm:$0xff] }
 0x47d   :  { %v11318_v49 = vadd.f32 %v3363_v31, %v15172_v32 }
 0x47e   :  { %15167 = vst [vmem:[#allocation162_spill] sm:$0xff] %v11295_v63  ;;  %v11300_v42 = vpop.eup %8210  ;;  %v11309_v6 = vpop.f32.mrf.mxu3 }
 0x47f   :  { %v11290_v45 = vpop.xlane.xlu1 %3471  ;;  %15170 = vst [vmem:[#allocation164_spill] sm:$0xff] %v11300_v42  ;;  %v11306_v62 = vpop.eup %8212 }
 0x480   :  { %15171 = vst [vmem:[#allocation165_spill] sm:$0xff] %v11306_v62  ;;  %v2571_v43 = vadd.f32 %v11306_v62, %v11300_v42 }
 0x481   :  { %15173 = vst [vmem:[#allocation166_spill] sm:$0xff] %v11318_v49 }
 0x483   :  { %v2814_v14 = vpop.f32.mrf.mxu0  ;;  %v2903_v50 = vpop.f32.mrf.mxu1  ;;  %3501 = vmax.xlane.f32.xlu0 %v3500_v39 }
 0x484   :  { %v2904_v4 = vadd.f32 %v2903_v50, %v2814_v14  ;;  %v3503_v50 = vmax.f32 %v11298_v3, %v11295_v63  ;;  %v11321_v14 = vadd.f32 %v3362_v24, %v15174_v19  ;;  %v11330_v2 = vpop.f32.mrf.mxu2  ;;  %v8215_v24 = vpop.eup %8214 }
 0x486   :  { %v2977_v18 = vpack.c.bf16 %v2904_v4, %v2902_v26  ;;  %15175 = vst [vmem:[#allocation167_spill] sm:$0xff] %v11321_v14  ;;  %v11332_v31 = vpop.f32.mrf.mxu3 }
 0x487   :  { %3504 = vmax.xlane.f32.xlu1 %v3503_v50  ;;  %v11323_v26 = vpop.xlane.xlu1 %3474  ;;  %v3506_v50 = vmax.f32 %v11321_v14, %v11318_v49  ;;  %v2628_v49 = vmul.f32 %v8215_v24, %v10758_v28 }
 0x488   :  { %7893 = vmatmul.msk.bf16.gmra.mxu3 %vm1787_vm2, %v2977_v18  ;;  %v11326_v18 = vpop.xlane.xlu2 %2530 }
 0x48b   :  { %v2817_v4 = vpop.f32.mrf.mxu0  ;;  %v2906_v39 = vpop.f32.mrf.mxu1  ;;  %2572 = vadd.xlane.f32.xlu0 %v2571_v43 }
 0x48c   :  { %v2907_v19 = vadd.f32 %v2906_v39, %v2817_v4 }
 0x48e   :  { %v2510_v5 = vpop.xlane.xlu0 %2509 }
 0x48f   :  { %8216 = vrcp.f32 %v2510_v5  ;;  %3507 = vmax.xlane.f32.xlu1 %v3506_v50  ;;  %v11334_v20 = vpop.xlane.xlu1 %2542  ;;  %v2629_v5 = vmul.f32 %v8215_v24, %v10766_v40 }
 0x490   :  { %v11340_v47 = vpop.xlane.xlu2 %3465 }
 0x493   :  { %v2819_v43 = vpop.f32.mrf.mxu0  ;;  %v2908_v32 = vpop.f32.mrf.mxu1 }
 0x494   :  { %v2909_v13 = vadd.f32 %v2908_v32, %v2819_v43  ;;  %v11343_v32 = vpop.f32.mrf.mxu2 }
 0x495   :  { %v8217_v62 = vpop.eup %8216 }
 0x496   :  { %v2978_v42 = vpack.c.bf16 %v2909_v13, %v2907_v19  ;;  %v2519_v63 = vpop.xlane.xlu0 %2518  ;;  %v2626_v3 = vmul.f32 %v8217_v62, %v10998_v61  ;;  %v2627_v14 = vmul.f32 %v8217_v62, %v11008_v30  ;;  %v11345_v13 = vpop.f32.mrf.mxu3  ;;  %v15176_v30 = vld [vmem:[#allocation57_spill] sm:$0xff] }
 0x497   :  { %8218 = vrcp.f32 %v2519_v63  ;;  %v11352_v62 = vpop.xlane.xlu1 %3477 }
 0x498   :  { %7894 = vmatmul.msk.bf16.gmra.mxu3 %vm1787_vm2, %v2978_v42  ;;  %v2680_v50 = vpack.c.bf16 %v2628_v49, %v2626_v3  ;;  %v2681_v4 = vpack.c.bf16 %v2629_v5, %v2627_v14  ;;  %8220 = vrcp.f32 %v11166_v33  ;;  %v3469_v42 = vpop.xlane.xlu2 %3468 }
 0x49a   :  { %2831 = vmatmul.bf16.gmra.mxu0 %v2680_v50  ;;  %2920 = vmatmul.bf16.gmra.mxu1 %v2681_v4 }
 0x49c   :  { %v11354_v14 = vpop.f32.mrf.mxu2 }
 0x49d   :  { %v8219_v3 = vpop.eup %8218 }
 0x49e   :  { %v3460_v28 = vpop.xlane.xlu0 %3459  ;;  %v8221_v19 = vpop.eup %8220 }
 0x49f   :  { %v3554_v61 = vsub.f32 %v11069_v11, %v3460_v28  ;;  %v3555_v40 = vsub.f32 %v11061_v23, %v3460_v28  ;;  %4554 = vrot.lane.b32.xlu0 %v15176_v30, %s8929_s4  ;;  %v11356_v63 = vpop.f32.mrf.mxu3  ;;  %v2632_v11 = vmul.f32 %v8219_v3, %v11024_v17  ;;  %v2633_v23 = vmul.f32 %v8219_v3, %v11027_v60  ;;  %v15181_v30 = vld [vmem:[#allocation151_spill] sm:$0xff] }
 0x4a0   :  { %v2630_v43 = vmul.f32 %v8221_v19, %v10798_v35  ;;  %v2631_v24 = vmul.f32 %v8221_v19, %v10803_v55  ;;  %v3365_v17 = vmul.f32 0.17677669, %v11244_v48  ;;  %v11371_v60 = vpop.xlane.xlu2 %2539  ;;  %v3364_v55 = vmul.f32 0.17677669, %v11241_v51  ;;  %v15179_v19 = vld [vmem:[#allocation116_spill] sm:$0xff] }
 0x4a1   :  { %v3618_v49 = vmul.f32 1.442695, %v3554_v61  ;;  %v3620_v39 = vmul.f32 1.442695, %v3555_v40  ;;  %v11367_v61 = vpop.xlane.xlu1 %3483  ;;  %v3559_v51 = vsub.f32 %v10930_v37, %v11340_v47 }
 0x4a2   :  { %v2682_v5 = vpack.c.bf16 %v2632_v11, %v2630_v43  ;;  %v2683_v50 = vpack.c.bf16 %v2633_v23, %v2631_v24  ;;  %v11385_v11 = vadd.f32 %v3365_v17, %v15179_v19  ;;  %v3560_v43 = vsub.f32 %v10950_v7, %v3469_v42 }
 0x4a3   :  { %8222 = vpow2.f32 %v3618_v49  ;;  %v3367_v17 = vmul.f32 0.17677669, %v11259_v21 }
 0x4a4   :  { %8224 = vpow2.f32 %v3620_v39  ;;  %v11376_v40 = vpop.f32.mrf.mxu2  ;;  %v3558_v39 = vsub.f32 %v10933_v25, %v11340_v47  ;;  %v3561_v25 = vsub.f32 %v10945_v10, %v3469_v42  ;;  %v3628_v47 = vmul.f32 1.442695, %v3559_v51 }
 0x4a5   :  { %8226 = vrcp.f32 %v11304_v41  ;;  %v3366_v10 = vmul.f32 0.17677669, %v11257_v59  ;;  %v15185_v59 = vld [vmem:[#allocation112_spill] sm:$0xff] }
 0x4a6   :  { %v2528_v33 = vpop.xlane.xlu0 %2527  ;;  %8228 = vrcp.f32 %v11237_v38  ;;  %v3632_v21 = vmul.f32 1.442695, %v3561_v25 }
 0x4a7   :  { %v11378_v41 = vpop.f32.mrf.mxu3 }
 0x4a8   :  { %v11404_v42 = vpop.xlane.xlu2 %2545 }
 0x4a9   :  { %v11362_v4 = vpop.eup %8222  ;;  %v11399_v7 = vpop.xlane.xlu1 %2554 }
 0x4aa   :  { %15177 = vst [vmem:[#allocation168_spill] sm:$0xff] %v11362_v4  ;;  %v11365_v28 = vpop.eup %8224  ;;  %2836 = vmatmul.bf16.gmra.mxu0 %v2682_v5  ;;  %2925 = vmatmul.bf16.gmra.mxu1 %v2683_v50  ;;  %v15180_v50 = vld [vmem:[#allocation117_spill] sm:$0xff] }
 0x4ab   :  { %15178 = vst [vmem:[#allocation169_spill] sm:$0xff] %v11365_v28  ;;  %v3746_v35 = vadd.f32 %v11365_v28, %v11362_v4  ;;  %v8227_v49 = vpop.eup %8226  ;;  %v3377_v28 = vmul.f32 0.17677669, %v11356_v63  ;;  %v3379_v4 = vmul.f32 0.17677669, %v11378_v41  ;;  %v15216_v41 = vld [vmem:[#allocation157_spill] sm:$0xff] }
 0x4ac   :  { %v8229_v23 = vpop.eup %8228 }
 0x4ad   :  { %3747 = vadd.xlane.f32.xlu2 %v3746_v35  ;;  %v11391_v35 = vadd.f32 %v3364_v55, %v15180_v50 }
 0x4ae   :  { %v3463_v3 = vpop.xlane.xlu0 %3462 }
 0x4af   :  { %v3556_v38 = vsub.f32 %v11109_v8, %v3463_v3  ;;  %v3557_v48 = vsub.f32 %v11101_v36, %v3463_v3  ;;  %v2636_v8 = vmul.f32 %v8227_v49, %v10868_v9  ;;  %v2637_v36 = vmul.f32 %v8227_v49, %v15181_v30  ;;  %v11408_v49 = vpop.f32.mrf.mxu2 }
 0x4b0   :  { %v3626_v3 = vmul.f32 1.442695, %v3558_v39  ;;  %v3509_v37 = vmax.f32 %v11391_v35, %v11385_v11  ;;  %v3630_v9 = vmul.f32 1.442695, %v3560_v43  ;;  %v15184_v39 = vld [vmem:[#allocation113_spill] sm:$0xff]  ;;  %v11418_v43 = vadd.f32 %v3366_v10, %v15185_v59 }
 0x4b1   :  { %v3622_v24 = vmul.f32 1.442695, %v3556_v38  ;;  %v3624_v5 = vmul.f32 1.442695, %v3557_v48  ;;  %v15182_v38 = vld [vmem:[#allocation152_spill] sm:$0xff]  ;;  %v15183_v48 = vld [vmem:[#allocation153_spill] sm:$0xff]  ;;  %v11411_v51 = vadd.f32 %v3367_v17, %v15184_v39 }
 0x4b2   :  { %v2634_v55 = vmul.f32 %v8229_v23, %v15182_v38  ;;  %v2635_v19 = vmul.f32 %v8229_v23, %v15183_v48 }
 0x4b3   :  { %8230 = vpow2.f32 %v3622_v24  ;;  %v11413_v24 = vpop.f32.mrf.mxu3  ;;  %v3512_v17 = vmax.f32 %v11418_v43, %v11411_v51 }
 0x4b4   :  { %8232 = vpow2.f32 %v3624_v5  ;;  %v2684_v5 = vpack.c.bf16 %v2636_v8, %v2634_v55  ;;  %v2685_v23 = vpack.c.bf16 %v2637_v36, %v2635_v19  ;;  %v11429_v8 = vpop.xlane.xlu2 %2551 }
 0x4b5   :  { %3510 = vmax.xlane.f32.xlu2 %v3509_v37  ;;  %8234 = vpow2.f32 %v3626_v3  ;;  %v3368_v37 = vmul.f32 0.17677669, %v11276_v46 }
 0x4b6   :  { %v11406_v30 = vpop.xlane.xlu0 %2533  ;;  %8236 = vpow2.f32 %v3628_v47  ;;  %v11435_v47 = vpop.xlane.xlu1 %3492 }
 0x4b7   :  { %8238 = vpow2.f32 %v3630_v9  ;;  %v3565_v9 = vsub.f32 %v10987_v56, %v11323_v26  ;;  %v3373_v56 = vmul.f32 0.17677669, %v11332_v31 }
 0x4b8   :  { %8240 = vpow2.f32 %v3632_v21 }
 0x4b9   :  { %v11415_v38 = vpop.eup %8230  ;;  %8242 = vrcp.f32 %v2528_v33  ;;  %v3369_v33 = vmul.f32 0.17677669, %v11278_v15  ;;  %v15191_v15 = vld [vmem:[#allocation121_spill] sm:$0xff] }
 0x4ba   :  { %v11420_v25 = vpop.eup %8232  ;;  %2841 = vmatmul.bf16.gmra.mxu0 %v2684_v5  ;;  %2930 = vmatmul.bf16.gmra.mxu1 %v2685_v23  ;;  %8244 = vrcp.f32 %v11326_v18  ;;  %v3564_v18 = vsub.f32 %v10994_v16, %v11323_v26  ;;  %v11445_v5 = vpop.f32.mrf.mxu2 }
 0x4bb   :  { %15186 = vst [vmem:[#allocation151_spill] sm:$0xff] %v11420_v25  ;;  %v3749_v3 = vadd.f32 %v11420_v25, %v11415_v38  ;;  %v11427_v19 = vpop.eup %8234  ;;  %v11454_v59 = vpop.f32.mrf.mxu3  ;;  %v15214_v25 = vld [vmem:[#allocation64_spill] sm:$0xff] }
 0x4bc   :  { %15187 = vst [vmem:[#allocation152_spill] sm:$0xff] %v11427_v19  ;;  %v11431_v36 = vpop.eup %8236  ;;  %v3638_v26 = vmul.f32 1.442695, %v3564_v18  ;;  %v15193_v18 = vld [vmem:[#allocation87_spill] sm:$0xff] }
 0x4bd   :  { %3513 = vmax.xlane.f32.xlu2 %v3512_v17  ;;  %3750 = vadd.xlane.f32.xlu1 %v3749_v3  ;;  %15188 = vst [vmem:[#allocation153_spill] sm:$0xff] %v11431_v36  ;;  %v11437_v48 = vpop.eup %8238  ;;  %v11449_v17 = vadd.f32 %v3368_v37, %v15191_v15  ;;  %v15192_v3 = vld [vmem:[#allocation119_spill] sm:$0xff]  ;;  %v3752_v50 = vadd.f32 %v11431_v36, %v11427_v19  ;;  %v3372_v37 = vmul.f32 0.17677669, %v11330_v2  ;;  %v3640_v15 = vmul.f32 1.442695, %v3565_v9  ;;  %v11469_v36 = vpop.xlane.xlu2 %3495 }
 0x4be   :  { %v3481_v55 = vpop.xlane.xlu0 %3480  ;;  %15189 = vst [vmem:[#allocation170_spill] sm:$0xff] %v11437_v48  ;;  %v11441_v10 = vpop.eup %8240  ;;  %v11452_v39 = vadd.f32 %v3369_v33, %v15192_v3  ;;  %v3563_v2 = vsub.f32 %v15193_v18, %v11290_v45  ;;  %8246 = vpow2.f32 %v3638_v26 }
 0x4bf   :  { %15190 = vst [vmem:[#allocation171_spill] sm:$0xff] %v11441_v10  ;;  %v8243_v21 = vpop.eup %8242  ;;  %v3568_v46 = vsub.f32 %v11154_v0, %v3481_v55  ;;  %v3569_v16 = vsub.f32 %v11149_v27, %v3481_v55  ;;  %v3755_v0 = vadd.f32 %v11441_v10, %v11437_v48  ;;  %v3376_v27 = vmul.f32 0.17677669, %v11354_v14 }
 0x4c0   :  { %v8245_v23 = vpop.eup %8244  ;;  %v2638_v33 = vmul.f32 %v8243_v21, %v11080_v54  ;;  %v2639_v3 = vmul.f32 %v8243_v21, %v11082_v57  ;;  %v3562_v55 = vsub.f32 %v10971_v53, %v11290_v45  ;;  %v3515_v54 = vmax.f32 %v11449_v17, %v11452_v39  ;;  %v15194_v57 = vld [vmem:[#allocation156_spill] sm:$0xff]  ;;  %v15195_v21 = vld [vmem:[#allocation77_spill] sm:$0xff]  ;;  %v11487_v45 = vpop.xlane.xlu1 %2560 }
 0x4c1   :  { %v3646_v31 = vmul.f32 1.442695, %v3568_v46  ;;  %v2640_v63 = vmul.f32 %v8245_v23, %v10914_v12  ;;  %v3648_v9 = vmul.f32 1.442695, %v3569_v16  ;;  %v2641_v14 = vmul.f32 %v8245_v23, %v15194_v57 }
 0x4c2   :  { %v3371_v53 = vmul.f32 0.17677669, %v11309_v6  ;;  %v11481_v46 = vadd.f32 %v3377_v28, %v15195_v21  ;;  %v3370_v12 = vmul.f32 0.17677669, %v11302_v52  ;;  %8248 = vpow2.f32 %v3640_v15  ;;  %v15198_v6 = vld [vmem:[#allocation145_spill] sm:$0xff]  ;;  %v15199_v28 = vld [vmem:[#allocation123_spill] sm:$0xff]  ;;  %v11495_v52 = vpop.f32.mrf.mxu2 }
 0x4c3   :  { %v2686_v16 = vpack.c.bf16 %v2640_v63, %v2638_v33  ;;  %v2687_v18 = vpack.c.bf16 %v2641_v14, %v2639_v3  ;;  %v3634_v48 = vmul.f32 1.442695, %v3562_v55  ;;  %8250 = vpow2.f32 %v3646_v31  ;;  %v15200_v15 = vld [vmem:[#allocation120_spill] sm:$0xff]  ;;  %v15203_v31 = vld [vmem:[#allocation118_spill] sm:$0xff]  ;;  %v15210_v21 = vld [vmem:[#allocation111_spill] sm:$0xff] }
 0x4c4   :  { %15196 = vst [vmem:[#allocation87_spill] sm:$0xff] %v11481_v46  ;;  %v11490_v26 = vadd.f32 %v3376_v27, %v15198_v6  ;;  %v11493_v57 = vadd.f32 %v3372_v37, %v15199_v28  ;;  %8252 = vpow2.f32 %v3648_v9  ;;  %v11498_v33 = vadd.f32 %v3371_v53, %v15200_v15  ;;  %v11506_v37 = vpop.f32.mrf.mxu3  ;;  %v11508_v55 = vpop.eup %8246 }
 0x4c5   :  { %3753 = vadd.xlane.f32.xlu2 %v3752_v50  ;;  %3756 = vadd.xlane.f32.xlu1 %v3755_v0  ;;  %v15197_v50 = vld [vmem:[#allocation124_spill] sm:$0xff]  ;;  %8254 = vrcp.f32 %v11406_v30  ;;  %15202 = vst [vmem:[#allocation172_spill] sm:$0xff] %v11508_v55  ;;  %v11511_v63 = vadd.f32 %v3370_v12, %v15203_v31  ;;  %v3570_v6 = vsub.f32 %v15210_v21, %v11367_v61  ;;  %v3375_v31 = vmul.f32 0.17677669, %v11345_v13 }
 0x4c6   :  { %v11474_v10 = vpop.xlane.xlu0 %2548  ;;  %v11484_v0 = vadd.f32 %v3373_v56, %v15197_v50  ;;  %v3636_v56 = vmul.f32 1.442695, %v3563_v2  ;;  %15201 = vst [vmem:[#allocation156_spill] sm:$0xff] %v11498_v33  ;;  %v3527_v3 = vmax.f32 %v11490_v26, %v11481_v46  ;;  %8256 = vrcp.f32 %v11268_v22  ;;  %v15207_v22 = vld [vmem:[#allocation65_spill] sm:$0xff] }
 0x4c7   :  { %15204 = vst [vmem:[#allocation173_spill] sm:$0xff] %v11511_v63  ;;  %8258 = vpow2.f32 %v3634_v48  ;;  %v3566_v14 = vsub.f32 %v15207_v22, %v11352_v62  ;;  %v3518_v53 = vmax.f32 %v11511_v63, %v11498_v33  ;;  %v15209_v48 = vld [vmem:[#allocation133_spill] sm:$0xff]  ;;  %v15211_v33 = vld [vmem:[#allocation20_spill] sm:$0xff] }
 0x4c8   :  { %v3521_v27 = vmax.f32 %v11493_v57, %v11484_v0  ;;  %v11515_v30 = vpop.eup %8248  ;;  %8260 = vpow2.f32 %v3636_v56  ;;  %v3567_v12 = vsub.f32 %v15209_v48, %v11352_v62  ;;  %v3378_v56 = vmul.f32 0.17677669, %v11376_v40 }
 0x4c9   :  { %v2822_v19 = vpop.f32.mrf.mxu0  ;;  %v2911_v23 = vpop.f32.mrf.mxu1  ;;  %3516 = vmax.xlane.f32.xlu0 %v3515_v54  ;;  %15205 = vst [vmem:[#allocation174_spill] sm:$0xff] %v11515_v30  ;;  %v3571_v62 = vsub.f32 %v15211_v33, %v11367_v61  ;;  %v3642_v40 = vmul.f32 1.442695, %v3566_v14  ;;  %8262 = vrcp.f32 %v11371_v60 }
 0x4ca   :  { %2846 = vmatmul.bf16.gmra.mxu0 %v2686_v16  ;;  %2935 = vmatmul.bf16.gmra.mxu1 %v2687_v18  ;;  %v11517_v54 = vpop.eup %8250  ;;  %v2912_v48 = vadd.f32 %v2911_v23, %v2822_v19  ;;  %v3644_v13 = vmul.f32 1.442695, %v3567_v12  ;;  %v15215_v19 = vld [vmem:[#allocation143_spill] sm:$0xff]  ;;  %v11546_v23 = vpop.f32.mrf.mxu2 }
 0x4cb   :  { %15206 = vst [vmem:[#allocation175_spill] sm:$0xff] %v11517_v54  ;;  %v11523_v16 = vpop.eup %8252  ;;  %8264 = vpow2.f32 %v3642_v40  ;;  %v3380_v40 = vmul.f32 0.17677669, %v11408_v49 }
 0x4cc   :  { %15208 = vst [vmem:[#allocation65_spill] sm:$0xff] %v11523_v16  ;;  %v3767_v21 = vadd.f32 %v11523_v16, %v11517_v54  ;;  %v15218_v54 = vld [vmem:[#allocation129_spill] sm:$0xff]  ;;  %8266 = vpow2.f32 %v3644_v13 }
 0x4cd   :  { %3528 = vmax.xlane.f32.xlu2 %v3527_v3  ;;  %3522 = vmax.xlane.f32.xlu1 %v3521_v27  ;;  %v8255_v3 = vpop.eup %8254  ;;  %v3374_v27 = vmul.f32 0.17677669, %v11343_v32  ;;  %v11553_v12 = vadd.f32 %v3375_v31, %v15218_v54  ;;  %v15221_v31 = vld [vmem:[#allocation128_spill] sm:$0xff]  ;;  %v3385_v54 = vmul.f32 0.17677669, %v11506_v37 }
 0x4ce   :  { %v11513_v2 = vpop.xlane.xlu2 %2563  ;;  %v3487_v9 = vpop.xlane.xlu0 %3486  ;;  %v2642_v61 = vmul.f32 %v8255_v3, %v15214_v25 }
 0x4cf   :  { %v4573_v18 = vpop.permute.xlu1 %4572  ;;  %v8257_v15 = vpop.eup %8256  ;;  %v3572_v33 = vsub.f32 %v11193_v58, %v3487_v9  ;;  %v15220_v58 = vld [vmem:[#allocation132_spill] sm:$0xff] }
 0x4d0   :  { %v4668_v50 = vsel %vm1787_vm2, %v4573_v18, 0  ;;  %v11535_v32 = vpop.eup %8258  ;;  %v2644_v14 = vmul.f32 %v8257_v15, %v15216_v41  ;;  %v11555_v25 = vpop.f32.mrf.mxu3 }
 0x4d1   :  { %v2824_v22 = vpop.f32.mrf.mxu0  ;;  %v2913_v28 = vpop.f32.mrf.mxu1  ;;  %3519 = vmax.xlane.f32.xlu0 %v3518_v53  ;;  %4759 = vmatpush.bf16.xpose.msra.mxu1 %v4668_v50  ;;  %15212 = vst [vmem:[#allocation133_spill] sm:$0xff] %v11535_v32  ;;  %v3761_v53 = vadd.f32 %v11515_v30, %v11508_v55  ;;  %v2643_v50 = vmul.f32 %v8255_v3, %v15215_v19  ;;  %v15219_v3 = vld [vmem:[#allocation88_spill] sm:$0xff] }
 0x4d2   :  { %v2914_v63 = vadd.f32 %v2913_v28, %v2824_v22  ;;  %v11542_v18 = vpop.eup %8260  ;;  %v3650_v28 = vmul.f32 1.442695, %v3570_v6  ;;  %v15217_v22 = vld [vmem:[#allocation158_spill] sm:$0xff] }
 0x4d3   :  { %15213 = vst [vmem:[#allocation111_spill] sm:$0xff] %v11542_v18  ;;  %v2645_v16 = vmul.f32 %v8257_v15, %v15217_v22  ;;  %v3381_v15 = vmul.f32 0.17677669, %v11413_v24  ;;  %v3758_v60 = vadd.f32 %v11542_v18, %v11535_v32 }
 0x4d4   :  { %v2979_v46 = vpack.c.bf16 %v2914_v63, %v2912_v48  ;;  %v3652_v63 = vmul.f32 1.442695, %v3571_v62  ;;  %v3573_v48 = vsub.f32 %v15219_v3, %v3487_v9  ;;  %v11570_v62 = vadd.f32 %v3374_v27, %v15221_v31  ;;  %v15223_v27 = vld [vmem:[#allocation136_spill] sm:$0xff] }
 0x4d5   :  { %3768 = vadd.xlane.f32.xlu2 %v3767_v21  ;;  %3762 = vadd.xlane.f32.xlu1 %v3761_v53  ;;  %v11562_v21 = vadd.f32 %v3379_v4, %v15220_v58  ;;  %v2688_v9 = vpack.c.bf16 %v2644_v14, %v2642_v61  ;;  %v2689_v19 = vpack.c.bf16 %v2645_v16, %v2643_v50  ;;  %8268 = vpow2.f32 %v3650_v28  ;;  %v15226_v50 = vld [vmem:[#allocation135_spill] sm:$0xff] }
 0x4d6   :  { %7895 = vmatmul.msk.bf16.gmra.mxu3 %vm1787_vm2, %v2979_v46  ;;  %v11559_v6 = vpop.xlane.xlu0 %3489  ;;  %v11565_v53 = vpop.xlane.xlu2 %2569  ;;  %v15222_v46 = vld [vmem:[#allocation131_spill] sm:$0xff]  ;;  %v3654_v4 = vmul.f32 1.442695, %v3572_v33  ;;  %8270 = vpow2.f32 %v3652_v63  ;;  %v3656_v24 = vmul.f32 1.442695, %v3573_v48  ;;  %v11578_v13 = vadd.f32 %v3381_v15, %v15223_v27 }
 0x4d7   :  { %v11573_v41 = vadd.f32 %v3378_v56, %v15222_v46  ;;  %8272 = vrcp.f32 %v11334_v20  ;;  %v3524_v49 = vmax.f32 %v11570_v62, %v11553_v12  ;;  %v8263_v56 = vpop.eup %8262  ;;  %v11587_v28 = vadd.f32 %v3380_v40, %v15226_v50  ;;  %v3233_v48 = vpop.f32.mrf.mxu2  ;;  %v15230_v50 = vld [vmem:[#allocation81_spill] sm:$0xff] }
 0x4d8   :  { %15224 = vst [vmem:[#allocation20_spill] sm:$0xff] %v11578_v13  ;;  %v11584_v61 = vpop.eup %8264  ;;  %8274 = vpow2.f32 %v3654_v4  ;;  %v3384_v20 = vmul.f32 0.17677669, %v11495_v52  ;;  %v3322_v4 = vpop.f32.mrf.mxu3  ;;  %v3382_v52 = vmul.f32 0.17677669, %v11445_v5 }
 0x4d9   :  { %3759 = vadd.xlane.f32.xlu0 %v3758_v60  ;;  %v3530_v16 = vmax.f32 %v11573_v41, %v11562_v21  ;;  %15225 = vst [vmem:[#allocation64_spill] sm:$0xff] %v11584_v61  ;;  %v11589_v33 = vpop.eup %8266  ;;  %8276 = vpow2.f32 %v3656_v24  ;;  %v3533_v60 = vmax.f32 %v11587_v28, %v11578_v13  ;;  %v15229_v24 = vld [vmem:[#allocation138_spill] sm:$0xff]  ;;  %v3388_v46 = vmul.f32 0.17677669, %v3233_v48 }
 0x4da   :  { %2851 = vmatmul.bf16.gmra.mxu0 %v2688_v9  ;;  %2940 = vmatmul.bf16.gmra.mxu1 %v2689_v19  ;;  %15227 = vst [vmem:[#allocation143_spill] sm:$0xff] %v11589_v33  ;;  %v15228_v19 = vld [vmem:[#allocation122_spill] sm:$0xff]  ;;  %v3577_v27 = vsub.f32 %v15229_v24, %v11435_v47  ;;  %v11607_v58 = vadd.f32 %v3384_v20, %v15230_v50  ;;  %v3389_v55 = vmul.f32 0.17677669, %v3322_v4  ;;  %v15232_v24 = vld [vmem:[#allocation97_spill] sm:$0xff]  ;;  %v15233_v50 = vld [vmem:[#allocation108_spill] sm:$0xff]  ;;  %8278 = vrcp.f32 %v11404_v42 }
 0x4db   :  { %v2827_v22 = vpop.f32.mrf.mxu0  ;;  %v2916_v3 = vpop.f32.mrf.mxu1  ;;  %v3576_v40 = vsub.f32 %v15228_v19, %v11435_v47  ;;  %v3764_v19 = vadd.f32 %v11589_v33, %v11584_v61  ;;  %v3574_v33 = vsub.f32 %v11224_v1, %v11559_v6  ;;  %v3575_v4 = vsub.f32 %v11217_v29, %v11559_v6 }
 0x4dc   :  { %v11594_v63 = vpop.eup %8268  ;;  %v2917_v5 = vadd.f32 %v2916_v3, %v2827_v22  ;;  %v3664_v13 = vmul.f32 1.442695, %v3577_v27  ;;  %v3383_v22 = vmul.f32 0.17677669, %v11454_v59  ;;  %v15235_v3 = vld [vmem:[#allocation80_spill] sm:$0xff] }
 0x4dd   :  { %3531 = vmax.xlane.f32.xlu2 %v3530_v16  ;;  %3525 = vmax.xlane.f32.xlu1 %v3524_v49  ;;  %v11598_v9 = vpop.eup %8270  ;;  %v3662_v20 = vmul.f32 1.442695, %v3576_v40  ;;  %v11627_v40 = vadd.f32 %v3385_v54, %v15235_v3  ;;  %v3658_v29 = vmul.f32 1.442695, %v3574_v33  ;;  %v15249_v3 = vld [vmem:[#allocation147_spill] sm:$0xff] }
 0x4de   :  { %v11592_v14 = vpop.xlane.xlu0 %2557  ;;  %v4571_v15 = vpop.permute.xlu2 %4570  ;;  %v3770_v47 = vadd.f32 %v11598_v9, %v11594_v63 }
 0x4df   :  { %v4665_v16 = vsel %vm1787_vm2, %v4571_v15, 0  ;;  %v8273_v49 = vpop.eup %8272  ;;  %8280 = vpow2.f32 %v3662_v20  ;;  %v3236_v33 = vpop.f32.mrf.mxu2 }
 0x4e0   :  { %4760 = vmatpush.bf16.xpose.msra.mxu1 %v4665_v16  ;;  %v11612_v15 = vpop.eup %8274  ;;  %v15231_v16 = vld [vmem:[#allocation85_spill] sm:$0xff]  ;;  %v2648_v37 = vmul.f32 %v8273_v49, %v15232_v24  ;;  %v2649_v32 = vmul.f32 %v8273_v49, %v15233_v50  ;;  %v15237_v49 = vld [vmem:[#allocation150_spill] sm:$0xff]  ;;  %8282 = vpow2.f32 %v3664_v13 }
 0x4e1   :  { %3534 = vmax.xlane.f32.xlu0 %v3533_v60  ;;  %v11616_v60 = vpop.eup %8276  ;;  %v2646_v48 = vmul.f32 %v8263_v56, %v15231_v16  ;;  %8284 = vrcp.f32 %v11474_v10 }
 0x4e2   :  { %v3773_v27 = vadd.f32 %v11616_v60, %v11612_v15  ;;  %v8279_v13 = vpop.eup %8278 }
 0x4e3   :  { %v2829_v31 = vpop.f32.mrf.mxu0  ;;  %v2918_v30 = vpop.f32.mrf.mxu1  ;;  %v2690_v59 = vpack.c.bf16 %v2648_v37, %v2646_v48 }
 0x4e4   :  { %v2919_v18 = vadd.f32 %v2918_v30, %v2829_v31  ;;  %v15234_v30 = vld [vmem:[#allocation127_spill] sm:$0xff] }
 0x4e5   :  { %3765 = vadd.xlane.f32.xlu1 %v3764_v19  ;;  %3771 = vadd.xlane.f32.xlu2 %v3770_v47  ;;  %v2647_v31 = vmul.f32 %v8263_v56, %v15234_v30  ;;  %v15236_v56 = vld [vmem:[#allocation148_spill] sm:$0xff]  ;;  %v11640_v19 = vadd.f32 %v3388_v46, %v15237_v49  ;;  %v15239_v47 = vld [vmem:[#allocation139_spill] sm:$0xff]  ;;  %v11653_v10 = vpop.eup %8280 }
 0x4e6   :  { %v2980_v61 = vpack.c.bf16 %v2919_v18, %v2917_v5  ;;  %v3499_v50 = vpop.xlane.xlu0 %3498  ;;  %v11637_v42 = vadd.f32 %v3389_v55, %v15236_v56  ;;  %v15238_v5 = vld [vmem:[#allocation140_spill] sm:$0xff]  ;;  %v11651_v20 = vadd.f32 %v3382_v52, %v15239_v47  ;;  %v11657_v48 = vpop.eup %8282  ;;  %v15241_v52 = vld [vmem:[#allocation114_spill] sm:$0xff] }
 0x4e7   :  { %v3580_v1 = vsub.f32 %v11255_v34, %v3499_v50  ;;  %v3581_v18 = vsub.f32 %v11252_v44, %v3499_v50  ;;  %v2691_v54 = vpack.c.bf16 %v2649_v32, %v2647_v31  ;;  %v3325_v34 = vpop.f32.mrf.mxu3  ;;  %v3660_v44 = vmul.f32 1.442695, %v3575_v4  ;;  %v8285_v37 = vpop.eup %8284  ;;  %v15243_v50 = vld [vmem:[#allocation115_spill] sm:$0xff] }
 0x4e8   :  { %7896 = vmatmul.msk.bf16.gmra.mxu3 %vm1787_vm2, %v2980_v61  ;;  %v11644_v55 = vadd.f32 %v3383_v22, %v15238_v5  ;;  %v3539_v32 = vmax.f32 %v11607_v58, %v11627_v40  ;;  %v3545_v46 = vmax.f32 %v11640_v19, %v11637_v42  ;;  %v3386_v31 = vmul.f32 0.17677669, %v11546_v23  ;;  %v3238_v56 = vpop.f32.mrf.mxu2  ;;  %v15248_v5 = vld [vmem:[#allocation92_spill] sm:$0xff] }
 0x4e9   :  { %v3670_v6 = vmul.f32 1.442695, %v3580_v1  ;;  %v3672_v61 = vmul.f32 1.442695, %v3581_v18  ;;  %3774 = vadd.xlane.f32.xlu0 %v3773_v27  ;;  %v3578_v22 = vsub.f32 %v15241_v52, %v11469_v36  ;;  %v3579_v1 = vsub.f32 %v15243_v50, %v11469_v36  ;;  %v15246_v36 = vld [vmem:[#allocation62_spill] sm:$0xff] }
 0x4ea   :  { %2856 = vmatmul.bf16.gmra.mxu0 %v2690_v59  ;;  %2945 = vmatmul.bf16.gmra.mxu1 %v2691_v54  ;;  %v3536_v24 = vmax.f32 %v11651_v20, %v11644_v55  ;;  %v3387_v18 = vmul.f32 0.17677669, %v11555_v25  ;;  %v3391_v27 = vmul.f32 0.17677669, %v3325_v34  ;;  %v3779_v23 = vadd.f32 %v11657_v48, %v11653_v10  ;;  %v15247_v34 = vld [vmem:[#allocation125_spill] sm:$0xff] }
 0x4eb   :  { %8286 = vpow2.f32 %v3670_v6  ;;  %v3390_v6 = vmul.f32 0.17677669, %v3236_v33  ;;  %v11682_v52 = vadd.f32 %v3386_v31, %v15246_v36  ;;  %v3666_v25 = vmul.f32 1.442695, %v3578_v22  ;;  %v15252_v36 = vld [vmem:[#allocation160_spill] sm:$0xff] }
 0x4ec   :  { %8288 = vpow2.f32 %v3672_v61  ;;  %v2650_v50 = vmul.f32 %v8279_v13, %v15247_v34  ;;  %v3668_v49 = vmul.f32 1.442695, %v3579_v1  ;;  %v11686_v47 = vadd.f32 %v3387_v18, %v15248_v5 }
 0x4ed   :  { %8290 = vpow2.f32 %v3658_v29  ;;  %3540 = vmax.xlane.f32.xlu1 %v3539_v32  ;;  %3546 = vmax.xlane.f32.xlu2 %v3545_v46  ;;  %v15245_v46 = vld [vmem:[#allocation146_spill] sm:$0xff]  ;;  %v11689_v33 = vadd.f32 %v3391_v27, %v15249_v3  ;;  %v3392_v27 = vmul.f32 0.17677669, %v3238_v56  ;;  %v15255_v56 = vld [vmem:[#allocation163_spill] sm:$0xff] }
 0x4ee   :  { %8292 = vpow2.f32 %v3660_v44  ;;  %v11655_v16 = vpop.xlane.xlu0 %2566  ;;  %v15244_v44 = vld [vmem:[#allocation63_spill] sm:$0xff] }
 0x4ef   :  { %v3327_v61 = vpop.f32.mrf.mxu3  ;;  %v2652_v32 = vmul.f32 %v8285_v37, %v15244_v44  ;;  %v15250_v44 = vld [vmem:[#allocation126_spill] sm:$0xff]  ;;  %8294 = vrcp.f32 %v11399_v7  ;;  %v3542_v7 = vmax.f32 %v11682_v52, %v11686_v47 }
 0x4f0   :  { %8296 = vpow2.f32 %v3666_v25 }
 0x4f1   :  { %v11661_v30 = vpop.eup %8286  ;;  %3537 = vmax.xlane.f32.xlu0 %v3536_v24  ;;  %v2653_v24 = vmul.f32 %v8285_v37, %v15245_v46  ;;  %v3393_v37 = vmul.f32 0.17677669, %v3327_v61  ;;  %v15251_v46 = vld [vmem:[#allocation161_spill] sm:$0xff]  ;;  %v2692_v1 = vpack.c.bf16 %v2652_v32, %v2650_v50  ;;  %8298 = vpow2.f32 %v3668_v49  ;;  %v15256_v32 = vld [vmem:[#allocation162_spill] sm:$0xff] }
 0x4f2   :  { %15240 = vst [vmem:[#allocation157_spill] sm:$0xff] %v11661_v30  ;;  %v11666_v4 = vpop.eup %8288 }
 0x4f3   :  { %15242 = vst [vmem:[#allocation158_spill] sm:$0xff] %v11666_v4  ;;  %v11671_v59 = vpop.eup %8290  ;;  %v3785_v54 = vadd.f32 %v11666_v4, %v11661_v30  ;;  %v2651_v30 = vmul.f32 %v8279_v13, %v15250_v44  ;;  %v15254_v13 = vld [vmem:[#allocation154_spill] sm:$0xff] }
 0x4f4   :  { %v11677_v29 = vpop.eup %8292 }
 0x4f5   :  { %3786 = vadd.xlane.f32.xlu2 %v3785_v54  ;;  %3780 = vadd.xlane.f32.xlu1 %v3779_v23  ;;  %v3776_v54 = vadd.f32 %v11677_v29, %v11671_v59  ;;  %v15253_v23 = vld [vmem:[#allocation149_spill] sm:$0xff]  ;;  %v2693_v18 = vpack.c.bf16 %v2653_v24, %v2651_v30 }
 0x4f6   :  { %v3502_v4 = vpop.xlane.xlu0 %3501  ;;  %v11697_v34 = vadd.f32 %v3390_v6, %v15253_v23 }
 0x4f7   :  { %v3582_v31 = vsub.f32 %v15251_v46, %v3502_v4  ;;  %v3583_v22 = vsub.f32 %v15252_v36, %v3502_v4  ;;  %v11701_v4 = vadd.f32 %v3393_v37, %v15254_v13  ;;  %v15257_v36 = vld [vmem:[#allocation155_spill] sm:$0xff] }
 0x4f8   :  { %v3548_v6 = vmax.f32 %v11697_v34, %v11689_v33  ;;  %v11710_v49 = vadd.f32 %v3392_v27, %v15257_v36  ;;  %v15261_v27 = vld [vmem:[#allocation137_spill] sm:$0xff] }
 0x4f9   :  { %v3674_v3 = vmul.f32 1.442695, %v3582_v31  ;;  %v3676_v5 = vmul.f32 1.442695, %v3583_v22  ;;  %3777 = vadd.xlane.f32.xlu0 %v3776_v54 }
 0x4fa   :  { %2861 = vmatmul.bf16.gmra.mxu0 %v2692_v1  ;;  %2950 = vmatmul.bf16.gmra.mxu1 %v2693_v18  ;;  %v3505_v61 = vpop.xlane.xlu1 %3504  ;;  %v3551_v37 = vmax.f32 %v11710_v49, %v11701_v4  ;;  %v15260_v1 = vld [vmem:[#allocation110_spill] sm:$0xff] }
 0x4fb   :  { %8300 = vpow2.f32 %v3674_v3  ;;  %v3584_v30 = vsub.f32 %v15255_v56, %v3505_v61  ;;  %v3585_v24 = vsub.f32 %v15256_v32, %v3505_v61  ;;  %v8295_v3 = vpop.eup %8294  ;;  %v15264_v32 = vld [vmem:[#allocation134_spill] sm:$0xff] }
 0x4fc   :  { %8302 = vpow2.f32 %v3676_v5  ;;  %v11713_v44 = vpop.eup %8296  ;;  %v2656_v18 = vmul.f32 %v8295_v3, %v15260_v1  ;;  %v2657_v61 = vmul.f32 %v8295_v3, %v15261_v27 }
 0x4fd   :  { %8304 = vrcp.f32 %v11429_v8  ;;  %3549 = vmax.xlane.f32.xlu2 %v3548_v6  ;;  %3543 = vmax.xlane.f32.xlu1 %v3542_v7  ;;  %v3678_v25 = vmul.f32 1.442695, %v3584_v30  ;;  %v3680_v50 = vmul.f32 1.442695, %v3585_v24  ;;  %v11717_v5 = vpop.eup %8298  ;;  %v15262_v7 = vld [vmem:[#allocation106_spill] sm:$0xff] }
 0x4fe   :  { %v3782_v54 = vadd.f32 %v11717_v5, %v11713_v44 }
 0x4ff   :  { %8306 = vpow2.f32 %v3678_v25 }
 0x500   :  { %8308 = vpow2.f32 %v3680_v50 }
 0x501   :  { %v11719_v46 = vpop.eup %8300  ;;  %3552 = vmax.xlane.f32.xlu0 %v3551_v37  ;;  %v2573_v37 = vpop.xlane.xlu0 %2572  ;;  %8310 = vrcp.f32 %v11592_v14 }
 0x502   :  { %15258 = vst [vmem:[#allocation88_spill] sm:$0xff] %v11719_v46  ;;  %v11721_v31 = vpop.eup %8302  ;;  %8312 = vrcp.f32 %v11487_v45  ;;  %v15269_v45 = vld [vmem:[#allocation51_spill] sm:$0xff] }
 0x503   :  { %15259 = vst [vmem:[#allocation122_spill] sm:$0xff] %v11721_v31  ;;  %v8305_v8 = vpop.eup %8304  ;;  %v3788_v22 = vadd.f32 %v11721_v31, %v11719_v46  ;;  %8314 = vrcp.f32 %v11655_v16  ;;  %v15279_v31 = vld [vmem:[#allocation166_spill] sm:$0xff]  ;;  %v15283_v46 = vld [vmem:[#allocation76_spill] sm:$0xff] }
 0x504   :  { %v2654_v56 = vmul.f32 %v8305_v8, %v15262_v7  ;;  %v2655_v24 = vmul.f32 %v8305_v8, %v15264_v32  ;;  %v15265_v8 = vld [vmem:[#allocation93_spill] sm:$0xff]  ;;  %8316 = vrcp.f32 %v11513_v2  ;;  %v15272_v2 = vld [vmem:[#allocation142_spill] sm:$0xff] }
 0x505   :  { %3789 = vadd.xlane.f32.xlu2 %v3788_v22  ;;  %3783 = vadd.xlane.f32.xlu1 %v3782_v54  ;;  %v11729_v6 = vpop.eup %8306  ;;  %v15266_v7 = vld [vmem:[#allocation141_spill] sm:$0xff]  ;;  %8318 = vrcp.f32 %v2573_v37 }
 0x506   :  { %v11732_v30 = vpop.eup %8308  ;;  %v2694_v50 = vpack.c.bf16 %v2656_v18, %v2654_v56  ;;  %v2695_v13 = vpack.c.bf16 %v2657_v61, %v2655_v24  ;;  %v15267_v18 = vld [vmem:[#allocation144_spill] sm:$0xff]  ;;  %8320 = vrcp.f32 %v11565_v53 }
 0x507   :  { %15263 = vst [vmem:[#allocation138_spill] sm:$0xff] %v11732_v30  ;;  %v3791_v25 = vadd.f32 %v11732_v30, %v11729_v6  ;;  %v8311_v3 = vpop.eup %8310  ;;  %v15280_v53 = vld [vmem:[#allocation164_spill] sm:$0xff] }
 0x508   :  { %v8313_v1 = vpop.eup %8312  ;;  %v2658_v27 = vmul.f32 %v8311_v3, %v15265_v8  ;;  %v2659_v32 = vmul.f32 %v8311_v3, %v15266_v7  ;;  %v15271_v3 = vld [vmem:[#allocation55_spill] sm:$0xff] }
 0x509   :  { %3792 = vadd.xlane.f32.xlu0 %v3791_v25  ;;  %v2660_v56 = vmul.f32 %v8313_v1, %v15267_v18  ;;  %v15268_v25 = vld [vmem:[#allocation130_spill] sm:$0xff] }
 0x50a   :  { %2866 = vmatmul.bf16.gmra.mxu0 %v2694_v50  ;;  %2955 = vmatmul.bf16.gmra.mxu1 %v2695_v13  ;;  %v2661_v50 = vmul.f32 %v8313_v1, %v15268_v25  ;;  %v15273_v25 = vld [vmem:[#allocation23_spill] sm:$0xff] }
 0x50b   :  { %v2696_v14 = vpack.c.bf16 %v2660_v56, %v2658_v27 }
 0x50c   :  { %v2697_v13 = vpack.c.bf16 %v2661_v50, %v2659_v32  ;;  %v8315_v32 = vpop.eup %8314  ;;  %v15274_v50 = vld [vmem:[#allocation159_spill] sm:$0xff] }
 0x50d   :  { %v8317_v16 = vpop.eup %8316  ;;  %v2664_v56 = vmul.f32 %v8315_v32, %v15272_v2  ;;  %v15278_v2 = vld [vmem:[#allocation167_spill] sm:$0xff] }
 0x511   :  { %v4555_v22 = vpop.permute.xlu0 %4554 }
 0x512   :  { %v4641_v54 = vsel %vm1787_vm2, %v4555_v22, 0  ;;  %v15270_v22 = vld [vmem:[#allocation28_spill] sm:$0xff] }
 0x513   :  { %4671 = vmatpush.bf16.xpose.msra.mxu0 %v4641_v54 }
 0x517   :  { %v2832_v61 = vpop.f32.mrf.mxu0  ;;  %v2921_v24 = vpop.f32.mrf.mxu1 }
 0x518   :  { %v2922_v1 = vadd.f32 %v2921_v24, %v2832_v61  ;;  %v3508_v24 = vpop.xlane.xlu1 %3507 }
 0x51a   :  { %2871 = vmatmul.bf16.gmra.mxu0 %v2696_v14  ;;  %2960 = vmatmul.bf16.gmra.mxu1 %v2697_v13  ;;  %v2665_v14 = vmul.f32 %v8315_v32, %v15274_v50  ;;  %v15275_v13 = vld [vmem:[#allocation94_spill] sm:$0xff]  ;;  %v3586_v50 = vsub.f32 %v15278_v2, %v3508_v24  ;;  %v15281_v2 = vld [vmem:[#allocation165_spill] sm:$0xff] }
 0x51c   :  { %v3682_v37 = vmul.f32 1.442695, %v3586_v50 }
 0x51d   :  { %4550 = vrot.lane.b32.xlu2 %v15269_v45, %s8929_s4  ;;  %4552 = vrot.lane.b32.xlu0 %v15271_v3, %s8929_s4  ;;  %v2662_v45 = vmul.f32 %v8317_v16, %v15275_v13  ;;  %v15276_v3 = vld [vmem:[#allocation25_spill] sm:$0xff] }
 0x51e   :  { %4568 = vrot.lane.b32.xlu1 %v15270_v22, %s8929_s4  ;;  %v2663_v61 = vmul.f32 %v8317_v16, %v15276_v3  ;;  %v8319_v16 = vpop.eup %8318  ;;  %8322 = vpow2.f32 %v3682_v37 }
 0x51f   :  { %v2834_v54 = vpop.f32.mrf.mxu0  ;;  %v2923_v8 = vpop.f32.mrf.mxu1 }
 0x520   :  { %v2924_v27 = vadd.f32 %v2923_v8, %v2834_v54  ;;  %v3748_v7 = vpop.xlane.xlu2 %3747  ;;  %v2698_v8 = vpack.c.bf16 %v2664_v56, %v2662_v45  ;;  %v3587_v45 = vsub.f32 %v15279_v31, %v3508_v24 }
 0x522   :  { %v2981_v18 = vpack.c.bf16 %v2924_v27, %v2922_v1  ;;  %v2699_v1 = vpack.c.bf16 %v2665_v14, %v2663_v61  ;;  %v15277_v27 = vld [vmem:[#allocation48_spill] sm:$0xff]  ;;  %v8321_v14 = vpop.eup %8320 }
 0x523   :  { %v2667_v31 = vmul.f32 %v8321_v14, %v15283_v46 }
 0x524   :  { %7897 = vmatmul.msk.bf16.gmra.mxu3 %vm1787_vm2, %v2981_v18  ;;  %v11773_v46 = vpop.eup %8322 }
 0x525   :  { %4566 = vrot.lane.b32.xlu2 %v15273_v25, %s8929_s4 }
 0x527   :  { %v2837_v36 = vpop.f32.mrf.mxu0  ;;  %v2926_v23 = vpop.f32.mrf.mxu1 }
 0x528   :  { %v3511_v54 = vpop.xlane.xlu2 %3510  ;;  %v2927_v13 = vadd.f32 %v2926_v23, %v2837_v36  ;;  %v2669_v23 = vmul.f32 %v8319_v16, %v15281_v2  ;;  %v15282_v36 = vld [vmem:[#allocation89_spill] sm:$0xff] }
 0x529   :  { %v3588_v61 = vsub.f32 %v11391_v35, %v3511_v54 }
 0x52a   :  { %2876 = vmatmul.bf16.gmra.mxu0 %v2698_v8  ;;  %2965 = vmatmul.bf16.gmra.mxu1 %v2699_v1  ;;  %v2668_v8 = vmul.f32 %v8319_v16, %v15280_v53  ;;  %v3684_v1 = vmul.f32 1.442695, %v3587_v45 }
 0x52c   :  { %8324 = vpow2.f32 %v3684_v1 }
 0x52d   :  { %4548 = vrot.lane.b32.xlu2 %v15277_v27, %s8929_s4  ;;  %v3589_v27 = vsub.f32 %v11385_v11, %v3511_v54  ;;  %8326 = vrcp.f32 %v3748_v7 }
 0x52f   :  { %v2839_v18 = vpop.f32.mrf.mxu0  ;;  %v2928_v32 = vpop.f32.mrf.mxu1 }
 0x530   :  { %v2929_v25 = vadd.f32 %v2928_v32, %v2839_v18  ;;  %v3514_v22 = vpop.xlane.xlu2 %3513  ;;  %v3751_v3 = vpop.xlane.xlu1 %3750  ;;  %v2666_v18 = vmul.f32 %v8321_v14, %v15282_v36 }
 0x531   :  { %8328 = vrcp.f32 %v3751_v3  ;;  %v3590_v11 = vsub.f32 %v11418_v43, %v3514_v22  ;;  %v3591_v16 = vsub.f32 %v11411_v51, %v3514_v22 }
 0x532   :  { %v2982_v56 = vpack.c.bf16 %v2929_v25, %v2927_v13  ;;  %v3686_v25 = vmul.f32 1.442695, %v3588_v61  ;;  %v2700_v35 = vpack.c.bf16 %v2668_v8, %v2666_v18  ;;  %v3688_v13 = vmul.f32 1.442695, %v3589_v27  ;;  %v11775_v45 = vpop.eup %8324 }
 0x533   :  { %v8327_v61 = vpop.eup %8326  ;;  %v3690_v27 = vmul.f32 1.442695, %v3590_v11  ;;  %v3692_v2 = vmul.f32 1.442695, %v3591_v16  ;;  %v15286_v16 = vld [vmem:[#allocation168_spill] sm:$0xff] }
 0x534   :  { %7898 = vmatmul.msk.bf16.gmra.mxu3 %vm1787_vm2, %v2982_v56  ;;  %v2701_v56 = vpack.c.bf16 %v2669_v23, %v2667_v31  ;;  %8330 = vpow2.f32 %v3686_v25 }
 0x535   :  { %8332 = vpow2.f32 %v3688_v13  ;;  %v15284_v13 = vld [vmem:[#allocation151_spill] sm:$0xff] }
 0x536   :  { %8334 = vpow2.f32 %v3690_v27 }
 0x537   :  { %v2842_v32 = vpop.f32.mrf.mxu0  ;;  %v2931_v30 = vpop.f32.mrf.mxu1  ;;  %8336 = vpow2.f32 %v3692_v2 }
 0x538   :  { %v3754_v24 = vpop.xlane.xlu2 %3753  ;;  %v3757_v50 = vpop.xlane.xlu1 %3756  ;;  %v2932_v53 = vadd.f32 %v2931_v30, %v2842_v32 }
 0x539   :  { %v8329_v1 = vpop.eup %8328  ;;  %8338 = vrcp.f32 %v3754_v24 }
 0x53a   :  { %2881 = vmatmul.bf16.gmra.mxu0 %v2700_v35  ;;  %2970 = vmatmul.bf16.gmra.mxu1 %v2701_v56  ;;  %v11778_v23 = vpop.eup %8330  ;;  %v3876_v30 = vmul.f32 %v8329_v1, %v11415_v38  ;;  %v15285_v56 = vld [vmem:[#allocation87_spill] sm:$0xff] }
 0x53b   :  { %v11782_v18 = vpop.eup %8332 }
 0x53c   :  { %v3517_v54 = vpop.xlane.xlu0 %3516  ;;  %v3797_v38 = vadd.f32 %v11782_v18, %v11778_v23 }
 0x53d   :  { %v3592_v51 = vsub.f32 %v11449_v17, %v3517_v54  ;;  %v3593_v31 = vsub.f32 %v11452_v39, %v3517_v54  ;;  %v3877_v17 = vmul.f32 %v8329_v1, %v15284_v13  ;;  %v3874_v39 = vmul.f32 %v8327_v61, %v15286_v16 }
 0x53f   :  { %v2844_v14 = vpop.f32.mrf.mxu0  ;;  %v2933_v37 = vpop.f32.mrf.mxu1  ;;  %v3694_v54 = vmul.f32 1.442695, %v3592_v51 }
 0x540   :  { %v2934_v7 = vadd.f32 %v2933_v37, %v2844_v14  ;;  %v3529_v8 = vpop.xlane.xlu2 %3528  ;;  %v3523_v3 = vpop.xlane.xlu1 %3522  ;;  %v3696_v37 = vmul.f32 1.442695, %v3593_v31 }
 0x541   :  { %v3596_v43 = vsub.f32 %v11493_v57, %v3523_v3  ;;  %v3597_v36 = vsub.f32 %v11484_v0, %v3523_v3  ;;  %v3600_v32 = vsub.f32 %v11490_v26, %v3529_v8  ;;  %v3601_v11 = vsub.f32 %v15285_v56, %v3529_v8  ;;  %v15287_v26 = vld [vmem:[#allocation169_spill] sm:$0xff] }
 0x542   :  { %v2983_v22 = vpack.c.bf16 %v2934_v7, %v2932_v53  ;;  %v3794_v0 = vadd.f32 %v11775_v45, %v11773_v46  ;;  %v3875_v14 = vmul.f32 %v8327_v61, %v15287_v26  ;;  %v3938_v7 = vpack.c.bf16 %v3876_v30, %v3874_v39  ;;  %v15288_v61 = vld [vmem:[#allocation173_spill] sm:$0xff] }
 0x543   :  { %v3702_v25 = vmul.f32 1.442695, %v3596_v43  ;;  %v3704_v35 = vmul.f32 1.442695, %v3597_v36  ;;  %v3710_v3 = vmul.f32 1.442695, %v3600_v32  ;;  %v11800_v43 = vpop.eup %8334 }
 0x544   :  { %7899 = vmatmul.msk.bf16.gmra.mxu3 %vm1787_vm2, %v2983_v22  ;;  %v3520_v57 = vpop.xlane.xlu0 %3519  ;;  %v3939_v24 = vpack.c.bf16 %v3877_v17, %v3875_v14  ;;  %v3712_v2 = vmul.f32 1.442695, %v3601_v11  ;;  %v11803_v22 = vpop.eup %8336  ;;  %v15289_v36 = vld [vmem:[#allocation156_spill] sm:$0xff] }
 0x545   :  { %8340 = vpow2.f32 %v3702_v25  ;;  %v3594_v51 = vsub.f32 %v15288_v61, %v3520_v57  ;;  %v3595_v31 = vsub.f32 %v15289_v36, %v3520_v57  ;;  %v8339_v25 = vpop.eup %8338  ;;  %v3800_v13 = vadd.f32 %v11803_v22, %v11800_v43 }
 0x546   :  { %8342 = vpow2.f32 %v3704_v35 }
 0x547   :  { %v2847_v27 = vpop.f32.mrf.mxu0  ;;  %v2936_v53 = vpop.f32.mrf.mxu1  ;;  %3795 = vadd.xlane.f32.xlu0 %v3794_v0  ;;  %8344 = vrcp.f32 %v3757_v50  ;;  %v3698_v35 = vmul.f32 1.442695, %v3594_v51  ;;  %v3700_v56 = vmul.f32 1.442695, %v3595_v31 }
 0x548   :  { %v11796_v8 = vpop.xlane.xlu2 %3768  ;;  %3798 = vadd.xlane.f32.xlu1 %v3797_v38  ;;  %v11798_v1 = vpop.xlane.xlu1 %3762  ;;  %8346 = vpow2.f32 %v3694_v54  ;;  %v2937_v39 = vadd.f32 %v2936_v53, %v2847_v27  ;;  %v15290_v27 = vld [vmem:[#allocation152_spill] sm:$0xff] }
 0x549   :  { %8348 = vpow2.f32 %v3696_v37  ;;  %v3878_v53 = vmul.f32 %v8339_v25, %v15290_v27 }
 0x54a   :  { %4026 = vmatmul.bf16.vlgmr.msrb.gmra.mxu0 %v3938_v7  ;;  %4115 = vmatmul.bf16.vlgmr.msrb.gmra.mxu1 %v3939_v24  ;;  %8350 = vpow2.f32 %v3710_v3 }
 0x54b   :  { %v11806_v32 = vpop.eup %8340  ;;  %8352 = vpow2.f32 %v3712_v2 }
 0x54c   :  { %v3760_v30 = vpop.xlane.xlu0 %3759  ;;  %v11808_v50 = vpop.eup %8342  ;;  %8354 = vpow2.f32 %v3698_v35 }
 0x54d   :  { %v8345_v17 = vpop.eup %8344  ;;  %v3809_v57 = vadd.f32 %v11808_v50, %v11806_v32  ;;  %8356 = vpow2.f32 %v3700_v56  ;;  %v15295_v56 = vld [vmem:[#allocation171_spill] sm:$0xff] }
 0x54e   :  { %v11814_v16 = vpop.eup %8346 }
 0x54f   :  { %v2849_v11 = vpop.f32.mrf.mxu0  ;;  %v2938_v0 = vpop.f32.mrf.mxu1  ;;  %3810 = vadd.xlane.f32.xlu0 %v3809_v57 }
 0x550   :  { %v2939_v54 = vadd.f32 %v2938_v0, %v2849_v11  ;;  %v3532_v38 = vpop.xlane.xlu2 %3531  ;;  %3801 = vadd.xlane.f32.xlu1 %v3800_v13  ;;  %v3526_v26 = vpop.xlane.xlu1 %3525  ;;  %v15293_v0 = vld [vmem:[#allocation153_spill] sm:$0xff] }
 0x551   :  { %v11816_v14 = vpop.eup %8348  ;;  %v3602_v37 = vsub.f32 %v11573_v41, %v3532_v38  ;;  %v3603_v7 = vsub.f32 %v11562_v21, %v3532_v38  ;;  %v3598_v3 = vsub.f32 %v11570_v62, %v3526_v26  ;;  %v3599_v24 = vsub.f32 %v11553_v12, %v3526_v26  ;;  %v15292_v12 = vld [vmem:[#allocation170_spill] sm:$0xff] }
 0x552   :  { %v11822_v2 = vpop.eup %8350  ;;  %v2984_v61 = vpack.c.bf16 %v2939_v54, %v2937_v39  ;;  %v3803_v62 = vadd.f32 %v11816_v14, %v11814_v16  ;;  %v3880_v11 = vmul.f32 %v8345_v17, %v15292_v12  ;;  %v3879_v35 = vmul.f32 %v8339_v25, %v15293_v0  ;;  %v15294_v39 = vld [vmem:[#allocation20_spill] sm:$0xff] }
 0x553   :  { %v11825_v51 = vpop.eup %8352  ;;  %v3714_v36 = vmul.f32 1.442695, %v3602_v37  ;;  %v3716_v31 = vmul.f32 1.442695, %v3603_v7  ;;  %v3706_v13 = vmul.f32 1.442695, %v3598_v3  ;;  %v3881_v38 = vmul.f32 %v8345_v17, %v15295_v56 }
 0x554   :  { %15291 = vst [vmem:[#allocation85_spill] sm:$0xff] %v11825_v51  ;;  %v3708_v41 = vmul.f32 1.442695, %v3599_v24  ;;  %7900 = vmatmul.msk.bf16.gmra.mxu3 %vm1787_vm2, %v2984_v61  ;;  %v3535_v21 = vpop.xlane.xlu0 %3534  ;;  %v3815_v26 = vadd.f32 %v11825_v51, %v11822_v2  ;;  %v11837_v61 = vpop.eup %8354 }
 0x555   :  { %8358 = vpow2.f32 %v3714_v36  ;;  %v3604_v57 = vsub.f32 %v11587_v28, %v3535_v21  ;;  %v3605_v54 = vsub.f32 %v15294_v39, %v3535_v21  ;;  %v3940_v28 = vpack.c.bf16 %v3880_v11, %v3878_v53  ;;  %v11841_v27 = vpop.eup %8356 }
 0x556   :  { %8360 = vpow2.f32 %v3716_v31  ;;  %3804 = vadd.xlane.f32.xlu2 %v3803_v62  ;;  %v3941_v17 = vpack.c.bf16 %v3881_v38, %v3879_v35 }
 0x557   :  { %8362 = vpow2.f32 %v3706_v13  ;;  %v3718_v37 = vmul.f32 1.442695, %v3604_v57  ;;  %v3720_v7 = vmul.f32 1.442695, %v3605_v54  ;;  %v2852_v3 = vpop.f32.mrf.mxu0  ;;  %v2941_v24 = vpop.f32.mrf.mxu1 }
 0x558   :  { %8364 = vpow2.f32 %v3708_v41  ;;  %v11839_v25 = vpop.xlane.xlu2 %3771  ;;  %3816 = vadd.xlane.f32.xlu1 %v3815_v26  ;;  %v3766_v31 = vpop.xlane.xlu1 %3765  ;;  %v3806_v41 = vadd.f32 %v11841_v27, %v11837_v61  ;;  %v2942_v39 = vadd.f32 %v2941_v24, %v2852_v3 }
 0x559   :  { %8366 = vrcp.f32 %v3760_v30 }
 0x55a   :  { %8368 = vpow2.f32 %v3718_v37  ;;  %4031 = vmatmul.bf16.gmra.mxu0 %v3940_v28  ;;  %4120 = vmatmul.bf16.gmra.mxu1 %v3941_v17  ;;  %v15300_v28 = vld [vmem:[#allocation133_spill] sm:$0xff] }
 0x55b   :  { %v11843_v36 = vpop.eup %8358  ;;  %8370 = vpow2.f32 %v3720_v7 }
 0x55c   :  { %15296 = vst [vmem:[#allocation97_spill] sm:$0xff] %v11843_v36  ;;  %v11845_v13 = vpop.eup %8360  ;;  %v11847_v21 = vpop.xlane.xlu0 %3774  ;;  %8372 = vrcp.f32 %v11798_v1 }
 0x55d   :  { %15297 = vst [vmem:[#allocation108_spill] sm:$0xff] %v11845_v13  ;;  %v11851_v62 = vpop.eup %8362  ;;  %v3818_v53 = vadd.f32 %v11845_v13, %v11843_v36  ;;  %v15303_v36 = vld [vmem:[#allocation174_spill] sm:$0xff] }
 0x55e   :  { %v11854_v30 = vpop.eup %8364  ;;  %3807 = vadd.xlane.f32.xlu2 %v3806_v41 }
 0x55f   :  { %v8367_v12 = vpop.eup %8366  ;;  %v3812_v11 = vadd.f32 %v11854_v30, %v11851_v62  ;;  %v2854_v0 = vpop.f32.mrf.mxu0 }
 0x560   :  { %v2943_v35 = vpop.f32.mrf.mxu1  ;;  %v11860_v57 = vpop.eup %8368  ;;  %3819 = vadd.xlane.f32.xlu1 %v3818_v53  ;;  %v3882_v17 = vmul.f32 %v8367_v12, %v15300_v28  ;;  %v15301_v53 = vld [vmem:[#allocation111_spill] sm:$0xff] }
 0x561   :  { %15298 = vst [vmem:[#allocation127_spill] sm:$0xff] %v11860_v57  ;;  %v2944_v54 = vadd.f32 %v2943_v35, %v2854_v0  ;;  %v11862_v56 = vpop.eup %8370  ;;  %3813 = vadd.xlane.f32.xlu0 %v3812_v11  ;;  %v11864_v38 = vpop.xlane.xlu2 %3546  ;;  %v3883_v0 = vmul.f32 %v8367_v12, %v15301_v53  ;;  %v15302_v11 = vld [vmem:[#allocation172_spill] sm:$0xff]  ;;  %v15305_v53 = vld [vmem:[#allocation17_spill] sm:$0xff] }
 0x562   :  { %15299 = vst [vmem:[#allocation114_spill] sm:$0xff] %v11862_v56  ;;  %v8373_v26 = vpop.eup %8372  ;;  %v3821_v7 = vadd.f32 %v11862_v56, %v11860_v57  ;;  %v3541_v41 = vpop.xlane.xlu1 %3540 }
 0x563   :  { %v2985_v1 = vpack.c.bf16 %v2944_v54, %v2942_v39  ;;  %v3884_v35 = vmul.f32 %v8373_v26, %v15302_v11  ;;  %v3885_v51 = vmul.f32 %v8373_v26, %v15303_v36  ;;  %v3608_v56 = vsub.f32 %v11607_v58, %v3541_v41 }
 0x564   :  { %v3538_v37 = vpop.xlane.xlu0 %3537  ;;  %v3609_v28 = vsub.f32 %v11627_v40, %v3541_v41 }
 0x565   :  { %7901 = vmatmul.msk.bf16.gmra.mxu3 %vm1787_vm2, %v2985_v1  ;;  %v3606_v3 = vsub.f32 %v11651_v20, %v3538_v37  ;;  %v3607_v24 = vsub.f32 %v11644_v55, %v3538_v37  ;;  %v3942_v57 = vpack.c.bf16 %v3884_v35, %v3882_v17  ;;  %v3943_v20 = vpack.c.bf16 %v3885_v51, %v3883_v0  ;;  %v15306_v0 = vld [vmem:[#allocation143_spill] sm:$0xff] }
 0x566   :  { %3822 = vadd.xlane.f32.xlu2 %v3821_v7  ;;  %v3726_v55 = vmul.f32 1.442695, %v3608_v56  ;;  %v3728_v37 = vmul.f32 1.442695, %v3609_v28 }
 0x567   :  { %v3722_v39 = vmul.f32 1.442695, %v3606_v3  ;;  %v3724_v54 = vmul.f32 1.442695, %v3607_v24  ;;  %v2857_v13 = vpop.f32.mrf.mxu0 }
 0x568   :  { %v2946_v1 = vpop.f32.mrf.mxu1 }
 0x569   :  { %8374 = vpow2.f32 %v3722_v39  ;;  %v11877_v12 = vpop.xlane.xlu2 %3786  ;;  %v2947_v40 = vadd.f32 %v2946_v1, %v2857_v13  ;;  %v15307_v39 = vld [vmem:[#allocation175_spill] sm:$0xff] }
 0x56a   :  { %8376 = vpow2.f32 %v3724_v54  ;;  %4036 = vmatmul.bf16.gmra.mxu0 %v3942_v57  ;;  %4125 = vmatmul.bf16.gmra.mxu1 %v3943_v20  ;;  %v3781_v41 = vpop.xlane.xlu1 %3780 }
 0x56b   :  { %8378 = vrcp.f32 %v3766_v31 }
 0x56c   :  { %8380 = vrcp.f32 %v11796_v8  ;;  %v3778_v3 = vpop.xlane.xlu0 %3777  ;;  %v15304_v8 = vld [vmem:[#allocation64_spill] sm:$0xff] }
 0x56d   :  { %8382 = vpow2.f32 %v3726_v55  ;;  %v15308_v55 = vld [vmem:[#allocation65_spill] sm:$0xff] }
 0x56e   :  { %8384 = vpow2.f32 %v3728_v37 }
 0x56f   :  { %v11880_v7 = vpop.eup %8374  ;;  %v2859_v36 = vpop.f32.mrf.mxu0  ;;  %8386 = vrcp.f32 %v11847_v21  ;;  %v15312_v21 = vld [vmem:[#allocation42_spill] sm:$0xff] }
 0x570   :  { %v2948_v26 = vpop.f32.mrf.mxu1  ;;  %v11882_v58 = vpop.eup %8376  ;;  %8388 = vrcp.f32 %v11839_v25 }
 0x571   :  { %v2949_v17 = vadd.f32 %v2948_v26, %v2859_v36  ;;  %v8379_v51 = vpop.eup %8378  ;;  %v3824_v31 = vadd.f32 %v11882_v58, %v11880_v7  ;;  %v11893_v35 = vpop.xlane.xlu2 %3549  ;;  %v15309_v26 = vld [vmem:[#allocation45_spill] sm:$0xff]  ;;  %8390 = vrcp.f32 %v3778_v3 }
 0x572   :  { %v8381_v56 = vpop.eup %8380  ;;  %v3886_v24 = vmul.f32 %v8379_v51, %v15304_v8  ;;  %v3887_v13 = vmul.f32 %v8379_v51, %v15306_v0  ;;  %v15310_v51 = vld [vmem:[#allocation13_spill] sm:$0xff]  ;;  %8392 = vrcp.f32 %v3781_v41 }
 0x573   :  { %v2986_v57 = vpack.c.bf16 %v2949_v17, %v2947_v40  ;;  %3825 = vadd.xlane.f32.xlu2 %v3824_v31  ;;  %v11891_v11 = vpop.eup %8382  ;;  %v3888_v54 = vmul.f32 %v8381_v56, %v15307_v39  ;;  %v3889_v37 = vmul.f32 %v8381_v56, %v15308_v55 }
 0x574   :  { %v11896_v1 = vpop.eup %8384  ;;  %v11907_v31 = vpop.xlane.xlu0 %3552 }
 0x575   :  { %7902 = vmatmul.msk.bf16.gmra.mxu3 %vm1787_vm2, %v2986_v57  ;;  %4562 = vrot.lane.b32.xlu0 %v15305_v53, %s8929_s4  ;;  %v3944_v36 = vpack.c.bf16 %v3888_v54, %v3886_v24  ;;  %v3945_v40 = vpack.c.bf16 %v3889_v37, %v3887_v13  ;;  %v3827_v17 = vadd.f32 %v11896_v1, %v11891_v11  ;;  %v3544_v57 = vpop.xlane.xlu1 %3543  ;;  %v11909_v24 = vpop.f32.mrf.mxu3  ;;  %v15441_v53 = vld [vmem:[#allocation136_spill] sm:$0xff] }
 0x576   :  { %15311 = vst [vmem:[#allocation115_spill] sm:$0xff] %v11909_v24  ;;  %v8387_v39 = vpop.eup %8386  ;;  %v3611_v41 = vsub.f32 %v11686_v47, %v3544_v57 }
 0x577   :  { %v2862_v28 = vpop.f32.mrf.mxu0  ;;  %v8389_v25 = vpop.eup %8388  ;;  %v3892_v37 = vmul.f32 %v8387_v39, %v11612_v15 }
 0x578   :  { %v2951_v20 = vpop.f32.mrf.mxu1 }
 0x579   :  { %4546 = vrot.lane.b32.xlu1 %v15309_v26, %s8929_s4  ;;  %v2952_v0 = vadd.f32 %v2951_v20, %v2862_v28  ;;  %v11911_v54 = vpop.xlane.xlu2 %3789  ;;  %v3891_v28 = vmul.f32 %v8389_v25, %v11598_v9 }
 0x57a   :  { %4041 = vmatmul.bf16.gmra.mxu0 %v3944_v36  ;;  %4130 = vmatmul.bf16.gmra.mxu1 %v3945_v40  ;;  %v3893_v36 = vmul.f32 %v8387_v39, %v11616_v60  ;;  %v3890_v40 = vmul.f32 %v8389_v25, %v11594_v63  ;;  %v8391_v39 = vpop.eup %8390 }
 0x57b   :  { %3828 = vadd.xlane.f32.xlu2 %v3827_v17 }
 0x57c   :  { %v11920_v24 = vpop.xlane.xlu0 %3792 }
 0x57d   :  { %4560 = vrot.lane.b32.xlu0 %v15310_v51, %s8929_s4 }
 0x57f   :  { %v2864_v56 = vpop.f32.mrf.mxu0 }
 0x580   :  { %v2953_v8 = vpop.f32.mrf.mxu1 }
 0x581   :  { %v2954_v13 = vadd.f32 %v2953_v8, %v2864_v56  ;;  %4544 = vrot.lane.b32.xlu1 %v15312_v21, %s8929_s4  ;;  %v3946_v56 = vpack.c.bf16 %v3892_v37, %v3890_v40  ;;  %v3784_v8 = vpop.xlane.xlu1 %3783  ;;  %v15313_v21 = vld [vmem:[#allocation40_spill] sm:$0xff]  ;;  %v4551_v15 = vpop.permute.xlu2 %4550  ;;  %v3610_v40 = vsub.f32 %v11682_v52, %v3544_v57 }
 0x582   :  { %v4635_v47 = vsel %vm1787_vm2, %v4551_v15, 0 }
 0x583   :  { %v2987_v55 = vpack.c.bf16 %v2954_v13, %v2952_v0  ;;  %v3947_v0 = vpack.c.bf16 %v3893_v36, %v3891_v28  ;;  %v11924_v13 = vpop.f32.mrf.mxu3  ;;  %v8393_v28 = vpop.eup %8392  ;;  %v3730_v52 = vmul.f32 1.442695, %v3610_v40 }
 0x584   :  { %15314 = vst [vmem:[#allocation63_spill] sm:$0xff] %v11924_v13 }
 0x585   :  { %7903 = vmatmul.msk.bf16.gmra.mxu3 %vm1787_vm2, %v2987_v55  ;;  %8394 = vpow2.f32 %v3730_v52 }
 0x586   :  { %8396 = vrcp.f32 %v3784_v8 }
 0x587   :  { %v2867_v17 = vpop.f32.mrf.mxu0 }
 0x588   :  { %v2956_v20 = vpop.f32.mrf.mxu1 }
 0x589   :  { %4542 = vrot.lane.b32.xlu1 %v15313_v21, %s8929_s4  ;;  %v2957_v9 = vadd.f32 %v2956_v20, %v2867_v17  ;;  %v3894_v17 = vmul.f32 %v8391_v39, %v11671_v59  ;;  %v4567_v20 = vpop.permute.xlu2 %4566 }
 0x58a   :  { %4046 = vmatmul.bf16.gmra.mxu0 %v3946_v56  ;;  %4135 = vmatmul.bf16.gmra.mxu1 %v3947_v0  ;;  %v15316_v56 = vld [vmem:[#allocation18_spill] sm:$0xff]  ;;  %v3896_v0 = vmul.f32 %v8393_v28, %v11653_v10  ;;  %v4659_v57 = vsel %vm1787_vm2, %v4567_v20, 0  ;;  %v3617_v10 = vsub.f32 %v11701_v4, %v11907_v31 }
 0x58b   :  { %v11929_v3 = vpop.f32.mrf.mxu3  ;;  %v11950_v40 = vpop.eup %8394 }
 0x58c   :  { %15315 = vst [vmem:[#allocation146_spill] sm:$0xff] %v11929_v3  ;;  %v3744_v8 = vmul.f32 1.442695, %v3617_v10 }
 0x58f   :  { %v2869_v63 = vpop.f32.mrf.mxu0  ;;  %v4553_v25 = vpop.permute.xlu0 %4552 }
 0x590   :  { %v2958_v60 = vpop.f32.mrf.mxu1  ;;  %v4569_v37 = vpop.permute.xlu1 %4568  ;;  %v4638_v51 = vsel %vm1787_vm2, %v4553_v25, 0  ;;  %v3897_v25 = vmul.f32 %v8393_v28, %v11657_v48 }
 0x591   :  { %v2959_v55 = vadd.f32 %v2958_v60, %v2869_v63  ;;  %v4662_v36 = vsel %vm1787_vm2, %v4569_v37, 0  ;;  %4672 = vmatpush.bf16.xpose.msra.mxu0 %v4638_v51  ;;  %v3895_v63 = vmul.f32 %v8391_v39, %v11677_v29  ;;  %v3732_v51 = vmul.f32 1.442695, %v3611_v41  ;;  %v4549_v39 = vpop.permute.xlu2 %4548  ;;  %v8397_v28 = vpop.eup %8396 }
 0x592   :  { %4761 = vmatpush.bf16.xpose.msra.mxu1 %v4662_v36  ;;  %v3612_v29 = vsub.f32 %v11640_v19, %v11864_v38 }
 0x593   :  { %v2988_v13 = vpack.c.bf16 %v2959_v55, %v2957_v9  ;;  %4564 = vrot.lane.b32.xlu2 %v15316_v56, %s8929_s4  ;;  %v3948_v55 = vpack.c.bf16 %v3896_v0, %v3894_v17  ;;  %v3949_v59 = vpack.c.bf16 %v3897_v25, %v3895_v63  ;;  %8398 = vpow2.f32 %v3732_v51  ;;  %v11946_v48 = vpop.f32.mrf.mxu3 }
 0x594   :  { %8400 = vrcp.f32 %v11877_v12  ;;  %15317 = vst [vmem:[#allocation125_spill] sm:$0xff] %v11946_v48  ;;  %v4632_v12 = vsel %vm1787_vm2, %v4549_v39, 0  ;;  %v3734_v20 = vmul.f32 1.442695, %v3612_v29  ;;  %v3898_v0 = vmul.f32 %v8397_v28, %v11713_v44  ;;  %v8047_v29 = vld [vmem:[%s14435_s5 + $0x18] sm:$0xff] }
 0x595   :  { %7904 = vmatmul.msk.bf16.gmra.mxu3 %vm1787_vm2, %v2988_v13  ;;  %v3616_v13 = vsub.f32 %v11710_v49, %v11907_v31  ;;  %v3613_v49 = vsub.f32 %v11637_v42, %v11864_v38  ;;  %v15318_v38 = vld [vmem:[#allocation157_spill] sm:$0xff]  ;;  %4278 = vmatpush.bf16.msra.mxu2 %v8047_v29 }
 0x597   :  { %v2872_v60 = vpop.f32.mrf.mxu0  ;;  %v3742_v15 = vmul.f32 1.442695, %v3616_v13  ;;  %v3736_v52 = vmul.f32 1.442695, %v3613_v49 }
 0x598   :  { %v2961_v9 = vpop.f32.mrf.mxu1 }
 0x599   :  { %4673 = vmatpush.bf16.xpose.msra.mxu0 %v4635_v47  ;;  %v2962_v4 = vadd.f32 %v2961_v9, %v2872_v60  ;;  %v11954_v41 = vpop.eup %8398  ;;  %8402 = vpow2.f32 %v3742_v15  ;;  %v3899_v60 = vmul.f32 %v8397_v28, %v11717_v5  ;;  %v15320_v47 = vld [vmem:[#allocation158_spill] sm:$0xff]  ;;  %v3615_v5 = vsub.f32 %v11689_v33, %v11893_v35 }
 0x59a   :  { %4051 = vmatmul.bf16.gmra.mxu0 %v3948_v55  ;;  %4762 = vmatpush.bf16.xpose.msra.mxu1 %v4659_v57  ;;  %v8401_v17 = vpop.eup %8400  ;;  %8404 = vpow2.f32 %v3744_v8  ;;  %v3830_v42 = vadd.f32 %v11954_v41, %v11950_v40 }
 0x59b   :  { %4140 = vmatmul.bf16.gmra.mxu1 %v3949_v59  ;;  %v3900_v63 = vmul.f32 %v8401_v17, %v15318_v38  ;;  %8406 = vpow2.f32 %v3734_v20  ;;  %v11963_v9 = vpop.f32.mrf.mxu3  ;;  %v3901_v57 = vmul.f32 %v8401_v17, %v15320_v47  ;;  %v3614_v59 = vsub.f32 %v11697_v34, %v11893_v35  ;;  %v8046_v17 = vld [vmem:[%s14435_s5 + $0x10] sm:$0xff]  ;;  %v15322_v20 = vld [vmem:[#allocation88_spill] sm:$0xff] }
 0x59c   :  { %15319 = vst [vmem:[#allocation126_spill] sm:$0xff] %v11963_v9  ;;  %8408 = vpow2.f32 %v3736_v52  ;;  %v3740_v33 = vmul.f32 1.442695, %v3615_v5  ;;  %v15323_v52 = vld [vmem:[#allocation138_spill] sm:$0xff]  ;;  %4279 = vmatpush.bf16.msra.mxu2 %v8046_v17 }
 0x59d   :  { %v3950_v25 = vpack.c.bf16 %v3900_v63, %v3898_v0  ;;  %v3951_v10 = vpack.c.bf16 %v3901_v57, %v3899_v60  ;;  %8410 = vrcp.f32 %v11920_v24  ;;  %v3738_v39 = vmul.f32 1.442695, %v3614_v59 }
 0x59e   :  { %8412 = vrcp.f32 %v11911_v54 }
 0x59f   :  { %v2874_v37 = vpop.f32.mrf.mxu0  ;;  %v11966_v44 = vpop.eup %8402  ;;  %8414 = vpow2.f32 %v3738_v39 }
 0x5a0   :  { %v2963_v36 = vpop.f32.mrf.mxu1  ;;  %v11970_v13 = vpop.eup %8404  ;;  %8416 = vpow2.f32 %v3740_v33 }
 0x5a1   :  { %v2964_v31 = vadd.f32 %v2963_v36, %v2874_v37  ;;  %4674 = vmatpush.bf16.xpose.msra.mxu0 %v4632_v12  ;;  %v11978_v15 = vpop.eup %8406  ;;  %v3839_v34 = vadd.f32 %v11970_v13, %v11966_v44 }
 0x5a2   :  { %v11983_v37 = vpop.eup %8408 }
 0x5a3   :  { %v2989_v19 = vpack.c.bf16 %v2964_v31, %v2962_v4  ;;  %v8411_v49 = vpop.eup %8410  ;;  %v3833_v28 = vadd.f32 %v11983_v37, %v11978_v15  ;;  %v11987_v4 = vpop.f32.mrf.mxu3 }
 0x5a4   :  { %15321 = vst [vmem:[#allocation161_spill] sm:$0xff] %v11987_v4  ;;  %v8413_v54 = vpop.eup %8412  ;;  %v3904_v12 = vmul.f32 %v8411_v49, %v11729_v6  ;;  %v3905_v0 = vmul.f32 %v8411_v49, %v15323_v52  ;;  %v15326_v49 = vld [vmem:[#allocation9_spill] sm:$0xff] }
 0x5a5   :  { %7905 = vmatmul.msk.bf16.gmra.mxu3 %vm1787_vm2, %v2989_v19  ;;  %v3902_v19 = vmul.f32 %v8413_v54, %v15322_v20 }
 0x5a7   :  { %3831 = vadd.xlane.f32.xlu0 %v3830_v42  ;;  %v2877_v51 = vpop.f32.mrf.mxu0  ;;  %v11996_v42 = vpop.eup %8414 }
 0x5a8   :  { %v2966_v55 = vpop.f32.mrf.mxu1  ;;  %v11998_v63 = vpop.eup %8416 }
 0x5a9   :  { %v2967_v8 = vadd.f32 %v2966_v55, %v2877_v51  ;;  %v3952_v51 = vpack.c.bf16 %v3904_v12, %v3902_v19  ;;  %v15324_v55 = vld [vmem:[#allocation122_spill] sm:$0xff]  ;;  %v3836_v5 = vadd.f32 %v11998_v63, %v11996_v42 }
 0x5aa   :  { %4056 = vmatmul.bf16.gmra.mxu0 %v3950_v25  ;;  %v3903_v6 = vmul.f32 %v8413_v54, %v15324_v55 }
 0x5ab   :  { %4145 = vmatmul.bf16.gmra.mxu1 %v3951_v10  ;;  %v12001_v25 = vpop.f32.mrf.mxu3 }
 0x5ac   :  { %15325 = vst [vmem:[#allocation160_spill] sm:$0xff] %v12001_v25  ;;  %v3953_v47 = vpack.c.bf16 %v3905_v0, %v3903_v6 }
 0x5af   :  { %3840 = vadd.xlane.f32.xlu0 %v3839_v34  ;;  %v2879_v35 = vpop.f32.mrf.mxu0 }
 0x5b0   :  { %v2968_v24 = vpop.f32.mrf.mxu1 }
 0x5b1   :  { %v2969_v36 = vadd.f32 %v2968_v24, %v2879_v35 }
 0x5b3   :  { %v2990_v31 = vpack.c.bf16 %v2969_v36, %v2967_v8  ;;  %3834 = vadd.xlane.f32.xlu1 %v3833_v28  ;;  %v12009_v28 = vpop.f32.mrf.mxu3 }
 0x5b4   :  { %15327 = vst [vmem:[#allocation163_spill] sm:$0xff] %v12009_v28  ;;  %v15356_v28 = vld [vmem:[#allocation30_spill] sm:$0xff] }
 0x5b5   :  { %7906 = vmatmul.msk.bf16.gmra.mxu3 %vm1787_vm2, %v2990_v31 }
 0x5b7   :  { %v2882_v38 = vpop.f32.mrf.mxu0 }
 0x5b8   :  { %v2971_v60 = vpop.f32.mrf.mxu1 }
 0x5b9   :  { %v2972_v39 = vadd.f32 %v2971_v60, %v2882_v38  ;;  %v15328_v38 = vld [vmem:[#allocation46_spill] sm:$0xff] }
 0x5ba   :  { %4061 = vmatmul.bf16.gmra.mxu0 %v3952_v51  ;;  %v3796_v57 = vpop.xlane.xlu0 %3795 }
 0x5bb   :  { %v3799_v59 = vpop.xlane.xlu1 %3798  ;;  %8418 = vrcp.f32 %v3796_v57  ;;  %4150 = vmatmul.bf16.gmra.mxu1 %v3953_v47  ;;  %v15330_v47 = vld [vmem:[#allocation50_spill] sm:$0xff]  ;;  %v15331_v57 = vld [vmem:[#allocation47_spill] sm:$0xff] }
 0x5bc   :  { %8420 = vrcp.f32 %v3799_v59  ;;  %3837 = vadd.xlane.f32.xlu2 %v3836_v5 }
 0x5bf   :  { %v2884_v10 = vpop.f32.mrf.mxu0 }
 0x5c0   :  { %v2973_v29 = vpop.f32.mrf.mxu1 }
 0x5c1   :  { %v2974_v34 = vadd.f32 %v2973_v29, %v2884_v10  ;;  %v8419_v33 = vpop.eup %8418  ;;  %v15332_v10 = vld [vmem:[#allocation39_spill] sm:$0xff] }
 0x5c2   :  { %v8421_v35 = vpop.eup %8420  ;;  %v3906_v8 = vmul.f32 %v8419_v33, %v11773_v46  ;;  %v3907_v54 = vmul.f32 %v8419_v33, %v11775_v45  ;;  %v15329_v46 = vld [vmem:[#allocation43_spill] sm:$0xff] }
 0x5c3   :  { %v2991_v24 = vpack.c.bf16 %v2974_v34, %v2972_v39  ;;  %4558 = vrot.lane.b32.xlu0 %v15326_v49, %s8929_s4  ;;  %v3908_v36 = vmul.f32 %v8421_v35, %v11778_v23  ;;  %v3909_v31 = vmul.f32 %v8421_v35, %v11782_v18  ;;  %v3802_v52 = vpop.xlane.xlu1 %3801  ;;  %v15411_v49 = vld [vmem:[#allocation109_spill] sm:$0xff] }
 0x5c5   :  { %7907 = vmatmul.msk.bf16.gmra.mxu3 %vm1787_vm2, %v2991_v24  ;;  %v3954_v20 = vpack.c.bf16 %v3908_v36, %v3906_v8  ;;  %v3955_v0 = vpack.c.bf16 %v3909_v31, %v3907_v54  ;;  %v3811_v36 = vpop.xlane.xlu0 %3810  ;;  %v15334_v31 = vld [vmem:[#allocation54_spill] sm:$0xff] }
 0x5c7   :  { %v4027_v12 = vpop.f32.mrf.mxu0 }
 0x5c8   :  { %v4116_v17 = vpop.f32.mrf.mxu1 }
 0x5c9   :  { %v3805_v19 = vpop.xlane.xlu2 %3804  ;;  %v4117_v18 = vadd.f32 %v4116_v17, %v4027_v12 }
 0x5ca   :  { %4066 = vmatmul.bf16.gmra.mxu0 %v3954_v20  ;;  %8422 = vrcp.f32 %v3805_v19 }
 0x5cb   :  { %4514 = vrot.lane.b32.xlu0 %v15328_v38, %s8929_s4  ;;  %4155 = vmatmul.bf16.gmra.mxu1 %v3955_v0  ;;  %8424 = vrcp.f32 %v3802_v52  ;;  %v3817_v8 = vpop.xlane.xlu1 %3816 }
 0x5cc   :  { %4512 = vrot.lane.b32.xlu1 %v15329_v46, %s8929_s4 }
 0x5cf   :  { %v4029_v23 = vpop.f32.mrf.mxu0 }
 0x5d0   :  { %v4118_v45 = vpop.f32.mrf.mxu1  ;;  %v8423_v60 = vpop.eup %8422 }
 0x5d1   :  { %v4119_v51 = vadd.f32 %v4118_v45, %v4029_v23  ;;  %v8425_v55 = vpop.eup %8424  ;;  %v3912_v59 = vmul.f32 %v8423_v60, %v11814_v16  ;;  %v3808_v5 = vpop.xlane.xlu2 %3807  ;;  %v3913_v39 = vmul.f32 %v8423_v60, %v11816_v14  ;;  %v15333_v16 = vld [vmem:[#allocation58_spill] sm:$0xff]  ;;  %v15336_v45 = vld [vmem:[#allocation11_spill] sm:$0xff]  ;;  %v15337_v60 = vld [vmem:[#allocation8_spill] sm:$0xff] }
 0x5d2   :  { %v3910_v29 = vmul.f32 %v8425_v55, %v11800_v43  ;;  %v3911_v24 = vmul.f32 %v8425_v55, %v11803_v22  ;;  %8426 = vrcp.f32 %v3808_v5  ;;  %v15335_v43 = vld [vmem:[#allocation60_spill] sm:$0xff] }
 0x5d3   :  { %v4196_v6 = vpack.c.bf16 %v4119_v51, %v4117_v18  ;;  %4518 = vrot.lane.b32.xlu0 %v15330_v47, %s8929_s4  ;;  %8428 = vrcp.f32 %v3811_v36  ;;  %v3820_v0 = vpop.xlane.xlu1 %3819  ;;  %v15338_v51 = vld [vmem:[#allocation15_spill] sm:$0xff]  ;;  %v15341_v36 = vld [vmem:[#allocation29_spill] sm:$0xff] }
 0x5d4   :  { %4516 = vrot.lane.b32.xlu1 %v15331_v57, %s8929_s4  ;;  %4510 = vrot.lane.b32.xlu2 %v15332_v10, %s8929_s4  ;;  %v3956_v35 = vpack.c.bf16 %v3912_v59, %v3910_v29  ;;  %v3957_v54 = vpack.c.bf16 %v3913_v39, %v3911_v24  ;;  %v3814_v59 = vpop.xlane.xlu0 %3813  ;;  %v15407_v57 = vld [vmem:[#allocation103_spill] sm:$0xff] }
 0x5d5   :  { %7868 = vmatmul.msk.bf16.vlgmr.msra.gmra.mxu2 %vm1787_vm2, %v4196_v6  ;;  %8430 = vrcp.f32 %v3814_v59  ;;  %v15344_v59 = vld [vmem:[#allocation53_spill] sm:$0xff] }
 0x5d6   :  { %8432 = vrcp.f32 %v3817_v8 }
 0x5d7   :  { %v4032_v34 = vpop.f32.mrf.mxu0 }
 0x5d8   :  { %v4121_v33 = vpop.f32.mrf.mxu1  ;;  %v8427_v22 = vpop.eup %8426 }
 0x5d9   :  { %v3823_v14 = vpop.xlane.xlu2 %3822  ;;  %v4122_v20 = vadd.f32 %v4121_v33, %v4032_v34  ;;  %v8429_v52 = vpop.eup %8428  ;;  %v3914_v18 = vmul.f32 %v8427_v22, %v11837_v61  ;;  %v3915_v6 = vmul.f32 %v8427_v22, %v11841_v27  ;;  %v15339_v61 = vld [vmem:[#allocation59_spill] sm:$0xff] }
 0x5da   :  { %4071 = vmatmul.bf16.gmra.mxu0 %v3956_v35  ;;  %v3916_v55 = vmul.f32 %v8429_v52, %v11806_v32  ;;  %v3917_v33 = vmul.f32 %v8429_v52, %v11808_v50  ;;  %v15340_v32 = vld [vmem:[#allocation16_spill] sm:$0xff]  ;;  %8434 = vrcp.f32 %v3823_v14 }
 0x5db   :  { %4522 = vrot.lane.b32.xlu0 %v15333_v16, %s8929_s4  ;;  %4160 = vmatmul.bf16.gmra.mxu1 %v3957_v54  ;;  %8436 = vrcp.f32 %v3820_v0  ;;  %v15351_v0 = vld [vmem:[#allocation127_spill] sm:$0xff] }
 0x5dc   :  { %4520 = vrot.lane.b32.xlu1 %v15334_v31, %s8929_s4  ;;  %4524 = vrot.lane.b32.xlu2 %v15335_v43, %s8929_s4  ;;  %v3958_v34 = vpack.c.bf16 %v3916_v55, %v3914_v18  ;;  %v3959_v35 = vpack.c.bf16 %v3917_v33, %v3915_v6  ;;  %v15343_v55 = vld [vmem:[#allocation22_spill] sm:$0xff]  ;;  %v15404_v31 = vld [vmem:[#allocation95_spill] sm:$0xff] }
 0x5df   :  { %v4034_v12 = vpop.f32.mrf.mxu0 }
 0x5e0   :  { %v4123_v17 = vpop.f32.mrf.mxu1 }
 0x5e1   :  { %v4124_v19 = vadd.f32 %v4123_v17, %v4034_v12  ;;  %v8431_v17 = vpop.eup %8430 }
 0x5e2   :  { %v3918_v6 = vmul.f32 %v8431_v17, %v11851_v62 }
 0x5e3   :  { %v4197_v23 = vpack.c.bf16 %v4124_v19, %v4122_v20  ;;  %4528 = vrot.lane.b32.xlu0 %v15336_v45, %s8929_s4  ;;  %v8433_v19 = vpop.eup %8432  ;;  %v15427_v45 = vld [vmem:[#allocation129_spill] sm:$0xff] }
 0x5e4   :  { %4526 = vrot.lane.b32.xlu1 %v15337_v60, %s8929_s4  ;;  %4530 = vrot.lane.b32.xlu2 %v15338_v51, %s8929_s4  ;;  %v15400_v60 = vld [vmem:[#allocation82_spill] sm:$0xff] }
 0x5e5   :  { %7869 = vmatmul.msk.bf16.gmra.mxu2 %vm1787_vm2, %v4197_v23  ;;  %v15342_v23 = vld [vmem:[#allocation52_spill] sm:$0xff] }
 0x5e6   :  { %v12045_v5 = vpop.xlane.xlu2 %3825 }
 0x5e7   :  { %v4037_v29 = vpop.f32.mrf.mxu0 }
 0x5e8   :  { %v4126_v39 = vpop.f32.mrf.mxu1 }
 0x5e9   :  { %v4127_v22 = vadd.f32 %v4126_v39, %v4037_v29  ;;  %v3920_v29 = vmul.f32 %v8433_v19, %v11822_v2  ;;  %v3919_v39 = vmul.f32 %v8431_v17, %v11854_v30  ;;  %v15347_v2 = vld [vmem:[#allocation56_spill] sm:$0xff]  ;;  %v15348_v17 = vld [vmem:[#allocation33_spill] sm:$0xff] }
 0x5ea   :  { %4076 = vmatmul.bf16.gmra.mxu0 %v3958_v34 }
 0x5eb   :  { %5502 = vrot.lane.b32.xlu0 %v15339_v61, %s8929_s4  ;;  %v4547_v24 = vpop.permute.xlu1 %4546  ;;  %4165 = vmatmul.bf16.gmra.mxu1 %v3959_v35  ;;  %v12446_v61 = vpop.f32.mrf.mxu3 }
 0x5ec   :  { %4532 = vrot.lane.b32.xlu1 %v15340_v32, %s8929_s4  ;;  %v4629_v27 = vsel %vm1787_vm2, %v4547_v24, 0  ;;  %4536 = vrot.lane.b32.xlu2 %v15341_v36, %s8929_s4  ;;  %v15399_v32 = vld [vmem:[#allocation83_spill] sm:$0xff]  ;;  %v15416_v36 = vld [vmem:[#allocation113_spill] sm:$0xff]  ;;  %15420 = vst [vmem:[#allocation130_spill] sm:$0xff] %v12446_v61 }
 0x5ed   :  { %4675 = vmatpush.bf16.xpose.msra.mxu0 %v4629_v27  ;;  %v3960_v27 = vpack.c.bf16 %v3920_v29, %v3918_v6 }
 0x5ee   :  { %v3829_v54 = vpop.xlane.xlu2 %3828 }
 0x5ef   :  { %v4039_v50 = vpop.f32.mrf.mxu0  ;;  %8438 = vrcp.f32 %v3829_v54  ;;  %v15359_v54 = vld [vmem:[#allocation14_spill] sm:$0xff] }
 0x5f0   :  { %v4128_v12 = vpop.f32.mrf.mxu1  ;;  %8440 = vrcp.f32 %v12045_v5  ;;  %v15361_v5 = vld [vmem:[#allocation24_spill] sm:$0xff] }
 0x5f1   :  { %v4129_v20 = vadd.f32 %v4128_v12, %v4039_v50  ;;  %v15345_v50 = vld [vmem:[#allocation85_spill] sm:$0xff] }
 0x5f2   :  { %v3921_v12 = vmul.f32 %v8433_v19, %v15345_v50 }
 0x5f3   :  { %v4198_v52 = vpack.c.bf16 %v4129_v20, %v4127_v22  ;;  %5496 = vrot.lane.b32.xlu0 %v15342_v23, %s8929_s4  ;;  %v4545_v18 = vpop.permute.xlu1 %4544  ;;  %v4563_v22 = vpop.permute.xlu0 %4562  ;;  %v15346_v20 = vld [vmem:[#allocation44_spill] sm:$0xff] }
 0x5f4   :  { %4534 = vrot.lane.b32.xlu1 %v15343_v55, %s8929_s4  ;;  %v4626_v8 = vsel %vm1787_vm2, %v4545_v18, 0  ;;  %5498 = vrot.lane.b32.xlu2 %v15344_v59, %s8929_s4  ;;  %v3961_v62 = vpack.c.bf16 %v3921_v12, %v3919_v39  ;;  %v4653_v14 = vsel %vm1787_vm2, %v4563_v22, 0  ;;  %v15353_v22 = vld [vmem:[#allocation97_spill] sm:$0xff]  ;;  %v15395_v59 = vld [vmem:[#allocation86_spill] sm:$0xff] }
 0x5f5   :  { %7870 = vmatmul.msk.bf16.gmra.mxu2 %vm1787_vm2, %v4198_v52  ;;  %4676 = vmatpush.bf16.xpose.msra.mxu0 %v4626_v8  ;;  %v8435_v8 = vpop.eup %8434 }
 0x5f6   :  { %v4565_v34 = vpop.permute.xlu2 %4564  ;;  %v8437_v39 = vpop.eup %8436  ;;  %v3924_v50 = vmul.f32 %v8435_v8, %v15351_v0 }
 0x5f7   :  { %v4042_v33 = vpop.f32.mrf.mxu0  ;;  %v4656_v24 = vsel %vm1787_vm2, %v4565_v34, 0 }
 0x5f8   :  { %v4131_v35 = vpop.f32.mrf.mxu1  ;;  %4763 = vmatpush.bf16.xpose.msra.mxu1 %v4656_v24  ;;  %v15349_v24 = vld [vmem:[#allocation38_spill] sm:$0xff] }
 0x5f9   :  { %v4132_v6 = vadd.f32 %v4131_v35, %v4042_v33  ;;  %v3922_v33 = vmul.f32 %v8437_v39, %v15353_v22  ;;  %v15354_v35 = vld [vmem:[#allocation114_spill] sm:$0xff]  ;;  %v8439_v22 = vpop.eup %8438 }
 0x5fa   :  { %4081 = vmatmul.bf16.gmra.mxu0 %v3960_v27  ;;  %v15350_v27 = vld [vmem:[#allocation49_spill] sm:$0xff] }
 0x5fb   :  { %5492 = vrot.lane.b32.xlu0 %v15346_v20, %s8929_s4  ;;  %v4543_v52 = vpop.permute.xlu1 %4542  ;;  %4170 = vmatmul.bf16.gmra.mxu1 %v3961_v62  ;;  %v4561_v12 = vpop.permute.xlu0 %4560  ;;  %v15352_v62 = vld [vmem:[#allocation41_spill] sm:$0xff] }
 0x5fc   :  { %5500 = vrot.lane.b32.xlu1 %v15347_v2, %s8929_s4  ;;  %v4623_v30 = vsel %vm1787_vm2, %v4543_v52, 0  ;;  %4538 = vrot.lane.b32.xlu2 %v15348_v17, %s8929_s4  ;;  %v3925_v52 = vmul.f32 %v8435_v8, %v15354_v35  ;;  %v15358_v8 = vld [vmem:[#allocation32_spill] sm:$0xff]  ;;  %v8441_v35 = vpop.eup %8440 }
 0x5fd   :  { %4677 = vmatpush.bf16.xpose.msra.mxu0 %v4623_v30  ;;  %v15396_v2 = vld [vmem:[#allocation84_spill] sm:$0xff] }
 0x5ff   :  { %v4044_v19 = vpop.f32.mrf.mxu0 }
 0x600   :  { %v4133_v18 = vpop.f32.mrf.mxu1  ;;  %4764 = vmatpush.bf16.xpose.msra.mxu1 %v4653_v14  ;;  %v3962_v14 = vpack.c.bf16 %v3924_v50, %v3922_v33 }
 0x601   :  { %v4134_v29 = vadd.f32 %v4133_v18, %v4044_v19  ;;  %v4650_v18 = vsel %vm1787_vm2, %v4561_v12, 0 }
 0x603   :  { %v4199_v34 = vpack.c.bf16 %v4134_v29, %v4132_v6  ;;  %5488 = vrot.lane.b32.xlu0 %v15349_v24, %s8929_s4  ;;  %v15355_v6 = vld [vmem:[#allocation108_spill] sm:$0xff]  ;;  %v15368_v24 = vld [vmem:[#allocation57_spill] sm:$0xff] }
 0x604   :  { %5494 = vrot.lane.b32.xlu1 %v15350_v27, %s8929_s4  ;;  %5490 = vrot.lane.b32.xlu2 %v15352_v62, %s8929_s4  ;;  %v3923_v29 = vmul.f32 %v8437_v39, %v15355_v6  ;;  %v3926_v6 = vmul.f32 %v8441_v35, %v11880_v7 }
 0x605   :  { %7871 = vmatmul.msk.bf16.gmra.mxu2 %vm1787_vm2, %v4199_v34  ;;  %v15357_v34 = vld [vmem:[#allocation34_spill] sm:$0xff] }
 0x606   :  { %v3963_v0 = vpack.c.bf16 %v3925_v52, %v3923_v29 }
 0x607   :  { %v4047_v30 = vpop.f32.mrf.mxu0 }
 0x608   :  { %v4136_v19 = vpop.f32.mrf.mxu1  ;;  %4765 = vmatpush.bf16.xpose.msra.mxu1 %v4650_v18  ;;  %v15360_v18 = vld [vmem:[#allocation27_spill] sm:$0xff] }
 0x609   :  { %v4137_v39 = vadd.f32 %v4136_v19, %v4047_v30  ;;  %v3929_v30 = vmul.f32 %v8439_v22, %v11896_v1 }
 0x60a   :  { %4086 = vmatmul.bf16.gmra.mxu0 %v3962_v14  ;;  %v3928_v14 = vmul.f32 %v8439_v22, %v11891_v11  ;;  %v15363_v11 = vld [vmem:[#allocation21_spill] sm:$0xff] }
 0x60b   :  { %5516 = vrot.lane.b32.xlu0 %v15356_v28, %s8929_s4  ;;  %4175 = vmatmul.bf16.gmra.mxu1 %v3963_v0  ;;  %v3927_v0 = vmul.f32 %v8441_v35, %v11882_v58  ;;  %v15365_v35 = vld [vmem:[#allocation36_spill] sm:$0xff] }
 0x60c   :  { %4540 = vrot.lane.b32.xlu1 %v15357_v34, %s8929_s4  ;;  %5518 = vrot.lane.b32.xlu2 %v15358_v8, %s8929_s4  ;;  %v3964_v29 = vpack.c.bf16 %v3928_v14, %v3926_v6  ;;  %v15366_v6 = vld [vmem:[#allocation61_spill] sm:$0xff]  ;;  %v15403_v34 = vld [vmem:[#allocation96_spill] sm:$0xff] }
 0x60f   :  { %v4049_v12 = vpop.f32.mrf.mxu0 }
 0x610   :  { %v4138_v50 = vpop.f32.mrf.mxu1 }
 0x611   :  { %v4139_v33 = vadd.f32 %v4138_v50, %v4049_v12  ;;  %v3965_v50 = vpack.c.bf16 %v3929_v30, %v3927_v0 }
 0x613   :  { %v4200_v52 = vpack.c.bf16 %v4139_v33, %v4137_v39  ;;  %5508 = vrot.lane.b32.xlu0 %v15359_v54, %s8929_s4  ;;  %v15362_v39 = vld [vmem:[#allocation31_spill] sm:$0xff]  ;;  %v15364_v33 = vld [vmem:[#allocation37_spill] sm:$0xff] }
 0x614   :  { %5514 = vrot.lane.b32.xlu1 %v15360_v18, %s8929_s4  ;;  %5512 = vrot.lane.b32.xlu2 %v15361_v5, %s8929_s4  ;;  %v15419_v18 = vld [vmem:[#allocation120_spill] sm:$0xff] }
 0x615   :  { %7872 = vmatmul.msk.bf16.gmra.mxu2 %vm1787_vm2, %v4200_v52 }
 0x617   :  { %v4052_v19 = vpop.f32.mrf.mxu0 }
 0x618   :  { %v4141_v12 = vpop.f32.mrf.mxu1 }
 0x619   :  { %v4142_v52 = vadd.f32 %v4141_v12, %v4052_v19 }
 0x61a   :  { %4091 = vmatmul.bf16.gmra.mxu0 %v3964_v29  ;;  %v3832_v22 = vpop.xlane.xlu0 %3831 }
 0x61b   :  { %5971 = vrot.lane.b32.xlu0 %v15362_v39, %s8930_s22  ;;  %4180 = vmatmul.bf16.gmra.mxu1 %v3965_v50  ;;  %8442 = vrcp.f32 %v3832_v22  ;;  %v15367_v39 = vld [vmem:[#allocation35_spill] sm:$0xff] }
 0x61c   :  { %5510 = vrot.lane.b32.xlu1 %v15363_v11, %s8929_s4  ;;  %5506 = vrot.lane.b32.xlu2 %v15364_v33, %s8929_s4  ;;  %v15392_v11 = vld [vmem:[#allocation78_spill] sm:$0xff] }
 0x61f   :  { %v4054_v7 = vpop.f32.mrf.mxu0 }
 0x620   :  { %v4143_v1 = vpop.f32.mrf.mxu1 }
 0x621   :  { %v4144_v14 = vadd.f32 %v4143_v1, %v4054_v7  ;;  %v8443_v50 = vpop.eup %8442 }
 0x622   :  { %v3841_v12 = vpop.xlane.xlu0 %3840  ;;  %v3930_v7 = vmul.f32 %v8443_v50, %v11950_v40  ;;  %v3931_v22 = vmul.f32 %v8443_v50, %v11954_v41 }
 0x623   :  { %v4201_v58 = vpack.c.bf16 %v4144_v14, %v4142_v52 }
 0x624   :  { %5504 = vrot.lane.b32.xlu1 %v15365_v35, %s8929_s4  ;;  %5957 = vrot.lane.b32.xlu2 %v15366_v6, %s8930_s22  ;;  %s7639_s4 = sshll.u32 %s14437_s7, 4  ;;  %s7640_s4 = int_to_ptr.hbm [resolvable:$true] %s7639_s4 }
 0x625   :  { %7873 = vmatmul.msk.bf16.gmra.mxu2 %vm1787_vm2, %v4201_v58 }
 0x626   :  { %v3835_v30 = vpop.xlane.xlu1 %3834 }
 0x627   :  { %8444 = vrcp.f32 %v3835_v30  ;;  %v4057_v29 = vpop.f32.mrf.mxu0 }
 0x628   :  { %v4146_v0 = vpop.f32.mrf.mxu1 }
 0x629   :  { %v4147_v48 = vadd.f32 %v4146_v0, %v4057_v29 }
 0x62c   :  { %5973 = vrot.lane.b32.xlu1 %v15367_v39, %s8930_s22 }
 0x62d   :  { %v8445_v19 = vpop.eup %8444 }
 0x62e   :  { %v3932_v1 = vmul.f32 %v8445_v19, %v11978_v15  ;;  %v3933_v52 = vmul.f32 %v8445_v19, %v11983_v37 }
 0x62f   :  { %v3838_v14 = vpop.xlane.xlu2 %3837  ;;  %v4059_v58 = vpop.f32.mrf.mxu0 }
 0x630   :  { %v3966_v6 = vpack.c.bf16 %v3932_v1, %v3930_v7  ;;  %v3967_v30 = vpack.c.bf16 %v3933_v52, %v3931_v22  ;;  %v4148_v4 = vpop.f32.mrf.mxu1  ;;  %8446 = vrcp.f32 %v3838_v14 }
 0x631   :  { %v4149_v35 = vadd.f32 %v4148_v4, %v4059_v58  ;;  %8448 = vrcp.f32 %v3841_v12  ;;  %v15369_v4 = vld [vmem:[#allocation28_spill] sm:$0xff] }
 0x632   :  { %4096 = vmatmul.bf16.gmra.mxu0 %v3966_v6  ;;  %4185 = vmatmul.bf16.gmra.mxu1 %v3967_v30 }
 0x633   :  { %v4202_v39 = vpack.c.bf16 %v4149_v35, %v4147_v48 }
 0x634   :  { %5955 = vrot.lane.b32.xlu1 %v15368_v24, %s8930_s22 }
 0x635   :  { %v4559_v40 = vpop.permute.xlu0 %4558  ;;  %7874 = vmatmul.msk.bf16.gmra.mxu2 %vm1787_vm2, %v4202_v39 }
 0x636   :  { %v4647_v41 = vsel %vm1787_vm2, %v4559_v40, 0  ;;  %v8447_v50 = vpop.eup %8446 }
 0x637   :  { %4766 = vmatpush.bf16.xpose.msra.mxu1 %v4647_v41  ;;  %v4511_v15 = vpop.permute.xlu2 %4510  ;;  %v4062_v37 = vpop.f32.mrf.mxu0  ;;  %v3934_v48 = vmul.f32 %v8447_v50, %v11996_v42  ;;  %v3935_v35 = vmul.f32 %v8447_v50, %v11998_v63  ;;  %v15370_v63 = vld [vmem:[#allocation55_spill] sm:$0xff] }
 0x638   :  { %v4151_v19 = vpop.f32.mrf.mxu1  ;;  %v8449_v29 = vpop.eup %8448 }
 0x639   :  { %v3936_v12 = vmul.f32 %v8449_v29, %v11966_v44  ;;  %v3937_v7 = vmul.f32 %v8449_v29, %v11970_v13  ;;  %v4152_v6 = vadd.f32 %v4151_v19, %v4062_v37 }
 0x63b   :  { %v3968_v52 = vpack.c.bf16 %v3936_v12, %v3934_v48  ;;  %v3969_v14 = vpack.c.bf16 %v3937_v7, %v3935_v35 }
 0x63c   :  { %5969 = vrot.lane.b32.xlu1 %v15369_v4, %s8930_s22 }
 0x63d   :  { %v12131_v24 = vpop.permute.xlu0 %4514 }
 0x63e   :  { %v4513_v0 = vpop.permute.xlu1 %4512 }
 0x63f   :  { %v12135_v1 = vpop.permute.xlu2 %4524  ;;  %v4064_v22 = vpop.f32.mrf.mxu0 }
 0x640   :  { %v4153_v58 = vpop.f32.mrf.mxu1 }
 0x641   :  { %v4154_v30 = vadd.f32 %v4153_v58, %v4064_v22 }
 0x642   :  { %4101 = vmatmul.bf16.gmra.mxu0 %v3968_v52  ;;  %4190 = vmatmul.bf16.gmra.mxu1 %v3969_v14 }
 0x643   :  { %v4203_v42 = vpack.c.bf16 %v4154_v30, %v4152_v6 }
 0x644   :  { %5953 = vrot.lane.b32.xlu1 %v15370_v63, %s8930_s22 }
 0x645   :  { %v12139_v39 = vpop.permute.xlu0 %4518  ;;  %7875 = vmatmul.msk.bf16.gmra.mxu2 %vm1787_vm2, %v4203_v42 }
 0x646   :  { %v12142_v44 = vpop.permute.xlu1 %4516 }
 0x647   :  { %v12144_v13 = vpop.permute.xlu2 %4530  ;;  %v4067_v40 = vpop.f32.mrf.mxu0 }
 0x648   :  { %v4156_v41 = vpop.f32.mrf.mxu1 }
 0x649   :  { %v4157_v48 = vadd.f32 %v4156_v41, %v4067_v40 }
 0x64d   :  { %v12146_v50 = vpop.permute.xlu0 %4522 }
 0x64e   :  { %v12148_v37 = vpop.permute.xlu1 %4520 }
 0x64f   :  { %v12150_v19 = vpop.permute.xlu2 %4536  ;;  %v4069_v29 = vpop.f32.mrf.mxu0 }
 0x650   :  { %v4158_v4 = vpop.f32.mrf.mxu1 }
 0x651   :  { %v4159_v35 = vadd.f32 %v4158_v4, %v4069_v29 }
 0x652   :  { %7908 = vmatmul.msk.bf16.vlgmr.msra.gmra.mxu0 %vm1787_vm2, %v4511_v15  ;;  %7924 = vmatmul.msk.bf16.vlgmr.msra.gmra.mxu1 %vm1787_vm2, %v4511_v15 }
 0x653   :  { %v4204_v12 = vpack.c.bf16 %v4159_v35, %v4157_v48 }
 0x655   :  { %v12154_v7 = vpop.permute.xlu0 %4528  ;;  %7876 = vmatmul.msk.bf16.gmra.mxu2 %vm1787_vm2, %v4204_v12 }
 0x656   :  { %v12157_v22 = vpop.permute.xlu1 %4526 }
 0x657   :  { %v5499_v52 = vpop.permute.xlu2 %5498  ;;  %v4072_v14 = vpop.f32.mrf.mxu0 }
 0x658   :  { %v4161_v58 = vpop.f32.mrf.mxu1 }
 0x659   :  { %v4162_v41 = vadd.f32 %v4161_v58, %v4072_v14 }
 0x65d   :  { %v5503_v6 = vpop.permute.xlu0 %5502 }
 0x65e   :  { %5536 = vmatpush.bf16.msrb.mxu2 %v5503_v6  ;;  %v12159_v30 = vpop.permute.xlu1 %4532 }
 0x65f   :  { %v12161_v42 = vpop.permute.xlu2 %4538  ;;  %v4074_v63 = vpop.f32.mrf.mxu0 }
 0x660   :  { %v4163_v40 = vpop.f32.mrf.mxu1 }
 0x661   :  { %v4164_v15 = vadd.f32 %v4163_v40, %v4074_v63 }
 0x662   :  { %7909 = vmatmul.msk.bf16.gmra.mxu0 %vm1787_vm2, %v4513_v0  ;;  %7925 = vmatmul.msk.bf16.gmra.mxu1 %vm1787_vm2, %v4513_v0 }
 0x663   :  { %v4205_v29 = vpack.c.bf16 %v4164_v15, %v4162_v41 }
 0x665   :  { %v5497_v4 = vpop.permute.xlu0 %5496  ;;  %7877 = vmatmul.msk.bf16.gmra.mxu2 %vm1787_vm2, %v4205_v29 }
 0x666   :  { %v12166_v48 = vpop.permute.xlu1 %4534 }
 0x667   :  { %v5491_v35 = vpop.permute.xlu2 %5490  ;;  %v4077_v12 = vpop.f32.mrf.mxu0 }
 0x668   :  { %v4166_v6 = vpop.f32.mrf.mxu1 }
 0x669   :  { %v4167_v58 = vadd.f32 %v4166_v6, %v4077_v12 }
 0x66d   :  { %v5493_v33 = vpop.permute.xlu0 %5492 }
 0x66e   :  { %v5501_v54 = vpop.permute.xlu1 %5500 }
 0x66f   :  { %5537 = vmatpush.bf16.msrb.mxu2 %v5501_v54  ;;  %v5519_v25 = vpop.permute.xlu2 %5518  ;;  %v4079_v9 = vpop.f32.mrf.mxu0 }
 0x670   :  { %v4168_v14 = vpop.f32.mrf.mxu1  ;;  %5625 = vmatpush.bf16.msrb.mxu3 %v5519_v25 }
 0x671   :  { %v4169_v63 = vadd.f32 %v4168_v14, %v4079_v9 }
 0x672   :  { %7910 = vmatmul.msk.bf16.gmra.mxu0 %vm1787_vm2, %v12131_v24  ;;  %7926 = vmatmul.msk.bf16.gmra.mxu1 %vm1787_vm2, %v12131_v24 }
 0x673   :  { %5538 = vmatpush.bf16.msrb.mxu2 %v5499_v52  ;;  %v4206_v0 = vpack.c.bf16 %v4169_v63, %v4167_v58  ;;  %v12179_v58 = vpop.f32.mrf.mxu2 }
 0x674   :  { %15371 = vst [vmem:[#allocation162_spill] sm:$0xff] %v12179_v58 }
 0x675   :  { %v5489_v40 = vpop.permute.xlu0 %5488  ;;  %7878 = vmatmul.msk.bf16.gmra.mxu2 %vm1787_vm2, %v4206_v0 }
 0x676   :  { %v5495_v41 = vpop.permute.xlu1 %5494 }
 0x677   :  { %5539 = vmatpush.bf16.msrb.mxu2 %v5497_v4  ;;  %v5513_v54 = vpop.permute.xlu2 %5512  ;;  %v4082_v15 = vpop.f32.mrf.mxu0 }
 0x678   :  { %v4171_v29 = vpop.f32.mrf.mxu1 }
 0x679   :  { %v4172_v24 = vadd.f32 %v4171_v29, %v4082_v15 }
 0x67b   :  { %5540 = vmatpush.bf16.msrb.mxu2 %v5495_v41 }
 0x67d   :  { %v5517_v25 = vpop.permute.xlu0 %5516 }
 0x67e   :  { %5626 = vmatpush.bf16.msrb.mxu3 %v5517_v25  ;;  %v12173_v9 = vpop.permute.xlu1 %4540  ;;  %v12183_v25 = vpop.f32.mrf.mxu2 }
 0x67f   :  { %5541 = vmatpush.bf16.msrb.mxu2 %v5493_v33  ;;  %v5507_v12 = vpop.permute.xlu2 %5506  ;;  %v4084_v6 = vpop.f32.mrf.mxu0  ;;  %15372 = vst [vmem:[#allocation110_spill] sm:$0xff] %v12183_v25  ;;  %v15383_v25 = vld [vmem:[#allocation19_spill] sm:$0xff] }
 0x680   :  { %v4173_v14 = vpop.f32.mrf.mxu1 }
 0x681   :  { %v4174_v52 = vadd.f32 %v4173_v14, %v4084_v6 }
 0x682   :  { %7911 = vmatmul.msk.bf16.gmra.mxu0 %vm1787_vm2, %v12142_v44  ;;  %7927 = vmatmul.msk.bf16.gmra.mxu1 %vm1787_vm2, %v12142_v44 }
 0x683   :  { %5542 = vmatpush.bf16.msrb.mxu2 %v5491_v35  ;;  %v4207_v4 = vpack.c.bf16 %v4174_v52, %v4172_v24 }
 0x685   :  { %7879 = vmatmul.msk.bf16.gmra.mxu2 %vm1787_vm2, %v4207_v4  ;;  %v5509_v6 = vpop.permute.xlu0 %5508 }
 0x686   :  { %v5515_v63 = vpop.permute.xlu1 %5514 }
 0x687   :  { %5543 = vmatpush.bf16.msrb.mxu2 %v5489_v40  ;;  %5627 = vmatpush.bf16.msrb.mxu3 %v5515_v63  ;;  %v5958_v33 = vpop.permute.xlu2 %5957  ;;  %v4087_v0 = vpop.f32.mrf.mxu0 }
 0x688   :  { %v6045_v41 = vsel %vm1787_vm2, %v5958_v33, 0  ;;  %v4176_v15 = vpop.f32.mrf.mxu1  ;;  %v12190_v63 = vpop.f32.mrf.mxu2 }
 0x689   :  { %6071 = vmatpush.bf16.xpose.msrb.mxu1 %v6045_v41  ;;  %v4177_v14 = vadd.f32 %v4176_v15, %v4087_v0  ;;  %15373 = vst [vmem:[#allocation137_spill] sm:$0xff] %v12190_v63  ;;  %v15391_v63 = vld [vmem:[#allocation79_spill] sm:$0xff] }
 0x68b   :  { %5628 = vmatpush.bf16.msrb.mxu3 %v5513_v54 }
 0x68e   :  { %v5511_v29 = vpop.permute.xlu1 %5510 }
 0x68f   :  { %5629 = vmatpush.bf16.msrb.mxu3 %v5511_v29  ;;  %v4089_v44 = vpop.f32.mrf.mxu0 }
 0x690   :  { %v4178_v35 = vpop.f32.mrf.mxu1 }
 0x691   :  { %v4179_v24 = vadd.f32 %v4178_v35, %v4089_v44 }
 0x692   :  { %7912 = vmatmul.msk.bf16.gmra.mxu0 %vm1787_vm2, %v12139_v39  ;;  %7928 = vmatmul.msk.bf16.gmra.mxu1 %vm1787_vm2, %v12139_v39  ;;  %v12197_v39 = vpop.f32.mrf.mxu2 }
 0x693   :  { %5630 = vmatpush.bf16.msrb.mxu3 %v5509_v6  ;;  %v4208_v40 = vpack.c.bf16 %v4179_v24, %v4177_v14  ;;  %15374 = vst [vmem:[#allocation106_spill] sm:$0xff] %v12197_v39 }
 0x695   :  { %7880 = vmatmul.msk.bf16.gmra.mxu2 %vm1787_vm2, %v4208_v40 }
 0x696   :  { %v5505_v54 = vpop.permute.xlu1 %5504 }
 0x697   :  { %5631 = vmatpush.bf16.msrb.mxu3 %v5507_v12  ;;  %v4092_v52 = vpop.f32.mrf.mxu0  ;;  %v5972_v12 = vpop.permute.xlu0 %5971 }
 0x698   :  { %v4181_v4 = vpop.f32.mrf.mxu1  ;;  %v6066_v24 = vsel %vm1787_vm2, %v5972_v12, 0 }
 0x699   :  { %v4182_v29 = vadd.f32 %v4181_v4, %v4092_v52 }
 0x69a   :  { %v12202_v40 = vpop.f32.mrf.mxu2 }
 0x69b   :  { %5632 = vmatpush.bf16.msrb.mxu3 %v5505_v54  ;;  %15375 = vst [vmem:[#allocation134_spill] sm:$0xff] %v12202_v40  ;;  %v15388_v40 = vld [vmem:[#allocation72_spill] sm:$0xff] }
 0x69e   :  { %v5974_v33 = vpop.permute.xlu1 %5973 }
 0x69f   :  { %v6069_v0 = vsel %vm1787_vm2, %v5974_v33, 0  ;;  %v4094_v41 = vpop.f32.mrf.mxu0 }
 0x6a0   :  { %6160 = vmatpush.bf16.xpose.msra.mxu2 %v6069_v0  ;;  %v4183_v15 = vpop.f32.mrf.mxu1 }
 0x6a1   :  { %v4184_v44 = vadd.f32 %v4183_v15, %v4094_v41 }
 0x6a2   :  { %7913 = vmatmul.msk.bf16.gmra.mxu0 %vm1787_vm2, %v12148_v37  ;;  %7929 = vmatmul.msk.bf16.gmra.mxu1 %vm1787_vm2, %v12148_v37 }
 0x6a3   :  { %v4209_v35 = vpack.c.bf16 %v4184_v44, %v4182_v29  ;;  %v12210_v29 = vpop.f32.mrf.mxu2 }
 0x6a4   :  { %15376 = vst [vmem:[#allocation93_spill] sm:$0xff] %v12210_v29  ;;  %v15380_v29 = vld [vmem:[#allocation66_spill] sm:$0xff] }
 0x6a5   :  { %7881 = vmatmul.msk.bf16.gmra.mxu2 %vm1787_vm2, %v4209_v35 }
 0x6a6   :  { %v5956_v6 = vpop.permute.xlu1 %5955 }
 0x6a7   :  { %v6042_v14 = vsel %vm1787_vm2, %v5956_v6, 0 }
 0x6a8   :  { %6072 = vmatpush.bf16.xpose.msrb.mxu1 %v6042_v14  ;;  %6161 = vmatpush.bf16.xpose.msra.mxu2 %v6066_v24 }
 0x6ab   :  { %v12213_v24 = vpop.f32.mrf.mxu2 }
 0x6ac   :  { %15377 = vst [vmem:[#allocation141_spill] sm:$0xff] %v12213_v24  ;;  %v15387_v24 = vld [vmem:[#allocation26_spill] sm:$0xff] }
 0x6ae   :  { %v5970_v54 = vpop.permute.xlu1 %5969 }
 0x6af   :  { %v4097_v52 = vpop.f32.mrf.mxu0  ;;  %v4186_v4 = vpop.f32.mrf.mxu1  ;;  %v6063_v37 = vsel %vm1787_vm2, %v5970_v54, 0 }
 0x6b0   :  { %6162 = vmatpush.bf16.xpose.msra.mxu2 %v6063_v37  ;;  %v4187_v44 = vadd.f32 %v4186_v4, %v4097_v52 }
 0x6b2   :  { %7914 = vmatmul.msk.bf16.gmra.mxu0 %vm1787_vm2, %v12146_v50  ;;  %7930 = vmatmul.msk.bf16.gmra.mxu1 %vm1787_vm2, %v12146_v50 }
 0x6b3   :  { %v12219_v4 = vpop.f32.mrf.mxu2 }
 0x6b4   :  { %15378 = vst [vmem:[#allocation144_spill] sm:$0xff] %v12219_v4 }
 0x6b6   :  { %v5954_v33 = vpop.permute.xlu1 %5953 }
 0x6b7   :  { %v4099_v0 = vpop.f32.mrf.mxu0  ;;  %v4188_v41 = vpop.f32.mrf.mxu1  ;;  %v6039_v15 = vsel %vm1787_vm2, %v5954_v33, 0 }
 0x6b8   :  { %v4189_v12 = vadd.f32 %v4188_v41, %v4099_v0  ;;  %6073 = vmatpush.bf16.xpose.msrb.mxu1 %v6039_v15 }
 0x6ba   :  { %v4210_v35 = vpack.c.bf16 %v4189_v12, %v4187_v44  ;;  %v15379_v12 = vld [vmem:[#allocation10_spill] sm:$0xff] }
 0x6bc   :  { %7882 = vmatmul.msk.bf16.gmra.mxu2 %vm1787_vm2, %v4210_v35 }
 0x6bf   :  { %v4102_v6 = vpop.f32.mrf.mxu0  ;;  %v4191_v14 = vpop.f32.mrf.mxu1 }
 0x6c0   :  { %v4192_v37 = vadd.f32 %v4191_v14, %v4102_v6 }
 0x6c2   :  { %7915 = vmatmul.msk.bf16.gmra.mxu0 %vm1787_vm2, %v12135_v1  ;;  %7931 = vmatmul.msk.bf16.gmra.mxu1 %vm1787_vm2, %v12135_v1 }
 0x6c7   :  { %v4104_v50 = vpop.f32.mrf.mxu0  ;;  %v4193_v54 = vpop.f32.mrf.mxu1 }
 0x6c8   :  { %v4194_v33 = vadd.f32 %v4193_v54, %v4104_v50 }
 0x6ca   :  { %v4211_v52 = vpack.c.bf16 %v4194_v33, %v4192_v37  ;;  %v15381_v37 = vld [vmem:[#allocation67_spill] sm:$0xff] }
 0x6cc   :  { %7883 = vmatmul.msk.bf16.gmra.mxu2 %vm1787_vm2, %v4211_v52  ;;  %v15382_v52 = vld [vmem:[#allocation68_spill] sm:$0xff] }
 0x6cf   :  { %v4679_v0 = vpop.f32.mrf.mxu0  ;;  %v4768_v41 = vpop.f32.mrf.mxu1 }
 0x6d0   :  { %v4848_v15 = vmul.f32 0.17677669, %v4679_v0  ;;  %v4849_v44 = vmul.f32 0.17677669, %v4768_v41 }
 0x6d2   :  { %v12223_v35 = vadd.f32 %v4848_v15, %v15379_v12  ;;  %v12226_v39 = vadd.f32 %v4849_v44, %v15380_v29  ;;  %7916 = vmatmul.msk.bf16.gmra.mxu0 %vm1787_vm2, %v12157_v22  ;;  %7932 = vmatmul.msk.bf16.gmra.mxu1 %vm1787_vm2, %v12157_v22  ;;  %v15384_v29 = vld [vmem:[#allocation69_spill] sm:$0xff] }
 0x6d4   :  { %v4976_v1 = vmax.f32 %v12223_v35, %v12226_v39 }
 0x6d6   :  { %4977 = vmax.xlane.f32.xlu0 %v4976_v1 }
 0x6d7   :  { %v4681_v6 = vpop.f32.mrf.mxu0  ;;  %v4770_v14 = vpop.f32.mrf.mxu1 }
 0x6d8   :  { %v4850_v50 = vmul.f32 0.17677669, %v4681_v6  ;;  %v4851_v54 = vmul.f32 0.17677669, %v4770_v14 }
 0x6da   :  { %v12235_v33 = vadd.f32 %v4850_v50, %v15381_v37  ;;  %v12238_v0 = vadd.f32 %v4851_v54, %v15382_v52 }
 0x6dc   :  { %v4979_v41 = vmax.f32 %v12235_v33, %v12238_v0 }
 0x6de   :  { %4980 = vmax.xlane.f32.xlu2 %v4979_v41 }
 0x6df   :  { %v4684_v15 = vpop.f32.mrf.mxu0  ;;  %v4773_v22 = vpop.f32.mrf.mxu1 }
 0x6e0   :  { %v4852_v44 = vmul.f32 0.17677669, %v4684_v15  ;;  %v4853_v4 = vmul.f32 0.17677669, %v4773_v22  ;;  %v15385_v22 = vld [vmem:[#allocation70_spill] sm:$0xff] }
 0x6e2   :  { %v12243_v1 = vadd.f32 %v4852_v44, %v15383_v25  ;;  %v12246_v6 = vadd.f32 %v4853_v4, %v15384_v29  ;;  %7917 = vmatmul.msk.bf16.gmra.mxu0 %vm1787_vm2, %v12154_v7  ;;  %7933 = vmatmul.msk.bf16.gmra.mxu1 %vm1787_vm2, %v12154_v7  ;;  %v15386_v25 = vld [vmem:[#allocation71_spill] sm:$0xff] }
 0x6e4   :  { %v4982_v14 = vmax.f32 %v12243_v1, %v12246_v6 }
 0x6e6   :  { %4983 = vmax.xlane.f32.xlu1 %v4982_v14 }
 0x6e7   :  { %v4686_v50 = vpop.f32.mrf.mxu0  ;;  %v4775_v54 = vpop.f32.mrf.mxu1 }
 0x6e8   :  { %v4854_v41 = vmul.f32 0.17677669, %v4686_v50  ;;  %v4855_v15 = vmul.f32 0.17677669, %v4775_v54 }
 0x6ea   :  { %v12255_v44 = vadd.f32 %v4854_v41, %v15385_v22  ;;  %v12258_v4 = vadd.f32 %v4855_v15, %v15386_v25 }
 0x6ec   :  { %v4985_v29 = vmax.f32 %v12255_v44, %v12258_v4 }
 0x6ee   :  { %4986 = vmax.xlane.f32.xlu0 %v4985_v29 }
 0x6ef   :  { %v4689_v52 = vpop.f32.mrf.mxu0  ;;  %v4778_v7 = vpop.f32.mrf.mxu1 }
 0x6f0   :  { %v4856_v37 = vmul.f32 0.17677669, %v4689_v52  ;;  %v4857_v12 = vmul.f32 0.17677669, %v4778_v7  ;;  %v15389_v7 = vld [vmem:[#allocation73_spill] sm:$0xff] }
 0x6f2   :  { %v12263_v14 = vadd.f32 %v4856_v37, %v15387_v24  ;;  %v12266_v50 = vadd.f32 %v4857_v12, %v15388_v40  ;;  %7918 = vmatmul.msk.bf16.gmra.mxu0 %vm1787_vm2, %v12144_v13  ;;  %7934 = vmatmul.msk.bf16.gmra.mxu1 %vm1787_vm2, %v12144_v13  ;;  %v15390_v24 = vld [vmem:[#allocation74_spill] sm:$0xff] }
 0x6f4   :  { %v4988_v54 = vmax.f32 %v12263_v14, %v12266_v50 }
 0x6f6   :  { %4989 = vmax.xlane.f32.xlu0 %v4988_v54 }
 0x6f7   :  { %v4691_v29 = vpop.f32.mrf.mxu0  ;;  %v4780_v41 = vpop.f32.mrf.mxu1 }
 0x6f8   :  { %v4858_v52 = vmul.f32 0.17677669, %v4691_v29  ;;  %v4859_v15 = vmul.f32 0.17677669, %v4780_v41 }
 0x6fa   :  { %v12275_v37 = vadd.f32 %v4858_v52, %v15389_v7  ;;  %v12278_v12 = vadd.f32 %v4859_v15, %v15390_v24 }
 0x6fc   :  { %v4991_v40 = vmax.f32 %v12275_v37, %v12278_v12 }
 0x6fe   :  { %4992 = vmax.xlane.f32.xlu1 %v4991_v40 }
 0x6ff   :  { %v4694_v25 = vpop.f32.mrf.mxu0  ;;  %v4783_v13 = vpop.f32.mrf.mxu1 }
 0x700   :  { %v4860_v22 = vmul.f32 0.17677669, %v4694_v25  ;;  %v4861_v3 = vmul.f32 0.17677669, %v4783_v13  ;;  %v15393_v13 = vld [vmem:[#allocation12_spill] sm:$0xff] }
 0x702   :  { %v12283_v54 = vadd.f32 %v4860_v22, %v15391_v63  ;;  %v12286_v29 = vadd.f32 %v4861_v3, %v15392_v11  ;;  %7919 = vmatmul.msk.bf16.gmra.mxu0 %vm1787_vm2, %v12159_v30  ;;  %7935 = vmatmul.msk.bf16.gmra.mxu1 %vm1787_vm2, %v12159_v30  ;;  %v15394_v63 = vld [vmem:[#allocation75_spill] sm:$0xff] }
 0x704   :  { %v4994_v41 = vmax.f32 %v12283_v54, %v12286_v29 }
 0x706   :  { %4995 = vmax.xlane.f32.xlu2 %v4994_v41 }
 0x707   :  { %v4696_v40 = vpop.f32.mrf.mxu0  ;;  %v4785_v52 = vpop.f32.mrf.mxu1 }
 0x708   :  { %v4862_v25 = vmul.f32 0.17677669, %v4696_v40  ;;  %v4863_v15 = vmul.f32 0.17677669, %v4785_v52 }
 0x70a   :  { %v12295_v22 = vadd.f32 %v4862_v25, %v15393_v13  ;;  %v12298_v3 = vadd.f32 %v4863_v15, %v15394_v63 }
 0x70c   :  { %v4997_v11 = vmax.f32 %v12295_v22, %v12298_v3 }
 0x70e   :  { %4998 = vmax.xlane.f32.xlu0 %v4997_v11 }
 0x70f   :  { %v4699_v24 = vpop.f32.mrf.mxu0  ;;  %v4788_v30 = vpop.f32.mrf.mxu1 }
 0x710   :  { %v4864_v7 = vmul.f32 0.17677669, %v4699_v24  ;;  %v4865_v20 = vmul.f32 0.17677669, %v4788_v30  ;;  %v15397_v30 = vld [vmem:[#allocation101_spill] sm:$0xff] }
 0x712   :  { %v12303_v41 = vadd.f32 %v4864_v7, %v15395_v59  ;;  %v12306_v40 = vadd.f32 %v4865_v20, %v15396_v2  ;;  %7920 = vmatmul.msk.bf16.gmra.mxu0 %vm1787_vm2, %v12166_v48  ;;  %7936 = vmatmul.msk.bf16.gmra.mxu1 %vm1787_vm2, %v12166_v48  ;;  %v15398_v59 = vld [vmem:[#allocation98_spill] sm:$0xff] }
 0x714   :  { %v5000_v52 = vmax.f32 %v12303_v41, %v12306_v40 }
 0x716   :  { %5001 = vmax.xlane.f32.xlu0 %v5000_v52 }
 0x717   :  { %v4701_v11 = vpop.f32.mrf.mxu0  ;;  %v4790_v25 = vpop.f32.mrf.mxu1 }
 0x718   :  { %v4866_v24 = vmul.f32 0.17677669, %v4701_v11  ;;  %v4867_v15 = vmul.f32 0.17677669, %v4790_v25 }
 0x71a   :  { %v12315_v7 = vadd.f32 %v4866_v24, %v15397_v30  ;;  %v12318_v20 = vadd.f32 %v4867_v15, %v15398_v59 }
 0x71c   :  { %v5003_v2 = vmax.f32 %v12315_v7, %v12318_v20 }
 0x71e   :  { %5004 = vmax.xlane.f32.xlu2 %v5003_v2 }
 0x71f   :  { %v4704_v63 = vpop.f32.mrf.mxu0  ;;  %v4793_v48 = vpop.f32.mrf.mxu1 }
 0x720   :  { %v4868_v13 = vmul.f32 0.17677669, %v4704_v63  ;;  %v4869_v55 = vmul.f32 0.17677669, %v4793_v48  ;;  %v15401_v48 = vld [vmem:[#allocation91_spill] sm:$0xff] }
 0x722   :  { %v12323_v52 = vadd.f32 %v4868_v13, %v15399_v32  ;;  %v12326_v11 = vadd.f32 %v4869_v55, %v15400_v60  ;;  %7921 = vmatmul.msk.bf16.gmra.mxu0 %vm1787_vm2, %v12150_v19  ;;  %7937 = vmatmul.msk.bf16.gmra.mxu1 %vm1787_vm2, %v12150_v19  ;;  %v15402_v32 = vld [vmem:[#allocation90_spill] sm:$0xff] }
 0x724   :  { %v5006_v25 = vmax.f32 %v12323_v52, %v12326_v11 }
 0x726   :  { %5007 = vmax.xlane.f32.xlu2 %v5006_v25 }
 0x727   :  { %v4706_v2 = vpop.f32.mrf.mxu0  ;;  %v4795_v24 = vpop.f32.mrf.mxu1 }
 0x728   :  { %v4870_v63 = vmul.f32 0.17677669, %v4706_v2  ;;  %v4871_v15 = vmul.f32 0.17677669, %v4795_v24 }
 0x72a   :  { %v12335_v13 = vadd.f32 %v4870_v63, %v15401_v48  ;;  %v12338_v55 = vadd.f32 %v4871_v15, %v15402_v32 }
 0x72c   :  { %v5009_v60 = vmax.f32 %v12335_v13, %v12338_v55 }
 0x72e   :  { %5010 = vmax.xlane.f32.xlu0 %v5009_v60 }
 0x72f   :  { %v4709_v30 = vpop.f32.mrf.mxu0  ;;  %v4798_v19 = vpop.f32.mrf.mxu1 }
 0x730   :  { %v4872_v59 = vmul.f32 0.17677669, %v4709_v30  ;;  %v4873_v58 = vmul.f32 0.17677669, %v4798_v19  ;;  %v15405_v19 = vld [vmem:[#allocation105_spill] sm:$0xff] }
 0x732   :  { %v12343_v25 = vadd.f32 %v4872_v59, %v15403_v34  ;;  %v12346_v2 = vadd.f32 %v4873_v58, %v15404_v31  ;;  %7922 = vmatmul.msk.bf16.gmra.mxu0 %vm1787_vm2, %v12161_v42  ;;  %7938 = vmatmul.msk.bf16.gmra.mxu1 %vm1787_vm2, %v12161_v42  ;;  %v15406_v34 = vld [vmem:[#allocation104_spill] sm:$0xff] }
 0x734   :  { %v5012_v24 = vmax.f32 %v12343_v25, %v12346_v2 }
 0x736   :  { %5013 = vmax.xlane.f32.xlu0 %v5012_v24 }
 0x737   :  { %v4711_v60 = vpop.f32.mrf.mxu0  ;;  %v4800_v63 = vpop.f32.mrf.mxu1 }
 0x738   :  { %v4874_v30 = vmul.f32 0.17677669, %v4711_v60  ;;  %v4875_v15 = vmul.f32 0.17677669, %v4800_v63  ;;  %v15408_v60 = vld [vmem:[#allocation102_spill] sm:$0xff] }
 0x73a   :  { %v12355_v59 = vadd.f32 %v4874_v30, %v15405_v19  ;;  %v12358_v58 = vadd.f32 %v4875_v15, %v15406_v34 }
 0x73c   :  { %v5015_v31 = vmax.f32 %v12355_v59, %v12358_v58 }
 0x73e   :  { %5016 = vmax.xlane.f32.xlu1 %v5015_v31 }
 0x73f   :  { %v4714_v48 = vpop.f32.mrf.mxu0  ;;  %v4803_v32 = vpop.f32.mrf.mxu1 }
 0x740   :  { %v4876_v42 = vmul.f32 0.17677669, %v4714_v48  ;;  %v4877_v28 = vmul.f32 0.17677669, %v4803_v32 }
 0x742   :  { %v12363_v24 = vadd.f32 %v4876_v42, %v15407_v57  ;;  %7923 = vmatmul.msk.bf16.gmra.mxu0 %vm1787_vm2, %v12173_v9  ;;  %7939 = vmatmul.msk.bf16.gmra.mxu1 %vm1787_vm2, %v12173_v9  ;;  %v12370_v63 = vadd.f32 %v4877_v28, %v15408_v60  ;;  %v15409_v42 = vld [vmem:[#allocation99_spill] sm:$0xff]  ;;  %v15410_v9 = vld [vmem:[#allocation100_spill] sm:$0xff] }
 0x744   :  { %v5018_v30 = vmax.f32 %v12363_v24, %v12370_v63 }
 0x746   :  { %5019 = vmax.xlane.f32.xlu1 %v5018_v30 }
 0x747   :  { %v4716_v31 = vpop.f32.mrf.mxu0  ;;  %v4805_v15 = vpop.f32.mrf.mxu1 }
 0x748   :  { %v4878_v48 = vmul.f32 0.17677669, %v4716_v31  ;;  %v4879_v32 = vmul.f32 0.17677669, %v4805_v15 }
 0x749   :  { %v4978_v19 = vpop.xlane.xlu0 %4977 }
 0x74a   :  { %v12375_v57 = vadd.f32 %v4878_v48, %v15409_v42  ;;  %v5072_v34 = vsub.f32 %v12223_v35, %v4978_v19  ;;  %v5073_v8 = vsub.f32 %v12226_v39, %v4978_v19  ;;  %v12380_v46 = vadd.f32 %v4879_v32, %v15410_v9 }
 0x74c   :  { %v5136_v28 = vmul.f32 1.442695, %v5072_v34  ;;  %v5138_v60 = vmul.f32 1.442695, %v5073_v8  ;;  %v5021_v30 = vmax.f32 %v12375_v57, %v12380_v46  ;;  %v15412_v34 = vld [vmem:[#allocation107_spill] sm:$0xff] }
 0x74e   :  { %8450 = vpow2.f32 %v5136_v28  ;;  %5022 = vmax.xlane.f32.xlu2 %v5021_v30 }
 0x74f   :  { %8452 = vpow2.f32 %v5138_v60  ;;  %v4719_v31 = vpop.f32.mrf.mxu0  ;;  %v4808_v17 = vpop.f32.mrf.mxu1 }
 0x750   :  { %v4880_v15 = vmul.f32 0.17677669, %v4719_v31  ;;  %v4881_v48 = vmul.f32 0.17677669, %v4808_v17 }
 0x751   :  { %v4981_v42 = vpop.xlane.xlu2 %4980 }
 0x752   :  { %v12385_v35 = vadd.f32 %v4880_v15, %v15411_v49  ;;  %v5074_v39 = vsub.f32 %v12235_v33, %v4981_v42  ;;  %v5075_v19 = vsub.f32 %v12238_v0, %v4981_v42  ;;  %v12390_v8 = vadd.f32 %v4881_v48, %v15412_v34  ;;  %v15413_v48 = vld [vmem:[#allocation117_spill] sm:$0xff] }
 0x754   :  { %v12392_v32 = vpop.eup %8450  ;;  %v5140_v28 = vmul.f32 1.442695, %v5074_v39  ;;  %v5142_v60 = vmul.f32 1.442695, %v5075_v19  ;;  %v5024_v17 = vmax.f32 %v12385_v35, %v12390_v8  ;;  %v15414_v39 = vld [vmem:[#allocation116_spill] sm:$0xff] }
 0x755   :  { %v12394_v30 = vpop.eup %8452 }
 0x756   :  { %8454 = vpow2.f32 %v5140_v28  ;;  %v5264_v31 = vadd.f32 %v12394_v30, %v12392_v32  ;;  %5025 = vmax.xlane.f32.xlu2 %v5024_v17 }
 0x757   :  { %8456 = vpow2.f32 %v5142_v60  ;;  %v4721_v33 = vpop.f32.mrf.mxu0  ;;  %v4810_v42 = vpop.f32.mrf.mxu1 }
 0x758   :  { %5265 = vadd.xlane.f32.xlu1 %v5264_v31  ;;  %v4882_v0 = vmul.f32 0.17677669, %v4721_v33  ;;  %v4883_v15 = vmul.f32 0.17677669, %v4810_v42 }
 0x75a   :  { %v12401_v49 = vadd.f32 %v4882_v0, %v15413_v48  ;;  %v12404_v19 = vadd.f32 %v4883_v15, %v15414_v39  ;;  %v15415_v48 = vld [vmem:[#allocation112_spill] sm:$0xff] }
 0x75c   :  { %v12406_v34 = vpop.eup %8454  ;;  %v5027_v28 = vmax.f32 %v12401_v49, %v12404_v19 }
 0x75d   :  { %v12408_v9 = vpop.eup %8456 }
 0x75e   :  { %v5267_v60 = vadd.f32 %v12408_v9, %v12406_v34  ;;  %5028 = vmax.xlane.f32.xlu0 %v5027_v28 }
 0x75f   :  { %v4724_v17 = vpop.f32.mrf.mxu0  ;;  %v4813_v31 = vpop.f32.mrf.mxu1 }
 0x760   :  { %5268 = vadd.xlane.f32.xlu2 %v5267_v60  ;;  %v4884_v33 = vmul.f32 0.17677669, %v4724_v17  ;;  %v4885_v0 = vmul.f32 0.17677669, %v4813_v31  ;;  %v12428_v31 = vpop.xlane.xlu1 %4983 }
 0x761   :  { %v4987_v42 = vpop.xlane.xlu0 %4986 }
 0x762   :  { %v12415_v15 = vadd.f32 %v4884_v33, %v15415_v48  ;;  %v5078_v39 = vsub.f32 %v12255_v44, %v4987_v42  ;;  %v5079_v62 = vsub.f32 %v12258_v4, %v4987_v42  ;;  %v12420_v5 = vadd.f32 %v4885_v0, %v15416_v36 }
 0x764   :  { %v5148_v51 = vmul.f32 1.442695, %v5078_v39  ;;  %v5150_v27 = vmul.f32 1.442695, %v5079_v62  ;;  %v5030_v28 = vmax.f32 %v12415_v15, %v12420_v5 }
 0x766   :  { %8458 = vpow2.f32 %v5148_v51  ;;  %5031 = vmax.xlane.f32.xlu0 %v5030_v28  ;;  %v15418_v28 = vld [vmem:[#allocation118_spill] sm:$0xff] }
 0x767   :  { %8460 = vpow2.f32 %v5150_v27  ;;  %v12424_v60 = vpop.f32.mrf.mxu0  ;;  %v12426_v17 = vpop.f32.mrf.mxu1  ;;  %v15417_v27 = vld [vmem:[#allocation23_spill] sm:$0xff] }
 0x76c   :  { %v12430_v44 = vpop.eup %8458 }
 0x76d   :  { %v12432_v4 = vpop.eup %8460 }
 0x76e   :  { %v5273_v39 = vadd.f32 %v12432_v4, %v12430_v44 }
 0x76f   :  { %v4729_v62 = vpop.f32.mrf.mxu0  ;;  %v4818_v33 = vpop.f32.mrf.mxu1 }
 0x770   :  { %5274 = vadd.xlane.f32.xlu0 %v5273_v39  ;;  %v4888_v0 = vmul.f32 0.17677669, %v4729_v62  ;;  %v4889_v51 = vmul.f32 0.17677669, %v4818_v33  ;;  %v12450_v62 = vpop.f32.mrf.mxu2 }
 0x771   :  { %5967 = vrot.lane.b32.xlu1 %v15417_v27, %s8930_s22  ;;  %v4993_v42 = vpop.xlane.xlu1 %4992  ;;  %15421 = vst [vmem:[#allocation142_spill] sm:$0xff] %v12450_v62  ;;  %v12452_v27 = vpop.xlane.xlu0 %4989 }
 0x772   :  { %v12439_v48 = vadd.f32 %v4888_v0, %v15418_v28  ;;  %v5082_v36 = vsub.f32 %v12275_v37, %v4993_v42  ;;  %v5083_v43 = vsub.f32 %v12278_v12, %v4993_v42  ;;  %v12444_v47 = vadd.f32 %v4889_v51, %v15419_v18  ;;  %v15422_v42 = vld [vmem:[#allocation123_spill] sm:$0xff]  ;;  %v15423_v18 = vld [vmem:[#allocation124_spill] sm:$0xff] }
 0x774   :  { %v5156_v23 = vmul.f32 1.442695, %v5082_v36  ;;  %v5158_v38 = vmul.f32 1.442695, %v5083_v43  ;;  %v5036_v39 = vmax.f32 %v12439_v48, %v12444_v47 }
 0x776   :  { %8462 = vpow2.f32 %v5156_v23  ;;  %5037 = vmax.xlane.f32.xlu2 %v5036_v39 }
 0x777   :  { %8464 = vpow2.f32 %v5158_v38  ;;  %v4731_v33 = vpop.f32.mrf.mxu0  ;;  %v4820_v37 = vpop.f32.mrf.mxu1 }
 0x778   :  { %v4890_v0 = vmul.f32 0.17677669, %v4731_v33  ;;  %v4891_v12 = vmul.f32 0.17677669, %v4820_v37 }
 0x779   :  { %v4996_v51 = vpop.xlane.xlu2 %4995 }
 0x77a   :  { %v12455_v36 = vadd.f32 %v4890_v0, %v15422_v42  ;;  %v5084_v43 = vsub.f32 %v12283_v54, %v4996_v51  ;;  %v5085_v28 = vsub.f32 %v12286_v29, %v4996_v51  ;;  %v12460_v61 = vadd.f32 %v4891_v12, %v15423_v18  ;;  %v12470_v42 = vpop.f32.mrf.mxu3  ;;  %v12472_v29 = vpop.f32.mrf.mxu2  ;;  %v15426_v18 = vld [vmem:[#allocation128_spill] sm:$0xff] }
 0x77b   :  { %15424 = vst [vmem:[#allocation159_spill] sm:$0xff] %v12470_v42 }
 0x77c   :  { %v12462_v23 = vpop.eup %8462  ;;  %v5160_v38 = vmul.f32 1.442695, %v5084_v43  ;;  %v5162_v39 = vmul.f32 1.442695, %v5085_v28  ;;  %v5039_v37 = vmax.f32 %v12455_v36, %v12460_v61  ;;  %15425 = vst [vmem:[#allocation94_spill] sm:$0xff] %v12472_v29 }
 0x77d   :  { %v12464_v33 = vpop.eup %8464 }
 0x77e   :  { %8466 = vpow2.f32 %v5160_v38  ;;  %v5279_v0 = vadd.f32 %v12464_v33, %v12462_v23  ;;  %5040 = vmax.xlane.f32.xlu0 %v5039_v37 }
 0x77f   :  { %8468 = vpow2.f32 %v5162_v39  ;;  %v4734_v54 = vpop.f32.mrf.mxu0  ;;  %v4823_v51 = vpop.f32.mrf.mxu1 }
 0x780   :  { %v4892_v12 = vmul.f32 0.17677669, %v4734_v54  ;;  %5280 = vadd.xlane.f32.xlu2 %v5279_v0  ;;  %v4893_v28 = vmul.f32 0.17677669, %v4823_v51  ;;  %v5076_v0 = vsub.f32 %v12243_v1, %v12428_v31 }
 0x781   :  { %v4999_v43 = vpop.xlane.xlu0 %4998 }
 0x782   :  { %v12475_v62 = vadd.f32 %v4892_v12, %v15426_v18  ;;  %v5086_v38 = vsub.f32 %v12295_v22, %v4999_v43  ;;  %v5087_v10 = vsub.f32 %v12298_v3, %v4999_v43  ;;  %v12480_v16 = vadd.f32 %v4893_v28, %v15427_v45  ;;  %v12492_v3 = vpop.f32.mrf.mxu3  ;;  %v12496_v18 = vpop.f32.mrf.mxu2 }
 0x783   :  { %15428 = vst [vmem:[#allocation25_spill] sm:$0xff] %v12492_v3  ;;  %v5144_v43 = vmul.f32 1.442695, %v5076_v0 }
 0x784   :  { %v12482_v39 = vpop.eup %8466  ;;  %v5164_v37 = vmul.f32 1.442695, %v5086_v38  ;;  %v5166_v42 = vmul.f32 1.442695, %v5087_v10  ;;  %v5042_v54 = vmax.f32 %v12475_v62, %v12480_v16  ;;  %v5077_v10 = vsub.f32 %v12246_v6, %v12428_v31  ;;  %15429 = vst [vmem:[#allocation167_spill] sm:$0xff] %v12496_v18 }
 0x785   :  { %v12484_v29 = vpop.eup %8468 }
 0x786   :  { %8470 = vpow2.f32 %v5164_v37  ;;  %v5282_v22 = vadd.f32 %v12484_v29, %v12482_v39  ;;  %5043 = vmax.xlane.f32.xlu0 %v5042_v54  ;;  %v15430_v37 = vld [vmem:[#allocation145_spill] sm:$0xff]  ;;  %v5146_v6 = vmul.f32 1.442695, %v5077_v10 }
 0x787   :  { %8472 = vpow2.f32 %v5166_v42  ;;  %v4736_v12 = vpop.f32.mrf.mxu0  ;;  %v4825_v28 = vpop.f32.mrf.mxu1  ;;  %v15431_v54 = vld [vmem:[#allocation77_spill] sm:$0xff] }
 0x788   :  { %v4894_v51 = vmul.f32 0.17677669, %v4736_v12  ;;  %5283 = vadd.xlane.f32.xlu2 %v5282_v22  ;;  %v4895_v1 = vmul.f32 0.17677669, %v4825_v28  ;;  %8474 = vpow2.f32 %v5144_v43 }
 0x789   :  { %v5002_v38 = vpop.xlane.xlu0 %5001 }
 0x78a   :  { %v12499_v45 = vadd.f32 %v4894_v51, %v15430_v37  ;;  %v5088_v21 = vsub.f32 %v12303_v41, %v5002_v38  ;;  %v5089_v42 = vsub.f32 %v12306_v40, %v5002_v38  ;;  %v12504_v3 = vadd.f32 %v4895_v1, %v15431_v54  ;;  %v12514_v10 = vpop.f32.mrf.mxu3  ;;  %v15433_v1 = vld [vmem:[#allocation131_spill] sm:$0xff] }
 0x78b   :  { %15432 = vst [vmem:[#allocation166_spill] sm:$0xff] %v12514_v10 }
 0x78c   :  { %v12506_v26 = vpop.eup %8470  ;;  %v5168_v31 = vmul.f32 1.442695, %v5088_v21  ;;  %v5170_v22 = vmul.f32 1.442695, %v5089_v42  ;;  %v5045_v12 = vmax.f32 %v12499_v45, %v12504_v3  ;;  %v15434_v42 = vld [vmem:[#allocation132_spill] sm:$0xff] }
 0x78d   :  { %v12508_v0 = vpop.eup %8472 }
 0x78e   :  { %8476 = vpow2.f32 %v5168_v31  ;;  %v5285_v41 = vadd.f32 %v12508_v0, %v12506_v26  ;;  %v12519_v43 = vpop.eup %8474 }
 0x78f   :  { %8478 = vpow2.f32 %v5170_v22  ;;  %v4739_v40 = vpop.f32.mrf.mxu0  ;;  %v4828_v28 = vpop.f32.mrf.mxu1 }
 0x790   :  { %8480 = vpow2.f32 %v5146_v6  ;;  %5286 = vadd.xlane.f32.xlu0 %v5285_v41  ;;  %v4896_v51 = vmul.f32 0.17677669, %v4739_v40  ;;  %5046 = vmax.xlane.f32.xlu2 %v5045_v12  ;;  %v4897_v21 = vmul.f32 0.17677669, %v4828_v28  ;;  %v12526_v22 = vpop.f32.mrf.mxu2 }
 0x791   :  { %15436 = vst [vmem:[#allocation165_spill] sm:$0xff] %v12526_v22 }
 0x792   :  { %v12517_v38 = vadd.f32 %v4896_v51, %v15433_v1  ;;  %v12522_v31 = vadd.f32 %v4897_v21, %v15434_v42  ;;  %v5080_v51 = vsub.f32 %v12263_v14, %v12452_v27  ;;  %v5081_v21 = vsub.f32 %v12266_v50, %v12452_v27  ;;  %v12547_v14 = vpop.f32.mrf.mxu3 }
 0x793   :  { %v4886_v1 = vmul.f32 0.17677669, %v12424_v60  ;;  %v4887_v42 = vmul.f32 0.17677669, %v12426_v17  ;;  %15440 = vst [vmem:[#allocation151_spill] sm:$0xff] %v12547_v14  ;;  %v15444_v17 = vld [vmem:[#allocation119_spill] sm:$0xff] }
 0x794   :  { %v12524_v37 = vpop.eup %8476  ;;  %v5048_v12 = vmax.f32 %v12517_v38, %v12522_v31  ;;  %v5154_v27 = vmul.f32 1.442695, %v5081_v21 }
 0x795   :  { %15435 = vst [vmem:[#allocation164_spill] sm:$0xff] %v12524_v37  ;;  %v12528_v6 = vpop.eup %8478 }
 0x796   :  { %15437 = vst [vmem:[#allocation89_spill] sm:$0xff] %v12528_v6  ;;  %v12532_v41 = vpop.eup %8480  ;;  %v5288_v40 = vadd.f32 %v12528_v6, %v12524_v37  ;;  %v15438_v6 = vld [vmem:[#allocation135_spill] sm:$0xff]  ;;  %v5152_v37 = vmul.f32 1.442695, %v5080_v51 }
 0x797   :  { %v4741_v28 = vpop.f32.mrf.mxu0  ;;  %v4830_v22 = vpop.f32.mrf.mxu1  ;;  %v5270_v18 = vadd.f32 %v12532_v41, %v12519_v43 }
 0x798   :  { %5289 = vadd.xlane.f32.xlu0 %v5288_v40  ;;  %v4898_v10 = vmul.f32 0.17677669, %v4741_v28  ;;  %5049 = vmax.xlane.f32.xlu2 %v5048_v12  ;;  %v4899_v54 = vmul.f32 0.17677669, %v4830_v22  ;;  %v5005_v12 = vpop.xlane.xlu2 %5004  ;;  %v15443_v40 = vld [vmem:[#allocation121_spill] sm:$0xff]  ;;  %v12556_v22 = vadd.f32 %v4887_v42, %v15444_v17  ;;  %8482 = vpow2.f32 %v5152_v37 }
 0x799   :  { %v12553_v60 = vadd.f32 %v4886_v1, %v15443_v40  ;;  %v5090_v51 = vsub.f32 %v12315_v7, %v5005_v12  ;;  %8484 = vpow2.f32 %v5154_v27 }
 0x79a   :  { %v12545_v56 = vadd.f32 %v4898_v10, %v15438_v6  ;;  %v12550_v50 = vadd.f32 %v4899_v54, %v15441_v53  ;;  %v12560_v10 = vpop.f32.mrf.mxu2  ;;  %v12570_v7 = vpop.f32.mrf.mxu3 }
 0x79b   :  { %5271 = vadd.xlane.f32.xlu1 %v5270_v18  ;;  %15445 = vst [vmem:[#allocation168_spill] sm:$0xff] %v12560_v10  ;;  %v5091_v18 = vsub.f32 %v12318_v20, %v5005_v12  ;;  %v5033_v1 = vmax.f32 %v12553_v60, %v12556_v22  ;;  %v5172_v42 = vmul.f32 1.442695, %v5090_v51 }
 0x79c   :  { %15439 = vst [vmem:[#allocation76_spill] sm:$0xff] %v12545_v56  ;;  %v5051_v28 = vmax.f32 %v12545_v56, %v12550_v50 }
 0x79d   :  { %15442 = vst [vmem:[#allocation87_spill] sm:$0xff] %v12550_v50  ;;  %v5174_v40 = vmul.f32 1.442695, %v5091_v18  ;;  %8486 = vpow2.f32 %v5172_v42  ;;  %v15448_v18 = vld [vmem:[#allocation81_spill] sm:$0xff] }
 0x79e   :  { %v12568_v37 = vpop.eup %8482  ;;  %15446 = vst [vmem:[#allocation169_spill] sm:$0xff] %v12570_v7 }
 0x79f   :  { %v4744_v6 = vpop.f32.mrf.mxu0  ;;  %v4833_v54 = vpop.f32.mrf.mxu1  ;;  %8488 = vpow2.f32 %v5174_v40 }
 0x7a0   :  { %5052 = vmax.xlane.f32.xlu0 %v5051_v28  ;;  %v12572_v27 = vpop.eup %8484  ;;  %v5008_v40 = vpop.xlane.xlu2 %5007 }
 0x7a1   :  { %v5011_v21 = vpop.xlane.xlu0 %5010 }
 0x7a2   :  { %v5094_v53 = vsub.f32 %v12335_v13, %v5011_v21  ;;  %v5095_v17 = vsub.f32 %v12338_v55, %v5011_v21  ;;  %v12574_v28 = vpop.f32.mrf.mxu2  ;;  %v5276_v55 = vadd.f32 %v12572_v27, %v12568_v37 }
 0x7a3   :  { %5034 = vmax.xlane.f32.xlu1 %v5033_v1  ;;  %15447 = vst [vmem:[#allocation173_spill] sm:$0xff] %v12574_v28 }
 0x7a4   :  { %v5180_v20 = vmul.f32 1.442695, %v5094_v53  ;;  %v5182_v14 = vmul.f32 1.442695, %v5095_v17  ;;  %v15450_v53 = vld [vmem:[#allocation80_spill] sm:$0xff] }
 0x7a6   :  { %8490 = vpow2.f32 %v5180_v20 }
 0x7a7   :  { %v4746_v12 = vpop.f32.mrf.mxu0  ;;  %v4835_v10 = vpop.f32.mrf.mxu1  ;;  %8492 = vpow2.f32 %v5182_v14  ;;  %v4900_v14 = vmul.f32 0.17677669, %v4744_v6 }
 0x7a8   :  { %v4902_v51 = vmul.f32 0.17677669, %v4746_v12  ;;  %v4903_v13 = vmul.f32 0.17677669, %v4835_v10  ;;  %v12586_v12 = vpop.eup %8486 }
 0x7a9   :  { %v5014_v1 = vpop.xlane.xlu0 %5013 }
 0x7aa   :  { %v12579_v21 = vadd.f32 %v4902_v51, %v15448_v18  ;;  %v5096_v7 = vsub.f32 %v12343_v25, %v5014_v1  ;;  %v5097_v42 = vsub.f32 %v12346_v2, %v5014_v1  ;;  %v12584_v50 = vadd.f32 %v4903_v13, %v15450_v53  ;;  %v12590_v51 = vpop.eup %8488  ;;  %v12592_v25 = vpop.f32.mrf.mxu3 }
 0x7ab   :  { %5277 = vadd.xlane.f32.xlu1 %v5276_v55  ;;  %15452 = vst [vmem:[#allocation170_spill] sm:$0xff] %v12592_v25  ;;  %v5092_v2 = vsub.f32 %v12323_v52, %v5008_v40  ;;  %v5093_v13 = vsub.f32 %v12326_v11, %v5008_v40  ;;  %v4901_v55 = vmul.f32 0.17677669, %v4833_v54  ;;  %v5291_v18 = vadd.f32 %v12590_v51, %v12586_v12  ;;  %v15458_v40 = vld [vmem:[#allocation140_spill] sm:$0xff] }
 0x7ac   :  { %15449 = vst [vmem:[#allocation156_spill] sm:$0xff] %v12579_v21  ;;  %v5184_v17 = vmul.f32 1.442695, %v5096_v7  ;;  %v5186_v10 = vmul.f32 1.442695, %v5097_v42  ;;  %v5057_v28 = vmax.f32 %v12579_v21, %v12584_v50  ;;  %v12596_v1 = vpop.eup %8490 }
 0x7ad   :  { %15451 = vst [vmem:[#allocation152_spill] sm:$0xff] %v12584_v50  ;;  %v12600_v53 = vpop.eup %8492  ;;  %v5176_v25 = vmul.f32 1.442695, %v5092_v2  ;;  %v12612_v54 = vadd.f32 %v4901_v55, %v15458_v40 }
 0x7ae   :  { %8494 = vpow2.f32 %v5184_v17  ;;  %5058 = vmax.xlane.f32.xlu2 %v5057_v28  ;;  %15453 = vst [vmem:[#allocation153_spill] sm:$0xff] %v12600_v53  ;;  %v12602_v17 = vpop.f32.mrf.mxu2  ;;  %v5178_v28 = vmul.f32 1.442695, %v5093_v13  ;;  %v5297_v56 = vadd.f32 %v12600_v53, %v12596_v1 }
 0x7af   :  { %8496 = vpow2.f32 %v5186_v10  ;;  %v4749_v20 = vpop.f32.mrf.mxu0  ;;  %v4838_v7 = vpop.f32.mrf.mxu1  ;;  %15454 = vst [vmem:[#allocation20_spill] sm:$0xff] %v12602_v17  ;;  %v15456_v10 = vld [vmem:[#allocation139_spill] sm:$0xff]  ;;  %v15462_v17 = vld [vmem:[#allocation92_spill] sm:$0xff] }
 0x7b0   :  { %v12607_v11 = vadd.f32 %v4900_v14, %v15456_v10  ;;  %v4904_v50 = vmul.f32 0.17677669, %v4749_v20  ;;  %v4905_v21 = vmul.f32 0.17677669, %v4838_v7  ;;  %8498 = vpow2.f32 %v5176_v25  ;;  %v15460_v20 = vld [vmem:[#allocation62_spill] sm:$0xff] }
 0x7b1   :  { %v5017_v42 = vpop.xlane.xlu1 %5016  ;;  %8500 = vpow2.f32 %v5178_v28 }
 0x7b2   :  { %v5099_v14 = vsub.f32 %v12358_v58, %v5017_v42  ;;  %v12620_v40 = vpop.f32.mrf.mxu3  ;;  %v12623_v7 = vadd.f32 %v4904_v50, %v15460_v20  ;;  %v12626_v53 = vadd.f32 %v4905_v21, %v15462_v17  ;;  %v15469_v17 = vld [vmem:[#allocation149_spill] sm:$0xff] }
 0x7b3   :  { %5292 = vadd.xlane.f32.xlu1 %v5291_v18  ;;  %v5098_v18 = vsub.f32 %v12355_v59, %v5017_v42  ;;  %15459 = vst [vmem:[#allocation111_spill] sm:$0xff] %v12620_v40  ;;  %v5054_v59 = vmax.f32 %v12607_v11, %v12612_v54  ;;  %v15466_v42 = vld [vmem:[#allocation148_spill] sm:$0xff] }
 0x7b4   :  { %v12604_v52 = vpop.eup %8494  ;;  %15461 = vst [vmem:[#allocation172_spill] sm:$0xff] %v12623_v7  ;;  %v5190_v50 = vmul.f32 1.442695, %v5099_v14 }
 0x7b5   :  { %15455 = vst [vmem:[#allocation171_spill] sm:$0xff] %v12604_v52  ;;  %v12609_v6 = vpop.eup %8496  ;;  %v5188_v58 = vmul.f32 1.442695, %v5098_v18 }
 0x7b6   :  { %15457 = vst [vmem:[#allocation133_spill] sm:$0xff] %v12609_v6  ;;  %v5300_v2 = vadd.f32 %v12609_v6, %v12604_v52  ;;  %5298 = vadd.xlane.f32.xlu2 %v5297_v56  ;;  %v15464_v56 = vld [vmem:[#allocation150_spill] sm:$0xff]  ;;  %v12638_v40 = vpop.eup %8498  ;;  %v15476_v52 = vld [vmem:[#allocation155_spill] sm:$0xff] }
 0x7b7   :  { %v4751_v13 = vpop.f32.mrf.mxu0  ;;  %v4840_v10 = vpop.f32.mrf.mxu1  ;;  %15463 = vst [vmem:[#allocation174_spill] sm:$0xff] %v12626_v53  ;;  %8502 = vpow2.f32 %v5188_v58 }
 0x7b8   :  { %5301 = vadd.xlane.f32.xlu0 %v5300_v2  ;;  %v4906_v55 = vmul.f32 0.17677669, %v4751_v13  ;;  %v4907_v6 = vmul.f32 0.17677669, %v4840_v10  ;;  %v12636_v13 = vpop.f32.mrf.mxu2  ;;  %v5060_v10 = vmax.f32 %v12623_v7, %v12626_v53  ;;  %8504 = vpow2.f32 %v5190_v50 }
 0x7b9   :  { %v5020_v28 = vpop.xlane.xlu1 %5019  ;;  %15468 = vst [vmem:[#allocation175_spill] sm:$0xff] %v12636_v13 }
 0x7ba   :  { %v12631_v25 = vadd.f32 %v4906_v55, %v15464_v56  ;;  %v12634_v2 = vadd.f32 %v4907_v6, %v15466_v42  ;;  %v5100_v21 = vsub.f32 %v12363_v24, %v5020_v28  ;;  %v12645_v56 = vpop.eup %8500  ;;  %v5101_v18 = vsub.f32 %v12370_v63, %v5020_v28  ;;  %v15471_v63 = vld [vmem:[#allocation147_spill] sm:$0xff] }
 0x7bb   :  { %5055 = vmax.xlane.f32.xlu1 %v5054_v59  ;;  %v5294_v24 = vadd.f32 %v12645_v56, %v12638_v40 }
 0x7bc   :  { %15465 = vst [vmem:[#allocation64_spill] sm:$0xff] %v12631_v25  ;;  %v5063_v55 = vmax.f32 %v12631_v25, %v12634_v2  ;;  %v5192_v13 = vmul.f32 1.442695, %v5100_v21  ;;  %v5194_v20 = vmul.f32 1.442695, %v5101_v18 }
 0x7bd   :  { %15467 = vst [vmem:[#allocation143_spill] sm:$0xff] %v12634_v2  ;;  %v12653_v2 = vpop.f32.mrf.mxu3  ;;  %v12660_v21 = vpop.eup %8502 }
 0x7be   :  { %5061 = vmax.xlane.f32.xlu2 %v5060_v10  ;;  %15470 = vst [vmem:[#allocation65_spill] sm:$0xff] %v12653_v2  ;;  %8506 = vpow2.f32 %v5192_v13 }
 0x7bf   :  { %v4754_v6 = vpop.f32.mrf.mxu0  ;;  %v4843_v59 = vpop.f32.mrf.mxu1  ;;  %8508 = vpow2.f32 %v5194_v20 }
 0x7c0   :  { %5064 = vmax.xlane.f32.xlu0 %v5063_v55  ;;  %v4908_v14 = vmul.f32 0.17677669, %v4754_v6  ;;  %v4909_v42 = vmul.f32 0.17677669, %v4843_v59  ;;  %v12664_v6 = vpop.eup %8504 }
 0x7c1   :  { %v5023_v7 = vpop.xlane.xlu2 %5022 }
 0x7c2   :  { %v12651_v53 = vadd.f32 %v4908_v14, %v15469_v17  ;;  %v12656_v28 = vadd.f32 %v4909_v42, %v15471_v63  ;;  %v5102_v58 = vsub.f32 %v12375_v57, %v5023_v7  ;;  %v5103_v50 = vsub.f32 %v12380_v46, %v5023_v7  ;;  %v12666_v14 = vpop.f32.mrf.mxu2 }
 0x7c3   :  { %5295 = vadd.xlane.f32.xlu1 %v5294_v24  ;;  %15472 = vst [vmem:[#allocation157_spill] sm:$0xff] %v12666_v14  ;;  %v5303_v46 = vadd.f32 %v12664_v6, %v12660_v21 }
 0x7c4   :  { %v5196_v10 = vmul.f32 1.442695, %v5102_v58  ;;  %v5198_v55 = vmul.f32 1.442695, %v5103_v50  ;;  %v5066_v18 = vmax.f32 %v12651_v53, %v12656_v28  ;;  %v12670_v7 = vpop.eup %8506 }
 0x7c5   :  { %v12672_v42 = vpop.eup %8508  ;;  %v12676_v59 = vpop.f32.mrf.mxu3 }
 0x7c6   :  { %8510 = vpow2.f32 %v5196_v10  ;;  %15473 = vst [vmem:[#allocation158_spill] sm:$0xff] %v12676_v59  ;;  %v5306_v59 = vadd.f32 %v12672_v42, %v12670_v7 }
 0x7c7   :  { %8512 = vpow2.f32 %v5198_v55  ;;  %v4756_v24 = vpop.f32.mrf.mxu0  ;;  %v4845_v50 = vpop.f32.mrf.mxu1 }
 0x7c8   :  { %5067 = vmax.xlane.f32.xlu0 %v5066_v18  ;;  %v4911_v63 = vmul.f32 0.17677669, %v4845_v50 }
 0x7c9   :  { %v5026_v57 = vpop.xlane.xlu2 %5025 }
 0x7ca   :  { %v5104_v58 = vsub.f32 %v12385_v35, %v5026_v57  ;;  %v5105_v10 = vsub.f32 %v12390_v8, %v5026_v57  ;;  %v12684_v17 = vpop.f32.mrf.mxu2 }
 0x7cb   :  { %5304 = vadd.xlane.f32.xlu1 %v5303_v46  ;;  %v5266_v55 = vpop.xlane.xlu1 %5265  ;;  %15475 = vst [vmem:[#allocation138_spill] sm:$0xff] %v12684_v17  ;;  %v4910_v46 = vmul.f32 0.17677669, %v4756_v24  ;;  %v15477_v24 = vld [vmem:[#allocation154_spill] sm:$0xff] }
 0x7cc   :  { %v12674_v13 = vpop.eup %8510  ;;  %v5200_v2 = vmul.f32 1.442695, %v5104_v58  ;;  %8514 = vrcp.f32 %v5266_v55  ;;  %v5202_v35 = vmul.f32 1.442695, %v5105_v10  ;;  %v12694_v50 = vadd.f32 %v4911_v63, %v15477_v24 }
 0x7cd   :  { %v12679_v20 = vpop.eup %8512  ;;  %v12696_v10 = vpop.f32.mrf.mxu3 }
 0x7ce   :  { %15474 = vst [vmem:[#allocation88_spill] sm:$0xff] %v12679_v20  ;;  %v5309_v18 = vadd.f32 %v12679_v20, %v12674_v13  ;;  %v12691_v20 = vadd.f32 %v4910_v46, %v15476_v52 }
 0x7cf   :  { %15478 = vst [vmem:[#allocation122_spill] sm:$0xff] %v12696_v10 }
 0x7d0   :  { %5310 = vadd.xlane.f32.xlu2 %v5309_v18 }
 0x7d1   :  { %v5029_v14 = vpop.xlane.xlu0 %5028 }
 0x7d2   :  { %v5106_v25 = vsub.f32 %v12401_v49, %v5029_v14  ;;  %v5107_v8 = vsub.f32 %v12404_v19, %v5029_v14  ;;  %v8515_v18 = vpop.eup %8514  ;;  %v5069_v49 = vmax.f32 %v12691_v20, %v12694_v50  ;;  %v12700_v14 = vpop.f32.mrf.mxu2 }
 0x7d3   :  { %v5269_v57 = vpop.xlane.xlu2 %5268  ;;  %5307 = vadd.xlane.f32.xlu1 %v5306_v59  ;;  %15479 = vst [vmem:[#allocation85_spill] sm:$0xff] %v12700_v14  ;;  %v5392_v59 = vmul.f32 %v8515_v18, %v12392_v32  ;;  %v5393_v63 = vmul.f32 %v8515_v18, %v12394_v30 }
 0x7d4   :  { %8516 = vrcp.f32 %v5269_v57  ;;  %v5204_v58 = vmul.f32 1.442695, %v5106_v25  ;;  %v5206_v55 = vmul.f32 1.442695, %v5107_v8 }
 0x7d5   :  { %8518 = vpow2.f32 %v5200_v2 }
 0x7d6   :  { %8520 = vpow2.f32 %v5202_v35 }
 0x7d7   :  { %8522 = vpow2.f32 %v5204_v58 }
 0x7d8   :  { %8524 = vpow2.f32 %v5206_v55 }
 0x7d9   :  { %v5032_v46 = vpop.xlane.xlu0 %5031 }
 0x7da   :  { %v8517_v19 = vpop.eup %8516  ;;  %v5108_v8 = vsub.f32 %v12415_v15, %v5032_v46  ;;  %v5109_v57 = vsub.f32 %v12420_v5, %v5032_v46 }
 0x7db   :  { %v12704_v2 = vpop.eup %8518  ;;  %v5394_v25 = vmul.f32 %v8517_v19, %v12406_v34  ;;  %v5395_v35 = vmul.f32 %v8517_v19, %v12408_v9  ;;  %5070 = vmax.xlane.f32.xlu1 %v5069_v49  ;;  %v12718_v34 = vpop.f32.mrf.mxu3 }
 0x7dc   :  { %v12710_v58 = vpop.eup %8520  ;;  %v5208_v52 = vmul.f32 1.442695, %v5108_v8  ;;  %v5210_v30 = vmul.f32 1.442695, %v5109_v57  ;;  %15480 = vst [vmem:[#allocation127_spill] sm:$0xff] %v12718_v34  ;;  %v12722_v49 = vpop.f32.mrf.mxu2  ;;  %v15486_v57 = vld [vmem:[#allocation51_spill] sm:$0xff] }
 0x7dd   :  { %v12712_v55 = vpop.eup %8522  ;;  %v5456_v17 = vpack.c.bf16 %v5394_v25, %v5392_v59  ;;  %v5457_v32 = vpack.c.bf16 %v5395_v35, %v5393_v63  ;;  %v5312_v5 = vadd.f32 %v12710_v58, %v12704_v2  ;;  %15481 = vst [vmem:[#allocation97_spill] sm:$0xff] %v12722_v49 }
 0x7de   :  { %v12714_v18 = vpop.eup %8524  ;;  %8526 = vpow2.f32 %v5208_v52 }
 0x7df   :  { %5544 = vmatmul.bf16.vlgmr.msrb.gmra.mxu2 %v5456_v17  ;;  %5633 = vmatmul.bf16.vlgmr.msrb.gmra.mxu3 %v5457_v32  ;;  %v5315_v9 = vadd.f32 %v12714_v18, %v12712_v55  ;;  %8528 = vpow2.f32 %v5210_v30 }
 0x7e1   :  { %5316 = vadd.xlane.f32.xlu0 %v5315_v9  ;;  %v15488_v9 = vld [vmem:[#allocation48_spill] sm:$0xff] }
 0x7e3   :  { %5313 = vadd.xlane.f32.xlu1 %v5312_v5  ;;  %v5968_v15 = vpop.permute.xlu1 %5967  ;;  %v12731_v63 = vpop.f32.mrf.mxu3 }
 0x7e4   :  { %v6060_v19 = vsel %vm1787_vm2, %v5968_v15, 0  ;;  %v12725_v59 = vpop.eup %8526  ;;  %15482 = vst [vmem:[#allocation114_spill] sm:$0xff] %v12731_v63  ;;  %v12733_v46 = vpop.f32.mrf.mxu2 }
 0x7e5   :  { %6163 = vmatpush.bf16.xpose.msra.mxu2 %v6060_v19  ;;  %v12727_v17 = vpop.eup %8528  ;;  %15483 = vst [vmem:[#allocation108_spill] sm:$0xff] %v12733_v46  ;;  %v5275_v15 = vpop.xlane.xlu0 %5274 }
 0x7e6   :  { %v5318_v52 = vadd.f32 %v12727_v17, %v12725_v59  ;;  %8530 = vrcp.f32 %v5275_v15 }
 0x7e8   :  { %5319 = vadd.xlane.f32.xlu2 %v5318_v52 }
 0x7e9   :  { %v5038_v25 = vpop.xlane.xlu2 %5037 }
 0x7eb   :  { %v12735_v35 = vpop.f32.mrf.mxu3 }
 0x7ec   :  { %15484 = vst [vmem:[#allocation31_spill] sm:$0xff] %v12735_v35  ;;  %v12737_v8 = vpop.f32.mrf.mxu2  ;;  %v8531_v24 = vpop.eup %8530 }
 0x7ed   :  { %15485 = vst [vmem:[#allocation61_spill] sm:$0xff] %v12737_v8 }
 0x7f1   :  { %v5041_v35 = vpop.xlane.xlu0 %5040 }
 0x7f3   :  { %v5281_v32 = vpop.xlane.xlu2 %5280  ;;  %v12741_v30 = vpop.f32.mrf.mxu3 }
 0x7f4   :  { %15487 = vst [vmem:[#allocation35_spill] sm:$0xff] %v12741_v30  ;;  %v12745_v5 = vpop.f32.mrf.mxu2  ;;  %v5115_v30 = vsub.f32 %v12460_v61, %v5041_v35 }
 0x7f5   :  { %15489 = vst [vmem:[#allocation57_spill] sm:$0xff] %v12745_v5 }
 0x7f6   :  { %v5222_v10 = vmul.f32 1.442695, %v5115_v30 }
 0x7fb   :  { %v12747_v19 = vpop.xlane.xlu2 %5283  ;;  %v12749_v52 = vpop.f32.mrf.mxu3 }
 0x7fc   :  { %5951 = vrot.lane.b32.xlu1 %v15486_v57, %s8930_s22  ;;  %15490 = vst [vmem:[#allocation28_spill] sm:$0xff] %v12749_v52  ;;  %v12751_v34 = vpop.f32.mrf.mxu2  ;;  %v5114_v57 = vsub.f32 %v12455_v36, %v5041_v35  ;;  %v5398_v52 = vmul.f32 %v8531_v24, %v12430_v44  ;;  %v5112_v35 = vsub.f32 %v12439_v48, %v5038_v25 }
 0x7fd   :  { %15491 = vst [vmem:[#allocation55_spill] sm:$0xff] %v12751_v34  ;;  %v5399_v34 = vmul.f32 %v8531_v24, %v12432_v4  ;;  %v5113_v44 = vsub.f32 %v12444_v47, %v5038_v25 }
 0x7fe   :  { %v5220_v63 = vmul.f32 1.442695, %v5114_v57 }
 0x800   :  { %5949 = vrot.lane.b32.xlu2 %v15488_v9, %s8930_s22 }
 0x803   :  { %v5047_v49 = vpop.xlane.xlu2 %5046  ;;  %v12755_v9 = vpop.f32.mrf.mxu3 }
 0x804   :  { %15492 = vst [vmem:[#allocation23_spill] sm:$0xff] %v12755_v9  ;;  %v5118_v46 = vsub.f32 %v12499_v45, %v5047_v49  ;;  %v12760_v15 = vpop.f32.mrf.mxu2  ;;  %v5044_v9 = vpop.xlane.xlu0 %5043 }
 0x805   :  { %v5117_v48 = vsub.f32 %v12480_v16, %v5044_v9 }
 0x806   :  { %v5228_v30 = vmul.f32 1.442695, %v5118_v46 }
 0x807   :  { %v5226_v25 = vmul.f32 1.442695, %v5117_v48 }
 0x80b   :  { %v12771_v47 = vpop.f32.mrf.mxu3 }
 0x80c   :  { %15493 = vst [vmem:[#allocation51_spill] sm:$0xff] %v12771_v47  ;;  %v5287_v48 = vpop.xlane.xlu0 %5286  ;;  %v15623_v47 = vld [vmem:[#allocation91_spill] sm:$0xff] }
 0x80e   :  { %v5272_v8 = vpop.xlane.xlu1 %5271 }
 0x80f   :  { %8532 = vrcp.f32 %v5272_v8  ;;  %v5119_v8 = vsub.f32 %v12504_v3, %v5047_v49 }
 0x810   :  { %8534 = vrcp.f32 %v5281_v32 }
 0x811   :  { %8536 = vpow2.f32 %v5220_v63 }
 0x812   :  { %8538 = vpow2.f32 %v5222_v10 }
 0x815   :  { %v8533_v5 = vpop.eup %8532 }
 0x816   :  { %v5035_v36 = vpop.xlane.xlu1 %5034  ;;  %v5396_v14 = vmul.f32 %v8533_v5, %v12519_v43  ;;  %v5397_v61 = vmul.f32 %v8533_v5, %v12532_v41  ;;  %v5116_v43 = vsub.f32 %v12475_v62, %v5044_v9  ;;  %v5230_v41 = vmul.f32 1.442695, %v5119_v8  ;;  %v12779_v5 = vpop.f32.mrf.mxu2 }
 0x817   :  { %v5110_v57 = vsub.f32 %v12553_v60, %v5035_v36  ;;  %v5111_v45 = vsub.f32 %v12556_v22, %v5035_v36  ;;  %v5050_v60 = vpop.xlane.xlu2 %5049  ;;  %v5216_v22 = vmul.f32 1.442695, %v5112_v35  ;;  %15494 = vst [vmem:[#allocation48_spill] sm:$0xff] %v12779_v5 }
 0x818   :  { %v5458_v4 = vpack.c.bf16 %v5398_v52, %v5396_v14  ;;  %v5459_v24 = vpack.c.bf16 %v5399_v34, %v5397_v61  ;;  %v5218_v14 = vmul.f32 1.442695, %v5113_v44  ;;  %v8535_v34 = vpop.eup %8534  ;;  %v5224_v63 = vmul.f32 1.442695, %v5116_v43  ;;  %v12801_v43 = vpop.f32.mrf.mxu3 }
 0x819   :  { %v5212_v3 = vmul.f32 1.442695, %v5110_v57  ;;  %v5214_v49 = vmul.f32 1.442695, %v5111_v45  ;;  %v5120_v10 = vsub.f32 %v12517_v38, %v5050_v60  ;;  %v12774_v62 = vpop.eup %8536  ;;  %v5121_v32 = vsub.f32 %v12522_v31, %v5050_v60 }
 0x81a   :  { %5549 = vmatmul.bf16.gmra.mxu2 %v5458_v4  ;;  %5638 = vmatmul.bf16.gmra.mxu3 %v5459_v24  ;;  %v12777_v16 = vpop.eup %8538  ;;  %v5402_v45 = vmul.f32 %v8535_v34, %v12462_v23 }
 0x81b   :  { %8540 = vpow2.f32 %v5212_v3  ;;  %v5232_v8 = vmul.f32 1.442695, %v5120_v10  ;;  %v5234_v36 = vmul.f32 1.442695, %v5121_v32  ;;  %v5327_v35 = vadd.f32 %v12777_v16, %v12774_v62 }
 0x81c   :  { %8542 = vpow2.f32 %v5214_v49  ;;  %v5403_v3 = vmul.f32 %v8535_v34, %v12464_v33 }
 0x81d   :  { %8544 = vpow2.f32 %v5228_v30 }
 0x81e   :  { %8546 = vpow2.f32 %v5230_v41  ;;  %v5278_v46 = vpop.xlane.xlu1 %5277 }
 0x81f   :  { %8548 = vrcp.f32 %v5278_v46 }
 0x820   :  { %8550 = vpow2.f32 %v5216_v22 }
 0x821   :  { %v12781_v52 = vpop.eup %8540  ;;  %8552 = vpow2.f32 %v5218_v14 }
 0x822   :  { %v12783_v9 = vpop.eup %8542  ;;  %8554 = vpow2.f32 %v5224_v63 }
 0x823   :  { %v12785_v38 = vpop.eup %8544  ;;  %8556 = vpow2.f32 %v5226_v25  ;;  %v5321_v31 = vadd.f32 %v12783_v9, %v12781_v52 }
 0x824   :  { %v12789_v61 = vpop.eup %8546  ;;  %8558 = vpow2.f32 %v5232_v8 }
 0x825   :  { %v8549_v57 = vpop.eup %8548  ;;  %5322 = vadd.xlane.f32.xlu0 %v5321_v31  ;;  %8560 = vpow2.f32 %v5234_v36  ;;  %v5333_v23 = vadd.f32 %v12789_v61, %v12785_v38  ;;  %v12824_v36 = vpop.f32.mrf.mxu3 }
 0x826   :  { %v12794_v44 = vpop.eup %8550  ;;  %5328 = vadd.xlane.f32.xlu1 %v5327_v35  ;;  %v5293_v4 = vpop.xlane.xlu1 %5292  ;;  %v5400_v24 = vmul.f32 %v8549_v57, %v12568_v37  ;;  %v5401_v30 = vmul.f32 %v8549_v57, %v12572_v27  ;;  %8562 = vrcp.f32 %v5287_v48  ;;  %15495 = vst [vmem:[#allocation176_spill] sm:$0xff] %v12824_v36 }
 0x827   :  { %v12799_v49 = vpop.eup %8552  ;;  %v12809_v37 = vpop.f32.mrf.mxu2  ;;  %8564 = vrcp.f32 %v12747_v19 }
 0x828   :  { %v12803_v41 = vpop.eup %8554  ;;  %v5460_v60 = vpack.c.bf16 %v5402_v45, %v5400_v24  ;;  %v5461_v22 = vpack.c.bf16 %v5403_v3, %v5401_v30  ;;  %v5324_v33 = vadd.f32 %v12799_v49, %v12794_v44  ;;  %v5290_v19 = vpop.xlane.xlu0 %5289 }
 0x829   :  { %v12807_v14 = vpop.eup %8556  ;;  %5334 = vadd.xlane.f32.xlu2 %v5333_v23 }
 0x82a   :  { %5554 = vmatmul.bf16.gmra.mxu2 %v5460_v60  ;;  %5643 = vmatmul.bf16.gmra.mxu3 %v5461_v22  ;;  %v12813_v27 = vpop.eup %8558  ;;  %v5330_v34 = vadd.f32 %v12807_v14, %v12803_v41 }
 0x82b   :  { %v12817_v63 = vpop.eup %8560 }
 0x82c   :  { %v5336_v32 = vadd.f32 %v12817_v63, %v12813_v27  ;;  %v8563_v8 = vpop.eup %8562 }
 0x82d   :  { %5325 = vadd.xlane.f32.xlu0 %v5324_v33  ;;  %v8565_v57 = vpop.eup %8564  ;;  %v5406_v24 = vmul.f32 %v8563_v8, %v12506_v26  ;;  %v12836_v22 = vpop.f32.mrf.mxu3 }
 0x82e   :  { %5331 = vadd.xlane.f32.xlu1 %v5330_v34  ;;  %v5056_v10 = vpop.xlane.xlu1 %5055  ;;  %v5405_v30 = vmul.f32 %v8565_v57, %v12484_v29 }
 0x82f   :  { %v5124_v46 = vsub.f32 %v12607_v11, %v5056_v10  ;;  %v5125_v25 = vsub.f32 %v12612_v54, %v5056_v10  ;;  %v12826_v45 = vpop.f32.mrf.mxu2  ;;  %v5407_v11 = vmul.f32 %v8563_v8, %v12508_v0  ;;  %v5404_v54 = vmul.f32 %v8565_v57, %v12482_v39  ;;  %v12842_v0 = vpop.xlane.xlu2 %5058  ;;  %v15497_v10 = vld [vmem:[#allocation17_spill] sm:$0xff]  ;;  %v15500_v57 = vld [vmem:[#allocation164_spill] sm:$0xff] }
 0x830   :  { %15496 = vst [vmem:[#allocation177_spill] sm:$0xff] %v12826_v45  ;;  %v5053_v39 = vpop.xlane.xlu0 %5052  ;;  %v8049_v8 = vld [vmem:[%s14435_s5 + $0x28] sm:$0xff] }
 0x831   :  { %v5240_v31 = vmul.f32 1.442695, %v5124_v46  ;;  %v5242_v35 = vmul.f32 1.442695, %v5125_v25  ;;  %5337 = vadd.xlane.f32.xlu2 %v5336_v32  ;;  %v5462_v3 = vpack.c.bf16 %v5406_v24, %v5404_v54  ;;  %v5463_v23 = vpack.c.bf16 %v5407_v11, %v5405_v30  ;;  %v15501_v24 = vld [vmem:[#allocation18_spill] sm:$0xff]  ;;  %v15502_v11 = vld [vmem:[#allocation89_spill] sm:$0xff]  ;;  %5796 = vmatpush.bf16.msrb.mxu0 %v8049_v8 }
 0x833   :  { %8566 = vpow2.f32 %v5240_v31 }
 0x834   :  { %8568 = vpow2.f32 %v5242_v35 }
 0x835   :  { %8570 = vrcp.f32 %v5293_v4  ;;  %v12847_v4 = vpop.f32.mrf.mxu3 }
 0x836   :  { %8572 = vrcp.f32 %v5290_v19  ;;  %v5296_v29 = vpop.xlane.xlu1 %5295  ;;  %15498 = vst [vmem:[#allocation17_spill] sm:$0xff] %v12847_v4 }
 0x837   :  { %v12840_v33 = vpop.f32.mrf.mxu2  ;;  %8574 = vrcp.f32 %v5296_v29  ;;  %v15503_v29 = vld [vmem:[#allocation45_spill] sm:$0xff] }
 0x838   :  { %v5302_v35 = vpop.xlane.xlu0 %5301 }
 0x839   :  { %v12832_v48 = vpop.eup %8566 }
 0x83a   :  { %v12834_v60 = vpop.eup %8568  ;;  %5559 = vmatmul.bf16.gmra.mxu2 %v5462_v3  ;;  %5648 = vmatmul.bf16.gmra.mxu3 %v5463_v23  ;;  %v5299_v23 = vpop.xlane.xlu2 %5298 }
 0x83b   :  { %v5342_v26 = vadd.f32 %v12834_v60, %v12832_v48  ;;  %v8571_v34 = vpop.eup %8570  ;;  %8576 = vrcp.f32 %v5299_v23 }
 0x83c   :  { %v8573_v46 = vpop.eup %8572  ;;  %v5410_v25 = vmul.f32 %v8571_v34, %v12586_v12  ;;  %v5411_v32 = vmul.f32 %v8571_v34, %v12590_v51  ;;  %v8048_v51 = vld [vmem:[%s14435_s5 + $0x20] sm:$0xff] }
 0x83d   :  { %5343 = vadd.xlane.f32.xlu2 %v5342_v26  ;;  %v5408_v19 = vmul.f32 %v8573_v46, %v15500_v57  ;;  %v5409_v54 = vmul.f32 %v8573_v46, %v15502_v11  ;;  %v12862_v26 = vpop.f32.mrf.mxu3  ;;  %5797 = vmatpush.bf16.msrb.mxu0 %v8048_v51  ;;  %v8575_v46 = vpop.eup %8574 }
 0x83e   :  { %v5305_v12 = vpop.xlane.xlu1 %5304  ;;  %v5413_v57 = vmul.f32 %v8575_v46, %v12645_v56 }
 0x83f   :  { %v12853_v31 = vpop.f32.mrf.mxu2  ;;  %v5464_v30 = vpack.c.bf16 %v5410_v25, %v5408_v19  ;;  %v5465_v3 = vpack.c.bf16 %v5411_v32, %v5409_v54  ;;  %v5412_v32 = vmul.f32 %v8575_v46, %v12638_v40  ;;  %v15505_v54 = vld [vmem:[#allocation153_spill] sm:$0xff]  ;;  %8578 = vrcp.f32 %v5305_v12 }
 0x840   :  { %15499 = vst [vmem:[#allocation178_spill] sm:$0xff] %v12853_v31  ;;  %8580 = vrcp.f32 %v5302_v35 }
 0x841   :  { %5963 = vrot.lane.b32.xlu0 %v15497_v10, %s8930_s22  ;;  %v12866_v10 = vpop.xlane.xlu0 %5064  ;;  %v8577_v25 = vpop.eup %8576 }
 0x842   :  { %v5414_v19 = vmul.f32 %v8577_v25, %v12596_v1  ;;  %v12878_v31 = vpop.xlane.xlu2 %5061 }
 0x844   :  { %v5466_v51 = vpack.c.bf16 %v5414_v19, %v5412_v32 }
 0x845   :  { %v12876_v4 = vpop.f32.mrf.mxu3 }
 0x846   :  { %v5308_v8 = vpop.xlane.xlu1 %5307  ;;  %15507 = vst [vmem:[#allocation164_spill] sm:$0xff] %v12876_v4 }
 0x847   :  { %5965 = vrot.lane.b32.xlu1 %v15501_v24, %s8930_s22  ;;  %v12864_v34 = vpop.f32.mrf.mxu2  ;;  %v15504_v24 = vld [vmem:[#allocation76_spill] sm:$0xff] }
 0x848   :  { %v5122_v11 = vsub.f32 %v15504_v24, %v5053_v39 }
 0x849   :  { %v5068_v45 = vpop.xlane.xlu0 %5067 }
 0x84a   :  { %5564 = vmatmul.bf16.gmra.mxu2 %v5464_v30  ;;  %5653 = vmatmul.bf16.gmra.mxu3 %v5465_v3  ;;  %v5415_v30 = vmul.f32 %v8577_v25, %v15505_v54  ;;  %v15506_v3 = vld [vmem:[#allocation87_spill] sm:$0xff]  ;;  %v5132_v46 = vsub.f32 %v12651_v53, %v5068_v45  ;;  %v8579_v25 = vpop.eup %8578 }
 0x84b   :  { %v5123_v23 = vsub.f32 %v15506_v3, %v5053_v39  ;;  %v5133_v39 = vsub.f32 %v12656_v28, %v5068_v45  ;;  %v5418_v12 = vmul.f32 %v8579_v25, %v12660_v21  ;;  %v5419_v35 = vmul.f32 %v8579_v25, %v12664_v6  ;;  %v15509_v28 = vld [vmem:[#allocation171_spill] sm:$0xff]  ;;  %v15510_v3 = vld [vmem:[#allocation133_spill] sm:$0xff]  ;;  %v15511_v21 = vld [vmem:[#allocation64_spill] sm:$0xff] }
 0x84c   :  { %v5467_v36 = vpack.c.bf16 %v5415_v30, %v5413_v57  ;;  %v5256_v32 = vmul.f32 1.442695, %v5132_v46  ;;  %v5311_v57 = vpop.xlane.xlu2 %5310  ;;  %v8581_v30 = vpop.eup %8580  ;;  %v15512_v25 = vld [vmem:[#allocation143_spill] sm:$0xff] }
 0x84d   :  { %v5238_v1 = vmul.f32 1.442695, %v5123_v23  ;;  %v5258_v19 = vmul.f32 1.442695, %v5133_v39  ;;  %v5416_v45 = vmul.f32 %v8581_v30, %v15509_v28  ;;  %v5417_v23 = vmul.f32 %v8581_v30, %v15510_v3 }
 0x84e   :  { %v12882_v56 = vpop.xlane.xlu1 %5070  ;;  %v5130_v39 = vsub.f32 %v15511_v21, %v12866_v10 }
 0x84f   :  { %v12880_v40 = vpop.f32.mrf.mxu2  ;;  %v5469_v46 = vpack.c.bf16 %v5419_v35, %v5417_v23 }
 0x850   :  { %15508 = vst [vmem:[#allocation18_spill] sm:$0xff] %v12880_v40 }
 0x855   :  { %5947 = vrot.lane.b32.xlu2 %v15503_v29, %s8930_s22  ;;  %v5236_v29 = vmul.f32 1.442695, %v5122_v11 }
 0x856   :  { %v5314_v53 = vpop.xlane.xlu1 %5313 }
 0x857   :  { %8582 = vpow2.f32 %v5236_v29 }
 0x858   :  { %8584 = vpow2.f32 %v5238_v1 }
 0x859   :  { %8586 = vpow2.f32 %v5256_v32 }
 0x85a   :  { %5569 = vmatmul.bf16.gmra.mxu2 %v5466_v51  ;;  %5658 = vmatmul.bf16.gmra.mxu3 %v5467_v36  ;;  %8588 = vpow2.f32 %v5258_v19  ;;  %v5468_v51 = vpack.c.bf16 %v5418_v12, %v5416_v45  ;;  %v5131_v19 = vsub.f32 %v15512_v25, %v12866_v10  ;;  %v5252_v45 = vmul.f32 1.442695, %v5130_v39 }
 0x85b   :  { %v5320_v29 = vpop.xlane.xlu2 %5319  ;;  %8590 = vrcp.f32 %v5308_v8 }
 0x85c   :  { %8592 = vrcp.f32 %v5311_v57  ;;  %v5254_v23 = vmul.f32 1.442695, %v5131_v19 }
 0x85d   :  { %v12887_v36 = vpop.eup %8582  ;;  %8594 = vpow2.f32 %v5252_v45 }
 0x85e   :  { %v12890_v11 = vpop.eup %8584  ;;  %8596 = vpow2.f32 %v5254_v23 }
 0x85f   :  { %v5339_v1 = vadd.f32 %v12890_v11, %v12887_v36  ;;  %v12898_v6 = vpop.eup %8586  ;;  %8598 = vrcp.f32 %v5314_v53 }
 0x860   :  { %v12902_v12 = vpop.eup %8588 }
 0x861   :  { %v8591_v10 = vpop.eup %8590 }
 0x862   :  { %v5545_v24 = vpop.f32.mrf.mxu2  ;;  %v5634_v54 = vpop.f32.mrf.mxu3  ;;  %v5420_v57 = vmul.f32 %v8591_v10, %v12670_v7 }
 0x863   :  { %v5635_v28 = vadd.f32 %v5634_v54, %v5545_v24  ;;  %v5950_v8 = vpop.permute.xlu2 %5949  ;;  %v5421_v24 = vmul.f32 %v8591_v10, %v12672_v42  ;;  %v15514_v42 = vld [vmem:[#allocation13_spill] sm:$0xff]  ;;  %v15515_v10 = vld [vmem:[#allocation40_spill] sm:$0xff] }
 0x86a   :  { %v5547_v32 = vpop.f32.mrf.mxu2  ;;  %v5636_v4 = vpop.f32.mrf.mxu3  ;;  %5574 = vmatmul.bf16.gmra.mxu2 %v5468_v51  ;;  %5663 = vmatmul.bf16.gmra.mxu3 %v5469_v46  ;;  %v5354_v51 = vadd.f32 %v12902_v12, %v12898_v6  ;;  %v15513_v46 = vld [vmem:[#allocation88_spill] sm:$0xff] }
 0x86b   :  { %v5637_v30 = vadd.f32 %v5636_v4, %v5547_v32  ;;  %5340 = vadd.xlane.f32.xlu0 %v5339_v1  ;;  %v8593_v4 = vpop.eup %8592  ;;  %v6033_v1 = vsel %vm1787_vm2, %v5950_v8, 0  ;;  %v15517_v8 = vld [vmem:[#allocation156_spill] sm:$0xff] }
 0x86c   :  { %v5422_v54 = vmul.f32 %v8593_v4, %v12674_v13  ;;  %v5423_v39 = vmul.f32 %v8593_v4, %v15513_v46  ;;  %v12913_v32 = vpop.eup %8594  ;;  %v15516_v4 = vld [vmem:[#allocation58_spill] sm:$0xff]  ;;  %v15521_v46 = vld [vmem:[#allocation172_spill] sm:$0xff] }
 0x86d   :  { %v5714_v35 = vpack.c.bf16 %v5637_v30, %v5635_v28  ;;  %v12915_v19 = vpop.eup %8596  ;;  %v5317_v30 = vpop.xlane.xlu0 %5316 }
 0x86e   :  { %v5952_v3 = vpop.permute.xlu1 %5951  ;;  %v5470_v25 = vpack.c.bf16 %v5422_v54, %v5420_v57  ;;  %v5471_v28 = vpack.c.bf16 %v5423_v39, %v5421_v24  ;;  %v5351_v7 = vadd.f32 %v12915_v19, %v12913_v32  ;;  %8600 = vrcp.f32 %v5317_v30  ;;  %v8599_v13 = vpop.eup %8598 }
 0x86f   :  { %v6036_v21 = vsel %vm1787_vm2, %v5952_v3, 0  ;;  %7948 = vmatmul.msk.bf16.vlgmr.msrb.gmra.mxu0 %vm1787_vm2, %v5714_v35  ;;  %v5424_v45 = vmul.f32 %v8599_v13, %v12704_v2  ;;  %v5425_v3 = vmul.f32 %v8599_v13, %v12710_v58  ;;  %v5126_v57 = vsub.f32 %v15517_v8, %v12842_v0  ;;  %v15518_v2 = vld [vmem:[#allocation152_spill] sm:$0xff] }
 0x870   :  { %6074 = vmatpush.bf16.xpose.msrb.mxu1 %v6036_v21  ;;  %v5127_v58 = vsub.f32 %v15518_v2, %v12842_v0  ;;  %8602 = vrcp.f32 %v5320_v29  ;;  %v5128_v39 = vsub.f32 %v15521_v46, %v12878_v31  ;;  %v15522_v0 = vld [vmem:[#allocation174_spill] sm:$0xff] }
 0x871   :  { %5355 = vadd.xlane.f32.xlu1 %v5354_v51  ;;  %v5244_v24 = vmul.f32 1.442695, %v5126_v57  ;;  %v5129_v30 = vsub.f32 %v15522_v0, %v12878_v31  ;;  %v15524_v31 = vld [vmem:[#allocation59_spill] sm:$0xff] }
 0x872   :  { %v5246_v54 = vmul.f32 1.442695, %v5127_v58  ;;  %v15525_v58 = vld [vmem:[#allocation46_spill] sm:$0xff] }
 0x874   :  { %v8601_v35 = vpop.eup %8600 }
 0x875   :  { %v5426_v23 = vmul.f32 %v8601_v35, %v12712_v55  ;;  %v5427_v21 = vmul.f32 %v8601_v35, %v12714_v18  ;;  %v15519_v55 = vld [vmem:[#allocation42_spill] sm:$0xff]  ;;  %v5248_v35 = vmul.f32 1.442695, %v5128_v39 }
 0x877   :  { %v5472_v53 = vpack.c.bf16 %v5426_v23, %v5424_v45  ;;  %v5473_v51 = vpack.c.bf16 %v5427_v21, %v5425_v3 }
 0x878   :  { %6075 = vmatpush.bf16.xpose.msrb.mxu1 %v6033_v1  ;;  %v15520_v1 = vld [vmem:[#allocation11_spill] sm:$0xff] }
 0x87a   :  { %5579 = vmatmul.bf16.gmra.mxu2 %v5470_v25  ;;  %5668 = vmatmul.bf16.gmra.mxu3 %v5471_v28  ;;  %v8603_v25 = vpop.eup %8602 }
 0x87b   :  { %v5428_v45 = vmul.f32 %v8603_v25, %v12725_v59  ;;  %v5429_v23 = vmul.f32 %v8603_v25, %v12727_v17  ;;  %v5134_v59 = vsub.f32 %v12691_v20, %v12882_v56 }
 0x87e   :  { %5352 = vadd.xlane.f32.xlu2 %v5351_v7 }
 0x87f   :  { %5961 = vrot.lane.b32.xlu0 %v15514_v42, %s8930_s22  ;;  %v15523_v42 = vld [vmem:[#allocation39_spill] sm:$0xff] }
 0x88a   :  { %5943 = vrot.lane.b32.xlu1 %v15515_v10, %s8930_s22  ;;  %5584 = vmatmul.bf16.gmra.mxu2 %v5472_v53  ;;  %v5250_v53 = vmul.f32 1.442695, %v5129_v30 }
 0x88b   :  { %5673 = vmatmul.bf16.gmra.mxu3 %v5473_v51 }
 0x892   :  { %5923 = vrot.lane.b32.xlu1 %v15516_v4, %s8930_s22 }
 0x896   :  { %5945 = vrot.lane.b32.xlu2 %v15519_v55, %s8930_s22 }
 0x898   :  { %v5323_v18 = vpop.xlane.xlu0 %5322 }
 0x899   :  { %8604 = vrcp.f32 %v5323_v18  ;;  %v5329_v2 = vpop.xlane.xlu1 %5328 }
 0x89a   :  { %5929 = vrot.lane.b32.xlu1 %v15520_v1, %s8930_s22  ;;  %8606 = vpow2.f32 %v5244_v24  ;;  %v5260_v1 = vmul.f32 1.442695, %v5134_v59 }
 0x89b   :  { %8608 = vpow2.f32 %v5246_v54 }
 0x89c   :  { %v12941_v7 = vpop.xlane.xlu2 %5334  ;;  %8610 = vpow2.f32 %v5248_v35 }
 0x89d   :  { %v5550_v28 = vpop.f32.mrf.mxu2  ;;  %v5639_v29 = vpop.f32.mrf.mxu3 }
 0x89e   :  { %5911 = vrot.lane.b32.xlu2 %v15523_v42, %s8930_s22  ;;  %v5640_v55 = vadd.f32 %v5639_v29, %v5550_v28  ;;  %v15527_v29 = vld [vmem:[#allocation50_spill] sm:$0xff] }
 0x89f   :  { %v8605_v13 = vpop.eup %8604 }
 0x8a0   :  { %v5430_v3 = vmul.f32 %v8605_v13, %v12781_v52  ;;  %v5431_v21 = vmul.f32 %v8605_v13, %v12783_v9  ;;  %v5326_v51 = vpop.xlane.xlu0 %5325  ;;  %v12951_v8 = vpop.eup %8606  ;;  %v5135_v52 = vsub.f32 %v12694_v50, %v12882_v56  ;;  %v15526_v50 = vld [vmem:[#allocation52_spill] sm:$0xff] }
 0x8a1   :  { %v12953_v57 = vpop.eup %8608  ;;  %8612 = vrcp.f32 %v5326_v51 }
 0x8a2   :  { %6903 = vrot.lane.b32.xlu1 %v15524_v31, %s8930_s22  ;;  %v5474_v10 = vpack.c.bf16 %v5430_v3, %v5428_v45  ;;  %v5475_v4 = vpack.c.bf16 %v5431_v21, %v5429_v23  ;;  %8614 = vpow2.f32 %v5250_v53  ;;  %v5345_v24 = vadd.f32 %v12953_v57, %v12951_v8  ;;  %v12965_v46 = vpop.eup %8610  ;;  %v5332_v21 = vpop.xlane.xlu1 %5331  ;;  %v15528_v53 = vld [vmem:[#allocation27_spill] sm:$0xff] }
 0x8a3   :  { %8616 = vrcp.f32 %v5329_v2  ;;  %v5262_v39 = vmul.f32 1.442695, %v5135_v52 }
 0x8a4   :  { %5589 = vmatmul.bf16.gmra.mxu2 %v5474_v10  ;;  %5678 = vmatmul.bf16.gmra.mxu3 %v5475_v4  ;;  %v12963_v54 = vpop.xlane.xlu2 %5337  ;;  %8618 = vpow2.f32 %v5260_v1 }
 0x8a5   :  { %v5552_v17 = vpop.f32.mrf.mxu2  ;;  %v5641_v9 = vpop.f32.mrf.mxu3  ;;  %8620 = vpow2.f32 %v5262_v39  ;;  %v15531_v39 = vld [vmem:[#allocation15_spill] sm:$0xff] }
 0x8a6   :  { %5915 = vrot.lane.b32.xlu2 %v15525_v58, %s8930_s22  ;;  %v5642_v18 = vadd.f32 %v5641_v9, %v5552_v17  ;;  %8622 = vrcp.f32 %v5332_v21 }
 0x8a7   :  { %v8613_v56 = vpop.eup %8612  ;;  %8624 = vrcp.f32 %v12941_v7 }
 0x8a8   :  { %v5715_v20 = vpack.c.bf16 %v5642_v18, %v5640_v55  ;;  %v12970_v25 = vpop.eup %8614  ;;  %v5432_v42 = vmul.f32 %v8613_v56, %v12794_v44  ;;  %v5433_v13 = vmul.f32 %v8613_v56, %v12799_v49  ;;  %v15530_v18 = vld [vmem:[#allocation49_spill] sm:$0xff]  ;;  %8626 = vrcp.f32 %v12963_v54 }
 0x8a9   :  { %5346 = vadd.xlane.f32.xlu0 %v5345_v24  ;;  %v8617_v28 = vpop.eup %8616  ;;  %v5348_v35 = vadd.f32 %v12970_v25, %v12965_v46 }
 0x8aa   :  { %6897 = vrot.lane.b32.xlu1 %v15526_v50, %s8930_s22  ;;  %7949 = vmatmul.msk.bf16.gmra.mxu0 %vm1787_vm2, %v5715_v20  ;;  %v5434_v3 = vmul.f32 %v8617_v28, %v12774_v62  ;;  %v5435_v23 = vmul.f32 %v8617_v28, %v12777_v16  ;;  %v12984_v10 = vpop.eup %8618  ;;  %v15529_v62 = vld [vmem:[#allocation60_spill] sm:$0xff] }
 0x8ab   :  { %v12986_v44 = vpop.eup %8620 }
 0x8ac   :  { %v5476_v51 = vpack.c.bf16 %v5434_v3, %v5432_v42  ;;  %v5477_v31 = vpack.c.bf16 %v5435_v23, %v5433_v13  ;;  %v5357_v59 = vadd.f32 %v12986_v44, %v12984_v10  ;;  %v8623_v24 = vpop.eup %8622  ;;  %v15532_v42 = vld [vmem:[#allocation24_spill] sm:$0xff] }
 0x8ad   :  { %v5555_v0 = vpop.f32.mrf.mxu2  ;;  %v5644_v30 = vpop.f32.mrf.mxu3  ;;  %v5436_v50 = vmul.f32 %v8623_v24, %v12803_v41  ;;  %v5437_v56 = vmul.f32 %v8623_v24, %v12807_v14  ;;  %v15533_v41 = vld [vmem:[#allocation29_spill] sm:$0xff] }
 0x8ae   :  { %5919 = vrot.lane.b32.xlu2 %v15527_v29, %s8930_s22  ;;  %v5645_v16 = vadd.f32 %v5644_v30, %v5555_v0  ;;  %v8625_v7 = vpop.eup %8624 }
 0x8af   :  { %v5438_v0 = vmul.f32 %v8625_v7, %v12785_v38  ;;  %v5439_v30 = vmul.f32 %v8625_v7, %v12789_v61  ;;  %v15534_v61 = vld [vmem:[#allocation41_spill] sm:$0xff]  ;;  %v8627_v7 = vpop.eup %8626 }
 0x8b0   :  { %v12978_v45 = vpop.xlane.xlu2 %5343 }
 0x8b1   :  { %5349 = vadd.xlane.f32.xlu0 %v5348_v35  ;;  %v5478_v13 = vpack.c.bf16 %v5438_v0, %v5436_v50  ;;  %v5479_v35 = vpack.c.bf16 %v5439_v30, %v5437_v56  ;;  %v15542_v50 = vld [vmem:[#allocation34_spill] sm:$0xff]  ;;  %v5440_v56 = vmul.f32 %v8627_v7, %v12813_v27  ;;  %v5441_v0 = vmul.f32 %v8627_v7, %v12817_v63 }
 0x8b2   :  { %6915 = vrot.lane.b32.xlu1 %v15528_v53, %s8930_s22  ;;  %v15535_v53 = vld [vmem:[#allocation9_spill] sm:$0xff] }
 0x8b3   :  { %v5964_v28 = vpop.permute.xlu0 %5963 }
 0x8b4   :  { %5594 = vmatmul.bf16.gmra.mxu2 %v5476_v51  ;;  %5683 = vmatmul.bf16.gmra.mxu3 %v5477_v31  ;;  %v6054_v29 = vsel %vm1787_vm2, %v5964_v28, 0 }
 0x8b5   :  { %v5557_v49 = vpop.f32.mrf.mxu2  ;;  %v5646_v4 = vpop.f32.mrf.mxu3 }
 0x8b6   :  { %5925 = vrot.lane.b32.xlu2 %v15529_v62, %s8930_s22  ;;  %v5647_v2 = vadd.f32 %v5646_v4, %v5557_v49  ;;  %v15536_v49 = vld [vmem:[#allocation33_spill] sm:$0xff]  ;;  %v15537_v4 = vld [vmem:[#allocation43_spill] sm:$0xff] }
 0x8b8   :  { %v5948_v17 = vpop.permute.xlu2 %5947  ;;  %v5716_v52 = vpack.c.bf16 %v5647_v2, %v5645_v16  ;;  %v15538_v2 = vld [vmem:[#allocation32_spill] sm:$0xff] }
 0x8b9   :  { %v6030_v9 = vsel %vm1787_vm2, %v5948_v17, 0  ;;  %5358 = vadd.xlane.f32.xlu0 %v5357_v59  ;;  %v5966_v58 = vpop.permute.xlu1 %5965 }
 0x8ba   :  { %6076 = vmatpush.bf16.xpose.msrb.mxu1 %v6030_v9  ;;  %v6057_v55 = vsel %vm1787_vm2, %v5966_v58, 0  ;;  %6895 = vrot.lane.b32.xlu1 %v15530_v18, %s8930_s22  ;;  %v15539_v9 = vld [vmem:[#allocation47_spill] sm:$0xff]  ;;  %v15540_v18 = vld [vmem:[#allocation30_spill] sm:$0xff] }
 0x8bb   :  { %7950 = vmatmul.msk.bf16.gmra.mxu0 %vm1787_vm2, %v5716_v52  ;;  %6164 = vmatpush.bf16.xpose.msra.mxu2 %v6057_v55 }
 0x8bd   :  { %v5560_v1 = vpop.f32.mrf.mxu2  ;;  %v5649_v20 = vpop.f32.mrf.mxu3 }
 0x8be   :  { %5931 = vrot.lane.b32.xlu2 %v15531_v39, %s8930_s22  ;;  %v5650_v14 = vadd.f32 %v5649_v20, %v5560_v1  ;;  %v15541_v20 = vld [vmem:[#allocation54_spill] sm:$0xff] }
 0x8c2   :  { %6913 = vrot.lane.b32.xlu1 %v15532_v42, %s8930_s22 }
 0x8c3   :  { %6165 = vmatpush.bf16.xpose.msra.mxu2 %v6054_v29 }
 0x8c4   :  { %5599 = vmatmul.bf16.gmra.mxu2 %v5478_v13  ;;  %5688 = vmatmul.bf16.gmra.mxu3 %v5479_v35 }
 0x8c5   :  { %v5562_v3 = vpop.f32.mrf.mxu2  ;;  %v5651_v23 = vpop.f32.mrf.mxu3 }
 0x8c6   :  { %5937 = vrot.lane.b32.xlu2 %v15533_v41, %s8930_s22  ;;  %v5652_v21 = vadd.f32 %v5651_v23, %v5562_v3  ;;  %v15543_v23 = vld [vmem:[#allocation162_spill] sm:$0xff]  ;;  %v15544_v41 = vld [vmem:[#allocation115_spill] sm:$0xff] }
 0x8c8   :  { %v5717_v38 = vpack.c.bf16 %v5652_v21, %v5650_v14  ;;  %v4431_v14 = vadd.f32 %v15544_v41, %v15543_v23 }
 0x8ca   :  { %6891 = vrot.lane.b32.xlu1 %v15534_v61, %s8930_s22 }
 0x8cb   :  { %7951 = vmatmul.msk.bf16.gmra.mxu0 %vm1787_vm2, %v5717_v38 }
 0x8cd   :  { %5959 = vrot.lane.b32.xlu0 %v15535_v53, %s8930_s22  ;;  %v5565_v51 = vpop.f32.mrf.mxu2  ;;  %v5654_v31 = vpop.f32.mrf.mxu3 }
 0x8ce   :  { %5939 = vrot.lane.b32.xlu2 %v15536_v49, %s8930_s22  ;;  %v5655_v59 = vadd.f32 %v5654_v31, %v5565_v51  ;;  %v15546_v31 = vld [vmem:[#allocation16_spill] sm:$0xff] }
 0x8d5   :  { %5913 = vrot.lane.b32.xlu0 %v15537_v4, %s8930_s22  ;;  %v5567_v62 = vpop.f32.mrf.mxu2  ;;  %v5656_v16 = vpop.f32.mrf.mxu3 }
 0x8d6   :  { %6919 = vrot.lane.b32.xlu2 %v15538_v2, %s8930_s22  ;;  %v5657_v17 = vadd.f32 %v5656_v16, %v5567_v62 }
 0x8d8   :  { %v5718_v52 = vpack.c.bf16 %v5657_v17, %v5655_v59 }
 0x8db   :  { %7952 = vmatmul.msk.bf16.gmra.mxu0 %vm1787_vm2, %v5718_v52 }
 0x8dd   :  { %5917 = vrot.lane.b32.xlu0 %v15539_v9, %s8930_s22  ;;  %v5570_v58 = vpop.f32.mrf.mxu2  ;;  %v5659_v24 = vpop.f32.mrf.mxu3  ;;  %v15547_v9 = vld [vmem:[#allocation22_spill] sm:$0xff] }
 0x8de   :  { %v5341_v55 = vpop.xlane.xlu0 %5340  ;;  %6917 = vrot.lane.b32.xlu2 %v15540_v18, %s8930_s22  ;;  %v5660_v29 = vadd.f32 %v5659_v24, %v5570_v58 }
 0x8df   :  { %8628 = vrcp.f32 %v5341_v55 }
 0x8e0   :  { %8630 = vrcp.f32 %v12978_v45 }
 0x8e4   :  { %v13044_v51 = vpop.xlane.xlu1 %5355 }
 0x8e5   :  { %v8629_v1 = vpop.eup %8628  ;;  %5921 = vrot.lane.b32.xlu0 %v15541_v20, %s8930_s22  ;;  %v5572_v39 = vpop.f32.mrf.mxu2 }
 0x8e6   :  { %5941 = vrot.lane.b32.xlu2 %v15542_v50, %s8930_s22  ;;  %v5661_v54 = vpop.f32.mrf.mxu3  ;;  %v5442_v28 = vmul.f32 %v8629_v1, %v12887_v36  ;;  %v5443_v30 = vmul.f32 %v8629_v1, %v12890_v11  ;;  %v15545_v36 = vld [vmem:[#allocation8_spill] sm:$0xff] }
 0x8e7   :  { %v5662_v42 = vadd.f32 %v5661_v54, %v5572_v39  ;;  %v15548_v1 = vld [vmem:[#allocation56_spill] sm:$0xff] }
 0x8e8   :  { %v5480_v13 = vpack.c.bf16 %v5442_v28, %v5440_v56  ;;  %v5481_v35 = vpack.c.bf16 %v5443_v30, %v5441_v0  ;;  %v15549_v30 = vld [vmem:[#allocation53_spill] sm:$0xff] }
 0x8e9   :  { %v5719_v3 = vpack.c.bf16 %v5662_v42, %v5660_v29 }
 0x8ea   :  { %5604 = vmatmul.bf16.gmra.mxu2 %v5480_v13  ;;  %5693 = vmatmul.bf16.gmra.mxu3 %v5481_v35 }
 0x8eb   :  { %7953 = vmatmul.msk.bf16.gmra.mxu0 %vm1787_vm2, %v5719_v3  ;;  %v15550_v3 = vld [vmem:[#allocation44_spill] sm:$0xff] }
 0x8ec   :  { %v5799_v21 = vpop.f32.mrf.mxu0 }
 0x8ed   :  { %v13037_v27 = vadd.f32 %v5799_v21, %v4431_v14  ;;  %5927 = vrot.lane.b32.xlu0 %v15545_v36, %s8930_s22  ;;  %v5575_v63 = vpop.f32.mrf.mxu2 }
 0x8ee   :  { %v5664_v11 = vpop.f32.mrf.mxu3 }
 0x8ef   :  { %v5665_v62 = vadd.f32 %v5664_v11, %v5575_v63 }
 0x8f1   :  { %v5962_v38 = vpop.permute.xlu0 %5961  ;;  %v13041_v61 = vpop.xlane.xlu2 %5352 }
 0x8f2   :  { %v6051_v53 = vsel %vm1787_vm2, %v5962_v38, 0  ;;  %v15551_v38 = vld [vmem:[#allocation21_spill] sm:$0xff] }
 0x8f3   :  { %6166 = vmatpush.bf16.xpose.msra.mxu2 %v6051_v53 }
 0x8f4   :  { %v13078_v53 = vpop.f32.mrf.mxu0 }
 0x8f5   :  { %5933 = vrot.lane.b32.xlu0 %v15546_v31, %s8930_s22  ;;  %v5577_v49 = vpop.f32.mrf.mxu2  ;;  %v8631_v31 = vpop.eup %8630 }
 0x8f6   :  { %v5666_v4 = vpop.f32.mrf.mxu3 }
 0x8f7   :  { %v5667_v16 = vadd.f32 %v5666_v4, %v5577_v49 }
 0x8f9   :  { %v5720_v2 = vpack.c.bf16 %v5667_v16, %v5665_v62  ;;  %v5946_v59 = vpop.permute.xlu2 %5945  ;;  %v5444_v62 = vmul.f32 %v8631_v31, %v12832_v48 }
 0x8fa   :  { %v6027_v17 = vsel %vm1787_vm2, %v5946_v59, 0 }
 0x8fb   :  { %7954 = vmatmul.msk.bf16.gmra.mxu0 %vm1787_vm2, %v5720_v2  ;;  %6077 = vmatpush.bf16.xpose.msrb.mxu1 %v6027_v17  ;;  %v5445_v2 = vmul.f32 %v8631_v31, %v12834_v60  ;;  %v15555_v31 = vld [vmem:[#allocation126_spill] sm:$0xff] }
 0x8fc   :  { %v5944_v52 = vpop.permute.xlu1 %5943 }
 0x8fd   :  { %5935 = vrot.lane.b32.xlu0 %v15547_v9, %s8930_s22  ;;  %v5580_v58 = vpop.f32.mrf.mxu2  ;;  %v6024_v24 = vsel %vm1787_vm2, %v5944_v52, 0  ;;  %v15552_v9 = vld [vmem:[#allocation137_spill] sm:$0xff] }
 0x8fe   :  { %v5669_v55 = vpop.f32.mrf.mxu3 }
 0x8ff   :  { %v5670_v50 = vadd.f32 %v5669_v55, %v5580_v58  ;;  %v15553_v58 = vld [vmem:[#allocation146_spill] sm:$0xff] }
 0x900   :  { %v4436_v55 = vadd.f32 %v15553_v58, %v15552_v9 }
 0x901   :  { %v13052_v18 = vpop.permute.xlu2 %5911 }
 0x903   :  { %6078 = vmatpush.bf16.xpose.msrb.mxu1 %v6024_v24 }
 0x904   :  { %v13055_v7 = vpop.permute.xlu1 %5923 }
 0x905   :  { %6901 = vrot.lane.b32.xlu0 %v15548_v1, %s8930_s22  ;;  %v5582_v20 = vpop.f32.mrf.mxu2 }
 0x906   :  { %v5671_v39 = vpop.f32.mrf.mxu3 }
 0x907   :  { %v5672_v54 = vadd.f32 %v5671_v39, %v5582_v20 }
 0x909   :  { %v5721_v56 = vpack.c.bf16 %v5672_v54, %v5670_v50  ;;  %v13059_v28 = vpop.permute.xlu2 %5915 }
 0x90a   :  { %7964 = vmatmul.msk.bf16.vlgmr.msrb.gmra.mxu1 %vm1787_vm2, %v13052_v18 }
 0x90b   :  { %7955 = vmatmul.msk.bf16.gmra.mxu0 %vm1787_vm2, %v5721_v56 }
 0x90c   :  { %v13064_v0 = vpop.permute.xlu1 %5929 }
 0x90d   :  { %6899 = vrot.lane.b32.xlu0 %v15549_v30, %s8930_s22  ;;  %v5585_v29 = vpop.f32.mrf.mxu2 }
 0x90e   :  { %v5674_v42 = vpop.f32.mrf.mxu3 }
 0x90f   :  { %v5675_v14 = vadd.f32 %v5674_v42, %v5585_v29 }
 0x911   :  { %v13068_v13 = vpop.permute.xlu2 %5919 }
 0x914   :  { %v6904_v35 = vpop.permute.xlu1 %6903 }
 0x915   :  { %6893 = vrot.lane.b32.xlu0 %v15550_v3, %s8930_s22  ;;  %v5587_v23 = vpop.f32.mrf.mxu2  ;;  %6937 = vmatpush.bf16.msra.mxu3 %v6904_v35 }
 0x916   :  { %v5676_v41 = vpop.f32.mrf.mxu3 }
 0x917   :  { %v5677_v21 = vadd.f32 %v5676_v41, %v5587_v23 }
 0x919   :  { %v5722_v36 = vpack.c.bf16 %v5677_v21, %v5675_v14  ;;  %v13072_v63 = vpop.permute.xlu2 %5925 }
 0x91b   :  { %7956 = vmatmul.msk.bf16.gmra.mxu0 %vm1787_vm2, %v5722_v36 }
 0x91c   :  { %v5347_v11 = vpop.xlane.xlu0 %5346 }
 0x91d   :  { %8632 = vrcp.f32 %v5347_v11  ;;  %6911 = vrot.lane.b32.xlu0 %v15551_v38, %s8930_s22  ;;  %v15554_v38 = vld [vmem:[#allocation134_spill] sm:$0xff] }
 0x921   :  { %v13080_v49 = vpop.permute.xlu2 %5931 }
 0x923   :  { %v8633_v4 = vpop.eup %8632 }
 0x924   :  { %v5446_v16 = vmul.f32 %v8633_v4, %v12951_v8  ;;  %v5447_v45 = vmul.f32 %v8633_v4, %v12953_v57  ;;  %v5350_v59 = vpop.xlane.xlu0 %5349  ;;  %v13092_v8 = vpop.permute.xlu1 %6897  ;;  %v4441_v4 = vadd.f32 %v15555_v31, %v15554_v38 }
 0x925   :  { %8634 = vrcp.f32 %v5350_v59 }
 0x926   :  { %v5482_v17 = vpack.c.bf16 %v5446_v16, %v5444_v62  ;;  %v5483_v52 = vpack.c.bf16 %v5447_v45, %v5445_v2  ;;  %8636 = vrcp.f32 %v13041_v61 }
 0x927   :  { %v5590_v24 = vpop.f32.mrf.mxu2  ;;  %v5679_v1 = vpop.f32.mrf.mxu3 }
 0x928   :  { %5609 = vmatmul.bf16.gmra.mxu2 %v5482_v17  ;;  %5698 = vmatmul.bf16.gmra.mxu3 %v5483_v52  ;;  %v5804_v20 = vpop.f32.mrf.mxu0  ;;  %v5680_v54 = vadd.f32 %v5679_v1, %v5590_v24 }
 0x929   :  { %v13088_v39 = vadd.f32 %v5804_v20, %v4436_v55  ;;  %v13090_v48 = vpop.permute.xlu2 %5937 }
 0x92b   :  { %v8635_v60 = vpop.eup %8634 }
 0x92c   :  { %v8637_v29 = vpop.eup %8636  ;;  %v5448_v3 = vmul.f32 %v8635_v60, %v12965_v46  ;;  %v5449_v23 = vmul.f32 %v8635_v60, %v12970_v25  ;;  %v6916_v41 = vpop.permute.xlu1 %6915 }
 0x92d   :  { %v5450_v61 = vmul.f32 %v8637_v29, %v12913_v32  ;;  %v5451_v14 = vmul.f32 %v8637_v29, %v12915_v19  ;;  %v5359_v21 = vpop.xlane.xlu0 %5358  ;;  %v15558_v29 = vld [vmem:[#allocation141_spill] sm:$0xff] }
 0x92e   :  { %8638 = vrcp.f32 %v5359_v21 }
 0x92f   :  { %v5592_v57 = vpop.f32.mrf.mxu2  ;;  %v5681_v50 = vpop.f32.mrf.mxu3  ;;  %v5484_v36 = vpack.c.bf16 %v5450_v61, %v5448_v3  ;;  %v5485_v11 = vpack.c.bf16 %v5451_v14, %v5449_v23  ;;  %8640 = vrcp.f32 %v13044_v51 }
 0x930   :  { %v5682_v56 = vadd.f32 %v5681_v50, %v5592_v57  ;;  %v13095_v30 = vpop.f32.mrf.mxu0 }
 0x931   :  { %v13097_v42 = vpop.permute.xlu2 %5939 }
 0x932   :  { %v5723_v35 = vpack.c.bf16 %v5682_v56, %v5680_v54 }
 0x934   :  { %7957 = vmatmul.msk.bf16.gmra.mxu0 %vm1787_vm2, %v5723_v35  ;;  %v13109_v32 = vpop.permute.xlu1 %6895  ;;  %v8639_v19 = vpop.eup %8638  ;;  %v15559_v35 = vld [vmem:[#allocation160_spill] sm:$0xff] }
 0x935   :  { %v8641_v58 = vpop.eup %8640  ;;  %v5454_v20 = vmul.f32 %v8639_v19, %v12984_v10  ;;  %v5455_v51 = vmul.f32 %v8639_v19, %v12986_v44  ;;  %v4446_v3 = vadd.f32 %v15559_v35, %v15558_v29  ;;  %v15570_v29 = vld [vmem:[#allocation168_spill] sm:$0xff]  ;;  %v15571_v35 = vld [vmem:[#allocation151_spill] sm:$0xff] }
 0x936   :  { %v5452_v57 = vmul.f32 %v8641_v58, %v12898_v6  ;;  %v5453_v50 = vmul.f32 %v8641_v58, %v12902_v12 }
 0x937   :  { %v5595_v62 = vpop.f32.mrf.mxu2  ;;  %v5684_v16 = vpop.f32.mrf.mxu3 }
 0x938   :  { %5614 = vmatmul.bf16.gmra.mxu2 %v5484_v36  ;;  %5703 = vmatmul.bf16.gmra.mxu3 %v5485_v11  ;;  %v5809_v46 = vpop.f32.mrf.mxu0  ;;  %v5685_v55 = vadd.f32 %v5684_v16, %v5595_v62  ;;  %v5486_v54 = vpack.c.bf16 %v5454_v20, %v5452_v57  ;;  %v5487_v56 = vpack.c.bf16 %v5455_v51, %v5453_v50  ;;  %v15563_v62 = vld [vmem:[#allocation130_spill] sm:$0xff] }
 0x939   :  { %v13106_v25 = vadd.f32 %v5809_v46, %v4441_v4  ;;  %v6920_v2 = vpop.permute.xlu2 %6919  ;;  %v15562_v4 = vld [vmem:[#allocation142_spill] sm:$0xff] }
 0x93a   :  { %7026 = vmatpush.bf16.msra.mxu0 %v6920_v2  ;;  %v4451_v16 = vadd.f32 %v15563_v62, %v15562_v4 }
 0x93b   :  { %15556 = vst [vmem:[#allocation89_spill] sm:$0xff] %v13106_v25 }
 0x93c   :  { %v6914_v44 = vpop.permute.xlu1 %6913 }
 0x93f   :  { %v5960_v45 = vpop.permute.xlu0 %5959  ;;  %v5597_v59 = vpop.f32.mrf.mxu2 }
 0x940   :  { %v6048_v17 = vsel %vm1787_vm2, %v5960_v45, 0  ;;  %v5686_v52 = vpop.f32.mrf.mxu3  ;;  %v13112_v9 = vpop.f32.mrf.mxu0 }
 0x941   :  { %15557 = vst [vmem:[#allocation45_spill] sm:$0xff] %v13112_v9  ;;  %v5687_v24 = vadd.f32 %v5686_v52, %v5597_v59  ;;  %v6918_v1 = vpop.permute.xlu2 %6917  ;;  %6167 = vmatpush.bf16.xpose.msra.mxu2 %v6048_v17  ;;  %v15566_v17 = vld [vmem:[#allocation167_spill] sm:$0xff]  ;;  %v15567_v52 = vld [vmem:[#allocation25_spill] sm:$0xff] }
 0x942   :  { %7027 = vmatpush.bf16.msra.mxu0 %v6918_v1  ;;  %v4456_v58 = vadd.f32 %v15567_v52, %v15566_v17  ;;  %v15579_v17 = vld [vmem:[#allocation65_spill] sm:$0xff] }
 0x943   :  { %v5724_v60 = vpack.c.bf16 %v5687_v24, %v5685_v55 }
 0x944   :  { %v6892_v62 = vpop.permute.xlu1 %6891 }
 0x945   :  { %7958 = vmatmul.msk.bf16.gmra.mxu0 %vm1787_vm2, %v5724_v60 }
 0x946   :  { %7028 = vmatpush.bf16.msra.mxu0 %v6916_v41 }
 0x947   :  { %v5914_v23 = vpop.permute.xlu0 %5913  ;;  %v5600_v61 = vpop.f32.mrf.mxu2 }
 0x948   :  { %v5689_v14 = vpop.f32.mrf.mxu3  ;;  %5619 = vmatmul.bf16.gmra.mxu2 %v5486_v54  ;;  %5708 = vmatmul.bf16.gmra.mxu3 %v5487_v56  ;;  %v5814_v10 = vpop.f32.mrf.mxu0 }
 0x949   :  { %v13121_v21 = vadd.f32 %v5814_v10, %v4446_v3  ;;  %7965 = vmatmul.msk.bf16.gmra.mxu1 %vm1787_vm2, %v5914_v23  ;;  %v5690_v11 = vadd.f32 %v5689_v14, %v5600_v61  ;;  %v4461_v3 = vadd.f32 %v15571_v35, %v15570_v29 }
 0x94a   :  { %7029 = vmatpush.bf16.msra.mxu0 %v6914_v44 }
 0x94b   :  { %15560 = vst [vmem:[#allocation76_spill] sm:$0xff] %v13121_v21 }
 0x94f   :  { %v5918_v6 = vpop.permute.xlu0 %5917  ;;  %v5602_v12 = vpop.f32.mrf.mxu2 }
 0x950   :  { %v5691_v41 = vpop.f32.mrf.mxu3  ;;  %v13124_v36 = vpop.f32.mrf.mxu0 }
 0x951   :  { %15561 = vst [vmem:[#allocation153_spill] sm:$0xff] %v13124_v36  ;;  %v5692_v38 = vadd.f32 %v5691_v41, %v5602_v12  ;;  %v15574_v41 = vld [vmem:[#allocation20_spill] sm:$0xff] }
 0x953   :  { %v5725_v31 = vpack.c.bf16 %v5692_v38, %v5690_v11  ;;  %v15575_v11 = vld [vmem:[#allocation170_spill] sm:$0xff] }
 0x954   :  { %v4466_v38 = vadd.f32 %v15575_v11, %v15574_v41  ;;  %v15587_v41 = vld [vmem:[#allocation114_spill] sm:$0xff] }
 0x955   :  { %7959 = vmatmul.msk.bf16.gmra.mxu0 %vm1787_vm2, %v5725_v31 }
 0x957   :  { %v5922_v46 = vpop.permute.xlu0 %5921 }
 0x958   :  { %v5819_v2 = vpop.f32.mrf.mxu0  ;;  %7980 = vmatmul.msk.bf16.vlgmr.msra.gmra.mxu2 %vm1787_vm2, %v13052_v18 }
 0x959   :  { %v13131_v19 = vadd.f32 %v5819_v2, %v4451_v16  ;;  %7966 = vmatmul.msk.bf16.gmra.mxu1 %vm1787_vm2, %v13059_v28 }
 0x95b   :  { %15564 = vst [vmem:[#allocation87_spill] sm:$0xff] %v13131_v19  ;;  %v15645_v19 = vld [vmem:[#allocation145_spill] sm:$0xff] }
 0x95f   :  { %v13135_v45 = vpop.permute.xlu0 %5927 }
 0x960   :  { %v13137_v59 = vpop.f32.mrf.mxu0 }
 0x961   :  { %15565 = vst [vmem:[#allocation171_spill] sm:$0xff] %v13137_v59 }
 0x967   :  { %v13141_v55 = vpop.permute.xlu0 %5933 }
 0x968   :  { %v5824_v24 = vpop.f32.mrf.mxu0  ;;  %7981 = vmatmul.msk.bf16.gmra.mxu2 %vm1787_vm2, %v5914_v23 }
 0x969   :  { %v13144_v1 = vadd.f32 %v5824_v24, %v4456_v58  ;;  %7967 = vmatmul.msk.bf16.gmra.mxu1 %vm1787_vm2, %v5918_v6 }
 0x96b   :  { %15568 = vst [vmem:[#allocation133_spill] sm:$0xff] %v13144_v1 }
 0x96d   :  { %v5605_v18 = vpop.f32.mrf.mxu2  ;;  %v5694_v20 = vpop.f32.mrf.mxu3 }
 0x96e   :  { %v5695_v54 = vadd.f32 %v5694_v20, %v5605_v18  ;;  %v15582_v20 = vld [vmem:[#allocation85_spill] sm:$0xff] }
 0x96f   :  { %v13147_v51 = vpop.permute.xlu0 %5935 }
 0x970   :  { %v13149_v60 = vpop.f32.mrf.mxu0 }
 0x971   :  { %15569 = vst [vmem:[#allocation64_spill] sm:$0xff] %v13149_v60 }
 0x975   :  { %v5607_v57 = vpop.f32.mrf.mxu2  ;;  %v5696_v50 = vpop.f32.mrf.mxu3 }
 0x976   :  { %v5697_v56 = vadd.f32 %v5696_v50, %v5607_v57  ;;  %v15583_v57 = vld [vmem:[#allocation122_spill] sm:$0xff] }
 0x977   :  { %v6902_v61 = vpop.permute.xlu0 %6901  ;;  %v4476_v50 = vadd.f32 %v15583_v57, %v15582_v20  ;;  %v15591_v20 = vld [vmem:[#allocation35_spill] sm:$0xff] }
 0x978   :  { %v5726_v14 = vpack.c.bf16 %v5697_v56, %v5695_v54  ;;  %v5829_v23 = vpop.f32.mrf.mxu0  ;;  %7982 = vmatmul.msk.bf16.gmra.mxu2 %vm1787_vm2, %v13059_v28  ;;  %6938 = vmatpush.bf16.msra.mxu3 %v6902_v61 }
 0x979   :  { %v13155_v10 = vadd.f32 %v5829_v23, %v4461_v3  ;;  %7968 = vmatmul.msk.bf16.gmra.mxu1 %vm1787_vm2, %v13068_v13 }
 0x97a   :  { %7960 = vmatmul.msk.bf16.gmra.mxu0 %vm1787_vm2, %v5726_v14 }
 0x97b   :  { %15572 = vst [vmem:[#allocation143_spill] sm:$0xff] %v13155_v10 }
 0x97f   :  { %v6900_v44 = vpop.permute.xlu0 %6899 }
 0x980   :  { %v13160_v12 = vpop.f32.mrf.mxu0  ;;  %6939 = vmatpush.bf16.msra.mxu3 %v6900_v44  ;;  %v15586_v44 = vld [vmem:[#allocation108_spill] sm:$0xff] }
 0x981   :  { %15573 = vst [vmem:[#allocation88_spill] sm:$0xff] %v13160_v12  ;;  %v4481_v11 = vadd.f32 %v15587_v41, %v15586_v44 }
 0x984   :  { %6940 = vmatpush.bf16.msra.mxu3 %v13092_v8  ;;  %v15578_v8 = vld [vmem:[#allocation157_spill] sm:$0xff] }
 0x985   :  { %v4471_v52 = vadd.f32 %v15579_v17, %v15578_v8 }
 0x987   :  { %v6894_v31 = vpop.permute.xlu0 %6893 }
 0x988   :  { %v5834_v4 = vpop.f32.mrf.mxu0  ;;  %7983 = vmatmul.msk.bf16.gmra.mxu2 %vm1787_vm2, %v5918_v6  ;;  %6941 = vmatpush.bf16.msra.mxu3 %v13109_v32 }
 0x989   :  { %v13167_v28 = vadd.f32 %v5834_v4, %v4466_v38  ;;  %7969 = vmatmul.msk.bf16.gmra.mxu1 %vm1787_vm2, %v5922_v46 }
 0x98b   :  { %15576 = vst [vmem:[#allocation13_spill] sm:$0xff] %v13167_v28  ;;  %v15640_v28 = vld [vmem:[#allocation107_spill] sm:$0xff] }
 0x98c   :  { %6942 = vmatpush.bf16.msra.mxu3 %v6894_v31 }
 0x98f   :  { %v6912_v16 = vpop.permute.xlu0 %6911 }
 0x990   :  { %v13170_v2 = vpop.f32.mrf.mxu0  ;;  %6943 = vmatpush.bf16.msra.mxu3 %v6892_v62  ;;  %7030 = vmatpush.bf16.msra.mxu0 %v6912_v16 }
 0x991   :  { %15577 = vst [vmem:[#allocation40_spill] sm:$0xff] %v13170_v2 }
 0x998   :  { %v5839_v58 = vpop.f32.mrf.mxu0  ;;  %7984 = vmatmul.msk.bf16.gmra.mxu2 %vm1787_vm2, %v13068_v13 }
 0x999   :  { %v13176_v6 = vadd.f32 %v5839_v58, %v4471_v52  ;;  %7970 = vmatmul.msk.bf16.gmra.mxu1 %vm1787_vm2, %v13055_v7 }
 0x99b   :  { %15580 = vst [vmem:[#allocation58_spill] sm:$0xff] %v13176_v6 }
 0x9a0   :  { %v13181_v32 = vpop.f32.mrf.mxu0 }
 0x9a1   :  { %15581 = vst [vmem:[#allocation156_spill] sm:$0xff] %v13181_v32 }
 0x9a8   :  { %7985 = vmatmul.msk.bf16.gmra.mxu2 %vm1787_vm2, %v5922_v46 }
 0x9a9   :  { %7971 = vmatmul.msk.bf16.gmra.mxu1 %vm1787_vm2, %v13072_v63 }
 0x9ab   :  { %v5610_v24 = vpop.f32.mrf.mxu2  ;;  %v5699_v18 = vpop.f32.mrf.mxu3 }
 0x9ac   :  { %v5700_v35 = vadd.f32 %v5699_v18, %v5610_v24  ;;  %v15590_v18 = vld [vmem:[#allocation57_spill] sm:$0xff] }
 0x9ad   :  { %v4486_v57 = vadd.f32 %v15591_v20, %v15590_v18 }
 0x9b1   :  { %v5844_v54 = vpop.f32.mrf.mxu0 }
 0x9b2   :  { %v13187_v56 = vadd.f32 %v5844_v54, %v4476_v50 }
 0x9b3   :  { %v5612_v13 = vpop.f32.mrf.mxu2  ;;  %v5701_v29 = vpop.f32.mrf.mxu3 }
 0x9b4   :  { %15584 = vst [vmem:[#allocation152_spill] sm:$0xff] %v13187_v56  ;;  %v5702_v3 = vadd.f32 %v5701_v29, %v5612_v13 }
 0x9b6   :  { %v5727_v61 = vpack.c.bf16 %v5702_v3, %v5700_v35 }
 0x9b8   :  { %7961 = vmatmul.msk.bf16.gmra.mxu0 %vm1787_vm2, %v5727_v61  ;;  %7986 = vmatmul.msk.bf16.gmra.mxu2 %vm1787_vm2, %v13055_v7  ;;  %v6080_v7 = vpop.f32.mrf.mxu1 }
 0x9b9   :  { %7972 = vmatmul.msk.bf16.gmra.mxu1 %vm1787_vm2, %v13135_v45  ;;  %v13194_v46 = vpop.f32.mrf.mxu0 }
 0x9ba   :  { %15585 = vst [vmem:[#allocation42_spill] sm:$0xff] %v13194_v46 }
 0x9bb   :  { %v5615_v14 = vpop.f32.mrf.mxu2  ;;  %v5704_v23 = vpop.f32.mrf.mxu3 }
 0x9bc   :  { %v5705_v16 = vadd.f32 %v5704_v23, %v5615_v14  ;;  %v6249_v14 = vmul.f32 0.17677669, %v6080_v7  ;;  %v15596_v7 = vld [vmem:[#allocation68_spill] sm:$0xff] }
 0x9c0   :  { %v6082_v61 = vpop.f32.mrf.mxu1 }
 0x9c2   :  { %v5849_v38 = vpop.f32.mrf.mxu0 }
 0x9c3   :  { %v13198_v31 = vadd.f32 %v5849_v38, %v4481_v11  ;;  %v5617_v4 = vpop.f32.mrf.mxu2  ;;  %v5706_v62 = vpop.f32.mrf.mxu3  ;;  %v15593_v11 = vld [vmem:[#allocation10_spill] sm:$0xff] }
 0x9c4   :  { %v5707_v8 = vadd.f32 %v5706_v62, %v5617_v4  ;;  %v13217_v38 = vadd.f32 %v6249_v14, %v15593_v11  ;;  %v15594_v4 = vld [vmem:[#allocation66_spill] sm:$0xff] }
 0x9c5   :  { %15588 = vst [vmem:[#allocation11_spill] sm:$0xff] %v13198_v31 }
 0x9c6   :  { %v5728_v17 = vpack.c.bf16 %v5707_v8, %v5705_v16  ;;  %v6251_v8 = vmul.f32 0.17677669, %v6082_v61  ;;  %v15598_v61 = vld [vmem:[#allocation69_spill] sm:$0xff] }
 0x9c8   :  { %7962 = vmatmul.msk.bf16.gmra.mxu0 %vm1787_vm2, %v5728_v17  ;;  %7987 = vmatmul.msk.bf16.gmra.mxu2 %vm1787_vm2, %v13072_v63  ;;  %v6085_v41 = vpop.f32.mrf.mxu1 }
 0x9c9   :  { %7973 = vmatmul.msk.bf16.gmra.mxu1 %vm1787_vm2, %v13064_v0 }
 0x9ca   :  { %v13205_v52 = vpop.f32.mrf.mxu0 }
 0x9cb   :  { %15589 = vst [vmem:[#allocation172_spill] sm:$0xff] %v13205_v52  ;;  %v5620_v58 = vpop.f32.mrf.mxu2  ;;  %v5709_v24 = vpop.f32.mrf.mxu3 }
 0x9cc   :  { %v5710_v35 = vadd.f32 %v5709_v24, %v5620_v58  ;;  %v15595_v58 = vld [vmem:[#allocation67_spill] sm:$0xff] }
 0x9cd   :  { %v13225_v24 = vadd.f32 %v6251_v8, %v15595_v58  ;;  %v15601_v8 = vld [vmem:[#allocation70_spill] sm:$0xff] }
 0x9d0   :  { %v6087_v20 = vpop.f32.mrf.mxu1 }
 0x9d2   :  { %v5854_v50 = vpop.f32.mrf.mxu0 }
 0x9d3   :  { %v13209_v54 = vadd.f32 %v5854_v50, %v4486_v57  ;;  %v5622_v13 = vpop.f32.mrf.mxu2  ;;  %v5711_v29 = vpop.f32.mrf.mxu3  ;;  %v6253_v50 = vmul.f32 0.17677669, %v6085_v41  ;;  %v15600_v41 = vld [vmem:[#allocation23_spill] sm:$0xff] }
 0x9d4   :  { %v5712_v3 = vadd.f32 %v5711_v29, %v5622_v13 }
 0x9d5   :  { %15592 = vst [vmem:[#allocation174_spill] sm:$0xff] %v13209_v54  ;;  %v15628_v54 = vld [vmem:[#allocation102_spill] sm:$0xff] }
 0x9d6   :  { %v5729_v63 = vpack.c.bf16 %v5712_v3, %v5710_v35  ;;  %v15597_v35 = vld [vmem:[#allocation19_spill] sm:$0xff] }
 0x9d7   :  { %v13237_v3 = vadd.f32 %v6253_v50, %v15597_v35  ;;  %v15604_v35 = vld [vmem:[#allocation26_spill] sm:$0xff] }
 0x9d8   :  { %7963 = vmatmul.msk.bf16.gmra.mxu0 %vm1787_vm2, %v5729_v63  ;;  %7988 = vmatmul.msk.bf16.gmra.mxu2 %vm1787_vm2, %v13135_v45 }
 0x9d9   :  { %7974 = vmatmul.msk.bf16.gmra.mxu1 %vm1787_vm2, %v13080_v49 }
 0x9da   :  { %v13242_v14 = vpop.f32.mrf.mxu0 }
 0x9db   :  { %v6169_v23 = vpop.f32.mrf.mxu2  ;;  %15599 = vst [vmem:[#allocation39_spill] sm:$0xff] %v13242_v14 }
 0x9dc   :  { %v6250_v44 = vmul.f32 0.17677669, %v6169_v23  ;;  %v6090_v23 = vpop.f32.mrf.mxu1 }
 0x9dd   :  { %v6257_v50 = vmul.f32 0.17677669, %v6090_v23 }
 0x9de   :  { %v13220_v62 = vadd.f32 %v6250_v44, %v15594_v4  ;;  %v6255_v44 = vmul.f32 0.17677669, %v6087_v20 }
 0x9e0   :  { %v6377_v16 = vmax.f32 %v13217_v38, %v13220_v62 }
 0x9e2   :  { %6378 = vmax.xlane.f32.xlu1 %v6377_v16  ;;  %v4491_v16 = vadd.f32 %v15600_v41, %v12760_v15 }
 0x9e3   :  { %v6171_v17 = vpop.f32.mrf.mxu2 }
 0x9e4   :  { %v6252_v45 = vmul.f32 0.17677669, %v6171_v17  ;;  %v13249_v17 = vadd.f32 %v6255_v44, %v15601_v8  ;;  %v6092_v15 = vpop.f32.mrf.mxu1  ;;  %v15606_v8 = vld [vmem:[#allocation73_spill] sm:$0xff] }
 0x9e6   :  { %v13228_v18 = vadd.f32 %v6252_v45, %v15596_v7  ;;  %v15602_v45 = vld [vmem:[#allocation71_spill] sm:$0xff] }
 0x9e8   :  { %7989 = vmatmul.msk.bf16.gmra.mxu2 %vm1787_vm2, %v13064_v0  ;;  %v6380_v57 = vmax.f32 %v13225_v24, %v13228_v18 }
 0x9e9   :  { %7975 = vmatmul.msk.bf16.gmra.mxu1 %vm1787_vm2, %v13141_v55 }
 0x9ea   :  { %6381 = vmax.xlane.f32.xlu2 %v6380_v57 }
 0x9eb   :  { %v6174_v13 = vpop.f32.mrf.mxu2 }
 0x9ec   :  { %v6254_v29 = vmul.f32 0.17677669, %v6174_v13 }
 0x9ee   :  { %v13240_v63 = vadd.f32 %v6254_v29, %v15598_v61  ;;  %v13263_v61 = vadd.f32 %v6257_v50, %v15604_v35 }
 0x9f0   :  { %v6383_v0 = vmax.f32 %v13237_v3, %v13240_v63 }
 0x9f2   :  { %6384 = vmax.xlane.f32.xlu0 %v6383_v0  ;;  %v15605_v0 = vld [vmem:[#allocation72_spill] sm:$0xff] }
 0x9f3   :  { %v6176_v11 = vpop.f32.mrf.mxu2 }
 0x9f4   :  { %v6256_v4 = vmul.f32 0.17677669, %v6176_v11  ;;  %v6259_v11 = vmul.f32 0.17677669, %v6092_v15 }
 0x9f6   :  { %v13252_v58 = vadd.f32 %v6256_v4, %v15602_v45  ;;  %v13271_v23 = vadd.f32 %v6259_v11, %v15606_v8  ;;  %v15607_v45 = vld [vmem:[#allocation74_spill] sm:$0xff] }
 0x9f7   :  { %v5859_v7 = vpop.f32.mrf.mxu0 }
 0x9f8   :  { %v13254_v57 = vadd.f32 %v5859_v7, %v4491_v16  ;;  %7990 = vmatmul.msk.bf16.gmra.mxu2 %vm1787_vm2, %v13080_v49  ;;  %v6386_v20 = vmax.f32 %v13249_v17, %v13252_v58  ;;  %v6095_v16 = vpop.f32.mrf.mxu1 }
 0x9f9   :  { %7976 = vmatmul.msk.bf16.gmra.mxu1 %vm1787_vm2, %v13147_v51  ;;  %v6261_v50 = vmul.f32 0.17677669, %v6095_v16  ;;  %v15611_v16 = vld [vmem:[#allocation75_spill] sm:$0xff] }
 0x9fa   :  { %15603 = vst [vmem:[#allocation59_spill] sm:$0xff] %v13254_v57  ;;  %6387 = vmax.xlane.f32.xlu1 %v6386_v20 }
 0x9fb   :  { %v6179_v13 = vpop.f32.mrf.mxu2 }
 0x9fc   :  { %v6258_v29 = vmul.f32 0.17677669, %v6179_v13 }
 0x9fe   :  { %v13266_v44 = vadd.f32 %v6258_v29, %v15605_v0  ;;  %v15608_v29 = vld [vmem:[#allocation79_spill] sm:$0xff]  ;;  %v15609_v0 = vld [vmem:[#allocation78_spill] sm:$0xff] }
 0x9ff   :  { %v13283_v35 = vadd.f32 %v6261_v50, %v15608_v29  ;;  %v13307_v29 = vpop.f32.mrf.mxu0 }
 0xa00   :  { %v6389_v49 = vmax.f32 %v13263_v61, %v13266_v44  ;;  %v6097_v11 = vpop.f32.mrf.mxu1  ;;  %15613 = vst [vmem:[#allocation46_spill] sm:$0xff] %v13307_v29 }
 0xa02   :  { %6390 = vmax.xlane.f32.xlu1 %v6389_v49 }
 0xa03   :  { %v6181_v4 = vpop.f32.mrf.mxu2 }
 0xa04   :  { %v6260_v41 = vmul.f32 0.17677669, %v6181_v4  ;;  %v6263_v4 = vmul.f32 0.17677669, %v6097_v11 }
 0xa06   :  { %v13274_v7 = vadd.f32 %v6260_v41, %v15607_v45  ;;  %v15610_v45 = vld [vmem:[#allocation12_spill] sm:$0xff] }
 0xa07   :  { %v13291_v40 = vadd.f32 %v6263_v4, %v15610_v45 }
 0xa08   :  { %7991 = vmatmul.msk.bf16.gmra.mxu2 %vm1787_vm2, %v13141_v55  ;;  %v6392_v20 = vmax.f32 %v13271_v23, %v13274_v7 }
 0xa09   :  { %7977 = vmatmul.msk.bf16.gmra.mxu1 %vm1787_vm2, %v13090_v48 }
 0xa0a   :  { %6393 = vmax.xlane.f32.xlu0 %v6392_v20 }
 0xa0b   :  { %v6184_v15 = vpop.f32.mrf.mxu2 }
 0xa0c   :  { %v6262_v13 = vmul.f32 0.17677669, %v6184_v15  ;;  %v15612_v15 = vld [vmem:[#allocation14_spill] sm:$0xff] }
 0xa0e   :  { %v13286_v49 = vadd.f32 %v6262_v13, %v15609_v0  ;;  %v5942_v13 = vpop.permute.xlu2 %5941 }
 0xa10   :  { %v6395_v55 = vmax.f32 %v13283_v35, %v13286_v49 }
 0xa12   :  { %6396 = vmax.xlane.f32.xlu0 %v6395_v55 }
 0xa13   :  { %v6186_v41 = vpop.f32.mrf.mxu2 }
 0xa14   :  { %v6264_v8 = vmul.f32 0.17677669, %v6186_v41  ;;  %v4501_v41 = vadd.f32 %v12836_v22, %v12840_v33  ;;  %v4506_v22 = vadd.f32 %v12862_v26, %v12864_v34 }
 0xa16   :  { %v13294_v20 = vadd.f32 %v6264_v8, %v15611_v16 }
 0xa18   :  { %7992 = vmatmul.msk.bf16.gmra.mxu2 %vm1787_vm2, %v13147_v51  ;;  %v6398_v50 = vmax.f32 %v13291_v40, %v13294_v20  ;;  %v4496_v51 = vadd.f32 %v12801_v43, %v12809_v37  ;;  %v15617_v43 = vld [vmem:[#allocation84_spill] sm:$0xff] }
 0xa19   :  { %7978 = vmatmul.msk.bf16.gmra.mxu1 %vm1787_vm2, %v13097_v42 }
 0xa1a   :  { %6399 = vmax.xlane.f32.xlu2 %v6398_v50 }
 0xa1b   :  { %v6189_v4 = vpop.f32.mrf.mxu2 }
 0xa1c   :  { %v6266_v45 = vmul.f32 0.17677669, %v6189_v4 }
 0xa1e   :  { %v13323_v37 = vadd.f32 %v6266_v45, %v15617_v43 }
 0xa26   :  { %6909 = vrot.lane.b32.xlu0 %v15612_v15, %s8930_s22  ;;  %v15618_v15 = vld [vmem:[#allocation86_spill] sm:$0xff] }
 0xa28   :  { %7993 = vmatmul.msk.bf16.gmra.mxu2 %vm1787_vm2, %v13090_v48  ;;  %v6100_v48 = vpop.f32.mrf.mxu1 }
 0xa29   :  { %7979 = vmatmul.msk.bf16.gmra.mxu1 %vm1787_vm2, %v5942_v13  ;;  %v6265_v50 = vmul.f32 0.17677669, %v6100_v48 }
 0xa30   :  { %v13342_v26 = vpop.f32.mrf.mxu1 }
 0xa35   :  { %v5864_v0 = vpop.f32.mrf.mxu0 }
 0xa36   :  { %v13311_v11 = vadd.f32 %v5864_v0, %v4496_v51  ;;  %v13326_v51 = vadd.f32 %v6265_v50, %v15618_v15  ;;  %v13338_v50 = vpop.f32.mrf.mxu2 }
 0xa38   :  { %15614 = vst [vmem:[#allocation52_spill] sm:$0xff] %v13311_v11  ;;  %7994 = vmatmul.msk.bf16.gmra.mxu2 %vm1787_vm2, %v13097_v42  ;;  %v6401_v0 = vmax.f32 %v13326_v51, %v13323_v37 }
 0xa3d   :  { %v13315_v55 = vpop.f32.mrf.mxu0 }
 0xa3e   :  { %15615 = vst [vmem:[#allocation50_spill] sm:$0xff] %v13315_v55 }
 0xa45   :  { %v5869_v8 = vpop.f32.mrf.mxu0 }
 0xa46   :  { %v13319_v16 = vadd.f32 %v5869_v8, %v4501_v41 }
 0xa48   :  { %15616 = vst [vmem:[#allocation27_spill] sm:$0xff] %v13319_v16  ;;  %7995 = vmatmul.msk.bf16.gmra.mxu2 %vm1787_vm2, %v5942_v13 }
 0xa4d   :  { %v13328_v42 = vpop.f32.mrf.mxu0 }
 0xa4e   :  { %15619 = vst [vmem:[#allocation60_spill] sm:$0xff] %v13328_v42 }
 0xa50   :  { %6402 = vmax.xlane.f32.xlu0 %v6401_v0 }
 0xa55   :  { %v5874_v33 = vpop.f32.mrf.mxu0  ;;  %v6379_v4 = vpop.xlane.xlu1 %6378 }
 0xa56   :  { %v13334_v41 = vadd.f32 %v5874_v33, %v4506_v22  ;;  %v6473_v13 = vsub.f32 %v13217_v38, %v6379_v4  ;;  %v6474_v48 = vsub.f32 %v13220_v62, %v6379_v4  ;;  %v13350_v4 = vpop.f32.mrf.mxu2 }
 0xa58   :  { %15620 = vst [vmem:[#allocation49_spill] sm:$0xff] %v13334_v41  ;;  %v6537_v8 = vmul.f32 1.442695, %v6473_v13  ;;  %v6539_v45 = vmul.f32 1.442695, %v6474_v48 }
 0xa5a   :  { %8642 = vpow2.f32 %v6537_v8 }
 0xa5b   :  { %8644 = vpow2.f32 %v6539_v45 }
 0xa5d   :  { %v6382_v43 = vpop.xlane.xlu2 %6381 }
 0xa5e   :  { %v6475_v15 = vsub.f32 %v13225_v24, %v6382_v43  ;;  %v6476_v0 = vsub.f32 %v13228_v18, %v6382_v43  ;;  %v13356_v18 = vpop.f32.mrf.mxu1 }
 0xa60   :  { %v13344_v34 = vpop.eup %8642  ;;  %v6541_v22 = vmul.f32 1.442695, %v6475_v15  ;;  %v6543_v33 = vmul.f32 1.442695, %v6476_v0 }
 0xa61   :  { %v13346_v38 = vpop.eup %8644 }
 0xa62   :  { %8646 = vpow2.f32 %v6541_v22  ;;  %v6665_v62 = vadd.f32 %v13346_v38, %v13344_v34  ;;  %v6196_v22 = vpop.f32.mrf.mxu2 }
 0xa63   :  { %8648 = vpow2.f32 %v6543_v33  ;;  %v6272_v41 = vmul.f32 0.17677669, %v6196_v22 }
 0xa64   :  { %6666 = vadd.xlane.f32.xlu1 %v6665_v62 }
 0xa65   :  { %v6385_v62 = vpop.xlane.xlu0 %6384 }
 0xa66   :  { %v6107_v33 = vpop.f32.mrf.mxu1 }
 0xa68   :  { %v13352_v13 = vpop.eup %8646 }
 0xa69   :  { %v13354_v24 = vpop.eup %8648 }
 0xa6a   :  { %v6668_v48 = vadd.f32 %v13354_v24, %v13352_v13  ;;  %v13368_v29 = vpop.f32.mrf.mxu2 }
 0xa6c   :  { %6669 = vadd.xlane.f32.xlu2 %v6668_v48 }
 0xa6d   :  { %v6388_v8 = vpop.xlane.xlu1 %6387 }
 0xa6e   :  { %v6479_v45 = vsub.f32 %v13249_v17, %v6388_v8  ;;  %v6480_v43 = vsub.f32 %v13252_v58, %v6388_v8  ;;  %v6271_v17 = vmul.f32 0.17677669, %v6107_v33  ;;  %v13370_v58 = vpop.f32.mrf.mxu1  ;;  %v15621_v8 = vld [vmem:[#allocation37_spill] sm:$0xff] }
 0xa70   :  { %v6549_v15 = vmul.f32 1.442695, %v6479_v45  ;;  %v6551_v0 = vmul.f32 1.442695, %v6480_v43  ;;  %v15622_v43 = vld [vmem:[#allocation90_spill] sm:$0xff]  ;;  %v13380_v5 = vadd.f32 %v6271_v17, %v15623_v47 }
 0xa72   :  { %8650 = vpow2.f32 %v6549_v15  ;;  %v13375_v15 = vadd.f32 %v6272_v41, %v15622_v43  ;;  %v6201_v41 = vpop.f32.mrf.mxu2 }
 0xa73   :  { %8652 = vpow2.f32 %v6551_v0  ;;  %v6276_v17 = vmul.f32 0.17677669, %v6201_v41 }
 0xa74   :  { %v6410_v33 = vmax.f32 %v13380_v5, %v13375_v15 }
 0xa78   :  { %v13362_v42 = vpop.eup %8650 }
 0xa79   :  { %v13364_v55 = vpop.eup %8652 }
 0xa7a   :  { %v6674_v48 = vadd.f32 %v13364_v55, %v13362_v42 }
 0xa7c   :  { %6675 = vadd.xlane.f32.xlu0 %v6674_v48  ;;  %v15624_v48 = vld [vmem:[#allocation38_spill] sm:$0xff] }
 0xa7d   :  { %6907 = vrot.lane.b32.xlu1 %v15621_v8, %s8930_s22  ;;  %v6394_v45 = vpop.xlane.xlu0 %6393  ;;  %v15625_v8 = vld [vmem:[#allocation36_spill] sm:$0xff] }
 0xa7e   :  { %v6483_v0 = vsub.f32 %v13271_v23, %v6394_v45  ;;  %v6484_v22 = vsub.f32 %v13274_v7, %v6394_v45  ;;  %v6112_v23 = vpop.f32.mrf.mxu1 }
 0xa7f   :  { %v6275_v45 = vmul.f32 0.17677669, %v6112_v23  ;;  %v15629_v23 = vld [vmem:[#allocation103_spill] sm:$0xff] }
 0xa80   :  { %v6557_v16 = vmul.f32 1.442695, %v6483_v0  ;;  %v6559_v11 = vmul.f32 1.442695, %v6484_v22  ;;  %v6204_v0 = vpop.f32.mrf.mxu2  ;;  %v15627_v22 = vld [vmem:[#allocation105_spill] sm:$0xff] }
 0xa81   :  { %v6278_v57 = vmul.f32 0.17677669, %v6204_v0  ;;  %v6478_v0 = vsub.f32 %v13240_v63, %v6385_v62 }
 0xa82   :  { %8654 = vpow2.f32 %v6557_v16 }
 0xa83   :  { %8656 = vpow2.f32 %v6559_v11  ;;  %v15626_v11 = vld [vmem:[#allocation104_spill] sm:$0xff]  ;;  %v13405_v52 = vadd.f32 %v6278_v57, %v15628_v54  ;;  %v6547_v31 = vmul.f32 1.442695, %v6478_v0 }
 0xa84   :  { %6889 = vrot.lane.b32.xlu2 %v15624_v48, %s8930_s22  ;;  %6411 = vmax.xlane.f32.xlu0 %v6410_v33  ;;  %v13395_v43 = vadd.f32 %v6276_v17, %v15626_v11  ;;  %v13398_v33 = vadd.f32 %v6275_v45, %v15627_v22  ;;  %v6477_v11 = vsub.f32 %v13237_v3, %v6385_v62 }
 0xa85   :  { %6905 = vrot.lane.b32.xlu1 %v15625_v8, %s8930_s22  ;;  %v13400_v48 = vpop.xlane.xlu0 %6396 }
 0xa86   :  { %v6115_v8 = vpop.f32.mrf.mxu1  ;;  %v6416_v14 = vmax.f32 %v13398_v33, %v13395_v43  ;;  %v6545_v22 = vmul.f32 1.442695, %v6477_v11 }
 0xa87   :  { %v6277_v41 = vmul.f32 0.17677669, %v6115_v8 }
 0xa88   :  { %v13388_v7 = vpop.eup %8654  ;;  %8658 = vpow2.f32 %v6545_v22 }
 0xa89   :  { %v13390_v47 = vpop.eup %8656  ;;  %8660 = vpow2.f32 %v6547_v31  ;;  %v6270_v31 = vmul.f32 0.17677669, %v13350_v4  ;;  %v15633_v4 = vld [vmem:[#allocation83_spill] sm:$0xff] }
 0xa8a   :  { %v6680_v16 = vadd.f32 %v13390_v47, %v13388_v7 }
 0xa8c   :  { %6681 = vadd.xlane.f32.xlu0 %v6680_v16  ;;  %v13408_v16 = vadd.f32 %v6277_v41, %v15629_v23  ;;  %v6267_v41 = vmul.f32 0.17677669, %v13342_v26  ;;  %v6391_v23 = vpop.xlane.xlu1 %6390  ;;  %v6269_v26 = vmul.f32 0.17677669, %v13356_v18 }
 0xa8d   :  { %v6400_v8 = vpop.xlane.xlu2 %6399 }
 0xa8e   :  { %v6419_v45 = vmax.f32 %v13408_v16, %v13405_v52  ;;  %v6487_v54 = vsub.f32 %v13291_v40, %v6400_v8  ;;  %v6488_v57 = vsub.f32 %v13294_v20, %v6400_v8  ;;  %v13421_v62 = vpop.eup %8658  ;;  %v6482_v40 = vsub.f32 %v13266_v44, %v6391_v23 }
 0xa8f   :  { %v13427_v0 = vpop.eup %8660 }
 0xa90   :  { %v6565_v3 = vmul.f32 1.442695, %v6487_v54  ;;  %v6567_v63 = vmul.f32 1.442695, %v6488_v57  ;;  %v6671_v8 = vadd.f32 %v13427_v0, %v13421_v62  ;;  %v13442_v57 = vadd.f32 %v6269_v26, %v15633_v4  ;;  %v15635_v4 = vld [vmem:[#allocation96_spill] sm:$0xff] }
 0xa91   :  { %v6273_v26 = vmul.f32 0.17677669, %v13370_v58 }
 0xa92   :  { %8662 = vpow2.f32 %v6565_v3  ;;  %v6206_v3 = vpop.f32.mrf.mxu2 }
 0xa93   :  { %8664 = vpow2.f32 %v6567_v63 }
 0xa94   :  { %6417 = vmax.xlane.f32.xlu0 %v6416_v14  ;;  %v6268_v14 = vmul.f32 0.17677669, %v13338_v50  ;;  %v6481_v50 = vsub.f32 %v13263_v61, %v6391_v23  ;;  %v15632_v61 = vld [vmem:[#allocation82_spill] sm:$0xff] }
 0xa95   :  { %v13437_v54 = vadd.f32 %v6270_v31, %v15632_v61  ;;  %v6274_v31 = vmul.f32 0.17677669, %v13368_v29 }
 0xa96   :  { %v6553_v22 = vmul.f32 1.442695, %v6481_v50  ;;  %v6485_v50 = vsub.f32 %v13283_v35, %v13400_v48 }
 0xa97   :  { %v6407_v18 = vmax.f32 %v13442_v57, %v13437_v54 }
 0xa98   :  { %v6910_v17 = vpop.permute.xlu0 %6909  ;;  %v13439_v44 = vpop.eup %8662  ;;  %8666 = vpow2.f32 %v6553_v22  ;;  %v6561_v22 = vmul.f32 1.442695, %v6485_v50 }
 0xa99   :  { %7031 = vmatpush.bf16.msra.mxu0 %v6910_v17  ;;  %v15630_v17 = vld [vmem:[#allocation98_spill] sm:$0xff] }
 0xa9a   :  { %v13419_v46 = vadd.f32 %v6268_v14, %v15630_v17  ;;  %v6555_v14 = vmul.f32 1.442695, %v6482_v40  ;;  %v6486_v40 = vsub.f32 %v13286_v49, %v13400_v48  ;;  %v6209_v35 = vpop.f32.mrf.mxu2 }
 0xa9b   :  { %v6282_v56 = vmul.f32 0.17677669, %v6209_v35 }
 0xa9c   :  { %6420 = vmax.xlane.f32.xlu0 %v6419_v45  ;;  %v15631_v45 = vld [vmem:[#allocation101_spill] sm:$0xff]  ;;  %8668 = vpow2.f32 %v6555_v14  ;;  %v15634_v14 = vld [vmem:[#allocation95_spill] sm:$0xff] }
 0xa9d   :  { %v13424_v11 = vadd.f32 %v6267_v41, %v15631_v45  ;;  %v13444_v41 = vpop.eup %8664  ;;  %v6117_v45 = vpop.f32.mrf.mxu1  ;;  %v13463_v61 = vadd.f32 %v6274_v31, %v15634_v14  ;;  %8670 = vpow2.f32 %v6561_v22  ;;  %v13499_v12 = vadd.f32 %v6282_v56, %v15640_v28 }
 0xa9e   :  { %v6686_v23 = vadd.f32 %v13444_v41, %v13439_v44  ;;  %v13450_v17 = vpop.eup %8666  ;;  %v6279_v14 = vmul.f32 0.17677669, %v6117_v45 }
 0xa9f   :  { %v6404_v20 = vmax.f32 %v13424_v11, %v13419_v46 }
 0xaa2   :  { %v13452_v63 = vpop.eup %8668  ;;  %v6211_v22 = vpop.f32.mrf.mxu2 }
 0xaa3   :  { %v13472_v31 = vpop.eup %8670 }
 0xaa5   :  { %v6120_v49 = vpop.f32.mrf.mxu1 }
 0xaa6   :  { %v6281_v6 = vmul.f32 0.17677669, %v6120_v49 }
 0xaaa   :  { %v6214_v2 = vpop.f32.mrf.mxu2 }
 0xaad   :  { %6405 = vmax.xlane.f32.xlu2 %v6404_v20  ;;  %v6677_v20 = vadd.f32 %v13452_v63, %v13450_v17 }
 0xaaf   :  { %6672 = vadd.xlane.f32.xlu1 %v6671_v8  ;;  %v6563_v8 = vmul.f32 1.442695, %v6486_v40 }
 0xab1   :  { %8672 = vpow2.f32 %v6563_v8 }
 0xab5   :  { %6408 = vmax.xlane.f32.xlu2 %v6407_v18  ;;  %v13466_v18 = vadd.f32 %v6273_v26, %v15635_v4  ;;  %v6280_v26 = vmul.f32 0.17677669, %v6206_v3  ;;  %v6122_v4 = vpop.f32.mrf.mxu1 }
 0xab7   :  { %6687 = vadd.xlane.f32.xlu1 %v6686_v23  ;;  %v6413_v29 = vmax.f32 %v13466_v18, %v13463_v61 }
 0xabd   :  { %6678 = vadd.xlane.f32.xlu2 %v6677_v20  ;;  %v13474_v20 = vpop.eup %8672 }
 0xabe   :  { %v6683_v8 = vadd.f32 %v13474_v20, %v13472_v31 }
 0xac3   :  { %v6403_v48 = vpop.xlane.xlu0 %6402 }
 0xac4   :  { %v6489_v23 = vsub.f32 %v13326_v51, %v6403_v48  ;;  %v6490_v58 = vsub.f32 %v13323_v37, %v6403_v48  ;;  %v15636_v48 = vld [vmem:[#allocation100_spill] sm:$0xff] }
 0xac5   :  { %6414 = vmax.xlane.f32.xlu2 %v6413_v29  ;;  %v13483_v29 = vadd.f32 %v6280_v26, %v15636_v48  ;;  %v15639_v26 = vld [vmem:[#allocation117_spill] sm:$0xff]  ;;  %v6125_v48 = vpop.f32.mrf.mxu1 }
 0xac6   :  { %v6569_v50 = vmul.f32 1.442695, %v6489_v23  ;;  %v6571_v40 = vmul.f32 1.442695, %v6490_v58  ;;  %v6284_v23 = vmul.f32 0.17677669, %v6211_v22 }
 0xac8   :  { %8674 = vpow2.f32 %v6569_v50  ;;  %v15637_v50 = vld [vmem:[#allocation99_spill] sm:$0xff] }
 0xac9   :  { %8676 = vpow2.f32 %v6571_v40  ;;  %v13488_v3 = vadd.f32 %v6279_v14, %v15637_v50  ;;  %v6283_v40 = vmul.f32 0.17677669, %v6122_v4  ;;  %v6286_v14 = vmul.f32 0.17677669, %v6214_v2  ;;  %v15641_v4 = vld [vmem:[#allocation109_spill] sm:$0xff] }
 0xaca   :  { %v6285_v50 = vmul.f32 0.17677669, %v6125_v48 }
 0xacb   :  { %v6422_v45 = vmax.f32 %v13488_v3, %v13483_v29  ;;  %v13496_v22 = vadd.f32 %v6283_v40, %v15639_v26 }
 0xacd   :  { %6684 = vadd.xlane.f32.xlu2 %v6683_v8  ;;  %v15638_v8 = vld [vmem:[#allocation116_spill] sm:$0xff] }
 0xace   :  { %v13478_v51 = vpop.eup %8674  ;;  %v13493_v32 = vadd.f32 %v6284_v23, %v15638_v8  ;;  %v15643_v8 = vld [vmem:[#allocation112_spill] sm:$0xff] }
 0xacf   :  { %v13480_v37 = vpop.eup %8676  ;;  %v13512_v28 = vadd.f32 %v6285_v50, %v15643_v8 }
 0xad0   :  { %v6689_v58 = vadd.f32 %v13480_v37, %v13478_v51  ;;  %v6428_v35 = vmax.f32 %v13496_v22, %v13493_v32 }
 0xad2   :  { %6690 = vadd.xlane.f32.xlu1 %v6689_v58  ;;  %v13504_v58 = vadd.f32 %v6281_v6, %v15641_v4 }
 0xad4   :  { %v6425_v49 = vmax.f32 %v13504_v58, %v13499_v12 }
 0xad5   :  { %6423 = vmax.xlane.f32.xlu2 %v6422_v45  ;;  %v15642_v45 = vld [vmem:[#allocation113_spill] sm:$0xff] }
 0xad6   :  { %v13509_v40 = vadd.f32 %v6286_v14, %v15642_v45  ;;  %v13520_v45 = vpop.f32.mrf.mxu1 }
 0xad7   :  { %v6667_v23 = vpop.xlane.xlu1 %6666 }
 0xad8   :  { %8678 = vrcp.f32 %v6667_v23  ;;  %v6431_v6 = vmax.f32 %v13512_v28, %v13509_v40 }
 0xada   :  { %6429 = vmax.xlane.f32.xlu1 %v6428_v35 }
 0xadd   :  { %6426 = vmax.xlane.f32.xlu2 %v6425_v49  ;;  %v13518_v49 = vpop.f32.mrf.mxu2 }
 0xade   :  { %v8679_v56 = vpop.eup %8678 }
 0xadf   :  { %v6670_v2 = vpop.xlane.xlu2 %6669  ;;  %v6793_v48 = vmul.f32 %v8679_v56, %v13344_v34 }
 0xae0   :  { %8680 = vrcp.f32 %v6670_v2  ;;  %v6794_v2 = vmul.f32 %v8679_v56, %v13346_v38 }
 0xae2   :  { %6432 = vmax.xlane.f32.xlu1 %v6431_v6 }
 0xae6   :  { %v8681_v26 = vpop.eup %8680 }
 0xae7   :  { %v6795_v35 = vmul.f32 %v8681_v26, %v13352_v13  ;;  %v6890_v4 = vpop.permute.xlu2 %6889  ;;  %v6796_v8 = vmul.f32 %v8681_v26, %v13354_v24 }
 0xae8   :  { %6944 = vmatpush.bf16.msra.mxu3 %v6890_v4  ;;  %v13528_v4 = vpop.f32.mrf.mxu1 }
 0xae9   :  { %v6857_v14 = vpack.c.bf16 %v6795_v35, %v6793_v48  ;;  %v13526_v48 = vpop.f32.mrf.mxu2  ;;  %v6858_v35 = vpack.c.bf16 %v6796_v8, %v6794_v2 }
 0xaeb   :  { %6945 = vmatmul.bf16.vlgmr.msra.gmra.mxu3 %v6857_v14 }
 0xaef   :  { %v6676_v50 = vpop.xlane.xlu0 %6675  ;;  %v6908_v23 = vpop.permute.xlu1 %6907 }
 0xaf0   :  { %7032 = vmatpush.bf16.msra.mxu0 %v6908_v23 }
 0xaf7   :  { %v6412_v6 = vpop.xlane.xlu0 %6411  ;;  %v6906_v10 = vpop.permute.xlu1 %6905 }
 0xaf8   :  { %v6495_v34 = vsub.f32 %v13380_v5, %v6412_v6  ;;  %v6496_v13 = vsub.f32 %v13375_v15, %v6412_v6  ;;  %7033 = vmatpush.bf16.msra.mxu0 %v6906_v10  ;;  %v13536_v5 = vpop.f32.mrf.mxu2  ;;  %v13538_v15 = vpop.f32.mrf.mxu1 }
 0xafa   :  { %v6581_v14 = vmul.f32 1.442695, %v6495_v34  ;;  %v6583_v60 = vmul.f32 1.442695, %v6496_v13 }
 0xafb   :  { %7034 = vmatmul.bf16.vlgmr.msra.gmra.mxu0 %v6858_v35 }
 0xafc   :  { %8682 = vpow2.f32 %v6581_v14 }
 0xafd   :  { %8684 = vpow2.f32 %v6583_v60 }
 0xaff   :  { %v13530_v24 = vpop.xlane.xlu0 %6681 }
 0xb00   :  { %v13544_v6 = vpop.f32.mrf.mxu2  ;;  %v13546_v34 = vpop.f32.mrf.mxu1 }
 0xb02   :  { %v13532_v38 = vpop.eup %8682 }
 0xb03   :  { %v13534_v56 = vpop.eup %8684 }
 0xb04   :  { %v6698_v10 = vadd.f32 %v13534_v56, %v13532_v38 }
 0xb06   :  { %6699 = vadd.xlane.f32.xlu2 %v6698_v10 }
 0xb07   :  { %v6418_v26 = vpop.xlane.xlu0 %6417 }
 0xb08   :  { %v6499_v23 = vsub.f32 %v13398_v33, %v6418_v26  ;;  %v6500_v8 = vsub.f32 %v13395_v43, %v6418_v26  ;;  %v6226_v26 = vpop.f32.mrf.mxu2 }
 0xb0a   :  { %v6589_v60 = vmul.f32 1.442695, %v6499_v23  ;;  %v6591_v2 = vmul.f32 1.442695, %v6500_v8  ;;  %v6137_v23 = vpop.f32.mrf.mxu1 }
 0xb0c   :  { %8686 = vpow2.f32 %v6589_v60 }
 0xb0d   :  { %8688 = vpow2.f32 %v6591_v2  ;;  %v6295_v2 = vmul.f32 0.17677669, %v6137_v23 }
 0xb0f   :  { %v6421_v13 = vpop.xlane.xlu0 %6420  ;;  %v13568_v36 = vadd.f32 %v6295_v2, %v15645_v19  ;;  %v15647_v2 = vld [vmem:[#allocation131_spill] sm:$0xff] }
 0xb10   :  { %v6501_v35 = vsub.f32 %v13408_v16, %v6421_v13  ;;  %v6502_v14 = vsub.f32 %v13405_v52, %v6421_v13  ;;  %v6296_v16 = vmul.f32 0.17677669, %v6226_v26  ;;  %v15644_v13 = vld [vmem:[#allocation77_spill] sm:$0xff] }
 0xb12   :  { %v13550_v1 = vpop.eup %8686  ;;  %v6593_v10 = vmul.f32 1.442695, %v6501_v35  ;;  %v6595_v59 = vmul.f32 1.442695, %v6502_v14  ;;  %v13563_v35 = vadd.f32 %v6296_v16, %v15644_v13  ;;  %v6140_v21 = vpop.f32.mrf.mxu1 }
 0xb13   :  { %v13552_v33 = vpop.eup %8688 }
 0xb14   :  { %8690 = vpow2.f32 %v6593_v10  ;;  %v6704_v43 = vadd.f32 %v13552_v33, %v13550_v1  ;;  %v6229_v10 = vpop.f32.mrf.mxu2  ;;  %v6446_v16 = vmax.f32 %v13568_v36, %v13563_v35 }
 0xb15   :  { %8692 = vpow2.f32 %v6595_v59  ;;  %v6298_v23 = vmul.f32 0.17677669, %v6229_v10 }
 0xb16   :  { %6705 = vadd.xlane.f32.xlu1 %v6704_v43  ;;  %8694 = vrcp.f32 %v6676_v50 }
 0xb1a   :  { %v13556_v8 = vpop.eup %8690 }
 0xb1b   :  { %v13558_v60 = vpop.eup %8692 }
 0xb1c   :  { %v6707_v52 = vadd.f32 %v13558_v60, %v13556_v8  ;;  %v8695_v50 = vpop.eup %8694 }
 0xb1e   :  { %6708 = vadd.xlane.f32.xlu1 %v6707_v52  ;;  %v6297_v52 = vmul.f32 0.17677669, %v6140_v21  ;;  %v6799_v21 = vmul.f32 %v8695_v50, %v13362_v42 }
 0xb20   :  { %v6406_v14 = vpop.xlane.xlu2 %6405 }
 0xb21   :  { %v6491_v59 = vsub.f32 %v13424_v11, %v6406_v14  ;;  %v6492_v43 = vsub.f32 %v13419_v46, %v6406_v14  ;;  %v15646_v11 = vld [vmem:[#allocation132_spill] sm:$0xff]  ;;  %v13576_v14 = vadd.f32 %v6297_v52, %v15647_v2 }
 0xb22   :  { %v6673_v26 = vpop.xlane.xlu1 %6672  ;;  %v13573_v13 = vadd.f32 %v6298_v23, %v15646_v11 }
 0xb23   :  { %v6573_v9 = vmul.f32 1.442695, %v6491_v59  ;;  %v6575_v25 = vmul.f32 1.442695, %v6492_v43  ;;  %8696 = vrcp.f32 %v6673_v26 }
 0xb24   :  { %v6449_v52 = vmax.f32 %v13576_v14, %v13573_v13 }
 0xb25   :  { %8698 = vpow2.f32 %v6573_v9  ;;  %v6800_v9 = vmul.f32 %v8695_v50, %v13364_v55 }
 0xb26   :  { %8700 = vpow2.f32 %v6575_v25  ;;  %6447 = vmax.xlane.f32.xlu1 %v6446_v16 }
 0xb28   :  { %v6409_v46 = vpop.xlane.xlu2 %6408 }
 0xb29   :  { %v8697_v19 = vpop.eup %8696  ;;  %v6493_v59 = vsub.f32 %v13442_v57, %v6409_v46  ;;  %v6494_v10 = vsub.f32 %v13437_v54, %v6409_v46  ;;  %v6288_v54 = vmul.f32 0.17677669, %v13518_v49 }
 0xb2a   :  { %v6797_v43 = vmul.f32 %v8697_v19, %v13421_v62  ;;  %v6798_v25 = vmul.f32 %v8697_v19, %v13427_v0 }
 0xb2b   :  { %v13584_v26 = vpop.eup %8698  ;;  %v6577_v23 = vmul.f32 1.442695, %v6493_v59  ;;  %v6579_v16 = vmul.f32 1.442695, %v6494_v10  ;;  %v6287_v59 = vmul.f32 0.17677669, %v13520_v45 }
 0xb2c   :  { %v13586_v11 = vpop.eup %8700  ;;  %v6859_v57 = vpack.c.bf16 %v6799_v21, %v6797_v43  ;;  %v6860_v2 = vpack.c.bf16 %v6800_v9, %v6798_v25 }
 0xb2d   :  { %8702 = vpow2.f32 %v6577_v23  ;;  %v6692_v62 = vadd.f32 %v13586_v11, %v13584_v26 }
 0xb2e   :  { %8704 = vpow2.f32 %v6579_v16  ;;  %6450 = vmax.xlane.f32.xlu1 %v6449_v52  ;;  %6950 = vmatmul.bf16.gmra.mxu3 %v6859_v57  ;;  %v15649_v16 = vld [vmem:[#allocation121_spill] sm:$0xff] }
 0xb2f   :  { %6693 = vadd.xlane.f32.xlu0 %v6692_v62  ;;  %7039 = vmatmul.bf16.gmra.mxu0 %v6860_v2  ;;  %8706 = vrcp.f32 %v13530_v24  ;;  %v15648_v24 = vld [vmem:[#allocation119_spill] sm:$0xff]  ;;  %v13610_v52 = vadd.f32 %v6287_v59, %v15649_v16  ;;  %v6292_v59 = vmul.f32 0.17677669, %v13536_v5  ;;  %v15652_v16 = vld [vmem:[#allocation124_spill] sm:$0xff] }
 0xb30   :  { %v6679_v55 = vpop.xlane.xlu2 %6678  ;;  %v13603_v21 = vadd.f32 %v6288_v54, %v15648_v24  ;;  %v15650_v54 = vld [vmem:[#allocation120_spill] sm:$0xff] }
 0xb31   :  { %8708 = vrcp.f32 %v6679_v55  ;;  %v6688_v55 = vpop.xlane.xlu1 %6687 }
 0xb33   :  { %v13593_v42 = vpop.eup %8702 }
 0xb34   :  { %v13595_v0 = vpop.eup %8704 }
 0xb35   :  { %v6695_v50 = vadd.f32 %v13595_v0, %v13593_v42  ;;  %v8707_v46 = vpop.eup %8706 }
 0xb36   :  { %v6803_v23 = vmul.f32 %v8707_v46, %v13388_v7  ;;  %v6804_v2 = vmul.f32 %v8707_v46, %v13390_v47  ;;  %v6289_v7 = vmul.f32 0.17677669, %v13528_v4 }
 0xb37   :  { %v8709_v19 = vpop.eup %8708  ;;  %6696 = vadd.xlane.f32.xlu0 %v6695_v50 }
 0xb38   :  { %v6415_v10 = vpop.xlane.xlu2 %6414  ;;  %v6801_v43 = vmul.f32 %v8709_v19, %v13450_v17  ;;  %v6802_v49 = vmul.f32 %v8709_v19, %v13452_v63  ;;  %v6290_v17 = vmul.f32 0.17677669, %v13526_v48  ;;  %v15651_v48 = vld [vmem:[#allocation118_spill] sm:$0xff] }
 0xb39   :  { %v6497_v25 = vsub.f32 %v13466_v18, %v6415_v10  ;;  %v6498_v9 = vsub.f32 %v13463_v61, %v6415_v10  ;;  %v6434_v18 = vmax.f32 %v13610_v52, %v13603_v21  ;;  %v13623_v46 = vadd.f32 %v6289_v7, %v15651_v48  ;;  %v6231_v7 = vpop.f32.mrf.mxu2 }
 0xb3a   :  { %v6861_v62 = vpack.c.bf16 %v6803_v23, %v6801_v43  ;;  %v6862_v61 = vpack.c.bf16 %v6804_v2, %v6802_v49  ;;  %v13618_v50 = vadd.f32 %v6290_v17, %v15650_v54  ;;  %v15653_v17 = vld [vmem:[#allocation123_spill] sm:$0xff] }
 0xb3b   :  { %v6585_v57 = vmul.f32 1.442695, %v6497_v25  ;;  %v6587_v45 = vmul.f32 1.442695, %v6498_v9  ;;  %v6291_v9 = vmul.f32 0.17677669, %v13538_v15 }
 0xb3c   :  { %v6437_v4 = vmax.f32 %v13623_v46, %v13618_v50 }
 0xb3d   :  { %8710 = vpow2.f32 %v6585_v57  ;;  %v13637_v57 = vadd.f32 %v6292_v59, %v15652_v16  ;;  %v6293_v59 = vmul.f32 0.17677669, %v13546_v34 }
 0xb3e   :  { %8712 = vpow2.f32 %v6587_v45  ;;  %6955 = vmatmul.bf16.gmra.mxu3 %v6861_v62 }
 0xb3f   :  { %6435 = vmax.xlane.f32.xlu0 %v6434_v18  ;;  %7044 = vmatmul.bf16.gmra.mxu0 %v6862_v61  ;;  %8714 = vrcp.f32 %v6688_v55  ;;  %v13644_v55 = vadd.f32 %v6291_v9, %v15653_v17 }
 0xb40   :  { %v6685_v63 = vpop.xlane.xlu2 %6684 }
 0xb41   :  { %8716 = vrcp.f32 %v6685_v63  ;;  %v6294_v63 = vmul.f32 0.17677669, %v13544_v6 }
 0xb43   :  { %v13620_v47 = vpop.eup %8710 }
 0xb44   :  { %v13625_v19 = vpop.eup %8712 }
 0xb45   :  { %v13628_v10 = vpop.xlane.xlu1 %6690  ;;  %v6701_v43 = vadd.f32 %v13625_v19, %v13620_v47  ;;  %v8715_v24 = vpop.eup %8714 }
 0xb46   :  { %v6807_v62 = vmul.f32 %v8715_v24, %v13439_v44  ;;  %v6808_v61 = vmul.f32 %v8715_v24, %v13444_v41 }
 0xb47   :  { %v8717_v25 = vpop.eup %8716  ;;  %6438 = vmax.xlane.f32.xlu0 %v6437_v4  ;;  %6702 = vadd.xlane.f32.xlu2 %v6701_v43  ;;  %v15654_v43 = vld [vmem:[#allocation129_spill] sm:$0xff] }
 0xb48   :  { %v6424_v49 = vpop.xlane.xlu2 %6423  ;;  %v6805_v23 = vmul.f32 %v8717_v25, %v13472_v31  ;;  %v6806_v2 = vmul.f32 %v8717_v25, %v13474_v20  ;;  %v6142_v20 = vpop.f32.mrf.mxu1  ;;  %v13654_v24 = vadd.f32 %v6294_v63, %v15654_v43  ;;  %v8051_v63 = vld [vmem:[%s14435_s5 + $0x38] sm:$0xff] }
 0xb49   :  { %v6503_v5 = vsub.f32 %v13488_v3, %v6424_v49  ;;  %v6504_v45 = vsub.f32 %v13483_v29, %v6424_v49  ;;  %v6440_v29 = vmax.f32 %v13644_v55, %v13637_v57  ;;  %7197 = vmatpush.bf16.msra.mxu1 %v8051_v63  ;;  %v15660_v63 = vld [vmem:[#allocation139_spill] sm:$0xff] }
 0xb4a   :  { %v6863_v31 = vpack.c.bf16 %v6807_v62, %v6805_v23  ;;  %v6864_v3 = vpack.c.bf16 %v6808_v61, %v6806_v2 }
 0xb4b   :  { %v6597_v15 = vmul.f32 1.442695, %v6503_v5  ;;  %v6599_v18 = vmul.f32 1.442695, %v6504_v45 }
 0xb4d   :  { %8718 = vpow2.f32 %v6597_v15  ;;  %v6430_v54 = vpop.xlane.xlu1 %6429 }
 0xb4e   :  { %8720 = vpow2.f32 %v6599_v18  ;;  %v6507_v44 = vsub.f32 %v13496_v22, %v6430_v54  ;;  %v6508_v48 = vsub.f32 %v13493_v32, %v6430_v54  ;;  %6960 = vmatmul.bf16.gmra.mxu3 %v6863_v31  ;;  %v15655_v22 = vld [vmem:[#allocation128_spill] sm:$0xff] }
 0xb4f   :  { %6441 = vmax.xlane.f32.xlu2 %v6440_v29  ;;  %7049 = vmatmul.bf16.gmra.mxu0 %v6864_v3  ;;  %v13661_v23 = vadd.f32 %v6293_v59, %v15655_v22 }
 0xb50   :  { %v6605_v41 = vmul.f32 1.442695, %v6507_v44  ;;  %v6607_v4 = vmul.f32 1.442695, %v6508_v48  ;;  %v6427_v6 = vpop.xlane.xlu2 %6426  ;;  %v6145_v17 = vpop.f32.mrf.mxu1  ;;  %v6299_v44 = vmul.f32 0.17677669, %v6142_v20 }
 0xb51   :  { %v6505_v25 = vsub.f32 %v13504_v58, %v6427_v6  ;;  %v6506_v9 = vsub.f32 %v13499_v12, %v6427_v6  ;;  %v6443_v45 = vmax.f32 %v13661_v23, %v13654_v24  ;;  %v6234_v12 = vpop.f32.mrf.mxu2 }
 0xb52   :  { %8722 = vpow2.f32 %v6605_v41  ;;  %v15656_v41 = vld [vmem:[#allocation136_spill] sm:$0xff]  ;;  %v6302_v20 = vmul.f32 0.17677669, %v6234_v12 }
 0xb53   :  { %v13658_v49 = vpop.eup %8718  ;;  %v6601_v32 = vmul.f32 1.442695, %v6505_v25  ;;  %v6603_v34 = vmul.f32 1.442695, %v6506_v9  ;;  %8724 = vpow2.f32 %v6607_v4  ;;  %v15657_v25 = vld [vmem:[#allocation135_spill] sm:$0xff] }
 0xb54   :  { %v13663_v16 = vpop.eup %8720  ;;  %v13697_v9 = vadd.f32 %v6299_v44, %v15657_v25 }
 0xb55   :  { %8726 = vpow2.f32 %v6601_v32  ;;  %v6433_v5 = vpop.xlane.xlu1 %6432  ;;  %v6710_v58 = vadd.f32 %v13663_v16, %v13658_v49 }
 0xb56   :  { %8728 = vpow2.f32 %v6603_v34  ;;  %v6509_v2 = vsub.f32 %v13512_v28, %v6433_v5  ;;  %v6510_v62 = vsub.f32 %v13509_v40, %v6433_v5  ;;  %v6300_v40 = vmul.f32 0.17677669, %v6231_v7  ;;  %v8050_v7 = vld [vmem:[%s14435_s5 + $0x30] sm:$0xff] }
 0xb57   :  { %6444 = vmax.xlane.f32.xlu2 %v6443_v45  ;;  %6711 = vadd.xlane.f32.xlu0 %v6710_v58  ;;  %v6301_v5 = vmul.f32 0.17677669, %v6145_v17  ;;  %v15658_v58 = vld [vmem:[#allocation140_spill] sm:$0xff] }
 0xb58   :  { %v6609_v15 = vmul.f32 1.442695, %v6509_v2  ;;  %v6611_v18 = vmul.f32 1.442695, %v6510_v62  ;;  %v13671_v61 = vpop.eup %8722  ;;  %v13689_v4 = vadd.f32 %v6300_v40, %v15656_v41  ;;  %v6147_v43 = vpop.f32.mrf.mxu1  ;;  %7198 = vmatpush.bf16.msra.mxu1 %v8050_v7  ;;  %v13704_v2 = vadd.f32 %v6302_v20, %v15658_v58  ;;  %v15659_v62 = vld [vmem:[#allocation80_spill] sm:$0xff]  ;;  %v15661_v40 = vld [vmem:[#allocation81_spill] sm:$0xff] }
 0xb59   :  { %v13673_v31 = vpop.eup %8724  ;;  %v6236_v48 = vpop.f32.mrf.mxu2  ;;  %v6303_v45 = vmul.f32 0.17677669, %v6147_v43  ;;  %v13710_v12 = vadd.f32 %v6301_v5, %v15660_v63  ;;  %v15662_v7 = vld [vmem:[#allocation92_spill] sm:$0xff]  ;;  %v15663_v20 = vld [vmem:[#allocation62_spill] sm:$0xff] }
 0xb5a   :  { %8730 = vpow2.f32 %v6609_v15  ;;  %v6716_v3 = vadd.f32 %v13673_v31, %v13671_v61  ;;  %v6304_v22 = vmul.f32 0.17677669, %v6236_v48  ;;  %v6452_v32 = vmax.f32 %v13697_v9, %v13689_v4  ;;  %v13719_v43 = vpop.f32.mrf.mxu0 }
 0xb5b   :  { %v13678_v54 = vpop.eup %8726  ;;  %8732 = vpow2.f32 %v6611_v18  ;;  %v6455_v17 = vmax.f32 %v13710_v12, %v13704_v2 }
 0xb5c   :  { %v13680_v29 = vpop.eup %8728  ;;  %v13707_v15 = vadd.f32 %v6304_v22, %v15659_v62 }
 0xb5d   :  { %v6713_v28 = vadd.f32 %v13680_v29, %v13678_v54 }
 0xb5f   :  { %6714 = vadd.xlane.f32.xlu0 %v6713_v28  ;;  %6717 = vadd.xlane.f32.xlu2 %v6716_v3  ;;  %v13713_v28 = vadd.f32 %v6303_v45, %v15661_v40 }
 0xb60   :  { %v13686_v59 = vpop.eup %8730  ;;  %v6150_v3 = vpop.f32.mrf.mxu1 }
 0xb61   :  { %v13691_v6 = vpop.eup %8732  ;;  %v6239_v18 = vpop.f32.mrf.mxu2  ;;  %v6458_v48 = vmax.f32 %v13713_v28, %v13707_v15  ;;  %v6305_v41 = vmul.f32 0.17677669, %v6150_v3 }
 0xb62   :  { %v6719_v34 = vadd.f32 %v13691_v6, %v13686_v59  ;;  %v6306_v44 = vmul.f32 0.17677669, %v6239_v18 }
 0xb63   :  { %v13725_v22 = vadd.f32 %v6305_v41, %v15663_v20 }
 0xb64   :  { %v13722_v25 = vadd.f32 %v6306_v44, %v15662_v7 }
 0xb67   :  { %6453 = vmax.xlane.f32.xlu0 %v6452_v32  ;;  %6720 = vadd.xlane.f32.xlu2 %v6719_v34  ;;  %v6461_v32 = vmax.f32 %v13725_v22, %v13722_v25 }
 0xb6e   :  { %v6946_v34 = vpop.f32.mrf.mxu3 }
 0xb6f   :  { %6456 = vmax.xlane.f32.xlu0 %v6455_v17  ;;  %6459 = vmax.xlane.f32.xlu2 %v6458_v48 }
 0xb76   :  { %v6948_v45 = vpop.f32.mrf.mxu3 }
 0xb77   :  { %6462 = vmax.xlane.f32.xlu2 %v6461_v32 }
 0xb78   :  { %v7035_v5 = vpop.f32.mrf.mxu0 }
 0xb79   :  { %v7036_v62 = vadd.f32 %v7035_v5, %v6946_v34 }
 0xb80   :  { %v7037_v58 = vpop.f32.mrf.mxu0 }
 0xb81   :  { %v7038_v18 = vadd.f32 %v7037_v58, %v6948_v45 }
 0xb83   :  { %v7115_v63 = vpack.c.bf16 %v7038_v18, %v7036_v62 }
 0xb85   :  { %8004 = vmatmul.msk.bf16.vlgmr.msra.gmra.mxu1 %vm1787_vm2, %v7115_v63 }
 0xb89   :  { %v13730_v40 = vpop.xlane.xlu1 %6705 }
 0xb91   :  { %v13732_v3 = vpop.xlane.xlu1 %6708 }
 0xb99   :  { %v6448_v44 = vpop.xlane.xlu1 %6447 }
 0xb9a   :  { %v6519_v17 = vsub.f32 %v13568_v36, %v6448_v44  ;;  %v6520_v48 = vsub.f32 %v13563_v35, %v6448_v44 }
 0xb9c   :  { %v6629_v41 = vmul.f32 1.442695, %v6519_v17  ;;  %v6631_v7 = vmul.f32 1.442695, %v6520_v48 }
 0xb9e   :  { %8734 = vpow2.f32 %v6629_v41 }
 0xb9f   :  { %8736 = vpow2.f32 %v6631_v7 }
 0xba0   :  { %8738 = vrcp.f32 %v13628_v10 }
 0xba1   :  { %v6451_v20 = vpop.xlane.xlu1 %6450 }
 0xba2   :  { %v6521_v32 = vsub.f32 %v13576_v14, %v6451_v20  ;;  %v6522_v34 = vsub.f32 %v13573_v13, %v6451_v20  ;;  %v6694_v5 = vpop.xlane.xlu0 %6693 }
 0xba3   :  { %8740 = vrcp.f32 %v6694_v5 }
 0xba4   :  { %v13739_v45 = vpop.eup %8734  ;;  %v6633_v58 = vmul.f32 1.442695, %v6521_v32  ;;  %v6635_v62 = vmul.f32 1.442695, %v6522_v34  ;;  %v6700_v34 = vpop.xlane.xlu2 %6699 }
 0xba5   :  { %v13741_v36 = vpop.eup %8736 }
 0xba6   :  { %8742 = vpow2.f32 %v6633_v58  ;;  %v6734_v35 = vadd.f32 %v13741_v36, %v13739_v45  ;;  %v8739_v18 = vpop.eup %8738 }
 0xba7   :  { %8744 = vpow2.f32 %v6635_v62  ;;  %v6809_v14 = vmul.f32 %v8739_v18, %v13478_v51  ;;  %v6810_v44 = vmul.f32 %v8739_v18, %v13480_v37 }
 0xba8   :  { %6735 = vadd.xlane.f32.xlu2 %v6734_v35 }
 0xba9   :  { %v8741_v10 = vpop.eup %8740 }
 0xbaa   :  { %v6697_v63 = vpop.xlane.xlu0 %6696  ;;  %v6811_v13 = vmul.f32 %v8741_v10, %v13584_v26  ;;  %v6812_v17 = vmul.f32 %v8741_v10, %v13586_v11 }
 0xbab   :  { %8746 = vrcp.f32 %v6697_v63 }
 0xbac   :  { %v13749_v48 = vpop.eup %8742  ;;  %v7040_v41 = vpop.f32.mrf.mxu0  ;;  %v6865_v7 = vpack.c.bf16 %v6811_v13, %v6809_v14  ;;  %v6866_v20 = vpack.c.bf16 %v6812_v17, %v6810_v44  ;;  %8748 = vrcp.f32 %v6700_v34 }
 0xbad   :  { %v13751_v32 = vpop.eup %8744 }
 0xbae   :  { %6965 = vmatmul.bf16.gmra.mxu3 %v6865_v7  ;;  %7054 = vmatmul.bf16.gmra.mxu0 %v6866_v20  ;;  %v6737_v5 = vadd.f32 %v13751_v32, %v13749_v48 }
 0xbb0   :  { %6738 = vadd.xlane.f32.xlu2 %v6737_v5 }
 0xbb1   :  { %v6951_v51 = vpop.f32.mrf.mxu3  ;;  %v8747_v62 = vpop.eup %8746 }
 0xbb2   :  { %v6436_v37 = vpop.xlane.xlu0 %6435  ;;  %v8749_v10 = vpop.eup %8748  ;;  %v6813_v14 = vmul.f32 %v8747_v62, %v13593_v42  ;;  %v6814_v13 = vmul.f32 %v8747_v62, %v13595_v0  ;;  %v7041_v44 = vadd.f32 %v7040_v41, %v6951_v51 }
 0xbb3   :  { %v6511_v26 = vsub.f32 %v13610_v52, %v6436_v37  ;;  %v6512_v11 = vsub.f32 %v13603_v21, %v6436_v37  ;;  %v6815_v52 = vmul.f32 %v8749_v10, %v13532_v38  ;;  %v6816_v21 = vmul.f32 %v8749_v10, %v13534_v56  ;;  %v6241_v38 = vpop.f32.mrf.mxu2 }
 0xbb4   :  { %v7042_v58 = vpop.f32.mrf.mxu0 }
 0xbb5   :  { %v6613_v35 = vmul.f32 1.442695, %v6511_v26  ;;  %v6615_v18 = vmul.f32 1.442695, %v6512_v11  ;;  %v6867_v11 = vpack.c.bf16 %v6815_v52, %v6813_v14 }
 0xbb7   :  { %8750 = vpow2.f32 %v6613_v35  ;;  %v6868_v35 = vpack.c.bf16 %v6816_v21, %v6814_v13 }
 0xbb8   :  { %8752 = vpow2.f32 %v6615_v18 }
 0xbb9   :  { %v6953_v63 = vpop.f32.mrf.mxu3 }
 0xbba   :  { %v6439_v17 = vpop.xlane.xlu0 %6438  ;;  %v6703_v7 = vpop.xlane.xlu2 %6702  ;;  %v7043_v20 = vadd.f32 %v7042_v58, %v6953_v63 }
 0xbbb   :  { %v6513_v34 = vsub.f32 %v13623_v46, %v6439_v17  ;;  %v6514_v5 = vsub.f32 %v13618_v50, %v6439_v17  ;;  %8754 = vrcp.f32 %v6703_v7  ;;  %v6152_v46 = vpop.f32.mrf.mxu1  ;;  %v6244_v21 = vpop.f32.mrf.mxu2 }
 0xbbc   :  { %v7116_v37 = vpack.c.bf16 %v7043_v20, %v7041_v44  ;;  %v7045_v26 = vpop.f32.mrf.mxu0  ;;  %v6308_v20 = vmul.f32 0.17677669, %v6241_v38  ;;  %v15664_v38 = vld [vmem:[#allocation148_spill] sm:$0xff] }
 0xbbd   :  { %v13763_v42 = vpop.eup %8750  ;;  %v6617_v0 = vmul.f32 1.442695, %v6513_v34  ;;  %v6619_v62 = vmul.f32 1.442695, %v6514_v5 }
 0xbbe   :  { %v13765_v41 = vpop.eup %8752  ;;  %6970 = vmatmul.bf16.gmra.mxu3 %v6867_v11  ;;  %7059 = vmatmul.bf16.gmra.mxu0 %v6868_v35 }
 0xbbf   :  { %8756 = vpow2.f32 %v6617_v0  ;;  %8005 = vmatmul.msk.bf16.gmra.mxu1 %vm1787_vm2, %v7116_v37  ;;  %v6722_v56 = vadd.f32 %v13765_v41, %v13763_v42 }
 0xbc0   :  { %8758 = vpow2.f32 %v6619_v62 }
 0xbc1   :  { %8760 = vrcp.f32 %v13730_v40  ;;  %6723 = vadd.xlane.f32.xlu1 %v6722_v56  ;;  %v6956_v50 = vpop.f32.mrf.mxu3  ;;  %v8755_v10 = vpop.eup %8754  ;;  %v13784_v56 = vadd.f32 %v6308_v20, %v15664_v38 }
 0xbc2   :  { %v6442_v51 = vpop.xlane.xlu2 %6441  ;;  %v6817_v52 = vmul.f32 %v8755_v10, %v13620_v47  ;;  %v7046_v5 = vadd.f32 %v7045_v26, %v6956_v50  ;;  %v15665_v26 = vld [vmem:[#allocation150_spill] sm:$0xff] }
 0xbc3   :  { %v6515_v58 = vsub.f32 %v13644_v55, %v6442_v51  ;;  %v6516_v18 = vsub.f32 %v13637_v57, %v6442_v51  ;;  %v6818_v55 = vmul.f32 %v8755_v10, %v13625_v19  ;;  %v6307_v57 = vmul.f32 0.17677669, %v6152_v46  ;;  %v6155_v19 = vpop.f32.mrf.mxu1 }
 0xbc4   :  { %v7047_v44 = vpop.f32.mrf.mxu0 }
 0xbc5   :  { %v13773_v14 = vpop.eup %8756  ;;  %v6621_v13 = vmul.f32 1.442695, %v6515_v58  ;;  %v6623_v63 = vmul.f32 1.442695, %v6516_v18  ;;  %v13791_v50 = vadd.f32 %v6307_v57, %v15665_v26 }
 0xbc6   :  { %v13775_v17 = vpop.eup %8758 }
 0xbc7   :  { %v8761_v7 = vpop.eup %8760  ;;  %8762 = vpow2.f32 %v6621_v13  ;;  %v6725_v40 = vadd.f32 %v13775_v17, %v13773_v14 }
 0xbc8   :  { %8764 = vpow2.f32 %v6623_v63  ;;  %v6819_v0 = vmul.f32 %v8761_v7, %v13550_v1  ;;  %v6820_v62 = vmul.f32 %v8761_v7, %v13552_v33  ;;  %v6310_v33 = vmul.f32 0.17677669, %v6244_v21 }
 0xbc9   :  { %6726 = vadd.xlane.f32.xlu1 %v6725_v40  ;;  %v6958_v34 = vpop.f32.mrf.mxu3  ;;  %v6309_v7 = vmul.f32 0.17677669, %v6155_v19 }
 0xbca   :  { %v6712_v37 = vpop.xlane.xlu0 %6711  ;;  %v6445_v11 = vpop.xlane.xlu2 %6444  ;;  %v7048_v35 = vadd.f32 %v7047_v44, %v6958_v34  ;;  %v6869_v58 = vpack.c.bf16 %v6819_v0, %v6817_v52  ;;  %v6870_v18 = vpack.c.bf16 %v6820_v62, %v6818_v55  ;;  %v15666_v55 = vld [vmem:[#allocation147_spill] sm:$0xff] }
 0xbcb   :  { %v6517_v51 = vsub.f32 %v13661_v23, %v6445_v11  ;;  %v6518_v47 = vsub.f32 %v13654_v24, %v6445_v11  ;;  %8766 = vrcp.f32 %v6712_v37  ;;  %v6464_v24 = vmax.f32 %v13791_v50, %v13784_v56  ;;  %v6246_v34 = vpop.f32.mrf.mxu2  ;;  %v15667_v37 = vld [vmem:[#allocation149_spill] sm:$0xff]  ;;  %v6157_v0 = vpop.f32.mrf.mxu1 }
 0xbcc   :  { %v7117_v46 = vpack.c.bf16 %v7048_v35, %v7046_v5  ;;  %v7050_v23 = vpop.f32.mrf.mxu0  ;;  %v13802_v57 = vadd.f32 %v6310_v33, %v15666_v55  ;;  %v13807_v11 = vadd.f32 %v6309_v7, %v15667_v37  ;;  %v15668_v7 = vld [vmem:[#allocation154_spill] sm:$0xff] }
 0xbcd   :  { %v13788_v10 = vpop.eup %8762  ;;  %v6625_v13 = vmul.f32 1.442695, %v6517_v51  ;;  %v6627_v1 = vmul.f32 1.442695, %v6518_v47 }
 0xbce   :  { %v13793_v63 = vpop.eup %8764  ;;  %6975 = vmatmul.bf16.gmra.mxu3 %v6869_v58  ;;  %7064 = vmatmul.bf16.gmra.mxu0 %v6870_v18  ;;  %v6467_v38 = vmax.f32 %v13807_v11, %v13802_v57 }
 0xbcf   :  { %8768 = vpow2.f32 %v6625_v13  ;;  %8006 = vmatmul.msk.bf16.gmra.mxu1 %vm1787_vm2, %v7117_v46  ;;  %v6728_v44 = vadd.f32 %v13793_v63, %v13788_v10  ;;  %v6311_v46 = vmul.f32 0.17677669, %v6157_v0  ;;  %v15669_v0 = vld [vmem:[#allocation155_spill] sm:$0xff] }
 0xbd0   :  { %8770 = vpow2.f32 %v6627_v1 }
 0xbd1   :  { %8772 = vrcp.f32 %v13732_v3  ;;  %6465 = vmax.xlane.f32.xlu1 %v6464_v24  ;;  %6729 = vadd.xlane.f32.xlu0 %v6728_v44  ;;  %v6961_v20 = vpop.f32.mrf.mxu3  ;;  %v8767_v21 = vpop.eup %8766  ;;  %v6312_v3 = vmul.f32 0.17677669, %v6246_v34 }
 0xbd2   :  { %v6715_v40 = vpop.xlane.xlu0 %6714  ;;  %v6718_v52 = vpop.xlane.xlu2 %6717  ;;  %v6823_v47 = vmul.f32 %v8767_v21, %v13658_v49  ;;  %v6824_v19 = vmul.f32 %v8767_v21, %v13663_v16  ;;  %v7051_v26 = vadd.f32 %v7050_v23, %v6961_v20  ;;  %v13827_v23 = vadd.f32 %v6311_v46, %v15669_v0 }
 0xbd3   :  { %v13822_v55 = vadd.f32 %v6312_v3, %v15668_v7  ;;  %8774 = vrcp.f32 %v6715_v40 }
 0xbd4   :  { %v7052_v58 = vpop.f32.mrf.mxu0  ;;  %8776 = vrcp.f32 %v6718_v52 }
 0xbd5   :  { %v13804_v5 = vpop.eup %8768 }
 0xbd6   :  { %v13809_v35 = vpop.eup %8770 }
 0xbd7   :  { %v8773_v62 = vpop.eup %8772  ;;  %v6731_v51 = vadd.f32 %v13809_v35, %v13804_v5 }
 0xbd8   :  { %v6821_v24 = vmul.f32 %v8773_v62, %v13556_v8  ;;  %v6822_v44 = vmul.f32 %v8773_v62, %v13558_v60  ;;  %v6470_v8 = vmax.f32 %v13827_v23, %v13822_v55 }
 0xbd9   :  { %6468 = vmax.xlane.f32.xlu1 %v6467_v38  ;;  %6732 = vadd.xlane.f32.xlu0 %v6731_v51  ;;  %v6963_v18 = vpop.f32.mrf.mxu3 }
 0xbda   :  { %v6454_v13 = vpop.xlane.xlu0 %6453  ;;  %v7053_v1 = vadd.f32 %v7052_v58, %v6963_v18  ;;  %v13817_v33 = vpop.xlane.xlu2 %6720  ;;  %v6871_v34 = vpack.c.bf16 %v6823_v47, %v6821_v24  ;;  %v6872_v37 = vpack.c.bf16 %v6824_v19, %v6822_v44 }
 0xbdb   :  { %v6523_v49 = vsub.f32 %v13697_v9, %v6454_v13  ;;  %v6524_v16 = vsub.f32 %v13689_v4, %v6454_v13  ;;  %v8775_v9 = vpop.eup %8774 }
 0xbdc   :  { %v7118_v21 = vpack.c.bf16 %v7053_v1, %v7051_v26  ;;  %v8777_v51 = vpop.eup %8776 }
 0xbdd   :  { %v6637_v20 = vmul.f32 1.442695, %v6523_v49  ;;  %v6639_v38 = vmul.f32 1.442695, %v6524_v16 }
 0xbde   :  { %6980 = vmatmul.bf16.gmra.mxu3 %v6871_v34  ;;  %7069 = vmatmul.bf16.gmra.mxu0 %v6872_v37 }
 0xbdf   :  { %8778 = vpow2.f32 %v6637_v20  ;;  %8007 = vmatmul.msk.bf16.gmra.mxu1 %vm1787_vm2, %v7118_v21 }
 0xbe0   :  { %8780 = vpow2.f32 %v6639_v38 }
 0xbe1   :  { %6471 = vmax.xlane.f32.xlu0 %v6470_v8 }
 0xbe2   :  { %v6457_v60 = vpop.xlane.xlu0 %6456  ;;  %v6460_v4 = vpop.xlane.xlu2 %6459 }
 0xbe3   :  { %v6525_v62 = vsub.f32 %v13710_v12, %v6457_v60  ;;  %v6526_v40 = vsub.f32 %v13704_v2, %v6457_v60  ;;  %v6527_v3 = vsub.f32 %v13713_v28, %v6460_v4  ;;  %v6528_v52 = vsub.f32 %v13707_v15, %v6460_v4 }
 0xbe4   :  { %v6825_v12 = vmul.f32 %v8775_v9, %v13678_v54  ;;  %v6827_v2 = vmul.f32 %v8777_v51, %v13671_v61  ;;  %v6826_v15 = vmul.f32 %v8775_v9, %v13680_v29  ;;  %v6828_v28 = vmul.f32 %v8777_v51, %v13673_v31 }
 0xbe5   :  { %v13836_v47 = vpop.eup %8778  ;;  %v6641_v19 = vmul.f32 1.442695, %v6525_v62  ;;  %v6643_v46 = vmul.f32 1.442695, %v6526_v40  ;;  %v6645_v58 = vmul.f32 1.442695, %v6527_v3 }
 0xbe6   :  { %v13838_v18 = vpop.eup %8780  ;;  %v6647_v26 = vmul.f32 1.442695, %v6528_v52  ;;  %v6873_v7 = vpack.c.bf16 %v6827_v2, %v6825_v12  ;;  %v6874_v49 = vpack.c.bf16 %v6828_v28, %v6826_v15  ;;  %v13871_v3 = vld [vmem:[%s14436_s6] ss:$0 sm:$0xff]  ;;  %v15670_v28 = vld [vmem:[#allocation110_spill] sm:$0xff] }
 0xbe7   :  { %8782 = vpow2.f32 %v6641_v19  ;;  %v6740_v13 = vadd.f32 %v13838_v18, %v13836_v47 }
 0xbe8   :  { %8784 = vpow2.f32 %v6643_v46 }
 0xbe9   :  { %8786 = vpow2.f32 %v6645_v58  ;;  %6741 = vadd.xlane.f32.xlu1 %v6740_v13 }
 0xbea   :  { %8788 = vpow2.f32 %v6647_v26  ;;  %v6463_v1 = vpop.xlane.xlu2 %6462 }
 0xbeb   :  { %v6529_v24 = vsub.f32 %v13725_v22, %v6463_v1  ;;  %v6530_v44 = vsub.f32 %v13722_v25, %v6463_v1  ;;  %v15671_v1 = vld [vmem:[#allocation63_spill] sm:$0xff] }
 0xbed   :  { %v13848_v16 = vpop.eup %8782  ;;  %v6649_v54 = vmul.f32 1.442695, %v6529_v24  ;;  %v6651_v21 = vmul.f32 1.442695, %v6530_v44  ;;  %v4433_v24 = vadd.f32 %v15671_v1, %v15670_v28 }
 0xbee   :  { %v13850_v34 = vpop.eup %8784  ;;  %6985 = vmatmul.bf16.gmra.mxu3 %v6873_v7  ;;  %7074 = vmatmul.bf16.gmra.mxu0 %v6874_v49 }
 0xbef   :  { %v13852_v61 = vpop.eup %8786  ;;  %8790 = vpow2.f32 %v6649_v54  ;;  %v6743_v31 = vadd.f32 %v13850_v34, %v13848_v16  ;;  %v5880_v54 = vadd.f32 %v13078_v53, %v4433_v24  ;;  %v15673_v53 = vld [vmem:[#allocation125_spill] sm:$0xff] }
 0xbf0   :  { %v13856_v29 = vpop.eup %8788  ;;  %8792 = vpow2.f32 %v6651_v21 }
 0xbf1   :  { %6744 = vadd.xlane.f32.xlu0 %v6743_v31  ;;  %v6746_v25 = vadd.f32 %v13856_v29, %v13852_v61  ;;  %8794 = vrcp.f32 %v13817_v33 }
 0xbf3   :  { %6747 = vadd.xlane.f32.xlu2 %v6746_v25 }
 0xbf5   :  { %v13860_v22 = vpop.eup %8790 }
 0xbf6   :  { %v13862_v37 = vpop.eup %8792 }
 0xbf7   :  { %v6749_v0 = vadd.f32 %v13862_v37, %v13860_v22  ;;  %v8795_v40 = vpop.eup %8794 }
 0xbf8   :  { %v6830_v2 = vmul.f32 %v8795_v40, %v13691_v6  ;;  %v8840_v6 = vld [vmem:[%s14430_s0] sm:$0xff] }
 0xbf9   :  { %6750 = vadd.xlane.f32.xlu1 %v6749_v0  ;;  %v15672_v0 = vld [vmem:[#allocation106_spill] sm:$0xff] }
 0xc02   :  { %v7200_v20 = vpop.f32.mrf.mxu1 }
 0xc03   :  { %v7280_v38 = vadd.f32 %v7200_v20, %v13037_v27  ;;  %v6829_v27 = vmul.f32 %v8795_v40, %v13686_v59  ;;  %v4438_v20 = vadd.f32 %v15673_v53, %v15672_v0 }
 0xc05   :  { %v7316_v44 = vadd.f32 %v13871_v3, %v7280_v38 }
 0xc0a   :  { %v7202_v9 = vpop.f32.mrf.mxu1 }
 0xc2b   :  { %v7055_v8 = vpop.f32.mrf.mxu0 }
 0xc31   :  { %v6966_v60 = vpop.f32.mrf.mxu3 }
 0xc32   :  { %v7056_v51 = vadd.f32 %v7055_v8, %v6966_v60  ;;  %v5882_v60 = vadd.f32 %v13095_v30, %v4438_v20  ;;  %v8842_v30 = vld [vmem:[%s14430_s0 + $0x8] sm:$0xff] }
 0xc33   :  { %v7057_v4 = vpop.f32.mrf.mxu0 }
 0xc34   :  { %v6724_v62 = vpop.xlane.xlu1 %6723 }
 0xc35   :  { %8796 = vrcp.f32 %v6724_v62 }
 0xc39   :  { %v6968_v52 = vpop.f32.mrf.mxu3 }
 0xc3a   :  { %v7058_v19 = vadd.f32 %v7057_v4, %v6968_v52 }
 0xc3b   :  { %v8797_v46 = vpop.eup %8796  ;;  %v7060_v58 = vpop.f32.mrf.mxu0 }
 0xc3c   :  { %v7119_v26 = vpack.c.bf16 %v7058_v19, %v7056_v51  ;;  %v6727_v13 = vpop.xlane.xlu1 %6726  ;;  %v7205_v33 = vpop.f32.mrf.mxu1  ;;  %v6831_v12 = vmul.f32 %v8797_v46, %v13763_v42  ;;  %v6832_v15 = vmul.f32 %v8797_v46, %v13765_v41  ;;  %v13887_v42 = vadd.f32 %v8840_v6, %v7316_v44 }
 0xc3d   :  { %v7282_v7 = vadd.f32 %v7205_v33, %v13088_v39  ;;  %v7281_v41 = vadd.f32 %v7202_v9, %v5880_v54  ;;  %v8841_v39 = vld [vmem:[%s14430_s0 + $0x10] sm:$0xff]  ;;  %8798 = vrcp.f32 %v6727_v13 }
 0xc3e   :  { %8008 = vmatmul.msk.bf16.gmra.mxu1 %vm1787_vm2, %v7119_v26  ;;  %v6875_v49 = vpack.c.bf16 %v6831_v12, %v6829_v27  ;;  %v6876_v59 = vpack.c.bf16 %v6832_v15, %v6830_v2 }
 0xc3f   :  { %v7318_v21 = vadd.f32 %v13871_v3, %v7282_v7  ;;  %v7317_v9 = vadd.f32 %v13871_v3, %v7281_v41 }
 0xc40   :  { %6990 = vmatmul.bf16.gmra.mxu3 %v6875_v49  ;;  %7079 = vmatmul.bf16.gmra.mxu0 %v6876_v59 }
 0xc41   :  { %v13892_v31 = vadd.f32 %v8841_v39, %v7318_v21  ;;  %v6971_v25 = vpop.f32.mrf.mxu3  ;;  %v13906_v33 = vadd.f32 %v8842_v30, %v7317_v9 }
 0xc42   :  { %v7061_v2 = vadd.f32 %v7060_v58, %v6971_v25  ;;  %v15674_v25 = vld [vmem:[#allocation89_spill] sm:$0xff] }
 0xc43   :  { %v7380_v38 = vadd.f32 %v13892_v31, %v13887_v42  ;;  %v7062_v8 = vpop.f32.mrf.mxu0  ;;  %v8799_v26 = vpop.eup %8798 }
 0xc44   :  { %v6730_v4 = vpop.xlane.xlu0 %6729  ;;  %v6466_v62 = vpop.xlane.xlu1 %6465  ;;  %v6833_v24 = vmul.f32 %v8799_v26, %v13773_v14  ;;  %v6834_v44 = vmul.f32 %v8799_v26, %v13775_v17 }
 0xc45   :  { %8800 = vrcp.f32 %v6730_v4  ;;  %v6531_v40 = vsub.f32 %v13791_v50, %v6466_v62  ;;  %v6532_v52 = vsub.f32 %v13784_v56, %v6466_v62  ;;  %v7207_v51 = vpop.f32.mrf.mxu1  ;;  %v8843_v56 = vld [vmem:[%s14430_s0 + $0x18] sm:$0xff]  ;;  %v15675_v4 = vld [vmem:[#allocation93_spill] sm:$0xff] }
 0xc46   :  { %v7283_v19 = vadd.f32 %v7207_v51, %v5882_v60  ;;  %v15676_v62 = vld [vmem:[#allocation161_spill] sm:$0xff] }
 0xc47   :  { %v6653_v46 = vmul.f32 1.442695, %v6531_v40  ;;  %v6655_v27 = vmul.f32 1.442695, %v6532_v52  ;;  %v4443_v9 = vadd.f32 %v15676_v62, %v15675_v4  ;;  %v8844_v40 = vld [vmem:[%s14430_s0 + $0x20] sm:$0xff]  ;;  %v15680_v62 = vld [vmem:[#allocation163_spill] sm:$0xff] }
 0xc48   :  { %v7319_v13 = vadd.f32 %v13871_v3, %v7283_v19  ;;  %v15677_v19 = vld [vmem:[#allocation45_spill] sm:$0xff]  ;;  %v15679_v4 = vld [vmem:[#allocation144_spill] sm:$0xff] }
 0xc49   :  { %8802 = vpow2.f32 %v6653_v46  ;;  %v6973_v12 = vpop.f32.mrf.mxu3  ;;  %v5884_v46 = vadd.f32 %v15677_v19, %v4443_v9  ;;  %v4448_v9 = vadd.f32 %v15680_v62, %v15679_v4  ;;  %v15681_v19 = vld [vmem:[#allocation153_spill] sm:$0xff]  ;;  %v15682_v62 = vld [vmem:[#allocation87_spill] sm:$0xff] }
 0xc4a   :  { %8804 = vpow2.f32 %v6655_v27  ;;  %v13911_v50 = vadd.f32 %v8843_v56, %v7319_v13  ;;  %v7063_v15 = vadd.f32 %v7062_v8, %v6973_v12 }
 0xc4b   :  { %v8801_v28 = vpop.eup %8800  ;;  %v7065_v1 = vpop.f32.mrf.mxu0 }
 0xc4c   :  { %v7395_v7 = vadd.f32 %v13911_v50, %v13906_v33  ;;  %v7120_v49 = vpack.c.bf16 %v7063_v15, %v7061_v2  ;;  %v6733_v59 = vpop.xlane.xlu0 %6732  ;;  %v6469_v58 = vpop.xlane.xlu1 %6468  ;;  %v6835_v54 = vmul.f32 %v8801_v28, %v13788_v10  ;;  %v6836_v21 = vmul.f32 %v8801_v28, %v13793_v63 }
 0xc4d   :  { %v6533_v6 = vsub.f32 %v13807_v11, %v6469_v58  ;;  %v6534_v41 = vsub.f32 %v13802_v57, %v6469_v58  ;;  %v7210_v39 = vpop.f32.mrf.mxu1  ;;  %v6736_v10 = vpop.xlane.xlu2 %6735  ;;  %8806 = vrcp.f32 %v6733_v59 }
 0xc4e   :  { %v7284_v0 = vadd.f32 %v7210_v39, %v15674_v25  ;;  %8009 = vmatmul.msk.bf16.gmra.mxu1 %vm1787_vm2, %v7120_v49  ;;  %v6877_v14 = vpack.c.bf16 %v6835_v54, %v6833_v24  ;;  %v6878_v17 = vpack.c.bf16 %v6836_v21, %v6834_v44  ;;  %v8845_v54 = vld [vmem:[%s14430_s0 + $0x28] sm:$0xff] }
 0xc4f   :  { %v13923_v53 = vpop.eup %8802  ;;  %v6657_v20 = vmul.f32 1.442695, %v6533_v6  ;;  %v6659_v8 = vmul.f32 1.442695, %v6534_v41 }
 0xc50   :  { %v13925_v60 = vpop.eup %8804  ;;  %v7320_v63 = vadd.f32 %v13871_v3, %v7284_v0  ;;  %6995 = vmatmul.bf16.gmra.mxu3 %v6877_v14  ;;  %7084 = vmatmul.bf16.gmra.mxu0 %v6878_v17 }
 0xc51   :  { %8808 = vpow2.f32 %v6657_v20  ;;  %v6976_v57 = vpop.f32.mrf.mxu3  ;;  %v6752_v11 = vadd.f32 %v13925_v60, %v13923_v53  ;;  %v15678_v20 = vld [vmem:[#allocation76_spill] sm:$0xff] }
 0xc52   :  { %8810 = vpow2.f32 %v6659_v8  ;;  %v13935_v52 = vadd.f32 %v8844_v40, %v7320_v63  ;;  %v7066_v58 = vadd.f32 %v7065_v1, %v6976_v57  ;;  %v8846_v40 = vld [vmem:[%s14430_s0 + $0x30] sm:$0xff] }
 0xc53   :  { %8812 = vrcp.f32 %v6736_v10  ;;  %6753 = vadd.xlane.f32.xlu0 %v6752_v11  ;;  %v7067_v51 = vpop.f32.mrf.mxu0  ;;  %v8807_v2 = vpop.eup %8806 }
 0xc54   :  { %v7381_v27 = vadd.f32 %v7380_v38, %v13935_v52  ;;  %v6472_v26 = vpop.xlane.xlu0 %6471  ;;  %v6838_v41 = vmul.f32 %v8807_v2, %v13809_v35 }
 0xc55   :  { %v6535_v13 = vsub.f32 %v13827_v23, %v6472_v26  ;;  %v6536_v30 = vsub.f32 %v13822_v55, %v6472_v26  ;;  %v7212_v12 = vpop.f32.mrf.mxu1  ;;  %v6837_v55 = vmul.f32 %v8807_v2, %v13804_v5  ;;  %v6739_v11 = vpop.xlane.xlu2 %6738 }
 0xc56   :  { %v7285_v56 = vadd.f32 %v7212_v12, %v5884_v46  ;;  %v5886_v46 = vadd.f32 %v15681_v19, %v4448_v9  ;;  %v15684_v19 = vld [vmem:[#allocation159_spill] sm:$0xff] }
 0xc57   :  { %v13941_v15 = vpop.eup %8808  ;;  %v6661_v28 = vmul.f32 1.442695, %v6535_v13  ;;  %v6663_v24 = vmul.f32 1.442695, %v6536_v30 }
 0xc58   :  { %v13943_v44 = vpop.eup %8810  ;;  %v7321_v49 = vadd.f32 %v13871_v3, %v7285_v56 }
 0xc59   :  { %v8813_v59 = vpop.eup %8812  ;;  %8814 = vpow2.f32 %v6661_v28  ;;  %v6978_v38 = vpop.f32.mrf.mxu3  ;;  %v6755_v23 = vadd.f32 %v13943_v44, %v13941_v15 }
 0xc5a   :  { %8816 = vpow2.f32 %v6663_v24  ;;  %v13952_v21 = vadd.f32 %v8845_v54, %v7321_v49  ;;  %v7068_v6 = vadd.f32 %v7067_v51, %v6978_v38  ;;  %v6839_v0 = vmul.f32 %v8813_v59, %v13739_v45 }
 0xc5b   :  { %6756 = vadd.xlane.f32.xlu2 %v6755_v23  ;;  %v7070_v39 = vpop.f32.mrf.mxu0  ;;  %v6840_v14 = vmul.f32 %v8813_v59, %v13741_v36  ;;  %v8847_v59 = vld [vmem:[%s14430_s0 + $0x38] sm:$0xff] }
 0xc5c   :  { %v7396_v1 = vadd.f32 %v7395_v7, %v13952_v21  ;;  %v7121_v25 = vpack.c.bf16 %v7068_v6, %v7066_v58  ;;  %v6742_v17 = vpop.xlane.xlu1 %6741  ;;  %v6879_v10 = vpack.c.bf16 %v6839_v0, %v6837_v55 }
 0xc5d   :  { %v7215_v5 = vpop.f32.mrf.mxu1  ;;  %v6880_v63 = vpack.c.bf16 %v6840_v14, %v6838_v41  ;;  %8818 = vrcp.f32 %v6742_v17 }
 0xc5e   :  { %v7286_v8 = vadd.f32 %v7215_v5, %v15678_v20  ;;  %8010 = vmatmul.msk.bf16.gmra.mxu1 %vm1787_vm2, %v7121_v25  ;;  %8820 = vrcp.f32 %v6739_v11 }
 0xc5f   :  { %v13960_v57 = vpop.eup %8814 }
 0xc60   :  { %v13962_v35 = vpop.eup %8816  ;;  %v7322_v7 = vadd.f32 %v13871_v3, %v7286_v8  ;;  %7000 = vmatmul.bf16.gmra.mxu3 %v6879_v10  ;;  %7089 = vmatmul.bf16.gmra.mxu0 %v6880_v63 }
 0xc61   :  { %v6758_v45 = vadd.f32 %v13962_v35, %v13960_v57  ;;  %v6981_v36 = vpop.f32.mrf.mxu3 }
 0xc62   :  { %v13972_v51 = vadd.f32 %v8846_v40, %v7322_v7  ;;  %v7071_v24 = vadd.f32 %v7070_v39, %v6981_v36 }
 0xc63   :  { %6759 = vadd.xlane.f32.xlu1 %v6758_v45  ;;  %v7072_v13 = vpop.f32.mrf.mxu0  ;;  %v8819_v2 = vpop.eup %8818 }
 0xc64   :  { %v7382_v26 = vadd.f32 %v7381_v27, %v13972_v51  ;;  %v8821_v28 = vpop.eup %8820  ;;  %v6843_v23 = vmul.f32 %v8819_v2, %v13836_v47  ;;  %v6844_v27 = vmul.f32 %v8819_v2, %v13838_v18  ;;  %v6745_v39 = vpop.xlane.xlu0 %6744 }
 0xc65   :  { %v7217_v30 = vpop.f32.mrf.mxu1  ;;  %v6841_v6 = vmul.f32 %v8821_v28, %v13749_v48  ;;  %v6842_v41 = vmul.f32 %v8821_v28, %v13751_v32  ;;  %8822 = vrcp.f32 %v6745_v39 }
 0xc66   :  { %v7287_v12 = vadd.f32 %v7217_v30, %v5886_v46  ;;  %v6748_v25 = vpop.xlane.xlu2 %6747  ;;  %v15685_v30 = vld [vmem:[#allocation171_spill] sm:$0xff] }
 0xc67   :  { %v6881_v0 = vpack.c.bf16 %v6843_v23, %v6841_v6  ;;  %v6882_v14 = vpack.c.bf16 %v6844_v27, %v6842_v41  ;;  %8824 = vrcp.f32 %v6748_v25  ;;  %v8849_v23 = vld [vmem:[%s14430_s0 + $0x48] sm:$0xff] }
 0xc68   :  { %v7323_v56 = vadd.f32 %v13871_v3, %v7287_v12 }
 0xc69   :  { %v6983_v49 = vpop.f32.mrf.mxu3 }
 0xc6a   :  { %v13980_v58 = vadd.f32 %v8847_v59, %v7323_v56  ;;  %v7073_v38 = vadd.f32 %v7072_v13, %v6983_v49 }
 0xc6b   :  { %v7075_v5 = vpop.f32.mrf.mxu0  ;;  %v8823_v18 = vpop.eup %8822 }
 0xc6c   :  { %v7397_v55 = vadd.f32 %v7396_v1, %v13980_v58  ;;  %v7122_v54 = vpack.c.bf16 %v7073_v38, %v7071_v24  ;;  %v6845_v48 = vmul.f32 %v8823_v18, %v13848_v16  ;;  %v6846_v32 = vmul.f32 %v8823_v18, %v13850_v34  ;;  %v15683_v34 = vld [vmem:[#allocation94_spill] sm:$0xff]  ;;  %v6751_v13 = vpop.xlane.xlu1 %6750 }
 0xc6d   :  { %v8825_v17 = vpop.eup %8824  ;;  %v4453_v46 = vadd.f32 %v15684_v19, %v15683_v34  ;;  %8826 = vrcp.f32 %v6751_v13  ;;  %v8851_v34 = vld [vmem:[%s14430_s0 + $0x58] sm:$0xff] }
 0xc6e   :  { %8011 = vmatmul.msk.bf16.gmra.mxu1 %vm1787_vm2, %v7122_v54  ;;  %v6847_v63 = vmul.f32 %v8825_v17, %v13852_v61  ;;  %v6848_v11 = vmul.f32 %v8825_v17, %v13856_v29  ;;  %v8848_v61 = vld [vmem:[%s14430_s0 + $0x40] sm:$0xff] }
 0xc6f   :  { %v5888_v12 = vadd.f32 %v15685_v30, %v4453_v46 }
 0xc70   :  { %7005 = vmatmul.bf16.gmra.mxu3 %v6881_v0  ;;  %7094 = vmatmul.bf16.gmra.mxu0 %v6882_v14  ;;  %v6883_v45 = vpack.c.bf16 %v6847_v63, %v6845_v48  ;;  %v6884_v36 = vpack.c.bf16 %v6848_v11, %v6846_v32  ;;  %v15686_v0 = vld [vmem:[#allocation133_spill] sm:$0xff]  ;;  %v8850_v63 = vld [vmem:[%s14430_s0 + $0x50] sm:$0xff] }
 0xc71   :  { %v6986_v47 = vpop.f32.mrf.mxu3 }
 0xc72   :  { %v7076_v8 = vadd.f32 %v7075_v5, %v6986_v47 }
 0xc73   :  { %v7077_v1 = vpop.f32.mrf.mxu0  ;;  %v8827_v54 = vpop.eup %8826 }
 0xc74   :  { %v6849_v18 = vmul.f32 %v8827_v54, %v13860_v22  ;;  %v6850_v17 = vmul.f32 %v8827_v54, %v13862_v37 }
 0xc79   :  { %v6988_v20 = vpop.f32.mrf.mxu3 }
 0xc7a   :  { %v7078_v10 = vadd.f32 %v7077_v1, %v6988_v20 }
 0xc7c   :  { %v7123_v7 = vpack.c.bf16 %v7078_v10, %v7076_v8  ;;  %v15688_v8 = vld [vmem:[#allocation166_spill] sm:$0xff] }
 0xc7e   :  { %8012 = vmatmul.msk.bf16.gmra.mxu1 %vm1787_vm2, %v7123_v7 }
 0xc80   :  { %7010 = vmatmul.bf16.gmra.mxu3 %v6883_v45  ;;  %7099 = vmatmul.bf16.gmra.mxu0 %v6884_v36  ;;  %v15689_v45 = vld [vmem:[#allocation64_spill] sm:$0xff] }
 0xcbb   :  { %v7220_v4 = vpop.f32.mrf.mxu1 }
 0xcbc   :  { %v7288_v9 = vadd.f32 %v7220_v4, %v15682_v62 }
 0xcbd   :  { %v7080_v40 = vpop.f32.mrf.mxu0 }
 0xcbe   :  { %v7324_v16 = vadd.f32 %v13871_v3, %v7288_v9 }
 0xcc0   :  { %v14000_v29 = vadd.f32 %v8848_v61, %v7324_v16 }
 0xcc2   :  { %v7383_v2 = vadd.f32 %v7382_v26, %v14000_v29 }
 0xcc3   :  { %v6991_v56 = vpop.f32.mrf.mxu3  ;;  %v7222_v28 = vpop.f32.mrf.mxu1 }
 0xcc4   :  { %v7289_v24 = vadd.f32 %v7222_v28, %v5888_v12  ;;  %v7081_v39 = vadd.f32 %v7080_v40, %v6991_v56  ;;  %v15690_v56 = vld [vmem:[#allocation143_spill] sm:$0xff] }
 0xcc5   :  { %v7082_v49 = vpop.f32.mrf.mxu0 }
 0xcc6   :  { %v7325_v59 = vadd.f32 %v13871_v3, %v7289_v24  ;;  %v6754_v38 = vpop.xlane.xlu0 %6753 }
 0xcc7   :  { %8828 = vrcp.f32 %v6754_v38 }
 0xcc8   :  { %v14008_v27 = vadd.f32 %v8849_v23, %v7325_v59 }
 0xcca   :  { %v7398_v6 = vadd.f32 %v7397_v55, %v14008_v27  ;;  %v15687_v55 = vld [vmem:[#allocation165_spill] sm:$0xff] }
 0xccb   :  { %v6993_v41 = vpop.f32.mrf.mxu3  ;;  %v7225_v26 = vpop.f32.mrf.mxu1  ;;  %v4458_v10 = vadd.f32 %v15688_v8, %v15687_v55 }
 0xccc   :  { %v7083_v25 = vadd.f32 %v7082_v49, %v6993_v41  ;;  %v7290_v14 = vadd.f32 %v7225_v26, %v15686_v0  ;;  %v8852_v0 = vld [vmem:[%s14430_s0 + $0x60] sm:$0xff] }
 0xccd   :  { %v8829_v5 = vpop.eup %8828  ;;  %v7085_v47 = vpop.f32.mrf.mxu0  ;;  %v5890_v36 = vadd.f32 %v15689_v45, %v4458_v10 }
 0xcce   :  { %v7124_v1 = vpack.c.bf16 %v7083_v25, %v7081_v39  ;;  %v7326_v20 = vadd.f32 %v13871_v3, %v7290_v14  ;;  %v6851_v48 = vmul.f32 %v8829_v5, %v13923_v53  ;;  %v6852_v32 = vmul.f32 %v8829_v5, %v13925_v60  ;;  %v6757_v7 = vpop.xlane.xlu2 %6756  ;;  %v15692_v39 = vld [vmem:[#allocation169_spill] sm:$0xff]  ;;  %v15693_v5 = vld [vmem:[#allocation88_spill] sm:$0xff] }
 0xccf   :  { %8830 = vrcp.f32 %v6757_v7 }
 0xcd0   :  { %v14022_v11 = vadd.f32 %v8850_v63, %v7326_v20  ;;  %8013 = vmatmul.msk.bf16.gmra.mxu1 %vm1787_vm2, %v7124_v1  ;;  %v6885_v22 = vpack.c.bf16 %v6851_v48, %v6849_v18  ;;  %v6886_v37 = vpack.c.bf16 %v6852_v32, %v6850_v17  ;;  %v8853_v48 = vld [vmem:[%s14430_s0 + $0x68] sm:$0xff] }
 0xcd2   :  { %v7384_v53 = vadd.f32 %v7383_v2, %v14022_v11  ;;  %7015 = vmatmul.bf16.gmra.mxu3 %v6885_v22  ;;  %7104 = vmatmul.bf16.gmra.mxu0 %v6886_v37  ;;  %v15694_v37 = vld [vmem:[#allocation13_spill] sm:$0xff] }
 0xcd3   :  { %v6996_v60 = vpop.f32.mrf.mxu3  ;;  %v7227_v4 = vpop.f32.mrf.mxu1 }
 0xcd4   :  { %v7291_v62 = vadd.f32 %v7227_v4, %v5890_v36  ;;  %v7086_v12 = vadd.f32 %v7085_v47, %v6996_v60  ;;  %v15695_v60 = vld [vmem:[#allocation175_spill] sm:$0xff] }
 0xcd5   :  { %v7087_v9 = vpop.f32.mrf.mxu0  ;;  %v8831_v46 = vpop.eup %8830  ;;  %v15696_v4 = vld [vmem:[#allocation111_spill] sm:$0xff] }
 0xcd6   :  { %v7327_v40 = vadd.f32 %v13871_v3, %v7291_v62  ;;  %v6760_v16 = vpop.xlane.xlu1 %6759  ;;  %v6853_v59 = vmul.f32 %v8831_v46, %v13941_v15  ;;  %v6854_v38 = vmul.f32 %v8831_v46, %v13943_v44  ;;  %v4468_v62 = vadd.f32 %v15696_v4, %v15695_v60 }
 0xcd7   :  { %8832 = vrcp.f32 %v6760_v16  ;;  %v15697_v16 = vld [vmem:[#allocation40_spill] sm:$0xff] }
 0xcd8   :  { %v14031_v19 = vadd.f32 %v8851_v34, %v7327_v40  ;;  %v5894_v34 = vadd.f32 %v15697_v16, %v4468_v62  ;;  %v8857_v62 = vld [vmem:[%s14430_s0 + $0x90] sm:$0xff] }
 0xcd9   :  { %v15705_v16 = vld [vmem:[#allocation42_spill] sm:$0xff] }
 0xcda   :  { %v7399_v61 = vadd.f32 %v7398_v6, %v14031_v19  ;;  %v15691_v6 = vld [vmem:[#allocation173_spill] sm:$0xff] }
 0xcdb   :  { %v6998_v13 = vpop.f32.mrf.mxu3  ;;  %v7230_v30 = vpop.f32.mrf.mxu1  ;;  %v4463_v25 = vadd.f32 %v15692_v39, %v15691_v6  ;;  %v8856_v39 = vld [vmem:[%s14430_s0 + $0x80] sm:$0xff] }
 0xcdc   :  { %v7088_v2 = vadd.f32 %v7087_v9, %v6998_v13  ;;  %v7292_v28 = vadd.f32 %v7230_v30, %v15690_v56  ;;  %v8854_v9 = vld [vmem:[%s14430_s0 + $0x70] sm:$0xff]  ;;  %v8855_v56 = vld [vmem:[%s14430_s0 + $0x78] sm:$0xff] }
 0xcdd   :  { %v8833_v24 = vpop.eup %8832  ;;  %v7090_v49 = vpop.f32.mrf.mxu0  ;;  %v5892_v47 = vadd.f32 %v15693_v5, %v4463_v25 }
 0xcde   :  { %v7125_v23 = vpack.c.bf16 %v7088_v2, %v7086_v12  ;;  %v7328_v54 = vadd.f32 %v13871_v3, %v7292_v28  ;;  %v6855_v41 = vmul.f32 %v8833_v24, %v13960_v57  ;;  %v6856_v26 = vmul.f32 %v8833_v24, %v13962_v35 }
 0xce0   :  { %v14045_v14 = vadd.f32 %v8852_v0, %v7328_v54  ;;  %8014 = vmatmul.msk.bf16.gmra.mxu1 %vm1787_vm2, %v7125_v23  ;;  %v6887_v15 = vpack.c.bf16 %v6855_v41, %v6853_v59  ;;  %v6888_v44 = vpack.c.bf16 %v6856_v26, %v6854_v38  ;;  %v15698_v54 = vld [vmem:[#allocation58_spill] sm:$0xff] }
 0xce2   :  { %v7385_v18 = vadd.f32 %v7384_v53, %v14045_v14  ;;  %7020 = vmatmul.bf16.gmra.mxu3 %v6887_v15  ;;  %7109 = vmatmul.bf16.gmra.mxu0 %v6888_v44 }
 0xce3   :  { %v7001_v57 = vpop.f32.mrf.mxu3  ;;  %v7232_v35 = vpop.f32.mrf.mxu1 }
 0xce4   :  { %v7293_v17 = vadd.f32 %v7232_v35, %v5892_v47  ;;  %v7091_v63 = vadd.f32 %v7090_v49, %v7001_v57 }
 0xce5   :  { %v7092_v1 = vpop.f32.mrf.mxu0 }
 0xce6   :  { %v7329_v20 = vadd.f32 %v13871_v3, %v7293_v17 }
 0xce8   :  { %v14054_v32 = vadd.f32 %v8853_v48, %v7329_v20  ;;  %v15700_v20 = vld [vmem:[#allocation158_spill] sm:$0xff] }
 0xcea   :  { %v7400_v55 = vadd.f32 %v7399_v61, %v14054_v32 }
 0xceb   :  { %v7003_v8 = vpop.f32.mrf.mxu3  ;;  %v7235_v10 = vpop.f32.mrf.mxu1 }
 0xcec   :  { %v7093_v22 = vadd.f32 %v7092_v1, %v7003_v8  ;;  %v7294_v7 = vadd.f32 %v7235_v10, %v15694_v37  ;;  %v15699_v1 = vld [vmem:[#allocation138_spill] sm:$0xff] }
 0xced   :  { %v7095_v45 = vpop.f32.mrf.mxu0  ;;  %v4473_v48 = vadd.f32 %v15700_v20, %v15699_v1  ;;  %v15709_v1 = vld [vmem:[#allocation172_spill] sm:$0xff] }
 0xcee   :  { %v7126_v36 = vpack.c.bf16 %v7093_v22, %v7091_v63  ;;  %v7330_v53 = vadd.f32 %v13871_v3, %v7294_v7  ;;  %v15702_v22 = vld [vmem:[#allocation152_spill] sm:$0xff] }
 0xcf0   :  { %v14064_v40 = vadd.f32 %v8854_v9, %v7330_v53  ;;  %8015 = vmatmul.msk.bf16.gmra.mxu1 %vm1787_vm2, %v7126_v36  ;;  %v15703_v36 = vld [vmem:[#allocation97_spill] sm:$0xff]  ;;  %v15704_v53 = vld [vmem:[#allocation127_spill] sm:$0xff] }
 0xcf1   :  { %v4478_v60 = vadd.f32 %v15704_v53, %v15703_v36 }
 0xcf2   :  { %v7386_v46 = vadd.f32 %v7385_v18, %v14064_v40 }
 0xcf3   :  { %v7006_v61 = vpop.f32.mrf.mxu3  ;;  %v7237_v13 = vpop.f32.mrf.mxu1 }
 0xcf4   :  { %v7295_v30 = vadd.f32 %v7237_v13, %v5894_v34  ;;  %v7096_v38 = vadd.f32 %v7095_v45, %v7006_v61  ;;  %v5898_v34 = vadd.f32 %v15705_v16, %v4478_v60 }
 0xcf5   :  { %v7097_v2 = vpop.f32.mrf.mxu0 }
 0xcf6   :  { %v7331_v12 = vadd.f32 %v13871_v3, %v7295_v30  ;;  %v8858_v30 = vld [vmem:[%s14430_s0 + $0x88] sm:$0xff] }
 0xcf8   :  { %v14073_v28 = vadd.f32 %v8855_v56, %v7331_v12 }
 0xcfa   :  { %v7401_v24 = vadd.f32 %v7400_v55, %v14073_v28  ;;  %v15701_v55 = vld [vmem:[#allocation156_spill] sm:$0xff] }
 0xcfb   :  { %v7008_v49 = vpop.f32.mrf.mxu3  ;;  %v7240_v59 = vpop.f32.mrf.mxu1  ;;  %v5896_v8 = vadd.f32 %v15701_v55, %v4473_v48 }
 0xcfc   :  { %v7098_v23 = vadd.f32 %v7097_v2, %v7008_v49  ;;  %v7296_v41 = vadd.f32 %v7240_v59, %v15698_v54 }
 0xcfd   :  { %v7100_v0 = vpop.f32.mrf.mxu0 }
 0xcfe   :  { %v7127_v26 = vpack.c.bf16 %v7098_v23, %v7096_v38  ;;  %v7332_v6 = vadd.f32 %v13871_v3, %v7296_v41  ;;  %v8859_v38 = vld [vmem:[%s14430_s0 + $0x98] sm:$0xff] }
 0xd00   :  { %v14081_v25 = vadd.f32 %v8856_v39, %v7332_v6  ;;  %8016 = vmatmul.msk.bf16.gmra.mxu1 %vm1787_vm2, %v7127_v26 }
 0xd02   :  { %v7387_v15 = vadd.f32 %v7386_v46, %v14081_v25 }
 0xd03   :  { %v7011_v44 = vpop.f32.mrf.mxu3  ;;  %v7242_v17 = vpop.f32.mrf.mxu1 }
 0xd04   :  { %v7101_v18 = vadd.f32 %v7100_v0, %v7011_v44  ;;  %v7297_v63 = vadd.f32 %v7242_v17, %v5896_v8  ;;  %v15706_v0 = vld [vmem:[#allocation11_spill] sm:$0xff] }
 0xd05   :  { %v7102_v5 = vpop.f32.mrf.mxu0 }
 0xd06   :  { %v7333_v4 = vadd.f32 %v13871_v3, %v7297_v63 }
 0xd08   :  { %v14104_v12 = vadd.f32 %v8858_v30, %v7333_v4 }
 0xd0a   :  { %v7402_v59 = vadd.f32 %v7401_v24, %v14104_v12 }
 0xd0b   :  { %v7013_v47 = vpop.f32.mrf.mxu3 }
 0xd0c   :  { %v7103_v57 = vadd.f32 %v7102_v5, %v7013_v47  ;;  %v15707_v47 = vld [vmem:[#allocation61_spill] sm:$0xff] }
 0xd0e   :  { %v7128_v35 = vpack.c.bf16 %v7103_v57, %v7101_v18  ;;  %v15708_v18 = vld [vmem:[#allocation31_spill] sm:$0xff]  ;;  %v8860_v57 = vld [vmem:[%s14430_s0 + $0xa0] sm:$0xff] }
 0xd0f   :  { %v4483_v24 = vadd.f32 %v15708_v18, %v15707_v47  ;;  %v8864_v18 = vld [vmem:[%s14430_s0 + $0xc0] sm:$0xff] }
 0xd10   :  { %8017 = vmatmul.msk.bf16.gmra.mxu1 %vm1787_vm2, %v7128_v35 }
 0xd11   :  { %v5900_v20 = vadd.f32 %v15709_v1, %v4483_v24 }
 0xd4d   :  { %v7245_v10 = vpop.f32.mrf.mxu1 }
 0xd4e   :  { %v7298_v37 = vadd.f32 %v7245_v10, %v15702_v22  ;;  %v8861_v22 = vld [vmem:[%s14430_s0 + $0xa8] sm:$0xff] }
 0xd4f   :  { %v7105_v7 = vpop.f32.mrf.mxu0 }
 0xd50   :  { %v7334_v45 = vadd.f32 %v13871_v3, %v7298_v37 }
 0xd52   :  { %v14097_v9 = vadd.f32 %v8857_v62, %v7334_v45  ;;  %v15710_v62 = vld [vmem:[#allocation174_spill] sm:$0xff] }
 0xd54   :  { %v7388_v46 = vadd.f32 %v7387_v15, %v14097_v9 }
 0xd55   :  { %v7016_v61 = vpop.f32.mrf.mxu3  ;;  %v7247_v13 = vpop.f32.mrf.mxu1 }
 0xd56   :  { %v7299_v2 = vadd.f32 %v7247_v13, %v5898_v34  ;;  %v7106_v6 = vadd.f32 %v7105_v7, %v7016_v61  ;;  %v15711_v61 = vld [vmem:[#allocation55_spill] sm:$0xff]  ;;  %v15712_v13 = vld [vmem:[#allocation28_spill] sm:$0xff] }
 0xd57   :  { %v7107_v49 = vpop.f32.mrf.mxu0  ;;  %v4488_v30 = vadd.f32 %v15712_v13, %v15711_v61 }
 0xd58   :  { %v7335_v56 = vadd.f32 %v13871_v3, %v7299_v2  ;;  %v8862_v2 = vld [vmem:[%s14430_s0 + $0xb0] sm:$0xff] }
 0xd5a   :  { %v14111_v23 = vadd.f32 %v8859_v38, %v7335_v56 }
 0xd5c   :  { %v7403_v54 = vadd.f32 %v7402_v59, %v14111_v23 }
 0xd5d   :  { %v7018_v41 = vpop.f32.mrf.mxu3  ;;  %v7250_v26 = vpop.f32.mrf.mxu1 }
 0xd5e   :  { %v7108_v39 = vadd.f32 %v7107_v49, %v7018_v41  ;;  %v7300_v15 = vadd.f32 %v7250_v26, %v15706_v0  ;;  %v15713_v49 = vld [vmem:[#allocation39_spill] sm:$0xff] }
 0xd5f   :  { %v7110_v17 = vpop.f32.mrf.mxu0  ;;  %v5902_v59 = vadd.f32 %v15713_v49, %v4488_v30  ;;  %v15717_v30 = vld [vmem:[#allocation48_spill] sm:$0xff] }
 0xd60   :  { %v7129_v44 = vpack.c.bf16 %v7108_v39, %v7106_v6  ;;  %v7336_v5 = vadd.f32 %v13871_v3, %v7300_v15  ;;  %v8863_v6 = vld [vmem:[%s14430_s0 + $0xb8] sm:$0xff] }
 0xd62   :  { %v14121_v35 = vadd.f32 %v8860_v57, %v7336_v5  ;;  %8018 = vmatmul.msk.bf16.gmra.mxu1 %vm1787_vm2, %v7129_v44  ;;  %v15714_v44 = vld [vmem:[#allocation59_spill] sm:$0xff] }
 0xd64   :  { %v7389_v48 = vadd.f32 %v7388_v46, %v14121_v35 }
 0xd65   :  { %v7021_v55 = vpop.f32.mrf.mxu3  ;;  %v7252_v8 = vpop.f32.mrf.mxu1 }
 0xd66   :  { %v7301_v10 = vadd.f32 %v7252_v8, %v5900_v20  ;;  %v7111_v60 = vadd.f32 %v7110_v17, %v7021_v55  ;;  %v15715_v20 = vld [vmem:[#allocation52_spill] sm:$0xff]  ;;  %v8865_v8 = vld [vmem:[%s14430_s0 + $0xd0] sm:$0xff] }
 0xd67   :  { %v7112_v45 = vpop.f32.mrf.mxu0 }
 0xd68   :  { %v7337_v63 = vadd.f32 %v13871_v3, %v7301_v10 }
 0xd6a   :  { %v14130_v37 = vadd.f32 %v8861_v22, %v7337_v63 }
 0xd6c   :  { %v7404_v7 = vadd.f32 %v7403_v54, %v14130_v37 }
 0xd6d   :  { %v7023_v36 = vpop.f32.mrf.mxu3  ;;  %v7255_v53 = vpop.f32.mrf.mxu1 }
 0xd6e   :  { %v7113_v4 = vadd.f32 %v7112_v45, %v7023_v36  ;;  %v7302_v16 = vadd.f32 %v7255_v53, %v15710_v62  ;;  %v15716_v36 = vld [vmem:[#allocation27_spill] sm:$0xff]  ;;  %v8866_v62 = vld [vmem:[%s14430_s0 + $0xe0] sm:$0xff] }
 0xd70   :  { %v7130_v34 = vpack.c.bf16 %v7113_v4, %v7111_v60  ;;  %v7338_v46 = vadd.f32 %v13871_v3, %v7302_v16 }
 0xd72   :  { %v14140_v56 = vadd.f32 %v8862_v2, %v7338_v46  ;;  %8019 = vmatmul.msk.bf16.gmra.mxu1 %vm1787_vm2, %v7130_v34  ;;  %v15718_v2 = vld [vmem:[#allocation51_spill] sm:$0xff] }
 0xd73   :  { %v4493_v49 = vadd.f32 %v15718_v2, %v15717_v30  ;;  %v15728_v30 = vld [vmem:[#allocation164_spill] sm:$0xff] }
 0xd74   :  { %v7390_v38 = vadd.f32 %v7389_v48, %v14140_v56 }
 0xd75   :  { %v7257_v54 = vpop.f32.mrf.mxu1 }
 0xd76   :  { %v7303_v41 = vadd.f32 %v7257_v54, %v5902_v59 }
 0xd78   :  { %v7339_v26 = vadd.f32 %v13871_v3, %v7303_v41 }
 0xd7a   :  { %v14149_v39 = vadd.f32 %v8863_v6, %v7339_v26  ;;  %v15720_v26 = vld [vmem:[#allocation49_spill] sm:$0xff] }
 0xd7c   :  { %v14152_v0 = vadd.f32 %v7404_v7, %v14149_v39  ;;  %v8931_v7 = vmov 16.0  }
 0xd7d   :  { %v7260_v15 = vpop.f32.mrf.mxu1  ;;  %8834 = vrcp.f32 %v8931_v7 }
 0xd7e   :  { %v7304_v5 = vadd.f32 %v7260_v15, %v15714_v44  ;;  %v15721_v15 = vld [vmem:[#allocation177_spill] sm:$0xff]  ;;  %v15722_v44 = vld [vmem:[#allocation176_spill] sm:$0xff] }
 0xd80   :  { %v7340_v47 = vadd.f32 %v13871_v3, %v7304_v5  ;;  %v4498_v5 = vadd.f32 %v15722_v44, %v15721_v15 }
 0xd82   :  { %v7372_v24 = vadd.f32 %v8864_v18, %v7340_v47  ;;  %v15723_v47 = vld [vmem:[#allocation178_spill] sm:$0xff]  ;;  %v15724_v18 = vld [vmem:[#allocation17_spill] sm:$0xff] }
 0xd83   :  { %v8835_v60 = vpop.eup %8834 }
 0xd84   :  { %v7391_v57 = vadd.f32 %v7390_v38, %v7372_v24  ;;  %v7411_v34 = vmul.f32 16.0, %v8835_v60  ;;  %v15719_v38 = vld [vmem:[#allocation46_spill] sm:$0xff]  ;;  %vm7415_vm2 = vweird.f32 %v8835_v60 }
 0xd85   :  { %v7262_v17 = vpop.f32.mrf.mxu1  ;;  %v5904_v54 = vadd.f32 %v15719_v38, %v4493_v49  ;;  %v8868_v38 = vld [vmem:[%s14430_s0 + $0xc8] sm:$0xff] }
 0xd86   :  { %v7412_v13 = vsub.f32 1.0, %v7411_v34 }
 0xd88   :  { %v7413_v59 = vmul.f32 %v8835_v60, %v7412_v13  ;;  %v15727_v13 = vld [vmem:[#allocation18_spill] sm:$0xff] }
 0xd89   :  { %v4508_v2 = vadd.f32 %v15728_v30, %v15727_v13 }
 0xd8d   :  { %v7265_v1 = vpop.f32.mrf.mxu1 }
 0xd8e   :  { %v7306_v48 = vadd.f32 %v7265_v1, %v15715_v20  ;;  %v7305_v1 = vadd.f32 %v7262_v17, %v5904_v54  ;;  %v7414_v20 = vadd.f32 %v8835_v60, %v7413_v59  ;;  %v5910_v59 = vadd.f32 %v13719_v43, %v4508_v2 }
 0xd90   :  { %v7342_v55 = vadd.f32 %v13871_v3, %v7306_v48  ;;  %v14184_v34 = vsel %vm7415_vm2, %v8835_v60, %v7414_v20 }
 0xd92   :  { %v7374_v10 = vadd.f32 %v8865_v8, %v7342_v55  ;;  %v15725_v55 = vld [vmem:[#allocation50_spill] sm:$0xff] }
 0xd93   :  { %v5906_v8 = vadd.f32 %v15725_v55, %v4498_v5 }
 0xd94   :  { %v7392_v63 = vadd.f32 %v7391_v57, %v7374_v10  ;;  %v4503_v57 = vadd.f32 %v15724_v18, %v15723_v47 }
 0xd95   :  { %v7267_v22 = vpop.f32.mrf.mxu1 }
 0xddf   :  { %v7270_v45 = vpop.f32.mrf.mxu1 }
 0xde0   :  { %v7308_v53 = vadd.f32 %v7270_v45, %v15716_v36  ;;  %v8867_v45 = vld [vmem:[%s14430_s0 + $0xf0] sm:$0xff] }
 0xde2   :  { %v7344_v4 = vadd.f32 %v13871_v3, %v7308_v53  ;;  %v7341_v53 = vadd.f32 %v13871_v3, %v7305_v1 }
 0xde4   :  { %v7376_v16 = vadd.f32 %v8866_v62, %v7344_v4  ;;  %v7307_v4 = vadd.f32 %v7267_v22, %v5906_v8  ;;  %v14193_v54 = vadd.f32 %v8868_v38, %v7341_v53  ;;  %v8871_v8 = vld [vmem:[%s14430_s0 + $0xf8] sm:$0xff] }
 0xde6   :  { %v7393_v46 = vadd.f32 %v7392_v63, %v7376_v16  ;;  %v15726_v63 = vld [vmem:[#allocation60_spill] sm:$0xff] }
 0xde7   :  { %v7272_v61 = vpop.f32.mrf.mxu1  ;;  %v5908_v7 = vadd.f32 %v15726_v63, %v4503_v57 }
 0xde9   :  { %v7309_v62 = vadd.f32 %v7272_v61, %v5908_v7 }
 0xdeb   :  { %v7345_v22 = vadd.f32 %v13871_v3, %v7309_v62 }
 0xdef   :  { %v7275_v41 = vpop.f32.mrf.mxu1 }
 0xdf0   :  { %v7310_v6 = vadd.f32 %v7275_v41, %v15720_v26  ;;  %v7343_v41 = vadd.f32 %v13871_v3, %v7307_v4 }
 0xdf2   :  { %v7346_v48 = vadd.f32 %v13871_v3, %v7310_v6 }
 0xdf4   :  { %v7378_v36 = vadd.f32 %v8867_v45, %v7346_v48 }
 0xdf6   :  { %v7394_v17 = vadd.f32 %v7393_v46, %v7378_v36 }
 0xdf8   :  { %v7417_v49 = vmul.f32 %v14184_v34, %v7394_v17 }
 0xdfa   :  { %v14198_v60 = vsub.f32 %v13887_v42, %v7417_v49  ;;  %v14201_v46 = vsub.f32 %v13892_v31, %v7417_v49  ;;  %v14204_v61 = vsub.f32 %v13935_v52, %v7417_v49  ;;  %v14207_v43 = vsub.f32 %v13972_v51, %v7417_v49  ;;  %v7277_v31 = vpop.f32.mrf.mxu1 }
 0xdfb   :  { %v14210_v26 = vsub.f32 %v14000_v29, %v7417_v49  ;;  %v14213_v6 = vsub.f32 %v14022_v11, %v7417_v49  ;;  %v14216_v15 = vsub.f32 %v14045_v14, %v7417_v49  ;;  %v14219_v42 = vsub.f32 %v14064_v40, %v7417_v49 }
 0xdfc   :  { %v14222_v44 = vsub.f32 %v14081_v25, %v7417_v49  ;;  %v14225_v52 = vsub.f32 %v14097_v9, %v7417_v49  ;;  %v14228_v51 = vsub.f32 %v14121_v35, %v7417_v49  ;;  %v14231_v29 = vsub.f32 %v14140_v56, %v7417_v49  ;;  %v8869_v25 = vld [vmem:[%s14430_s0 + $0xd8] sm:$0xff] }
 0xdfd   :  { %v14233_v11 = vsub.f32 %v7372_v24, %v7417_v49  ;;  %v14235_v14 = vsub.f32 %v7374_v10, %v7417_v49  ;;  %v14237_v5 = vsub.f32 %v7376_v16, %v7417_v49  ;;  %v14239_v40 = vsub.f32 %v7378_v36, %v7417_v49  ;;  %v8870_v16 = vld [vmem:[%s14430_s0 + $0xe8] sm:$0xff]  ;;  %s8932_s0 = smov [#allocation5]  }
 0xdfe   :  { %v14244_v9 = vadd.f32 %v8869_v25, %v7343_v41  ;;  %v7451_v35 = vmul.f32 %v14198_v60, %v14198_v60  ;;  %v7453_v56 = vmul.f32 %v14201_v46, %v14201_v46  ;;  %v7311_v24 = vadd.f32 %v7277_v31, %v5910_v59  ;;  %s7637_s12 = sshll.u32 %s8932_s0, 4  ;;  %s7638_s12 = int_to_ptr.vmem [resolvable:$true] %s7637_s12 }
 0xdff   :  { %v7406_v10 = vadd.f32 %v14152_v0, %v14193_v54  ;;  %v14255_v47 = vadd.f32 %v8870_v16, %v7345_v22  ;;  %v7455_v57 = vmul.f32 %v14204_v61, %v14204_v61  ;;  %v7457_v55 = vmul.f32 %v14207_v43, %v14207_v43 }
 0xe00   :  { %v7483_v1 = vadd.f32 %v7453_v56, %v7451_v35  ;;  %v7347_v20 = vadd.f32 %v13871_v3, %v7311_v24  ;;  %v7459_v7 = vmul.f32 %v14210_v26, %v14210_v26  ;;  %v7461_v3 = vmul.f32 %v14213_v6, %v14213_v6 }
 0xe01   :  { %v7407_v18 = vadd.f32 %v7406_v10, %v14244_v9  ;;  %v7463_v62 = vmul.f32 %v14216_v15, %v14216_v15  ;;  %v7467_v41 = vmul.f32 %v14222_v44, %v14222_v44  ;;  %v7473_v24 = vmul.f32 %v14231_v29, %v14231_v29 }
 0xe02   :  { %v7484_v0 = vadd.f32 %v7483_v1, %v7455_v57  ;;  %v14267_v63 = vadd.f32 %v8871_v8, %v7347_v20  ;;  %v7475_v57 = vmul.f32 %v14233_v11, %v14233_v11 }
 0xe03   :  { %v7408_v48 = vadd.f32 %v7407_v18, %v14255_v47 }
 0xe04   :  { %v7485_v45 = vadd.f32 %v7484_v0, %v7457_v55  ;;  %v7477_v55 = vmul.f32 %v14235_v14, %v14235_v14 }
 0xe05   :  { %v7409_v36 = vadd.f32 %v7408_v48, %v14267_v63 }
 0xe06   :  { %v7486_v53 = vadd.f32 %v7485_v45, %v7459_v7  ;;  %v7479_v45 = vmul.f32 %v14237_v5, %v14237_v5 }
 0xe07   :  { %v14275_v4 = vmul.f32 %v14184_v34, %v7409_v36 }
 0xe08   :  { %v7487_v17 = vadd.f32 %v7486_v53, %v7461_v3 }
 0xe09   :  { %v14281_v13 = vsub.f32 %v13906_v33, %v14275_v4  ;;  %v14285_v30 = vsub.f32 %v13911_v50, %v14275_v4  ;;  %v14289_v2 = vsub.f32 %v13952_v21, %v14275_v4  ;;  %v14293_v49 = vsub.f32 %v13980_v58, %v14275_v4 }
 0xe0a   :  { %v14297_v59 = vsub.f32 %v14008_v27, %v14275_v4  ;;  %v14301_v33 = vsub.f32 %v14031_v19, %v14275_v4  ;;  %v14305_v50 = vsub.f32 %v14054_v32, %v14275_v4  ;;  %v7465_v21 = vmul.f32 %v14219_v42, %v14219_v42 }
 0xe0b   :  { %v7488_v38 = vadd.f32 %v7487_v17, %v7463_v62  ;;  %v14311_v58 = vsub.f32 %v14073_v28, %v14275_v4  ;;  %v14315_v27 = vsub.f32 %v14111_v23, %v14275_v4  ;;  %v14319_v19 = vsub.f32 %v14130_v37, %v14275_v4 }
 0xe0c   :  { %v14323_v32 = vsub.f32 %v14149_v39, %v14275_v4  ;;  %v7452_v28 = vmul.f32 %v14281_v13, %v14281_v13  ;;  %v7454_v31 = vmul.f32 %v14285_v30, %v14285_v30  ;;  %v7469_v23 = vmul.f32 %v14225_v52, %v14225_v52 }
 0xe0d   :  { %v7489_v22 = vadd.f32 %v7488_v38, %v7465_v21  ;;  %v7471_v37 = vmul.f32 %v14228_v51, %v14228_v51  ;;  %v7456_v39 = vmul.f32 %v14289_v2, %v14289_v2  ;;  %v7458_v16 = vmul.f32 %v14293_v49, %v14293_v49 }
 0xe0e   :  { %v7498_v56 = vadd.f32 %v7454_v31, %v7452_v28  ;;  %v7460_v20 = vmul.f32 %v14297_v59, %v14297_v59  ;;  %v7462_v8 = vmul.f32 %v14301_v33, %v14301_v33  ;;  %v14353_v3 = vsub.f32 %v14104_v12, %v14275_v4 }
 0xe0f   :  { %v7490_v25 = vadd.f32 %v7489_v22, %v7467_v41  ;;  %v7464_v53 = vmul.f32 %v14305_v50, %v14305_v50  ;;  %v7481_v17 = vmul.f32 %v14239_v40, %v14239_v40  ;;  %v7466_v38 = vmul.f32 %v14311_v58, %v14311_v58 }
 0xe10   :  { %v7499_v18 = vadd.f32 %v7498_v56, %v7456_v39  ;;  %v7468_v28 = vmul.f32 %v14353_v3, %v14353_v3  ;;  %v7472_v39 = vmul.f32 %v14319_v19, %v14319_v19 }
 0xe11   :  { %v7491_v35 = vadd.f32 %v7490_v25, %v7469_v23  ;;  %v7470_v23 = vmul.f32 %v14315_v27, %v14315_v27 }
 0xe12   :  { %v7500_v48 = vadd.f32 %v7499_v18, %v7458_v16  ;;  %v14380_v18 = vsub.f32 %v14255_v47, %v14275_v4 }
 0xe13   :  { %v7492_v10 = vadd.f32 %v7491_v35, %v7471_v37  ;;  %v14368_v35 = vsub.f32 %v14193_v54, %v14275_v4 }
 0xe14   :  { %v7501_v7 = vadd.f32 %v7500_v48, %v7460_v20 }
 0xe15   :  { %v7493_v1 = vadd.f32 %v7492_v10, %v7473_v24  ;;  %v14374_v24 = vsub.f32 %v14244_v9, %v14275_v4  ;;  %v7474_v10 = vmul.f32 %v14323_v32, %v14323_v32  ;;  %v7476_v54 = vmul.f32 %v14368_v35, %v14368_v35 }
 0xe16   :  { %v7502_v62 = vadd.f32 %v7501_v7, %v7462_v8 }
 0xe17   :  { %v7494_v0 = vadd.f32 %v7493_v1, %v7475_v57  ;;  %v14386_v1 = vsub.f32 %v14267_v63, %v14275_v4  ;;  %v7478_v9 = vmul.f32 %v14374_v24, %v14374_v24 }
 0xe18   :  { %v7503_v41 = vadd.f32 %v7502_v62, %v7464_v53 }
 0xe19   :  { %v7495_v36 = vadd.f32 %v7494_v0, %v7477_v55  ;;  %v7480_v0 = vmul.f32 %v14380_v18, %v14380_v18  ;;  %v7482_v7 = vmul.f32 %v14386_v1, %v14386_v1 }
 0xe1a   :  { %v7504_v31 = vadd.f32 %v7503_v41, %v7466_v38 }
 0xe1b   :  { %v7496_v21 = vadd.f32 %v7495_v36, %v7479_v45 }
 0xe1c   :  { %v7505_v25 = vadd.f32 %v7504_v31, %v7468_v28 }
 0xe1d   :  { %v7497_v22 = vadd.f32 %v7496_v21, %v7481_v17 }
 0xe1e   :  { %v7506_v56 = vadd.f32 %v7505_v25, %v7470_v23 }
 0xe1f   :  { %v7513_v12 = vmul.f32 %v7497_v22, %v14184_v34 }
 0xe20   :  { %v7507_v16 = vadd.f32 %v7506_v56, %v7472_v39 }
 0xe21   :  { %v7515_v37 = vadd.f32 1e-05, %v7513_v12 }
 0xe22   :  { %v7508_v57 = vadd.f32 %v7507_v16, %v7474_v10 }
 0xe23   :  { %8836 = vrsqrt.f32 %v7515_v37  ;;  %vm7523_vm8 = vweird.f32 %v7515_v37 }
 0xe24   :  { %v7509_v20 = vadd.f32 %v7508_v57, %v7476_v54 }
 0xe26   :  { %v7510_v8 = vadd.f32 %v7509_v20, %v7478_v9 }
 0xe28   :  { %v7511_v45 = vadd.f32 %v7510_v8, %v7480_v0 }
 0xe29   :  { %v8837_v48 = vpop.eup %8836 }
 0xe2a   :  { %v7518_v55 = vmul.f32 %v8837_v48, %v7515_v37  ;;  %v7512_v53 = vadd.f32 %v7511_v45, %v7482_v7  ;;  %vm7524_vm7 = vweird.f32 %v8837_v48 }
 0xe2b   :  { %vm7525_vm9 = vmor %vm7523_vm8, %vm7524_vm7 }
 0xe2c   :  { %v7519_v47 = vmul.f32 %v8837_v48, %v7518_v55  ;;  %v7514_v63 = vmul.f32 %v7512_v53, %v14184_v34 }
 0xe2e   :  { %v7520_v36 = vmul.f32 0.5, %v7519_v47  ;;  %v7516_v17 = vadd.f32 1e-05, %v7514_v63 }
 0xe30   :  { %v7521_v62 = vsub.f32 1.5, %v7520_v36  ;;  %8838 = vrsqrt.f32 %v7516_v17  ;;  %vm7533_vm11 = vweird.f32 %v7516_v17 }
 0xe32   :  { %v7522_v4 = vmul.f32 %v8837_v48, %v7521_v62 }
 0xe34   :  { %v7526_v21 = vsel %vm7525_vm9, %v8837_v48, %v7522_v4 }
 0xe35   :  { %v7537_v38 = vmul.f32 %v7526_v21, %v14198_v60  ;;  %v7539_v41 = vmul.f32 %v7526_v21, %v14201_v46  ;;  %v7541_v22 = vmul.f32 %v7526_v21, %v14204_v61  ;;  %v7543_v28 = vmul.f32 %v7526_v21, %v14207_v43 }
 0xe36   :  { %v7545_v31 = vmul.f32 %v7526_v21, %v14210_v26  ;;  %v7547_v12 = vmul.f32 %v7526_v21, %v14213_v6  ;;  %v7549_v34 = vmul.f32 %v7526_v21, %v14216_v15  ;;  %v7551_v23 = vmul.f32 %v7526_v21, %v14219_v42  ;;  %v8839_v42 = vpop.eup %8838 }
 0xe37   :  { %v7553_v25 = vmul.f32 %v7526_v21, %v14222_v44  ;;  %v7555_v37 = vmul.f32 %v7526_v21, %v14225_v52  ;;  %v7557_v60 = vmul.f32 %v7526_v21, %v14228_v51  ;;  %v7559_v46 = vmul.f32 %v7526_v21, %v14231_v29 }
 0xe38   :  { %v7561_v61 = vmul.f32 %v7526_v21, %v14233_v11  ;;  %v7563_v43 = vmul.f32 %v7526_v21, %v14235_v14  ;;  %v7565_v26 = vmul.f32 %v7526_v21, %v14237_v5  ;;  %v7567_v6 = vmul.f32 %v7526_v21, %v14239_v40 }
 0xe39   :  { %v7569_v39 = vmax.f32 %v7537_v38, 0.0  ;;  %v7571_v15 = vmax.f32 %v7539_v41, 0.0  ;;  %v7573_v56 = vmax.f32 %v7541_v22, 0.0  ;;  %v7575_v10 = vmax.f32 %v7543_v28, 0.0 }
 0xe3a   :  { %v7577_v44 = vmax.f32 %v7545_v31, 0.0  ;;  %v7579_v52 = vmax.f32 %v7547_v12, 0.0  ;;  %v7581_v51 = vmax.f32 %v7549_v34, 0.0  ;;  %v7528_v29 = vmul.f32 %v8839_v42, %v7516_v17 }
 0xe3b   :  { %7601 = vst [vmem:[#allocation5] sm:$0xff] %v7569_v39  ;;  %v7583_v16 = vmax.f32 %v7551_v23, 0.0  ;;  %v7585_v11 = vmax.f32 %v7553_v25, 0.0  ;;  %v7587_v5 = vmax.f32 %v7555_v37, 0.0  ;;  %v7589_v40 = vmax.f32 %v7557_v60, 0.0 }
 0xe3c   :  { %7603 = vst [vmem:[#allocation5 + $0x10] sm:$0xff] %v7571_v15  ;;  %v7529_v14 = vmul.f32 %v8839_v42, %v7528_v29  ;;  %v7591_v57 = vmax.f32 %v7559_v46, 0.0  ;;  %v7593_v9 = vmax.f32 %v7561_v61, 0.0  ;;  %vm7534_vm10 = vweird.f32 %v8839_v42 }
 0xe3d   :  { %7605 = vst [vmem:[#allocation5 + $0x20] sm:$0xff] %v7573_v56  ;;  %v7595_v48 = vmax.f32 %v7563_v43, 0.0  ;;  %v7597_v55 = vmax.f32 %v7565_v26, 0.0  ;;  %v7599_v8 = vmax.f32 %v7567_v6, 0.0  ;;  %vm7535_vm12 = vmor %vm7533_vm11, %vm7534_vm10 }
 0xe3e   :  { %7607 = vst [vmem:[#allocation5 + $0x30] sm:$0xff] %v7575_v10  ;;  %v7530_v54 = vmul.f32 0.5, %v7529_v14 }
 0xe3f   :  { %7609 = vst [vmem:[#allocation5 + $0x40] sm:$0xff] %v7577_v44 }
 0xe40   :  { %7611 = vst [vmem:[#allocation5 + $0x50] sm:$0xff] %v7579_v52  ;;  %v7531_v20 = vsub.f32 1.5, %v7530_v54 }
 0xe41   :  { %7613 = vst [vmem:[#allocation5 + $0x60] sm:$0xff] %v7581_v51 }
 0xe42   :  { %7615 = vst [vmem:[#allocation5 + $0x70] sm:$0xff] %v7583_v16  ;;  %v7532_v0 = vmul.f32 %v8839_v42, %v7531_v20 }
 0xe43   :  { %7617 = vst [vmem:[#allocation5 + $0x80] sm:$0xff] %v7585_v11 }
 0xe44   :  { %7619 = vst [vmem:[#allocation5 + $0x90] sm:$0xff] %v7587_v5  ;;  %v7536_v47 = vsel %vm7535_vm12, %v8839_v42, %v7532_v0 }
 0xe45   :  { %7621 = vst [vmem:[#allocation5 + $0xa0] sm:$0xff] %v7589_v40  ;;  %v7538_v7 = vmul.f32 %v7536_v47, %v14281_v13  ;;  %v7540_v45 = vmul.f32 %v7536_v47, %v14285_v30  ;;  %v7542_v36 = vmul.f32 %v7536_v47, %v14289_v2  ;;  %v7544_v53 = vmul.f32 %v7536_v47, %v14293_v49 }
 0xe46   :  { %7623 = vst [vmem:[#allocation5 + $0xb0] sm:$0xff] %v7591_v57  ;;  %v7546_v62 = vmul.f32 %v7536_v47, %v14297_v59  ;;  %v7548_v63 = vmul.f32 %v7536_v47, %v14301_v33  ;;  %v7550_v4 = vmul.f32 %v7536_v47, %v14305_v50  ;;  %v7552_v17 = vmul.f32 %v7536_v47, %v14311_v58 }
 0xe47   :  { %7625 = vst [vmem:[#allocation5 + $0xc0] sm:$0xff] %v7593_v9  ;;  %v7554_v21 = vmul.f32 %v7536_v47, %v14353_v3  ;;  %v7556_v13 = vmul.f32 %v7536_v47, %v14315_v27  ;;  %v7558_v30 = vmul.f32 %v7536_v47, %v14319_v19  ;;  %v7560_v2 = vmul.f32 %v7536_v47, %v14323_v32 }
 0xe48   :  { %7627 = vst [vmem:[#allocation5 + $0xd0] sm:$0xff] %v7595_v48  ;;  %v7562_v49 = vmul.f32 %v7536_v47, %v14368_v35  ;;  %v7564_v38 = vmul.f32 %v7536_v47, %v14374_v24  ;;  %v7566_v59 = vmul.f32 %v7536_v47, %v14380_v18  ;;  %v7568_v33 = vmul.f32 %v7536_v47, %v14386_v1 }
 0xe49   :  { %7629 = vst [vmem:[#allocation5 + $0xe0] sm:$0xff] %v7597_v55  ;;  %v7570_v50 = vmax.f32 %v7538_v7, 0.0  ;;  %v7572_v41 = vmax.f32 %v7540_v45, 0.0  ;;  %v7574_v58 = vmax.f32 %v7542_v36, 0.0  ;;  %v7576_v22 = vmax.f32 %v7544_v53, 0.0 }
 0xe4a   :  { %7631 = vst [vmem:[#allocation5 + $0xf0] sm:$0xff] %v7599_v8  ;;  %v7578_v28 = vmax.f32 %v7546_v62, 0.0  ;;  %v7580_v3 = vmax.f32 %v7548_v63, 0.0  ;;  %v7582_v27 = vmax.f32 %v7550_v4, 0.0  ;;  %v7584_v19 = vmax.f32 %v7552_v17, 0.0 }
 0xe4b   :  { %7602 = vst [vmem:[#allocation5 + $0x8] sm:$0xff] %v7570_v50  ;;  %v7586_v32 = vmax.f32 %v7554_v21, 0.0  ;;  %v7588_v35 = vmax.f32 %v7556_v13, 0.0  ;;  %v7590_v24 = vmax.f32 %v7558_v30, 0.0  ;;  %v7592_v18 = vmax.f32 %v7560_v2, 0.0 }
 0xe4c   :  { %7604 = vst [vmem:[#allocation5 + $0x18] sm:$0xff] %v7572_v41  ;;  %v7594_v1 = vmax.f32 %v7562_v49, 0.0  ;;  %v7596_v31 = vmax.f32 %v7564_v38, 0.0  ;;  %v7598_v12 = vmax.f32 %v7566_v59, 0.0  ;;  %v7600_v34 = vmax.f32 %v7568_v33, 0.0 }
 0xe4d   :  { %7606 = vst [vmem:[#allocation5 + $0x28] sm:$0xff] %v7574_v58 }
 0xe4e   :  { %7608 = vst [vmem:[#allocation5 + $0x38] sm:$0xff] %v7576_v22 }
 0xe4f   :  { %7610 = vst [vmem:[#allocation5 + $0x48] sm:$0xff] %v7578_v28 }
 0xe50   :  { %7612 = vst [vmem:[#allocation5 + $0x58] sm:$0xff] %v7580_v3 }
 0xe51   :  { %7614 = vst [vmem:[#allocation5 + $0x68] sm:$0xff] %v7582_v27 }
 0xe52   :  { %7616 = vst [vmem:[#allocation5 + $0x78] sm:$0xff] %v7584_v19 }
 0xe53   :  { %7618 = vst [vmem:[#allocation5 + $0x88] sm:$0xff] %v7586_v32 }
 0xe54   :  { %7620 = vst [vmem:[#allocation5 + $0x98] sm:$0xff] %v7588_v35 }
 0xe55   :  { %7622 = vst [vmem:[#allocation5 + $0xa8] sm:$0xff] %v7590_v24 }
 0xe56   :  { %7624 = vst [vmem:[#allocation5 + $0xb8] sm:$0xff] %v7592_v18 }
 0xe57   :  { %7626 = vst [vmem:[#allocation5 + $0xc8] sm:$0xff] %v7594_v1 }
 0xe58   :  { %7628 = vst [vmem:[#allocation5 + $0xd8] sm:$0xff] %v7596_v31 }
 0xe59   :  { %7630 = vst [vmem:[#allocation5 + $0xe8] sm:$0xff] %v7598_v12 }
 0xe5a   :  { %7632 = vst [vmem:[#allocation5 + $0xf8] sm:$0xff] %v7600_v34 }
 0xe5b   :  { %7645 = dma.vmem_to_hbm [thread:$0]  %s7638_s12, 4096, %s7640_s4, [#allocation4], %s8933_s15, %s8933_s15, %s8934_s16  }
 0xe5c   :  { %8922 = dma.done.wait [#allocation4], 4096  }
 0xe5d   :  { %8923 = vsyncadd [#allocation4], 4294963200 }
 0xe5e   :  { %7650 = vsyncpa [#allocation3], 1 }
 0xe5f   :  { %7651 = vsyncpa [#allocation4], 1 }

</bundles_post_ra>
